<compile_context>
chip_gen: v7x
topology: tpu7x:2x2x1
jax: 0.10.0
libtpu: 0.0.40
codegen_flags: <defaults>
</compile_context>

<pallas_src>
import functools

import jax
import jax.numpy as jnp
import numpy as np
from jax.experimental import pallas as pl
from jax.experimental.pallas import tpu as pltpu


def _unit_ctrgcn_kernel(x_ref, w3_ref, b3_ref, wd_ref, bd_ref, w12_ref, b12_ref,
                        w4_ref, b4_ref, a_ref, bns_ref, bnt_ref, alpha_ref,
                        o_ref, x3_s, dn_s, m_s, y_s,
                        *, nb, t_len, v_len, rel, num_subset, cout):
    T, V, R, S, C = t_len, v_len, rel, num_subset, cout
    SR, SC, TV = S * R, S * C, t_len * v_len

    alpha = alpha_ref[0, 0]                         # scalar straight from SMEM
    w3 = w3_ref[...]; b3 = b3_ref[...]
    wd = wd_ref[...]; bd = bd_ref[...]
    w12 = w12_ref[...]; b12 = b12_ref[...]
    w4 = w4_ref[...]; b4 = b4_ref[...]

    # ---- stage 1: per-sample 1x1 convs (MXU) + CTR relation branch -> VMEM scratch --
    for n in range(nb):                             # static unroll; nb is small
        xn = jnp.transpose(x_ref[n])                # (Cin, TV) -> (TV, Cin), in-kernel

        # conv3 of all subsets fused along the output axis.
        x3_s[pl.ds(n * TV, TV), :] = (
            jnp.dot(xn, w3, preferred_element_type=jnp.float32) + b3)

        # residual 'down' 1x1 conv (its BatchNorm already folded into wd/bd).
        dn_s[pl.ds(n * TV, TV), :] = (
            jnp.dot(xn, wd, preferred_element_type=jnp.float32) + bd)

        # temporal mean BEFORE conv1/conv2 (mean is linear) -> tiny matmul.
        xbar = jnp.mean(xn.reshape(T, V, -1), axis=0)                 # (V, Cin)
        u12 = jnp.dot(xbar, w12, preferred_element_type=jnp.float32) + b12
        u1, u2 = u12[:, :SR], u12[:, SR:]

        # pairwise joint differences + tanh, all subsets at once.
        d = jnp.tanh(u1[:, None, :] - u2[None, :, :]).reshape(V * V, SR)

        # fused conv4 (block-diagonal weights), scale by alpha, add adjacency.
        mn = jnp.dot(d, w4, preferred_element_type=jnp.float32) + b4  # (V*V, S*C)
        m_s[pl.ds(n * V, V)] = (mn * alpha + a_ref[...]).reshape(V, V, SC)

    # ---- stage 2: contraction y[n,t,v,c] = sum_i sum_u x3_i[n,t,u,c]*M_i[n,u,v,c] --
    # Loop (n, t) with a small (V, S*C) accumulator; M tiles are read directly from
    # scratch (no broadcast over T), x3 rows are plain (1, S*C) loads.
    for n in range(nb):                             # static
        @pl.loop(0, T)
        def _(t, n=n):
            base = pl.multiple_of((n * T + t) * V, 8)
            acc = x3_s[pl.ds(base, 1), :] * m_s[n * V]          # u = 0
            for u in range(1, V):                   # static unroll inside loop body
                acc = acc + x3_s[pl.ds(base + u, 1), :] * m_s[n * V + u]
            # fold the per-subset slices of the accumulator.
            y = acc[:, :C]
            for i in range(1, S):
                y = y + acc[:, i * C:(i + 1) * C]
            y_s[pl.ds(base, V), :] = y

    # ---- stage 3: main-path BN + residual + ReLU; lane-dense (Cout, T*V) store ----
    bns = bns_ref[...]; bnt = bnt_ref[...]
    for n in range(nb):                             # static
        rows = pl.ds(n * TV, TV)
        y = y_s[rows, :] * bns + bnt + dn_s[rows, :]            # (TV, C)
        o_ref[n] = jnp.transpose(jnp.maximum(y, 0.0))           # (C, TV), 128 lanes


def _pack_params(params, eps):
    """Fold / concatenate the module parameters into MXU-friendly fused matrices."""
    A = params["A"].astype(jnp.float32)                     # (S, V, V)
    S, V, _ = A.shape
    w1, b1 = params["w1"], params["b1"]                     # (S, Cin, R), (S, 1, R)
    w2, b2 = params["w2"], params["b2"]
    w3, b3 = params["w3"], params["b3"]                     # (S, Cin, Cout), (S, 1, Cout)
    w4, b4 = params["w4"], params["b4"]                     # (S, R, Cout), (S, 1, Cout)
    Cin, R = w1.shape[1], w1.shape[2]
    Cout = w3.shape[2]

    # down path: fold its (inference) BatchNorm into the 1x1 conv.
    sd = params["bnd_gamma"] * jax.lax.rsqrt(params["bnd_var"] + eps)   # (1, Cout)
    td = params["bnd_beta"] - params["bnd_mean"] * sd
    wd_f = params["wd"] * sd                                            # (Cin, Cout)
    bd_f = params["bd"] * sd + td                                       # (1, Cout)

    # conv3 of all subsets as one wide (Cin, S*Cout) weight.
    w3c = w3.transpose(1, 0, 2).reshape(Cin, S * Cout)
    b3c = b3.transpose(1, 0, 2).reshape(1, S * Cout)

    # [w1_0..w1_{S-1} | w2_0..w2_{S-1}] for the temporal-mean branch.
    w12 = jnp.concatenate([w1.transpose(1, 0, 2).reshape(Cin, S * R),
                           w2.transpose(1, 0, 2).reshape(Cin, S * R)], axis=1)
    b12 = jnp.concatenate([b1.transpose(1, 0, 2).reshape(1, S * R),
                           b2.transpose(1, 0, 2).reshape(1, S * R)], axis=1)

    # block-diagonal conv4 weights -> one (S*R, S*Cout) matmul for all subsets.
    w4bd = jnp.zeros((S * R, S * Cout), jnp.float32)
    for i in range(S):
        w4bd = w4bd.at[i * R:(i + 1) * R, i * Cout:(i + 1) * Cout].set(w4[i])
    b4c = b4.transpose(1, 0, 2).reshape(1, S * Cout)

    # adjacency pre-broadcast to (V*V, S*Cout): in-kernel add is against a wide tile.
    a_all = jnp.broadcast_to(A.transpose(1, 2, 0)[:, :, :, None],
                             (V, V, S, Cout)).reshape(V * V, S * Cout)

    # main-path BatchNorm (inference) as precomputed scale / shift.
    bns = params["bn_gamma"] * jax.lax.rsqrt(params["bn_var"] + eps)
    bnt = params["bn_beta"] - params["bn_mean"] * bns

    return dict(w3=w3c, b3=b3c, wd=wd_f, bd=bd_f, w12=w12, b12=b12,
                w4=w4bd, b4=b4c, a_all=a_all, bns=bns, bnt=bnt,
                alpha=params["alpha"].astype(jnp.float32))


def unit_ctrgcn_forward(x_nchw, params, *, eps=1e-5, block_n=4):
    """x_nchw: (N, C_in, T, V) float32 -> (N, C_out, T, V) float32."""
    N, Cin, T, V = x_nchw.shape
    S = params["A"].shape[0]
    R = params["w1"].shape[-1]
    Cout = params["w3"].shape[-1]
    TV = T * V

    nb = int(min(block_n, N))
    n_pad = pl.cdiv(N, nb) * nb
    # NCHW kept as-is: only a free reshape, no HBM transpose pass in the wrapper.
    x3d = x_nchw.reshape(N, Cin, TV).astype(jnp.float32)
    if n_pad != N:
        x3d = jnp.pad(x3d, ((0, n_pad - N), (0, 0), (0, 0)))

    pk = _pack_params(params, eps)

    def full2d(a):
        return pl.BlockSpec(a.shape, lambda n: (0,) * a.ndim)

    in_specs = [
        pl.BlockSpec((nb, Cin, TV), lambda n: (n, 0, 0)),
        full2d(pk["w3"]), full2d(pk["b3"]),
        full2d(pk["wd"]), full2d(pk["bd"]),
        full2d(pk["w12"]), full2d(pk["b12"]),
        full2d(pk["w4"]), full2d(pk["b4"]),
        full2d(pk["a_all"]), full2d(pk["bns"]), full2d(pk["bnt"]),
        pl.BlockSpec(memory_space=pltpu.MemorySpace.SMEM),      # alpha scalar
    ]

    out = pl.pallas_call(
        functools.partial(_unit_ctrgcn_kernel, nb=nb, t_len=T, v_len=V,
                          rel=R, num_subset=S, cout=Cout),
        out_shape=jax.ShapeDtypeStruct((n_pad, Cout, TV), jnp.float32),
        grid=(n_pad // nb,),
        in_specs=in_specs,
        out_specs=pl.BlockSpec((nb, Cout, TV), lambda n: (n, 0, 0)),
        scratch_shapes=[
            pltpu.VMEM((nb * TV, S * Cout), jnp.float32),    # x3 (all subsets)
            pltpu.VMEM((nb * TV, Cout), jnp.float32),        # down-path result
            pltpu.VMEM((nb * V, V, S * Cout), jnp.float32),  # M matrices
            pltpu.VMEM((nb * TV, Cout), jnp.float32),        # pre-BN output
        ],
        compiler_params=pltpu.CompilerParams(
            dimension_semantics=("parallel",)),
    )(x3d, pk["w3"], pk["b3"], pk["wd"], pk["bd"], pk["w12"], pk["b12"],
      pk["w4"], pk["b4"], pk["a_all"], pk["bns"], pk["bnt"], pk["alpha"])

    return out[:N].reshape(N, Cout, T, V)            # free reshape back to NCHW


def init_params(key, in_channels, out_channels, A):
    """Deterministic synthetic parameters matching the module's shapes."""
    num_subset = A.shape[0]
    rel = 8 if in_channels <= 16 else in_channels // 8
    ks = jax.random.split(key, 10)

    def w(k, shape, scale=0.1):
        return (scale * jax.random.normal(k, shape)).astype(jnp.float32)

    ones = lambda: jnp.ones((1, out_channels), jnp.float32)
    zeros = lambda: jnp.zeros((1, out_channels), jnp.float32)

    return dict(
        A=A.astype(jnp.float32),
        # PyTorch inits alpha = 0; use a nonzero value so the conv4 path is exercised.
        alpha=jnp.full((1, 1), 0.5, jnp.float32),
        w1=w(ks[0], (num_subset, in_channels, rel)),
        b1=w(ks[1], (num_subset, 1, rel)),
        w2=w(ks[2], (num_subset, in_channels, rel)),
        b2=w(ks[3], (num_subset, 1, rel)),
        w3=w(ks[4], (num_subset, in_channels, out_channels)),
        b3=w(ks[5], (num_subset, 1, out_channels)),
        w4=w(ks[6], (num_subset, rel, out_channels)),
        b4=w(ks[7], (num_subset, 1, out_channels)),
        wd=w(ks[8], (in_channels, out_channels)),
        bd=w(ks[9], (1, out_channels)),
        # BatchNorm (inference) params: PyTorch default init state.
        bn_gamma=ones(), bn_beta=zeros(), bn_mean=zeros(), bn_var=ones(),
        bnd_gamma=ones(), bnd_beta=zeros(), bnd_mean=zeros(), bnd_var=ones(),
    )


def reference_forward(x_nchw, params, eps=1e-5):
    """Pure-JAX reference (same semantics as the PyTorch module, unfused params)."""
    x = jnp.transpose(x_nchw, (0, 2, 3, 1)).astype(jnp.float32)
    A = params["A"]
    alpha = params["alpha"][0, 0]
    y = 0.0
    for i in range(A.shape[0]):
        x1 = jnp.einsum('ntvc,cr->ntvr', x, params["w1"][i]) + params["b1"][i]
        x2 = jnp.einsum('ntvc,cr->ntvr', x, params["w2"][i]) + params["b2"][i]
        x3 = jnp.einsum('ntvc,co->ntvo', x, params["w3"][i]) + params["b3"][i]
        x1 = x1.mean(axis=1)                                  # (N, V, R)
        x2 = x2.mean(axis=1)
        d = jnp.tanh(x1[:, :, None, :] - x2[:, None, :, :])   # (N, V, V, R)
        M = jnp.einsum('nuvr,ro->nuvo', d, params["w4"][i]) + params["b4"][i]
        M = M * alpha + A[i][None, :, :, None]
        z = jnp.einsum('ntuc,nuvc->ntvc', x3, M)
        y = y + z
    y = (y - params["bn_mean"]) * jax.lax.rsqrt(params["bn_var"] + eps) \
        * params["bn_gamma"] + params["bn_beta"]
    xd = jnp.einsum('ntvc,co->ntvo', x, params["wd"]) + params["bd"]
    xd = (xd - params["bnd_mean"]) * jax.lax.rsqrt(params["bnd_var"] + eps) \
        * params["bnd_gamma"] + params["bnd_beta"]
    y = jax.nn.relu(y + xd)
    return jnp.transpose(y, (0, 3, 1, 2))


if __name__ == "__main__":
    # Small shapes consistent with the module: C_in=16 (-> rel=8), C_out=32,
    # T=8 time steps, V=16 joints, num_subset=3.  N=8 with block_n=4 exercises
    # both per-block batching and >=2 parallel grid blocks (v7x megacore).
    N, Cin, Cout, T, V, S = 8, 16, 32, 8, 16, 3
    key = jax.random.PRNGKey(0)
    kx, kA, kp = jax.random.split(key, 3)

    x = jax.random.normal(kx, (N, Cin, T, V), jnp.float32)
    A = 0.1 * jax.random.normal(kA, (S, V, V), jnp.float32)
    params = init_params(kp, Cin, Cout, A)

    out = unit_ctrgcn_forward(x, params, block_n=4)
    out = jax.block_until_ready(out)

    ref = reference_forward(x, params)
    assert out.shape == (N, Cout, T, V)
    np.testing.assert_allclose(np.asarray(out), np.asarray(ref),
                               rtol=2e-4, atol=2e-4)
    print("KERNEL_OK")
</pallas_src>

<mosaic_0001>
module attributes {stable_mosaic.version = 11 : i64} {
  func.func @_unit_ctrgcn_kernel(%arg0: i32, %arg1: memref<4x16x128xf32, #tpu.memory_space<vmem>>, %arg2: memref<16x96xf32, #tpu.memory_space<vmem>>, %arg3: memref<1x96xf32, #tpu.memory_space<vmem>>, %arg4: memref<16x32xf32, #tpu.memory_space<vmem>>, %arg5: memref<1x32xf32, #tpu.memory_space<vmem>>, %arg6: memref<16x48xf32, #tpu.memory_space<vmem>>, %arg7: memref<1x48xf32, #tpu.memory_space<vmem>>, %arg8: memref<24x96xf32, #tpu.memory_space<vmem>>, %arg9: memref<1x96xf32, #tpu.memory_space<vmem>>, %arg10: memref<256x96xf32, #tpu.memory_space<vmem>>, %arg11: memref<1x32xf32, #tpu.memory_space<vmem>>, %arg12: memref<1x32xf32, #tpu.memory_space<vmem>>, %arg13: memref<1x1xf32, #tpu.memory_space<smem>>, %arg14: memref<4x32x128xf32, #tpu.memory_space<vmem>>, %arg15: memref<512x96xf32, #tpu.memory_space<vmem>>, %arg16: memref<512x32xf32, #tpu.memory_space<vmem>>, %arg17: memref<64x16x96xf32, #tpu.memory_space<vmem>>, %arg18: memref<512x32xf32, #tpu.memory_space<vmem>>) attributes {dimension_semantics = [#tpu.dimension_semantics<parallel>], iteration_bounds = array<i64: 2>, scalar_prefetch = 0 : i64, scratch_operands = 4 : i64, tpu.core_type = #tpu.core_type<tc>, window_params = [{transform_indices = @transform_0, window_bounds = array<i64: 4, 16, 128>}, {pipeline_mode = #tpu.pipeline_mode<synchronous>, transform_indices = @transform_1, window_bounds = array<i64: 16, 96>}, {pipeline_mode = #tpu.pipeline_mode<synchronous>, transform_indices = @transform_2, window_bounds = array<i64: 1, 96>}, {pipeline_mode = #tpu.pipeline_mode<synchronous>, transform_indices = @transform_3, window_bounds = array<i64: 16, 32>}, {pipeline_mode = #tpu.pipeline_mode<synchronous>, transform_indices = @transform_4, window_bounds = array<i64: 1, 32>}, {pipeline_mode = #tpu.pipeline_mode<synchronous>, transform_indices = @transform_5, window_bounds = array<i64: 16, 48>}, {pipeline_mode = #tpu.pipeline_mode<synchronous>, transform_indices = @transform_6, window_bounds = array<i64: 1, 48>}, {pipeline_mode = #tpu.pipeline_mode<synchronous>, transform_indices = @transform_7, window_bounds = array<i64: 24, 96>}, {pipeline_mode = #tpu.pipeline_mode<synchronous>, transform_indices = @transform_8, window_bounds = array<i64: 1, 96>}, {pipeline_mode = #tpu.pipeline_mode<synchronous>, transform_indices = @transform_9, window_bounds = array<i64: 256, 96>}, {pipeline_mode = #tpu.pipeline_mode<synchronous>, transform_indices = @transform_10, window_bounds = array<i64: 1, 32>}, {pipeline_mode = #tpu.pipeline_mode<synchronous>, transform_indices = @transform_11, window_bounds = array<i64: 1, 32>}, {transform_indices = @transform_12, window_bounds = array<i64: 1, 1>}, {transform_indices = @transform_13, window_bounds = array<i64: 4, 32, 128>}]} {
    %c0 = arith.constant 0 : index
    %c0_0 = arith.constant 0 : index
    %0 = memref.load %arg13[%c0, %c0_0] : memref<1x1xf32, #tpu.memory_space<smem>>
    %c0_1 = arith.constant 0 : index
    %c0_2 = arith.constant 0 : index
    %1 = vector.load %arg2[%c0_1, %c0_2] : memref<16x96xf32, #tpu.memory_space<vmem>>, vector<16x96xf32>
    %c0_3 = arith.constant 0 : index
    %c0_4 = arith.constant 0 : index
    %2 = vector.load %arg3[%c0_3, %c0_4] : memref<1x96xf32, #tpu.memory_space<vmem>>, vector<1x96xf32>
    %c0_5 = arith.constant 0 : index
    %c0_6 = arith.constant 0 : index
    %3 = vector.load %arg4[%c0_5, %c0_6] : memref<16x32xf32, #tpu.memory_space<vmem>>, vector<16x32xf32>
    %c0_7 = arith.constant 0 : index
    %c0_8 = arith.constant 0 : index
    %4 = vector.load %arg5[%c0_7, %c0_8] : memref<1x32xf32, #tpu.memory_space<vmem>>, vector<1x32xf32>
    %c0_9 = arith.constant 0 : index
    %c0_10 = arith.constant 0 : index
    %5 = vector.load %arg6[%c0_9, %c0_10] : memref<16x48xf32, #tpu.memory_space<vmem>>, vector<16x48xf32>
    %c0_11 = arith.constant 0 : index
    %c0_12 = arith.constant 0 : index
    %6 = vector.load %arg7[%c0_11, %c0_12] : memref<1x48xf32, #tpu.memory_space<vmem>>, vector<1x48xf32>
    %c0_13 = arith.constant 0 : index
    %c0_14 = arith.constant 0 : index
    %7 = vector.load %arg8[%c0_13, %c0_14] : memref<24x96xf32, #tpu.memory_space<vmem>>, vector<24x96xf32>
    %c0_15 = arith.constant 0 : index
    %c0_16 = arith.constant 0 : index
    %8 = vector.load %arg9[%c0_15, %c0_16] : memref<1x96xf32, #tpu.memory_space<vmem>>, vector<1x96xf32>
    %c0_17 = arith.constant 0 : index
    %c0_18 = arith.constant 0 : index
    %c0_19 = arith.constant 0 : index
    %9 = vector.load %arg1[%c0_17, %c0_18, %c0_19] : memref<4x16x128xf32, #tpu.memory_space<vmem>>, vector<1x16x128xf32>
    %10 = vector.shape_cast %9 : vector<1x16x128xf32> to vector<16x128xf32>
    %11 = tpu.transpose %10, [1, 0] : vector<16x128xf32> -> vector<128x16xf32>
    %cst = arith.constant dense<0.000000e+00> : vector<128x96xf32>
    %12 = tpu.matmul %11, %1, %cst {dimension_numbers = #tpu.dot_dimension_numbers<[1], [0], [0], [1], [0, 0, 1, 1], [], []>} : vector<128x16xf32>, vector<16x96xf32>, vector<128x96xf32> -> vector<128x96xf32>
    %13 = vector.broadcast %2 : vector<1x96xf32> to vector<128x96xf32>
    %14 = arith.addf %12, %13 : vector<128x96xf32>
    %c0_20 = arith.constant 0 : index
    %c0_21 = arith.constant 0 : index
    %15 = vector.load %arg15[%c0_20, %c0_21] : memref<512x96xf32, #tpu.memory_space<vmem>>, vector<128x96xf32>
    tpu.vector_store %arg15[%c0_20, %c0_21], %14 {strides = array<i32>} : memref<512x96xf32, #tpu.memory_space<vmem>>, vector<128x96xf32>,
    %cst_22 = arith.constant dense<0.000000e+00> : vector<128x32xf32>
    %16 = tpu.matmul %11, %3, %cst_22 {dimension_numbers = #tpu.dot_dimension_numbers<[1], [0], [0], [1], [0, 0, 1, 1], [], []>} : vector<128x16xf32>, vector<16x32xf32>, vector<128x32xf32> -> vector<128x32xf32>
    %17 = vector.broadcast %4 : vector<1x32xf32> to vector<128x32xf32>
    %18 = arith.addf %16, %17 : vector<128x32xf32>
    %c0_23 = arith.constant 0 : index
    %c0_24 = arith.constant 0 : index
    %19 = vector.load %arg16[%c0_23, %c0_24] : memref<512x32xf32, #tpu.memory_space<vmem>>, vector<128x32xf32>
    tpu.vector_store %arg16[%c0_23, %c0_24], %18 {strides = array<i32>} : memref<512x32xf32, #tpu.memory_space<vmem>>, vector<128x32xf32>,
    %20 = vector.shape_cast %11 : vector<128x16xf32> to vector<8x16x16xf32>
    %cst_25 = arith.constant dense<0.000000e+00> : vector<16x16xf32>
    %21 = vector.multi_reduction <add>, %20, %cst_25 [0] : vector<8x16x16xf32> to vector<16x16xf32>
    %cst_26 = arith.constant 8.000000e+00 : f32
    %22 = vector.broadcast %cst_26 : f32 to vector<16x16xf32>
    %23 = arith.divf %21, %22 : vector<16x16xf32>
    %cst_27 = arith.constant dense<0.000000e+00> : vector<16x48xf32>
    %24 = tpu.matmul %23, %5, %cst_27 {dimension_numbers = #tpu.dot_dimension_numbers<[1], [0], [0], [1], [0, 0, 1, 1], [], []>} : vector<16x16xf32>, vector<16x48xf32>, vector<16x48xf32> -> vector<16x48xf32>
    %25 = vector.broadcast %6 : vector<1x48xf32> to vector<16x48xf32>
    %26 = arith.addf %24, %25 : vector<16x48xf32>
    %27 = vector.extract_strided_slice %26 {offsets = [0, 0], sizes = [16, 24], strides = [1, 1]} : vector<16x48xf32> to vector<16x24xf32>
    %28 = vector.extract_strided_slice %26 {offsets = [0, 24], sizes = [16, 24], strides = [1, 1]} : vector<16x48xf32> to vector<16x24xf32>
    %29 = vector.shape_cast %27 : vector<16x24xf32> to vector<16x1x24xf32>
    %30 = vector.shape_cast %28 : vector<16x24xf32> to vector<1x16x24xf32>
    %31 = vector.broadcast %29 : vector<16x1x24xf32> to vector<16x16x24xf32>
    %32 = vector.broadcast %30 : vector<1x16x24xf32> to vector<16x16x24xf32>
    %33 = arith.subf %31, %32 : vector<16x16x24xf32>
    %34 = math.tanh %33 : vector<16x16x24xf32>
    %35 = vector.shape_cast %34 : vector<16x16x24xf32> to vector<256x24xf32>
    %cst_28 = arith.constant dense<0.000000e+00> : vector<256x96xf32>
    %36 = tpu.matmul %35, %7, %cst_28 {dimension_numbers = #tpu.dot_dimension_numbers<[1], [0], [0], [1], [0, 0, 1, 1], [], []>} : vector<256x24xf32>, vector<24x96xf32>, vector<256x96xf32> -> vector<256x96xf32>
    %37 = vector.broadcast %8 : vector<1x96xf32> to vector<256x96xf32>
    %38 = arith.addf %36, %37 : vector<256x96xf32>
    %39 = vector.broadcast %0 : f32 to vector<256x96xf32>
    %40 = arith.mulf %38, %39 : vector<256x96xf32>
    %c0_29 = arith.constant 0 : index
    %c0_30 = arith.constant 0 : index
    %41 = vector.load %arg10[%c0_29, %c0_30] : memref<256x96xf32, #tpu.memory_space<vmem>>, vector<256x96xf32>
    %42 = arith.addf %40, %41 : vector<256x96xf32>
    %43 = vector.shape_cast %42 : vector<256x96xf32> to vector<16x16x96xf32>
    %c0_31 = arith.constant 0 : index
    %c0_32 = arith.constant 0 : index
    %c0_33 = arith.constant 0 : index
    %44 = vector.load %arg17[%c0_31, %c0_32, %c0_33] : memref<64x16x96xf32, #tpu.memory_space<vmem>>, vector<16x16x96xf32>
    tpu.vector_store %arg17[%c0_31, %c0_32, %c0_33], %43 {strides = array<i32>} : memref<64x16x96xf32, #tpu.memory_space<vmem>>, vector<16x16x96xf32>,
    %c1 = arith.constant 1 : index
    %c0_34 = arith.constant 0 : index
    %c0_35 = arith.constant 0 : index
    %45 = vector.load %arg1[%c1, %c0_34, %c0_35] : memref<4x16x128xf32, #tpu.memory_space<vmem>>, vector<1x16x128xf32>
    %46 = vector.shape_cast %45 : vector<1x16x128xf32> to vector<16x128xf32>
    %47 = tpu.transpose %46, [1, 0] : vector<16x128xf32> -> vector<128x16xf32>
    %cst_36 = arith.constant dense<0.000000e+00> : vector<128x96xf32>
    %48 = tpu.matmul %47, %1, %cst_36 {dimension_numbers = #tpu.dot_dimension_numbers<[1], [0], [0], [1], [0, 0, 1, 1], [], []>} : vector<128x16xf32>, vector<16x96xf32>, vector<128x96xf32> -> vector<128x96xf32>
    %49 = vector.broadcast %2 : vector<1x96xf32> to vector<128x96xf32>
    %50 = arith.addf %48, %49 : vector<128x96xf32>
    %c128 = arith.constant 128 : index
    %c0_37 = arith.constant 0 : index
    %51 = vector.load %arg15[%c128, %c0_37] : memref<512x96xf32, #tpu.memory_space<vmem>>, vector<128x96xf32>
    tpu.vector_store %arg15[%c128, %c0_37], %50 {strides = array<i32>} : memref<512x96xf32, #tpu.memory_space<vmem>>, vector<128x96xf32>,
    %cst_38 = arith.constant dense<0.000000e+00> : vector<128x32xf32>
    %52 = tpu.matmul %47, %3, %cst_38 {dimension_numbers = #tpu.dot_dimension_numbers<[1], [0], [0], [1], [0, 0, 1, 1], [], []>} : vector<128x16xf32>, vector<16x32xf32>, vector<128x32xf32> -> vector<128x32xf32>
    %53 = vector.broadcast %4 : vector<1x32xf32> to vector<128x32xf32>
    %54 = arith.addf %52, %53 : vector<128x32xf32>
    %c128_39 = arith.constant 128 : index
    %c0_40 = arith.constant 0 : index
    %55 = vector.load %arg16[%c128_39, %c0_40] : memref<512x32xf32, #tpu.memory_space<vmem>>, vector<128x32xf32>
    tpu.vector_store %arg16[%c128_39, %c0_40], %54 {strides = array<i32>} : memref<512x32xf32, #tpu.memory_space<vmem>>, vector<128x32xf32>,
    %56 = vector.shape_cast %47 : vector<128x16xf32> to vector<8x16x16xf32>
    %cst_41 = arith.constant dense<0.000000e+00> : vector<16x16xf32>
    %57 = vector.multi_reduction <add>, %56, %cst_41 [0] : vector<8x16x16xf32> to vector<16x16xf32>
    %cst_42 = arith.constant 8.000000e+00 : f32
    %58 = vector.broadcast %cst_42 : f32 to vector<16x16xf32>
    %59 = arith.divf %57, %58 : vector<16x16xf32>
    %cst_43 = arith.constant dense<0.000000e+00> : vector<16x48xf32>
    %60 = tpu.matmul %59, %5, %cst_43 {dimension_numbers = #tpu.dot_dimension_numbers<[1], [0], [0], [1], [0, 0, 1, 1], [], []>} : vector<16x16xf32>, vector<16x48xf32>, vector<16x48xf32> -> vector<16x48xf32>
    %61 = vector.broadcast %6 : vector<1x48xf32> to vector<16x48xf32>
    %62 = arith.addf %60, %61 : vector<16x48xf32>
    %63 = vector.extract_strided_slice %62 {offsets = [0, 0], sizes = [16, 24], strides = [1, 1]} : vector<16x48xf32> to vector<16x24xf32>
    %64 = vector.extract_strided_slice %62 {offsets = [0, 24], sizes = [16, 24], strides = [1, 1]} : vector<16x48xf32> to vector<16x24xf32>
    %65 = vector.shape_cast %63 : vector<16x24xf32> to vector<16x1x24xf32>
    %66 = vector.shape_cast %64 : vector<16x24xf32> to vector<1x16x24xf32>
    %67 = vector.broadcast %65 : vector<16x1x24xf32> to vector<16x16x24xf32>
    %68 = vector.broadcast %66 : vector<1x16x24xf32> to vector<16x16x24xf32>
    %69 = arith.subf %67, %68 : vector<16x16x24xf32>
    %70 = math.tanh %69 : vector<16x16x24xf32>
    %71 = vector.shape_cast %70 : vector<16x16x24xf32> to vector<256x24xf32>
    %cst_44 = arith.constant dense<0.000000e+00> : vector<256x96xf32>
    %72 = tpu.matmul %71, %7, %cst_44 {dimension_numbers = #tpu.dot_dimension_numbers<[1], [0], [0], [1], [0, 0, 1, 1], [], []>} : vector<256x24xf32>, vector<24x96xf32>, vector<256x96xf32> -> vector<256x96xf32>
    %73 = vector.broadcast %8 : vector<1x96xf32> to vector<256x96xf32>
    %74 = arith.addf %72, %73 : vector<256x96xf32>
    %75 = vector.broadcast %0 : f32 to vector<256x96xf32>
    %76 = arith.mulf %74, %75 : vector<256x96xf32>
    %c0_45 = arith.constant 0 : index
    %c0_46 = arith.constant 0 : index
    %77 = vector.load %arg10[%c0_45, %c0_46] : memref<256x96xf32, #tpu.memory_space<vmem>>, vector<256x96xf32>
    %78 = arith.addf %76, %77 : vector<256x96xf32>
    %79 = vector.shape_cast %78 : vector<256x96xf32> to vector<16x16x96xf32>
    %c16 = arith.constant 16 : index
    %c0_47 = arith.constant 0 : index
    %c0_48 = arith.constant 0 : index
    %80 = vector.load %arg17[%c16, %c0_47, %c0_48] : memref<64x16x96xf32, #tpu.memory_space<vmem>>, vector<16x16x96xf32>
    tpu.vector_store %arg17[%c16, %c0_47, %c0_48], %79 {strides = array<i32>} : memref<64x16x96xf32, #tpu.memory_space<vmem>>, vector<16x16x96xf32>,
    %c2 = arith.constant 2 : index
    %c0_49 = arith.constant 0 : index
    %c0_50 = arith.constant 0 : index
    %81 = vector.load %arg1[%c2, %c0_49, %c0_50] : memref<4x16x128xf32, #tpu.memory_space<vmem>>, vector<1x16x128xf32>
    %82 = vector.shape_cast %81 : vector<1x16x128xf32> to vector<16x128xf32>
    %83 = tpu.transpose %82, [1, 0] : vector<16x128xf32> -> vector<128x16xf32>
    %cst_51 = arith.constant dense<0.000000e+00> : vector<128x96xf32>
    %84 = tpu.matmul %83, %1, %cst_51 {dimension_numbers = #tpu.dot_dimension_numbers<[1], [0], [0], [1], [0, 0, 1, 1], [], []>} : vector<128x16xf32>, vector<16x96xf32>, vector<128x96xf32> -> vector<128x96xf32>
    %85 = vector.broadcast %2 : vector<1x96xf32> to vector<128x96xf32>
    %86 = arith.addf %84, %85 : vector<128x96xf32>
    %c256 = arith.constant 256 : index
    %c0_52 = arith.constant 0 : index
    %87 = vector.load %arg15[%c256, %c0_52] : memref<512x96xf32, #tpu.memory_space<vmem>>, vector<128x96xf32>
    tpu.vector_store %arg15[%c256, %c0_52], %86 {strides = array<i32>} : memref<512x96xf32, #tpu.memory_space<vmem>>, vector<128x96xf32>,
    %cst_53 = arith.constant dense<0.000000e+00> : vector<128x32xf32>
    %88 = tpu.matmul %83, %3, %cst_53 {dimension_numbers = #tpu.dot_dimension_numbers<[1], [0], [0], [1], [0, 0, 1, 1], [], []>} : vector<128x16xf32>, vector<16x32xf32>, vector<128x32xf32> -> vector<128x32xf32>
    %89 = vector.broadcast %4 : vector<1x32xf32> to vector<128x32xf32>
    %90 = arith.addf %88, %89 : vector<128x32xf32>
    %c256_54 = arith.constant 256 : index
    %c0_55 = arith.constant 0 : index
    %91 = vector.load %arg16[%c256_54, %c0_55] : memref<512x32xf32, #tpu.memory_space<vmem>>, vector<128x32xf32>
    tpu.vector_store %arg16[%c256_54, %c0_55], %90 {strides = array<i32>} : memref<512x32xf32, #tpu.memory_space<vmem>>, vector<128x32xf32>,
    %92 = vector.shape_cast %83 : vector<128x16xf32> to vector<8x16x16xf32>
    %cst_56 = arith.constant dense<0.000000e+00> : vector<16x16xf32>
    %93 = vector.multi_reduction <add>, %92, %cst_56 [0] : vector<8x16x16xf32> to vector<16x16xf32>
    %cst_57 = arith.constant 8.000000e+00 : f32
    %94 = vector.broadcast %cst_57 : f32 to vector<16x16xf32>
    %95 = arith.divf %93, %94 : vector<16x16xf32>
    %cst_58 = arith.constant dense<0.000000e+00> : vector<16x48xf32>
    %96 = tpu.matmul %95, %5, %cst_58 {dimension_numbers = #tpu.dot_dimension_numbers<[1], [0], [0], [1], [0, 0, 1, 1], [], []>} : vector<16x16xf32>, vector<16x48xf32>, vector<16x48xf32> -> vector<16x48xf32>
    %97 = vector.broadcast %6 : vector<1x48xf32> to vector<16x48xf32>
    %98 = arith.addf %96, %97 : vector<16x48xf32>
    %99 = vector.extract_strided_slice %98 {offsets = [0, 0], sizes = [16, 24], strides = [1, 1]} : vector<16x48xf32> to vector<16x24xf32>
    %100 = vector.extract_strided_slice %98 {offsets = [0, 24], sizes = [16, 24], strides = [1, 1]} : vector<16x48xf32> to vector<16x24xf32>
    %101 = vector.shape_cast %99 : vector<16x24xf32> to vector<16x1x24xf32>
    %102 = vector.shape_cast %100 : vector<16x24xf32> to vector<1x16x24xf32>
    %103 = vector.broadcast %101 : vector<16x1x24xf32> to vector<16x16x24xf32>
    %104 = vector.broadcast %102 : vector<1x16x24xf32> to vector<16x16x24xf32>
    %105 = arith.subf %103, %104 : vector<16x16x24xf32>
    %106 = math.tanh %105 : vector<16x16x24xf32>
    %107 = vector.shape_cast %106 : vector<16x16x24xf32> to vector<256x24xf32>
    %cst_59 = arith.constant dense<0.000000e+00> : vector<256x96xf32>
    %108 = tpu.matmul %107, %7, %cst_59 {dimension_numbers = #tpu.dot_dimension_numbers<[1], [0], [0], [1], [0, 0, 1, 1], [], []>} : vector<256x24xf32>, vector<24x96xf32>, vector<256x96xf32> -> vector<256x96xf32>
    %109 = vector.broadcast %8 : vector<1x96xf32> to vector<256x96xf32>
    %110 = arith.addf %108, %109 : vector<256x96xf32>
    %111 = vector.broadcast %0 : f32 to vector<256x96xf32>
    %112 = arith.mulf %110, %111 : vector<256x96xf32>
    %c0_60 = arith.constant 0 : index
    %c0_61 = arith.constant 0 : index
    %113 = vector.load %arg10[%c0_60, %c0_61] : memref<256x96xf32, #tpu.memory_space<vmem>>, vector<256x96xf32>
    %114 = arith.addf %112, %113 : vector<256x96xf32>
    %115 = vector.shape_cast %114 : vector<256x96xf32> to vector<16x16x96xf32>
    %c32 = arith.constant 32 : index
    %c0_62 = arith.constant 0 : index
    %c0_63 = arith.constant 0 : index
    %116 = vector.load %arg17[%c32, %c0_62, %c0_63] : memref<64x16x96xf32, #tpu.memory_space<vmem>>, vector<16x16x96xf32>
    tpu.vector_store %arg17[%c32, %c0_62, %c0_63], %115 {strides = array<i32>} : memref<64x16x96xf32, #tpu.memory_space<vmem>>, vector<16x16x96xf32>,
    %c3 = arith.constant 3 : index
    %c0_64 = arith.constant 0 : index
    %c0_65 = arith.constant 0 : index
    %117 = vector.load %arg1[%c3, %c0_64, %c0_65] : memref<4x16x128xf32, #tpu.memory_space<vmem>>, vector<1x16x128xf32>
    %118 = vector.shape_cast %117 : vector<1x16x128xf32> to vector<16x128xf32>
    %119 = tpu.transpose %118, [1, 0] : vector<16x128xf32> -> vector<128x16xf32>
    %cst_66 = arith.constant dense<0.000000e+00> : vector<128x96xf32>
    %120 = tpu.matmul %119, %1, %cst_66 {dimension_numbers = #tpu.dot_dimension_numbers<[1], [0], [0], [1], [0, 0, 1, 1], [], []>} : vector<128x16xf32>, vector<16x96xf32>, vector<128x96xf32> -> vector<128x96xf32>
    %121 = vector.broadcast %2 : vector<1x96xf32> to vector<128x96xf32>
    %122 = arith.addf %120, %121 : vector<128x96xf32>
    %c384 = arith.constant 384 : index
    %c0_67 = arith.constant 0 : index
    %123 = vector.load %arg15[%c384, %c0_67] : memref<512x96xf32, #tpu.memory_space<vmem>>, vector<128x96xf32>
    tpu.vector_store %arg15[%c384, %c0_67], %122 {strides = array<i32>} : memref<512x96xf32, #tpu.memory_space<vmem>>, vector<128x96xf32>,
    %cst_68 = arith.constant dense<0.000000e+00> : vector<128x32xf32>
    %124 = tpu.matmul %119, %3, %cst_68 {dimension_numbers = #tpu.dot_dimension_numbers<[1], [0], [0], [1], [0, 0, 1, 1], [], []>} : vector<128x16xf32>, vector<16x32xf32>, vector<128x32xf32> -> vector<128x32xf32>
    %125 = vector.broadcast %4 : vector<1x32xf32> to vector<128x32xf32>
    %126 = arith.addf %124, %125 : vector<128x32xf32>
    %c384_69 = arith.constant 384 : index
    %c0_70 = arith.constant 0 : index
    %127 = vector.load %arg16[%c384_69, %c0_70] : memref<512x32xf32, #tpu.memory_space<vmem>>, vector<128x32xf32>
    tpu.vector_store %arg16[%c384_69, %c0_70], %126 {strides = array<i32>} : memref<512x32xf32, #tpu.memory_space<vmem>>, vector<128x32xf32>,
    %128 = vector.shape_cast %119 : vector<128x16xf32> to vector<8x16x16xf32>
    %cst_71 = arith.constant dense<0.000000e+00> : vector<16x16xf32>
    %129 = vector.multi_reduction <add>, %128, %cst_71 [0] : vector<8x16x16xf32> to vector<16x16xf32>
    %cst_72 = arith.constant 8.000000e+00 : f32
    %130 = vector.broadcast %cst_72 : f32 to vector<16x16xf32>
    %131 = arith.divf %129, %130 : vector<16x16xf32>
    %cst_73 = arith.constant dense<0.000000e+00> : vector<16x48xf32>
    %132 = tpu.matmul %131, %5, %cst_73 {dimension_numbers = #tpu.dot_dimension_numbers<[1], [0], [0], [1], [0, 0, 1, 1], [], []>} : vector<16x16xf32>, vector<16x48xf32>, vector<16x48xf32> -> vector<16x48xf32>
    %133 = vector.broadcast %6 : vector<1x48xf32> to vector<16x48xf32>
    %134 = arith.addf %132, %133 : vector<16x48xf32>
    %135 = vector.extract_strided_slice %134 {offsets = [0, 0], sizes = [16, 24], strides = [1, 1]} : vector<16x48xf32> to vector<16x24xf32>
    %136 = vector.extract_strided_slice %134 {offsets = [0, 24], sizes = [16, 24], strides = [1, 1]} : vector<16x48xf32> to vector<16x24xf32>
    %137 = vector.shape_cast %135 : vector<16x24xf32> to vector<16x1x24xf32>
    %138 = vector.shape_cast %136 : vector<16x24xf32> to vector<1x16x24xf32>
    %139 = vector.broadcast %137 : vector<16x1x24xf32> to vector<16x16x24xf32>
    %140 = vector.broadcast %138 : vector<1x16x24xf32> to vector<16x16x24xf32>
    %141 = arith.subf %139, %140 : vector<16x16x24xf32>
    %142 = math.tanh %141 : vector<16x16x24xf32>
    %143 = vector.shape_cast %142 : vector<16x16x24xf32> to vector<256x24xf32>
    %cst_74 = arith.constant dense<0.000000e+00> : vector<256x96xf32>
    %144 = tpu.matmul %143, %7, %cst_74 {dimension_numbers = #tpu.dot_dimension_numbers<[1], [0], [0], [1], [0, 0, 1, 1], [], []>} : vector<256x24xf32>, vector<24x96xf32>, vector<256x96xf32> -> vector<256x96xf32>
    %145 = vector.broadcast %8 : vector<1x96xf32> to vector<256x96xf32>
    %146 = arith.addf %144, %145 : vector<256x96xf32>
    %147 = vector.broadcast %0 : f32 to vector<256x96xf32>
    %148 = arith.mulf %146, %147 : vector<256x96xf32>
    %c0_75 = arith.constant 0 : index
    %c0_76 = arith.constant 0 : index
    %149 = vector.load %arg10[%c0_75, %c0_76] : memref<256x96xf32, #tpu.memory_space<vmem>>, vector<256x96xf32>
    %150 = arith.addf %148, %149 : vector<256x96xf32>
    %151 = vector.shape_cast %150 : vector<256x96xf32> to vector<16x16x96xf32>
    %c48 = arith.constant 48 : index
    %c0_77 = arith.constant 0 : index
    %c0_78 = arith.constant 0 : index
    %152 = vector.load %arg17[%c48, %c0_77, %c0_78] : memref<64x16x96xf32, #tpu.memory_space<vmem>>, vector<16x16x96xf32>
    tpu.vector_store %arg17[%c48, %c0_77, %c0_78], %151 {strides = array<i32>} : memref<64x16x96xf32, #tpu.memory_space<vmem>>, vector<16x16x96xf32>,
    %c0_i32 = arith.constant 0 : i32
    %c8_i32 = arith.constant 8 : i32
    %153 = arith.addi %c0_i32, %c8_i32 : i32
    %c1_i32 = arith.constant 1 : i32
    scf.for %arg19 = %c0_i32 to %153 step %c1_i32  : i32 {
      %c1_i32_128 = arith.constant 1 : i32
      %211 = arith.muli %arg19, %c1_i32_128 : i32
      %c0_i32_129 = arith.constant 0 : i32
      %212 = arith.addi %c0_i32_129, %211 : i32
      %c0_i32_130 = arith.constant 0 : i32
      %213 = arith.addi %c0_i32_130, %212 : i32
      %c16_i32 = arith.constant 16 : i32
      %214 = arith.muli %213, %c16_i32 : i32
      %215 = tpu.assume_multiple %214, 8 : i32
      %216 = arith.index_cast %215 : i32 to index
      %c0_131 = arith.constant 0 : index
      %217 = vector.load %arg15[%216, %c0_131] : memref<512x96xf32, #tpu.memory_space<vmem>>, vector<1x96xf32>
      %c0_132 = arith.constant 0 : index
      %c0_133 = arith.constant 0 : index
      %c0_134 = arith.constant 0 : index
      %218 = vector.load %arg17[%c0_132, %c0_133, %c0_134] : memref<64x16x96xf32, #tpu.memory_space<vmem>>, vector<1x16x96xf32>
      %219 = vector.shape_cast %218 : vector<1x16x96xf32> to vector<16x96xf32>
      %220 = vector.broadcast %217 : vector<1x96xf32> to vector<16x96xf32>
      %221 = arith.mulf %220, %219 : vector<16x96xf32>
      %c1_i32_135 = arith.constant 1 : i32
      %222 = arith.addi %215, %c1_i32_135 : i32
      %223 = arith.index_cast %222 : i32 to index
      %c0_136 = arith.constant 0 : index
      %224 = vector.load %arg15[%223, %c0_136] : memref<512x96xf32, #tpu.memory_space<vmem>>, vector<1x96xf32>
      %c1_137 = arith.constant 1 : index
      %c0_138 = arith.constant 0 : index
      %c0_139 = arith.constant 0 : index
      %225 = vector.load %arg17[%c1_137, %c0_138, %c0_139] : memref<64x16x96xf32, #tpu.memory_space<vmem>>, vector<1x16x96xf32>
      %226 = vector.shape_cast %225 : vector<1x16x96xf32> to vector<16x96xf32>
      %227 = vector.broadcast %224 : vector<1x96xf32> to vector<16x96xf32>
      %228 = arith.mulf %227, %226 : vector<16x96xf32>
      %229 = arith.addf %221, %228 : vector<16x96xf32>
      %c2_i32 = arith.constant 2 : i32
      %230 = arith.addi %215, %c2_i32 : i32
      %231 = arith.index_cast %230 : i32 to index
      %c0_140 = arith.constant 0 : index
      %232 = vector.load %arg15[%231, %c0_140] : memref<512x96xf32, #tpu.memory_space<vmem>>, vector<1x96xf32>
      %c2_141 = arith.constant 2 : index
      %c0_142 = arith.constant 0 : index
      %c0_143 = arith.constant 0 : index
      %233 = vector.load %arg17[%c2_141, %c0_142, %c0_143] : memref<64x16x96xf32, #tpu.memory_space<vmem>>, vector<1x16x96xf32>
      %234 = vector.shape_cast %233 : vector<1x16x96xf32> to vector<16x96xf32>
      %235 = vector.broadcast %232 : vector<1x96xf32> to vector<16x96xf32>
      %236 = arith.mulf %235, %234 : vector<16x96xf32>
      %237 = arith.addf %229, %236 : vector<16x96xf32>
      %c3_i32 = arith.constant 3 : i32
      %238 = arith.addi %215, %c3_i32 : i32
      %239 = arith.index_cast %238 : i32 to index
      %c0_144 = arith.constant 0 : index
      %240 = vector.load %arg15[%239, %c0_144] : memref<512x96xf32, #tpu.memory_space<vmem>>, vector<1x96xf32>
      %c3_145 = arith.constant 3 : index
      %c0_146 = arith.constant 0 : index
      %c0_147 = arith.constant 0 : index
      %241 = vector.load %arg17[%c3_145, %c0_146, %c0_147] : memref<64x16x96xf32, #tpu.memory_space<vmem>>, vector<1x16x96xf32>
      %242 = vector.shape_cast %241 : vector<1x16x96xf32> to vector<16x96xf32>
      %243 = vector.broadcast %240 : vector<1x96xf32> to vector<16x96xf32>
      %244 = arith.mulf %243, %242 : vector<16x96xf32>
      %245 = arith.addf %237, %244 : vector<16x96xf32>
      %c4_i32 = arith.constant 4 : i32
      %246 = arith.addi %215, %c4_i32 : i32
      %247 = arith.index_cast %246 : i32 to index
      %c0_148 = arith.constant 0 : index
      %248 = vector.load %arg15[%247, %c0_148] : memref<512x96xf32, #tpu.memory_space<vmem>>, vector<1x96xf32>
      %c4 = arith.constant 4 : index
      %c0_149 = arith.constant 0 : index
      %c0_150 = arith.constant 0 : index
      %249 = vector.load %arg17[%c4, %c0_149, %c0_150] : memref<64x16x96xf32, #tpu.memory_space<vmem>>, vector<1x16x96xf32>
      %250 = vector.shape_cast %249 : vector<1x16x96xf32> to vector<16x96xf32>
      %251 = vector.broadcast %248 : vector<1x96xf32> to vector<16x96xf32>
      %252 = arith.mulf %251, %250 : vector<16x96xf32>
      %253 = arith.addf %245, %252 : vector<16x96xf32>
      %c5_i32 = arith.constant 5 : i32
      %254 = arith.addi %215, %c5_i32 : i32
      %255 = arith.index_cast %254 : i32 to index
      %c0_151 = arith.constant 0 : index
      %256 = vector.load %arg15[%255, %c0_151] : memref<512x96xf32, #tpu.memory_space<vmem>>, vector<1x96xf32>
      %c5 = arith.constant 5 : index
      %c0_152 = arith.constant 0 : index
      %c0_153 = arith.constant 0 : index
      %257 = vector.load %arg17[%c5, %c0_152, %c0_153] : memref<64x16x96xf32, #tpu.memory_space<vmem>>, vector<1x16x96xf32>
      %258 = vector.shape_cast %257 : vector<1x16x96xf32> to vector<16x96xf32>
      %259 = vector.broadcast %256 : vector<1x96xf32> to vector<16x96xf32>
      %260 = arith.mulf %259, %258 : vector<16x96xf32>
      %261 = arith.addf %253, %260 : vector<16x96xf32>
      %c6_i32 = arith.constant 6 : i32
      %262 = arith.addi %215, %c6_i32 : i32
      %263 = arith.index_cast %262 : i32 to index
      %c0_154 = arith.constant 0 : index
      %264 = vector.load %arg15[%263, %c0_154] : memref<512x96xf32, #tpu.memory_space<vmem>>, vector<1x96xf32>
      %c6 = arith.constant 6 : index
      %c0_155 = arith.constant 0 : index
      %c0_156 = arith.constant 0 : index
      %265 = vector.load %arg17[%c6, %c0_155, %c0_156] : memref<64x16x96xf32, #tpu.memory_space<vmem>>, vector<1x16x96xf32>
      %266 = vector.shape_cast %265 : vector<1x16x96xf32> to vector<16x96xf32>
      %267 = vector.broadcast %264 : vector<1x96xf32> to vector<16x96xf32>
      %268 = arith.mulf %267, %266 : vector<16x96xf32>
      %269 = arith.addf %261, %268 : vector<16x96xf32>
      %c7_i32 = arith.constant 7 : i32
      %270 = arith.addi %215, %c7_i32 : i32
      %271 = arith.index_cast %270 : i32 to index
      %c0_157 = arith.constant 0 : index
      %272 = vector.load %arg15[%271, %c0_157] : memref<512x96xf32, #tpu.memory_space<vmem>>, vector<1x96xf32>
      %c7 = arith.constant 7 : index
      %c0_158 = arith.constant 0 : index
      %c0_159 = arith.constant 0 : index
      %273 = vector.load %arg17[%c7, %c0_158, %c0_159] : memref<64x16x96xf32, #tpu.memory_space<vmem>>, vector<1x16x96xf32>
      %274 = vector.shape_cast %273 : vector<1x16x96xf32> to vector<16x96xf32>
      %275 = vector.broadcast %272 : vector<1x96xf32> to vector<16x96xf32>
      %276 = arith.mulf %275, %274 : vector<16x96xf32>
      %277 = arith.addf %269, %276 : vector<16x96xf32>
      %c8_i32_160 = arith.constant 8 : i32
      %278 = arith.addi %215, %c8_i32_160 : i32
      %279 = arith.index_cast %278 : i32 to index
      %c0_161 = arith.constant 0 : index
      %280 = vector.load %arg15[%279, %c0_161] : memref<512x96xf32, #tpu.memory_space<vmem>>, vector<1x96xf32>
      %c8 = arith.constant 8 : index
      %c0_162 = arith.constant 0 : index
      %c0_163 = arith.constant 0 : index
      %281 = vector.load %arg17[%c8, %c0_162, %c0_163] : memref<64x16x96xf32, #tpu.memory_space<vmem>>, vector<1x16x96xf32>
      %282 = vector.shape_cast %281 : vector<1x16x96xf32> to vector<16x96xf32>
      %283 = vector.broadcast %280 : vector<1x96xf32> to vector<16x96xf32>
      %284 = arith.mulf %283, %282 : vector<16x96xf32>
      %285 = arith.addf %277, %284 : vector<16x96xf32>
      %c9_i32 = arith.constant 9 : i32
      %286 = arith.addi %215, %c9_i32 : i32
      %287 = arith.index_cast %286 : i32 to index
      %c0_164 = arith.constant 0 : index
      %288 = vector.load %arg15[%287, %c0_164] : memref<512x96xf32, #tpu.memory_space<vmem>>, vector<1x96xf32>
      %c9 = arith.constant 9 : index
      %c0_165 = arith.constant 0 : index
      %c0_166 = arith.constant 0 : index
      %289 = vector.load %arg17[%c9, %c0_165, %c0_166] : memref<64x16x96xf32, #tpu.memory_space<vmem>>, vector<1x16x96xf32>
      %290 = vector.shape_cast %289 : vector<1x16x96xf32> to vector<16x96xf32>
      %291 = vector.broadcast %288 : vector<1x96xf32> to vector<16x96xf32>
      %292 = arith.mulf %291, %290 : vector<16x96xf32>
      %293 = arith.addf %285, %292 : vector<16x96xf32>
      %c10_i32 = arith.constant 10 : i32
      %294 = arith.addi %215, %c10_i32 : i32
      %295 = arith.index_cast %294 : i32 to index
      %c0_167 = arith.constant 0 : index
      %296 = vector.load %arg15[%295, %c0_167] : memref<512x96xf32, #tpu.memory_space<vmem>>, vector<1x96xf32>
      %c10 = arith.constant 10 : index
      %c0_168 = arith.constant 0 : index
      %c0_169 = arith.constant 0 : index
      %297 = vector.load %arg17[%c10, %c0_168, %c0_169] : memref<64x16x96xf32, #tpu.memory_space<vmem>>, vector<1x16x96xf32>
      %298 = vector.shape_cast %297 : vector<1x16x96xf32> to vector<16x96xf32>
      %299 = vector.broadcast %296 : vector<1x96xf32> to vector<16x96xf32>
      %300 = arith.mulf %299, %298 : vector<16x96xf32>
      %301 = arith.addf %293, %300 : vector<16x96xf32>
      %c11_i32 = arith.constant 11 : i32
      %302 = arith.addi %215, %c11_i32 : i32
      %303 = arith.index_cast %302 : i32 to index
      %c0_170 = arith.constant 0 : index
      %304 = vector.load %arg15[%303, %c0_170] : memref<512x96xf32, #tpu.memory_space<vmem>>, vector<1x96xf32>
      %c11 = arith.constant 11 : index
      %c0_171 = arith.constant 0 : index
      %c0_172 = arith.constant 0 : index
      %305 = vector.load %arg17[%c11, %c0_171, %c0_172] : memref<64x16x96xf32, #tpu.memory_space<vmem>>, vector<1x16x96xf32>
      %306 = vector.shape_cast %305 : vector<1x16x96xf32> to vector<16x96xf32>
      %307 = vector.broadcast %304 : vector<1x96xf32> to vector<16x96xf32>
      %308 = arith.mulf %307, %306 : vector<16x96xf32>
      %309 = arith.addf %301, %308 : vector<16x96xf32>
      %c12_i32 = arith.constant 12 : i32
      %310 = arith.addi %215, %c12_i32 : i32
      %311 = arith.index_cast %310 : i32 to index
      %c0_173 = arith.constant 0 : index
      %312 = vector.load %arg15[%311, %c0_173] : memref<512x96xf32, #tpu.memory_space<vmem>>, vector<1x96xf32>
      %c12 = arith.constant 12 : index
      %c0_174 = arith.constant 0 : index
      %c0_175 = arith.constant 0 : index
      %313 = vector.load %arg17[%c12, %c0_174, %c0_175] : memref<64x16x96xf32, #tpu.memory_space<vmem>>, vector<1x16x96xf32>
      %314 = vector.shape_cast %313 : vector<1x16x96xf32> to vector<16x96xf32>
      %315 = vector.broadcast %312 : vector<1x96xf32> to vector<16x96xf32>
      %316 = arith.mulf %315, %314 : vector<16x96xf32>
      %317 = arith.addf %309, %316 : vector<16x96xf32>
      %c13_i32 = arith.constant 13 : i32
      %318 = arith.addi %215, %c13_i32 : i32
      %319 = arith.index_cast %318 : i32 to index
      %c0_176 = arith.constant 0 : index
      %320 = vector.load %arg15[%319, %c0_176] : memref<512x96xf32, #tpu.memory_space<vmem>>, vector<1x96xf32>
      %c13 = arith.constant 13 : index
      %c0_177 = arith.constant 0 : index
      %c0_178 = arith.constant 0 : index
      %321 = vector.load %arg17[%c13, %c0_177, %c0_178] : memref<64x16x96xf32, #tpu.memory_space<vmem>>, vector<1x16x96xf32>
      %322 = vector.shape_cast %321 : vector<1x16x96xf32> to vector<16x96xf32>
      %323 = vector.broadcast %320 : vector<1x96xf32> to vector<16x96xf32>
      %324 = arith.mulf %323, %322 : vector<16x96xf32>
      %325 = arith.addf %317, %324 : vector<16x96xf32>
      %c14_i32 = arith.constant 14 : i32
      %326 = arith.addi %215, %c14_i32 : i32
      %327 = arith.index_cast %326 : i32 to index
      %c0_179 = arith.constant 0 : index
      %328 = vector.load %arg15[%327, %c0_179] : memref<512x96xf32, #tpu.memory_space<vmem>>, vector<1x96xf32>
      %c14 = arith.constant 14 : index
      %c0_180 = arith.constant 0 : index
      %c0_181 = arith.constant 0 : index
      %329 = vector.load %arg17[%c14, %c0_180, %c0_181] : memref<64x16x96xf32, #tpu.memory_space<vmem>>, vector<1x16x96xf32>
      %330 = vector.shape_cast %329 : vector<1x16x96xf32> to vector<16x96xf32>
      %331 = vector.broadcast %328 : vector<1x96xf32> to vector<16x96xf32>
      %332 = arith.mulf %331, %330 : vector<16x96xf32>
      %333 = arith.addf %325, %332 : vector<16x96xf32>
      %c15_i32 = arith.constant 15 : i32
      %334 = arith.addi %215, %c15_i32 : i32
      %335 = arith.index_cast %334 : i32 to index
      %c0_182 = arith.constant 0 : index
      %336 = vector.load %arg15[%335, %c0_182] : memref<512x96xf32, #tpu.memory_space<vmem>>, vector<1x96xf32>
      %c15 = arith.constant 15 : index
      %c0_183 = arith.constant 0 : index
      %c0_184 = arith.constant 0 : index
      %337 = vector.load %arg17[%c15, %c0_183, %c0_184] : memref<64x16x96xf32, #tpu.memory_space<vmem>>, vector<1x16x96xf32>
      %338 = vector.shape_cast %337 : vector<1x16x96xf32> to vector<16x96xf32>
      %339 = vector.broadcast %336 : vector<1x96xf32> to vector<16x96xf32>
      %340 = arith.mulf %339, %338 : vector<16x96xf32>
      %341 = arith.addf %333, %340 : vector<16x96xf32>
      %342 = vector.extract_strided_slice %341 {offsets = [0, 0], sizes = [16, 32], strides = [1, 1]} : vector<16x96xf32> to vector<16x32xf32>
      %343 = vector.extract_strided_slice %341 {offsets = [0, 32], sizes = [16, 32], strides = [1, 1]} : vector<16x96xf32> to vector<16x32xf32>
      %344 = arith.addf %342, %343 : vector<16x32xf32>
      %345 = vector.extract_strided_slice %341 {offsets = [0, 64], sizes = [16, 32], strides = [1, 1]} : vector<16x96xf32> to vector<16x32xf32>
      %346 = arith.addf %344, %345 : vector<16x32xf32>
      %347 = arith.index_cast %215 : i32 to index
      %c0_185 = arith.constant 0 : index
      %348 = vector.load %arg18[%347, %c0_185] : memref<512x32xf32, #tpu.memory_space<vmem>>, vector<16x32xf32>
      tpu.vector_store %arg18[%347, %c0_185], %346 {strides = array<i32>} : memref<512x32xf32, #tpu.memory_space<vmem>>, vector<16x32xf32>,
    }
    %c8_i32_79 = arith.constant 8 : i32
    %c0_i32_80 = arith.constant 0 : i32
    %c8_i32_81 = arith.constant 8 : i32
    %154 = arith.addi %c0_i32_80, %c8_i32_81 : i32
    %c1_i32_82 = arith.constant 1 : i32
    scf.for %arg19 = %c0_i32_80 to %154 step %c1_i32_82  : i32 {
      %c1_i32_128 = arith.constant 1 : i32
      %211 = arith.muli %arg19, %c1_i32_128 : i32
      %c0_i32_129 = arith.constant 0 : i32
      %212 = arith.addi %c0_i32_129, %211 : i32
      %c8_i32_130 = arith.constant 8 : i32
      %213 = arith.addi %c8_i32_130, %212 : i32
      %c16_i32 = arith.constant 16 : i32
      %214 = arith.muli %213, %c16_i32 : i32
      %215 = tpu.assume_multiple %214, 8 : i32
      %216 = arith.index_cast %215 : i32 to index
      %c0_131 = arith.constant 0 : index
      %217 = vector.load %arg15[%216, %c0_131] : memref<512x96xf32, #tpu.memory_space<vmem>>, vector<1x96xf32>
      %c16_132 = arith.constant 16 : index
      %c0_133 = arith.constant 0 : index
      %c0_134 = arith.constant 0 : index
      %218 = vector.load %arg17[%c16_132, %c0_133, %c0_134] : memref<64x16x96xf32, #tpu.memory_space<vmem>>, vector<1x16x96xf32>
      %219 = vector.shape_cast %218 : vector<1x16x96xf32> to vector<16x96xf32>
      %220 = vector.broadcast %217 : vector<1x96xf32> to vector<16x96xf32>
      %221 = arith.mulf %220, %219 : vector<16x96xf32>
      %c1_i32_135 = arith.constant 1 : i32
      %222 = arith.addi %215, %c1_i32_135 : i32
      %223 = arith.index_cast %222 : i32 to index
      %c0_136 = arith.constant 0 : index
      %224 = vector.load %arg15[%223, %c0_136] : memref<512x96xf32, #tpu.memory_space<vmem>>, vector<1x96xf32>
      %c17 = arith.constant 17 : index
      %c0_137 = arith.constant 0 : index
      %c0_138 = arith.constant 0 : index
      %225 = vector.load %arg17[%c17, %c0_137, %c0_138] : memref<64x16x96xf32, #tpu.memory_space<vmem>>, vector<1x16x96xf32>
      %226 = vector.shape_cast %225 : vector<1x16x96xf32> to vector<16x96xf32>
      %227 = vector.broadcast %224 : vector<1x96xf32> to vector<16x96xf32>
      %228 = arith.mulf %227, %226 : vector<16x96xf32>
      %229 = arith.addf %221, %228 : vector<16x96xf32>
      %c2_i32 = arith.constant 2 : i32
      %230 = arith.addi %215, %c2_i32 : i32
      %231 = arith.index_cast %230 : i32 to index
      %c0_139 = arith.constant 0 : index
      %232 = vector.load %arg15[%231, %c0_139] : memref<512x96xf32, #tpu.memory_space<vmem>>, vector<1x96xf32>
      %c18 = arith.constant 18 : index
      %c0_140 = arith.constant 0 : index
      %c0_141 = arith.constant 0 : index
      %233 = vector.load %arg17[%c18, %c0_140, %c0_141] : memref<64x16x96xf32, #tpu.memory_space<vmem>>, vector<1x16x96xf32>
      %234 = vector.shape_cast %233 : vector<1x16x96xf32> to vector<16x96xf32>
      %235 = vector.broadcast %232 : vector<1x96xf32> to vector<16x96xf32>
      %236 = arith.mulf %235, %234 : vector<16x96xf32>
      %237 = arith.addf %229, %236 : vector<16x96xf32>
      %c3_i32 = arith.constant 3 : i32
      %238 = arith.addi %215, %c3_i32 : i32
      %239 = arith.index_cast %238 : i32 to index
      %c0_142 = arith.constant 0 : index
      %240 = vector.load %arg15[%239, %c0_142] : memref<512x96xf32, #tpu.memory_space<vmem>>, vector<1x96xf32>
      %c19 = arith.constant 19 : index
      %c0_143 = arith.constant 0 : index
      %c0_144 = arith.constant 0 : index
      %241 = vector.load %arg17[%c19, %c0_143, %c0_144] : memref<64x16x96xf32, #tpu.memory_space<vmem>>, vector<1x16x96xf32>
      %242 = vector.shape_cast %241 : vector<1x16x96xf32> to vector<16x96xf32>
      %243 = vector.broadcast %240 : vector<1x96xf32> to vector<16x96xf32>
      %244 = arith.mulf %243, %242 : vector<16x96xf32>
      %245 = arith.addf %237, %244 : vector<16x96xf32>
      %c4_i32 = arith.constant 4 : i32
      %246 = arith.addi %215, %c4_i32 : i32
      %247 = arith.index_cast %246 : i32 to index
      %c0_145 = arith.constant 0 : index
      %248 = vector.load %arg15[%247, %c0_145] : memref<512x96xf32, #tpu.memory_space<vmem>>, vector<1x96xf32>
      %c20 = arith.constant 20 : index
      %c0_146 = arith.constant 0 : index
      %c0_147 = arith.constant 0 : index
      %249 = vector.load %arg17[%c20, %c0_146, %c0_147] : memref<64x16x96xf32, #tpu.memory_space<vmem>>, vector<1x16x96xf32>
      %250 = vector.shape_cast %249 : vector<1x16x96xf32> to vector<16x96xf32>
      %251 = vector.broadcast %248 : vector<1x96xf32> to vector<16x96xf32>
      %252 = arith.mulf %251, %250 : vector<16x96xf32>
      %253 = arith.addf %245, %252 : vector<16x96xf32>
      %c5_i32 = arith.constant 5 : i32
      %254 = arith.addi %215, %c5_i32 : i32
      %255 = arith.index_cast %254 : i32 to index
      %c0_148 = arith.constant 0 : index
      %256 = vector.load %arg15[%255, %c0_148] : memref<512x96xf32, #tpu.memory_space<vmem>>, vector<1x96xf32>
      %c21 = arith.constant 21 : index
      %c0_149 = arith.constant 0 : index
      %c0_150 = arith.constant 0 : index
      %257 = vector.load %arg17[%c21, %c0_149, %c0_150] : memref<64x16x96xf32, #tpu.memory_space<vmem>>, vector<1x16x96xf32>
      %258 = vector.shape_cast %257 : vector<1x16x96xf32> to vector<16x96xf32>
      %259 = vector.broadcast %256 : vector<1x96xf32> to vector<16x96xf32>
      %260 = arith.mulf %259, %258 : vector<16x96xf32>
      %261 = arith.addf %253, %260 : vector<16x96xf32>
      %c6_i32 = arith.constant 6 : i32
      %262 = arith.addi %215, %c6_i32 : i32
      %263 = arith.index_cast %262 : i32 to index
      %c0_151 = arith.constant 0 : index
      %264 = vector.load %arg15[%263, %c0_151] : memref<512x96xf32, #tpu.memory_space<vmem>>, vector<1x96xf32>
      %c22 = arith.constant 22 : index
      %c0_152 = arith.constant 0 : index
      %c0_153 = arith.constant 0 : index
      %265 = vector.load %arg17[%c22, %c0_152, %c0_153] : memref<64x16x96xf32, #tpu.memory_space<vmem>>, vector<1x16x96xf32>
      %266 = vector.shape_cast %265 : vector<1x16x96xf32> to vector<16x96xf32>
      %267 = vector.broadcast %264 : vector<1x96xf32> to vector<16x96xf32>
      %268 = arith.mulf %267, %266 : vector<16x96xf32>
      %269 = arith.addf %261, %268 : vector<16x96xf32>
      %c7_i32 = arith.constant 7 : i32
      %270 = arith.addi %215, %c7_i32 : i32
      %271 = arith.index_cast %270 : i32 to index
      %c0_154 = arith.constant 0 : index
      %272 = vector.load %arg15[%271, %c0_154] : memref<512x96xf32, #tpu.memory_space<vmem>>, vector<1x96xf32>
      %c23 = arith.constant 23 : index
      %c0_155 = arith.constant 0 : index
      %c0_156 = arith.constant 0 : index
      %273 = vector.load %arg17[%c23, %c0_155, %c0_156] : memref<64x16x96xf32, #tpu.memory_space<vmem>>, vector<1x16x96xf32>
      %274 = vector.shape_cast %273 : vector<1x16x96xf32> to vector<16x96xf32>
      %275 = vector.broadcast %272 : vector<1x96xf32> to vector<16x96xf32>
      %276 = arith.mulf %275, %274 : vector<16x96xf32>
      %277 = arith.addf %269, %276 : vector<16x96xf32>
      %c8_i32_157 = arith.constant 8 : i32
      %278 = arith.addi %215, %c8_i32_157 : i32
      %279 = arith.index_cast %278 : i32 to index
      %c0_158 = arith.constant 0 : index
      %280 = vector.load %arg15[%279, %c0_158] : memref<512x96xf32, #tpu.memory_space<vmem>>, vector<1x96xf32>
      %c24 = arith.constant 24 : index
      %c0_159 = arith.constant 0 : index
      %c0_160 = arith.constant 0 : index
      %281 = vector.load %arg17[%c24, %c0_159, %c0_160] : memref<64x16x96xf32, #tpu.memory_space<vmem>>, vector<1x16x96xf32>
      %282 = vector.shape_cast %281 : vector<1x16x96xf32> to vector<16x96xf32>
      %283 = vector.broadcast %280 : vector<1x96xf32> to vector<16x96xf32>
      %284 = arith.mulf %283, %282 : vector<16x96xf32>
      %285 = arith.addf %277, %284 : vector<16x96xf32>
      %c9_i32 = arith.constant 9 : i32
      %286 = arith.addi %215, %c9_i32 : i32
      %287 = arith.index_cast %286 : i32 to index
      %c0_161 = arith.constant 0 : index
      %288 = vector.load %arg15[%287, %c0_161] : memref<512x96xf32, #tpu.memory_space<vmem>>, vector<1x96xf32>
      %c25 = arith.constant 25 : index
      %c0_162 = arith.constant 0 : index
      %c0_163 = arith.constant 0 : index
      %289 = vector.load %arg17[%c25, %c0_162, %c0_163] : memref<64x16x96xf32, #tpu.memory_space<vmem>>, vector<1x16x96xf32>
      %290 = vector.shape_cast %289 : vector<1x16x96xf32> to vector<16x96xf32>
      %291 = vector.broadcast %288 : vector<1x96xf32> to vector<16x96xf32>
      %292 = arith.mulf %291, %290 : vector<16x96xf32>
      %293 = arith.addf %285, %292 : vector<16x96xf32>
      %c10_i32 = arith.constant 10 : i32
      %294 = arith.addi %215, %c10_i32 : i32
      %295 = arith.index_cast %294 : i32 to index
      %c0_164 = arith.constant 0 : index
      %296 = vector.load %arg15[%295, %c0_164] : memref<512x96xf32, #tpu.memory_space<vmem>>, vector<1x96xf32>
      %c26 = arith.constant 26 : index
      %c0_165 = arith.constant 0 : index
      %c0_166 = arith.constant 0 : index
      %297 = vector.load %arg17[%c26, %c0_165, %c0_166] : memref<64x16x96xf32, #tpu.memory_space<vmem>>, vector<1x16x96xf32>
      %298 = vector.shape_cast %297 : vector<1x16x96xf32> to vector<16x96xf32>
      %299 = vector.broadcast %296 : vector<1x96xf32> to vector<16x96xf32>
      %300 = arith.mulf %299, %298 : vector<16x96xf32>
      %301 = arith.addf %293, %300 : vector<16x96xf32>
      %c11_i32 = arith.constant 11 : i32
      %302 = arith.addi %215, %c11_i32 : i32
      %303 = arith.index_cast %302 : i32 to index
      %c0_167 = arith.constant 0 : index
      %304 = vector.load %arg15[%303, %c0_167] : memref<512x96xf32, #tpu.memory_space<vmem>>, vector<1x96xf32>
      %c27 = arith.constant 27 : index
      %c0_168 = arith.constant 0 : index
      %c0_169 = arith.constant 0 : index
      %305 = vector.load %arg17[%c27, %c0_168, %c0_169] : memref<64x16x96xf32, #tpu.memory_space<vmem>>, vector<1x16x96xf32>
      %306 = vector.shape_cast %305 : vector<1x16x96xf32> to vector<16x96xf32>
      %307 = vector.broadcast %304 : vector<1x96xf32> to vector<16x96xf32>
      %308 = arith.mulf %307, %306 : vector<16x96xf32>
      %309 = arith.addf %301, %308 : vector<16x96xf32>
      %c12_i32 = arith.constant 12 : i32
      %310 = arith.addi %215, %c12_i32 : i32
      %311 = arith.index_cast %310 : i32 to index
      %c0_170 = arith.constant 0 : index
      %312 = vector.load %arg15[%311, %c0_170] : memref<512x96xf32, #tpu.memory_space<vmem>>, vector<1x96xf32>
      %c28 = arith.constant 28 : index
      %c0_171 = arith.constant 0 : index
      %c0_172 = arith.constant 0 : index
      %313 = vector.load %arg17[%c28, %c0_171, %c0_172] : memref<64x16x96xf32, #tpu.memory_space<vmem>>, vector<1x16x96xf32>
      %314 = vector.shape_cast %313 : vector<1x16x96xf32> to vector<16x96xf32>
      %315 = vector.broadcast %312 : vector<1x96xf32> to vector<16x96xf32>
      %316 = arith.mulf %315, %314 : vector<16x96xf32>
      %317 = arith.addf %309, %316 : vector<16x96xf32>
      %c13_i32 = arith.constant 13 : i32
      %318 = arith.addi %215, %c13_i32 : i32
      %319 = arith.index_cast %318 : i32 to index
      %c0_173 = arith.constant 0 : index
      %320 = vector.load %arg15[%319, %c0_173] : memref<512x96xf32, #tpu.memory_space<vmem>>, vector<1x96xf32>
      %c29 = arith.constant 29 : index
      %c0_174 = arith.constant 0 : index
      %c0_175 = arith.constant 0 : index
      %321 = vector.load %arg17[%c29, %c0_174, %c0_175] : memref<64x16x96xf32, #tpu.memory_space<vmem>>, vector<1x16x96xf32>
      %322 = vector.shape_cast %321 : vector<1x16x96xf32> to vector<16x96xf32>
      %323 = vector.broadcast %320 : vector<1x96xf32> to vector<16x96xf32>
      %324 = arith.mulf %323, %322 : vector<16x96xf32>
      %325 = arith.addf %317, %324 : vector<16x96xf32>
      %c14_i32 = arith.constant 14 : i32
      %326 = arith.addi %215, %c14_i32 : i32
      %327 = arith.index_cast %326 : i32 to index
      %c0_176 = arith.constant 0 : index
      %328 = vector.load %arg15[%327, %c0_176] : memref<512x96xf32, #tpu.memory_space<vmem>>, vector<1x96xf32>
      %c30 = arith.constant 30 : index
      %c0_177 = arith.constant 0 : index
      %c0_178 = arith.constant 0 : index
      %329 = vector.load %arg17[%c30, %c0_177, %c0_178] : memref<64x16x96xf32, #tpu.memory_space<vmem>>, vector<1x16x96xf32>
      %330 = vector.shape_cast %329 : vector<1x16x96xf32> to vector<16x96xf32>
      %331 = vector.broadcast %328 : vector<1x96xf32> to vector<16x96xf32>
      %332 = arith.mulf %331, %330 : vector<16x96xf32>
      %333 = arith.addf %325, %332 : vector<16x96xf32>
      %c15_i32 = arith.constant 15 : i32
      %334 = arith.addi %215, %c15_i32 : i32
      %335 = arith.index_cast %334 : i32 to index
      %c0_179 = arith.constant 0 : index
      %336 = vector.load %arg15[%335, %c0_179] : memref<512x96xf32, #tpu.memory_space<vmem>>, vector<1x96xf32>
      %c31 = arith.constant 31 : index
      %c0_180 = arith.constant 0 : index
      %c0_181 = arith.constant 0 : index
      %337 = vector.load %arg17[%c31, %c0_180, %c0_181] : memref<64x16x96xf32, #tpu.memory_space<vmem>>, vector<1x16x96xf32>
      %338 = vector.shape_cast %337 : vector<1x16x96xf32> to vector<16x96xf32>
      %339 = vector.broadcast %336 : vector<1x96xf32> to vector<16x96xf32>
      %340 = arith.mulf %339, %338 : vector<16x96xf32>
      %341 = arith.addf %333, %340 : vector<16x96xf32>
      %342 = vector.extract_strided_slice %341 {offsets = [0, 0], sizes = [16, 32], strides = [1, 1]} : vector<16x96xf32> to vector<16x32xf32>
      %343 = vector.extract_strided_slice %341 {offsets = [0, 32], sizes = [16, 32], strides = [1, 1]} : vector<16x96xf32> to vector<16x32xf32>
      %344 = arith.addf %342, %343 : vector<16x32xf32>
      %345 = vector.extract_strided_slice %341 {offsets = [0, 64], sizes = [16, 32], strides = [1, 1]} : vector<16x96xf32> to vector<16x32xf32>
      %346 = arith.addf %344, %345 : vector<16x32xf32>
      %347 = arith.index_cast %215 : i32 to index
      %c0_182 = arith.constant 0 : index
      %348 = vector.load %arg18[%347, %c0_182] : memref<512x32xf32, #tpu.memory_space<vmem>>, vector<16x32xf32>
      tpu.vector_store %arg18[%347, %c0_182], %346 {strides = array<i32>} : memref<512x32xf32, #tpu.memory_space<vmem>>, vector<16x32xf32>,
    }
    %c8_i32_83 = arith.constant 8 : i32
    %c0_i32_84 = arith.constant 0 : i32
    %c8_i32_85 = arith.constant 8 : i32
    %155 = arith.addi %c0_i32_84, %c8_i32_85 : i32
    %c1_i32_86 = arith.constant 1 : i32
    scf.for %arg19 = %c0_i32_84 to %155 step %c1_i32_86  : i32 {
      %c1_i32_128 = arith.constant 1 : i32
      %211 = arith.muli %arg19, %c1_i32_128 : i32
      %c0_i32_129 = arith.constant 0 : i32
      %212 = arith.addi %c0_i32_129, %211 : i32
      %c16_i32 = arith.constant 16 : i32
      %213 = arith.addi %c16_i32, %212 : i32
      %c16_i32_130 = arith.constant 16 : i32
      %214 = arith.muli %213, %c16_i32_130 : i32
      %215 = tpu.assume_multiple %214, 8 : i32
      %216 = arith.index_cast %215 : i32 to index
      %c0_131 = arith.constant 0 : index
      %217 = vector.load %arg15[%216, %c0_131] : memref<512x96xf32, #tpu.memory_space<vmem>>, vector<1x96xf32>
      %c32_132 = arith.constant 32 : index
      %c0_133 = arith.constant 0 : index
      %c0_134 = arith.constant 0 : index
      %218 = vector.load %arg17[%c32_132, %c0_133, %c0_134] : memref<64x16x96xf32, #tpu.memory_space<vmem>>, vector<1x16x96xf32>
      %219 = vector.shape_cast %218 : vector<1x16x96xf32> to vector<16x96xf32>
      %220 = vector.broadcast %217 : vector<1x96xf32> to vector<16x96xf32>
      %221 = arith.mulf %220, %219 : vector<16x96xf32>
      %c1_i32_135 = arith.constant 1 : i32
      %222 = arith.addi %215, %c1_i32_135 : i32
      %223 = arith.index_cast %222 : i32 to index
      %c0_136 = arith.constant 0 : index
      %224 = vector.load %arg15[%223, %c0_136] : memref<512x96xf32, #tpu.memory_space<vmem>>, vector<1x96xf32>
      %c33 = arith.constant 33 : index
      %c0_137 = arith.constant 0 : index
      %c0_138 = arith.constant 0 : index
      %225 = vector.load %arg17[%c33, %c0_137, %c0_138] : memref<64x16x96xf32, #tpu.memory_space<vmem>>, vector<1x16x96xf32>
      %226 = vector.shape_cast %225 : vector<1x16x96xf32> to vector<16x96xf32>
      %227 = vector.broadcast %224 : vector<1x96xf32> to vector<16x96xf32>
      %228 = arith.mulf %227, %226 : vector<16x96xf32>
      %229 = arith.addf %221, %228 : vector<16x96xf32>
      %c2_i32 = arith.constant 2 : i32
      %230 = arith.addi %215, %c2_i32 : i32
      %231 = arith.index_cast %230 : i32 to index
      %c0_139 = arith.constant 0 : index
      %232 = vector.load %arg15[%231, %c0_139] : memref<512x96xf32, #tpu.memory_space<vmem>>, vector<1x96xf32>
      %c34 = arith.constant 34 : index
      %c0_140 = arith.constant 0 : index
      %c0_141 = arith.constant 0 : index
      %233 = vector.load %arg17[%c34, %c0_140, %c0_141] : memref<64x16x96xf32, #tpu.memory_space<vmem>>, vector<1x16x96xf32>
      %234 = vector.shape_cast %233 : vector<1x16x96xf32> to vector<16x96xf32>
      %235 = vector.broadcast %232 : vector<1x96xf32> to vector<16x96xf32>
      %236 = arith.mulf %235, %234 : vector<16x96xf32>
      %237 = arith.addf %229, %236 : vector<16x96xf32>
      %c3_i32 = arith.constant 3 : i32
      %238 = arith.addi %215, %c3_i32 : i32
      %239 = arith.index_cast %238 : i32 to index
      %c0_142 = arith.constant 0 : index
      %240 = vector.load %arg15[%239, %c0_142] : memref<512x96xf32, #tpu.memory_space<vmem>>, vector<1x96xf32>
      %c35 = arith.constant 35 : index
      %c0_143 = arith.constant 0 : index
      %c0_144 = arith.constant 0 : index
      %241 = vector.load %arg17[%c35, %c0_143, %c0_144] : memref<64x16x96xf32, #tpu.memory_space<vmem>>, vector<1x16x96xf32>
      %242 = vector.shape_cast %241 : vector<1x16x96xf32> to vector<16x96xf32>
      %243 = vector.broadcast %240 : vector<1x96xf32> to vector<16x96xf32>
      %244 = arith.mulf %243, %242 : vector<16x96xf32>
      %245 = arith.addf %237, %244 : vector<16x96xf32>
      %c4_i32 = arith.constant 4 : i32
      %246 = arith.addi %215, %c4_i32 : i32
      %247 = arith.index_cast %246 : i32 to index
      %c0_145 = arith.constant 0 : index
      %248 = vector.load %arg15[%247, %c0_145] : memref<512x96xf32, #tpu.memory_space<vmem>>, vector<1x96xf32>
      %c36 = arith.constant 36 : index
      %c0_146 = arith.constant 0 : index
      %c0_147 = arith.constant 0 : index
      %249 = vector.load %arg17[%c36, %c0_146, %c0_147] : memref<64x16x96xf32, #tpu.memory_space<vmem>>, vector<1x16x96xf32>
      %250 = vector.shape_cast %249 : vector<1x16x96xf32> to vector<16x96xf32>
      %251 = vector.broadcast %248 : vector<1x96xf32> to vector<16x96xf32>
      %252 = arith.mulf %251, %250 : vector<16x96xf32>
      %253 = arith.addf %245, %252 : vector<16x96xf32>
      %c5_i32 = arith.constant 5 : i32
      %254 = arith.addi %215, %c5_i32 : i32
      %255 = arith.index_cast %254 : i32 to index
      %c0_148 = arith.constant 0 : index
      %256 = vector.load %arg15[%255, %c0_148] : memref<512x96xf32, #tpu.memory_space<vmem>>, vector<1x96xf32>
      %c37 = arith.constant 37 : index
      %c0_149 = arith.constant 0 : index
      %c0_150 = arith.constant 0 : index
      %257 = vector.load %arg17[%c37, %c0_149, %c0_150] : memref<64x16x96xf32, #tpu.memory_space<vmem>>, vector<1x16x96xf32>
      %258 = vector.shape_cast %257 : vector<1x16x96xf32> to vector<16x96xf32>
      %259 = vector.broadcast %256 : vector<1x96xf32> to vector<16x96xf32>
      %260 = arith.mulf %259, %258 : vector<16x96xf32>
      %261 = arith.addf %253, %260 : vector<16x96xf32>
      %c6_i32 = arith.constant 6 : i32
      %262 = arith.addi %215, %c6_i32 : i32
      %263 = arith.index_cast %262 : i32 to index
      %c0_151 = arith.constant 0 : index
      %264 = vector.load %arg15[%263, %c0_151] : memref<512x96xf32, #tpu.memory_space<vmem>>, vector<1x96xf32>
      %c38 = arith.constant 38 : index
      %c0_152 = arith.constant 0 : index
      %c0_153 = arith.constant 0 : index
      %265 = vector.load %arg17[%c38, %c0_152, %c0_153] : memref<64x16x96xf32, #tpu.memory_space<vmem>>, vector<1x16x96xf32>
      %266 = vector.shape_cast %265 : vector<1x16x96xf32> to vector<16x96xf32>
      %267 = vector.broadcast %264 : vector<1x96xf32> to vector<16x96xf32>
      %268 = arith.mulf %267, %266 : vector<16x96xf32>
      %269 = arith.addf %261, %268 : vector<16x96xf32>
      %c7_i32 = arith.constant 7 : i32
      %270 = arith.addi %215, %c7_i32 : i32
      %271 = arith.index_cast %270 : i32 to index
      %c0_154 = arith.constant 0 : index
      %272 = vector.load %arg15[%271, %c0_154] : memref<512x96xf32, #tpu.memory_space<vmem>>, vector<1x96xf32>
      %c39 = arith.constant 39 : index
      %c0_155 = arith.constant 0 : index
      %c0_156 = arith.constant 0 : index
      %273 = vector.load %arg17[%c39, %c0_155, %c0_156] : memref<64x16x96xf32, #tpu.memory_space<vmem>>, vector<1x16x96xf32>
      %274 = vector.shape_cast %273 : vector<1x16x96xf32> to vector<16x96xf32>
      %275 = vector.broadcast %272 : vector<1x96xf32> to vector<16x96xf32>
      %276 = arith.mulf %275, %274 : vector<16x96xf32>
      %277 = arith.addf %269, %276 : vector<16x96xf32>
      %c8_i32_157 = arith.constant 8 : i32
      %278 = arith.addi %215, %c8_i32_157 : i32
      %279 = arith.index_cast %278 : i32 to index
      %c0_158 = arith.constant 0 : index
      %280 = vector.load %arg15[%279, %c0_158] : memref<512x96xf32, #tpu.memory_space<vmem>>, vector<1x96xf32>
      %c40 = arith.constant 40 : index
      %c0_159 = arith.constant 0 : index
      %c0_160 = arith.constant 0 : index
      %281 = vector.load %arg17[%c40, %c0_159, %c0_160] : memref<64x16x96xf32, #tpu.memory_space<vmem>>, vector<1x16x96xf32>
      %282 = vector.shape_cast %281 : vector<1x16x96xf32> to vector<16x96xf32>
      %283 = vector.broadcast %280 : vector<1x96xf32> to vector<16x96xf32>
      %284 = arith.mulf %283, %282 : vector<16x96xf32>
      %285 = arith.addf %277, %284 : vector<16x96xf32>
      %c9_i32 = arith.constant 9 : i32
      %286 = arith.addi %215, %c9_i32 : i32
      %287 = arith.index_cast %286 : i32 to index
      %c0_161 = arith.constant 0 : index
      %288 = vector.load %arg15[%287, %c0_161] : memref<512x96xf32, #tpu.memory_space<vmem>>, vector<1x96xf32>
      %c41 = arith.constant 41 : index
      %c0_162 = arith.constant 0 : index
      %c0_163 = arith.constant 0 : index
      %289 = vector.load %arg17[%c41, %c0_162, %c0_163] : memref<64x16x96xf32, #tpu.memory_space<vmem>>, vector<1x16x96xf32>
      %290 = vector.shape_cast %289 : vector<1x16x96xf32> to vector<16x96xf32>
      %291 = vector.broadcast %288 : vector<1x96xf32> to vector<16x96xf32>
      %292 = arith.mulf %291, %290 : vector<16x96xf32>
      %293 = arith.addf %285, %292 : vector<16x96xf32>
      %c10_i32 = arith.constant 10 : i32
      %294 = arith.addi %215, %c10_i32 : i32
      %295 = arith.index_cast %294 : i32 to index
      %c0_164 = arith.constant 0 : index
      %296 = vector.load %arg15[%295, %c0_164] : memref<512x96xf32, #tpu.memory_space<vmem>>, vector<1x96xf32>
      %c42 = arith.constant 42 : index
      %c0_165 = arith.constant 0 : index
      %c0_166 = arith.constant 0 : index
      %297 = vector.load %arg17[%c42, %c0_165, %c0_166] : memref<64x16x96xf32, #tpu.memory_space<vmem>>, vector<1x16x96xf32>
      %298 = vector.shape_cast %297 : vector<1x16x96xf32> to vector<16x96xf32>
      %299 = vector.broadcast %296 : vector<1x96xf32> to vector<16x96xf32>
      %300 = arith.mulf %299, %298 : vector<16x96xf32>
      %301 = arith.addf %293, %300 : vector<16x96xf32>
      %c11_i32 = arith.constant 11 : i32
      %302 = arith.addi %215, %c11_i32 : i32
      %303 = arith.index_cast %302 : i32 to index
      %c0_167 = arith.constant 0 : index
      %304 = vector.load %arg15[%303, %c0_167] : memref<512x96xf32, #tpu.memory_space<vmem>>, vector<1x96xf32>
      %c43 = arith.constant 43 : index
      %c0_168 = arith.constant 0 : index
      %c0_169 = arith.constant 0 : index
      %305 = vector.load %arg17[%c43, %c0_168, %c0_169] : memref<64x16x96xf32, #tpu.memory_space<vmem>>, vector<1x16x96xf32>
      %306 = vector.shape_cast %305 : vector<1x16x96xf32> to vector<16x96xf32>
      %307 = vector.broadcast %304 : vector<1x96xf32> to vector<16x96xf32>
      %308 = arith.mulf %307, %306 : vector<16x96xf32>
      %309 = arith.addf %301, %308 : vector<16x96xf32>
      %c12_i32 = arith.constant 12 : i32
      %310 = arith.addi %215, %c12_i32 : i32
      %311 = arith.index_cast %310 : i32 to index
      %c0_170 = arith.constant 0 : index
      %312 = vector.load %arg15[%311, %c0_170] : memref<512x96xf32, #tpu.memory_space<vmem>>, vector<1x96xf32>
      %c44 = arith.constant 44 : index
      %c0_171 = arith.constant 0 : index
      %c0_172 = arith.constant 0 : index
      %313 = vector.load %arg17[%c44, %c0_171, %c0_172] : memref<64x16x96xf32, #tpu.memory_space<vmem>>, vector<1x16x96xf32>
      %314 = vector.shape_cast %313 : vector<1x16x96xf32> to vector<16x96xf32>
      %315 = vector.broadcast %312 : vector<1x96xf32> to vector<16x96xf32>
      %316 = arith.mulf %315, %314 : vector<16x96xf32>
      %317 = arith.addf %309, %316 : vector<16x96xf32>
      %c13_i32 = arith.constant 13 : i32
      %318 = arith.addi %215, %c13_i32 : i32
      %319 = arith.index_cast %318 : i32 to index
      %c0_173 = arith.constant 0 : index
      %320 = vector.load %arg15[%319, %c0_173] : memref<512x96xf32, #tpu.memory_space<vmem>>, vector<1x96xf32>
      %c45 = arith.constant 45 : index
      %c0_174 = arith.constant 0 : index
      %c0_175 = arith.constant 0 : index
      %321 = vector.load %arg17[%c45, %c0_174, %c0_175] : memref<64x16x96xf32, #tpu.memory_space<vmem>>, vector<1x16x96xf32>
      %322 = vector.shape_cast %321 : vector<1x16x96xf32> to vector<16x96xf32>
      %323 = vector.broadcast %320 : vector<1x96xf32> to vector<16x96xf32>
      %324 = arith.mulf %323, %322 : vector<16x96xf32>
      %325 = arith.addf %317, %324 : vector<16x96xf32>
      %c14_i32 = arith.constant 14 : i32
      %326 = arith.addi %215, %c14_i32 : i32
      %327 = arith.index_cast %326 : i32 to index
      %c0_176 = arith.constant 0 : index
      %328 = vector.load %arg15[%327, %c0_176] : memref<512x96xf32, #tpu.memory_space<vmem>>, vector<1x96xf32>
      %c46 = arith.constant 46 : index
      %c0_177 = arith.constant 0 : index
      %c0_178 = arith.constant 0 : index
      %329 = vector.load %arg17[%c46, %c0_177, %c0_178] : memref<64x16x96xf32, #tpu.memory_space<vmem>>, vector<1x16x96xf32>
      %330 = vector.shape_cast %329 : vector<1x16x96xf32> to vector<16x96xf32>
      %331 = vector.broadcast %328 : vector<1x96xf32> to vector<16x96xf32>
      %332 = arith.mulf %331, %330 : vector<16x96xf32>
      %333 = arith.addf %325, %332 : vector<16x96xf32>
      %c15_i32 = arith.constant 15 : i32
      %334 = arith.addi %215, %c15_i32 : i32
      %335 = arith.index_cast %334 : i32 to index
      %c0_179 = arith.constant 0 : index
      %336 = vector.load %arg15[%335, %c0_179] : memref<512x96xf32, #tpu.memory_space<vmem>>, vector<1x96xf32>
      %c47 = arith.constant 47 : index
      %c0_180 = arith.constant 0 : index
      %c0_181 = arith.constant 0 : index
      %337 = vector.load %arg17[%c47, %c0_180, %c0_181] : memref<64x16x96xf32, #tpu.memory_space<vmem>>, vector<1x16x96xf32>
      %338 = vector.shape_cast %337 : vector<1x16x96xf32> to vector<16x96xf32>
      %339 = vector.broadcast %336 : vector<1x96xf32> to vector<16x96xf32>
      %340 = arith.mulf %339, %338 : vector<16x96xf32>
      %341 = arith.addf %333, %340 : vector<16x96xf32>
      %342 = vector.extract_strided_slice %341 {offsets = [0, 0], sizes = [16, 32], strides = [1, 1]} : vector<16x96xf32> to vector<16x32xf32>
      %343 = vector.extract_strided_slice %341 {offsets = [0, 32], sizes = [16, 32], strides = [1, 1]} : vector<16x96xf32> to vector<16x32xf32>
      %344 = arith.addf %342, %343 : vector<16x32xf32>
      %345 = vector.extract_strided_slice %341 {offsets = [0, 64], sizes = [16, 32], strides = [1, 1]} : vector<16x96xf32> to vector<16x32xf32>
      %346 = arith.addf %344, %345 : vector<16x32xf32>
      %347 = arith.index_cast %215 : i32 to index
      %c0_182 = arith.constant 0 : index
      %348 = vector.load %arg18[%347, %c0_182] : memref<512x32xf32, #tpu.memory_space<vmem>>, vector<16x32xf32>
      tpu.vector_store %arg18[%347, %c0_182], %346 {strides = array<i32>} : memref<512x32xf32, #tpu.memory_space<vmem>>, vector<16x32xf32>,
    }
    %c8_i32_87 = arith.constant 8 : i32
    %c0_i32_88 = arith.constant 0 : i32
    %c8_i32_89 = arith.constant 8 : i32
    %156 = arith.addi %c0_i32_88, %c8_i32_89 : i32
    %c1_i32_90 = arith.constant 1 : i32
    scf.for %arg19 = %c0_i32_88 to %156 step %c1_i32_90  : i32 {
      %c1_i32_128 = arith.constant 1 : i32
      %211 = arith.muli %arg19, %c1_i32_128 : i32
      %c0_i32_129 = arith.constant 0 : i32
      %212 = arith.addi %c0_i32_129, %211 : i32
      %c24_i32 = arith.constant 24 : i32
      %213 = arith.addi %c24_i32, %212 : i32
      %c16_i32 = arith.constant 16 : i32
      %214 = arith.muli %213, %c16_i32 : i32
      %215 = tpu.assume_multiple %214, 8 : i32
      %216 = arith.index_cast %215 : i32 to index
      %c0_130 = arith.constant 0 : index
      %217 = vector.load %arg15[%216, %c0_130] : memref<512x96xf32, #tpu.memory_space<vmem>>, vector<1x96xf32>
      %c48_131 = arith.constant 48 : index
      %c0_132 = arith.constant 0 : index
      %c0_133 = arith.constant 0 : index
      %218 = vector.load %arg17[%c48_131, %c0_132, %c0_133] : memref<64x16x96xf32, #tpu.memory_space<vmem>>, vector<1x16x96xf32>
      %219 = vector.shape_cast %218 : vector<1x16x96xf32> to vector<16x96xf32>
      %220 = vector.broadcast %217 : vector<1x96xf32> to vector<16x96xf32>
      %221 = arith.mulf %220, %219 : vector<16x96xf32>
      %c1_i32_134 = arith.constant 1 : i32
      %222 = arith.addi %215, %c1_i32_134 : i32
      %223 = arith.index_cast %222 : i32 to index
      %c0_135 = arith.constant 0 : index
      %224 = vector.load %arg15[%223, %c0_135] : memref<512x96xf32, #tpu.memory_space<vmem>>, vector<1x96xf32>
      %c49 = arith.constant 49 : index
      %c0_136 = arith.constant 0 : index
      %c0_137 = arith.constant 0 : index
      %225 = vector.load %arg17[%c49, %c0_136, %c0_137] : memref<64x16x96xf32, #tpu.memory_space<vmem>>, vector<1x16x96xf32>
      %226 = vector.shape_cast %225 : vector<1x16x96xf32> to vector<16x96xf32>
      %227 = vector.broadcast %224 : vector<1x96xf32> to vector<16x96xf32>
      %228 = arith.mulf %227, %226 : vector<16x96xf32>
      %229 = arith.addf %221, %228 : vector<16x96xf32>
      %c2_i32 = arith.constant 2 : i32
      %230 = arith.addi %215, %c2_i32 : i32
      %231 = arith.index_cast %230 : i32 to index
      %c0_138 = arith.constant 0 : index
      %232 = vector.load %arg15[%231, %c0_138] : memref<512x96xf32, #tpu.memory_space<vmem>>, vector<1x96xf32>
      %c50 = arith.constant 50 : index
      %c0_139 = arith.constant 0 : index
      %c0_140 = arith.constant 0 : index
      %233 = vector.load %arg17[%c50, %c0_139, %c0_140] : memref<64x16x96xf32, #tpu.memory_space<vmem>>, vector<1x16x96xf32>
      %234 = vector.shape_cast %233 : vector<1x16x96xf32> to vector<16x96xf32>
      %235 = vector.broadcast %232 : vector<1x96xf32> to vector<16x96xf32>
      %236 = arith.mulf %235, %234 : vector<16x96xf32>
      %237 = arith.addf %229, %236 : vector<16x96xf32>
      %c3_i32 = arith.constant 3 : i32
      %238 = arith.addi %215, %c3_i32 : i32
      %239 = arith.index_cast %238 : i32 to index
      %c0_141 = arith.constant 0 : index
      %240 = vector.load %arg15[%239, %c0_141] : memref<512x96xf32, #tpu.memory_space<vmem>>, vector<1x96xf32>
      %c51 = arith.constant 51 : index
      %c0_142 = arith.constant 0 : index
      %c0_143 = arith.constant 0 : index
      %241 = vector.load %arg17[%c51, %c0_142, %c0_143] : memref<64x16x96xf32, #tpu.memory_space<vmem>>, vector<1x16x96xf32>
      %242 = vector.shape_cast %241 : vector<1x16x96xf32> to vector<16x96xf32>
      %243 = vector.broadcast %240 : vector<1x96xf32> to vector<16x96xf32>
      %244 = arith.mulf %243, %242 : vector<16x96xf32>
      %245 = arith.addf %237, %244 : vector<16x96xf32>
      %c4_i32 = arith.constant 4 : i32
      %246 = arith.addi %215, %c4_i32 : i32
      %247 = arith.index_cast %246 : i32 to index
      %c0_144 = arith.constant 0 : index
      %248 = vector.load %arg15[%247, %c0_144] : memref<512x96xf32, #tpu.memory_space<vmem>>, vector<1x96xf32>
      %c52 = arith.constant 52 : index
      %c0_145 = arith.constant 0 : index
      %c0_146 = arith.constant 0 : index
      %249 = vector.load %arg17[%c52, %c0_145, %c0_146] : memref<64x16x96xf32, #tpu.memory_space<vmem>>, vector<1x16x96xf32>
      %250 = vector.shape_cast %249 : vector<1x16x96xf32> to vector<16x96xf32>
      %251 = vector.broadcast %248 : vector<1x96xf32> to vector<16x96xf32>
      %252 = arith.mulf %251, %250 : vector<16x96xf32>
      %253 = arith.addf %245, %252 : vector<16x96xf32>
      %c5_i32 = arith.constant 5 : i32
      %254 = arith.addi %215, %c5_i32 : i32
      %255 = arith.index_cast %254 : i32 to index
      %c0_147 = arith.constant 0 : index
      %256 = vector.load %arg15[%255, %c0_147] : memref<512x96xf32, #tpu.memory_space<vmem>>, vector<1x96xf32>
      %c53 = arith.constant 53 : index
      %c0_148 = arith.constant 0 : index
      %c0_149 = arith.constant 0 : index
      %257 = vector.load %arg17[%c53, %c0_148, %c0_149] : memref<64x16x96xf32, #tpu.memory_space<vmem>>, vector<1x16x96xf32>
      %258 = vector.shape_cast %257 : vector<1x16x96xf32> to vector<16x96xf32>
      %259 = vector.broadcast %256 : vector<1x96xf32> to vector<16x96xf32>
      %260 = arith.mulf %259, %258 : vector<16x96xf32>
      %261 = arith.addf %253, %260 : vector<16x96xf32>
      %c6_i32 = arith.constant 6 : i32
      %262 = arith.addi %215, %c6_i32 : i32
      %263 = arith.index_cast %262 : i32 to index
      %c0_150 = arith.constant 0 : index
      %264 = vector.load %arg15[%263, %c0_150] : memref<512x96xf32, #tpu.memory_space<vmem>>, vector<1x96xf32>
      %c54 = arith.constant 54 : index
      %c0_151 = arith.constant 0 : index
      %c0_152 = arith.constant 0 : index
      %265 = vector.load %arg17[%c54, %c0_151, %c0_152] : memref<64x16x96xf32, #tpu.memory_space<vmem>>, vector<1x16x96xf32>
      %266 = vector.shape_cast %265 : vector<1x16x96xf32> to vector<16x96xf32>
      %267 = vector.broadcast %264 : vector<1x96xf32> to vector<16x96xf32>
      %268 = arith.mulf %267, %266 : vector<16x96xf32>
      %269 = arith.addf %261, %268 : vector<16x96xf32>
      %c7_i32 = arith.constant 7 : i32
      %270 = arith.addi %215, %c7_i32 : i32
      %271 = arith.index_cast %270 : i32 to index
      %c0_153 = arith.constant 0 : index
      %272 = vector.load %arg15[%271, %c0_153] : memref<512x96xf32, #tpu.memory_space<vmem>>, vector<1x96xf32>
      %c55 = arith.constant 55 : index
      %c0_154 = arith.constant 0 : index
      %c0_155 = arith.constant 0 : index
      %273 = vector.load %arg17[%c55, %c0_154, %c0_155] : memref<64x16x96xf32, #tpu.memory_space<vmem>>, vector<1x16x96xf32>
      %274 = vector.shape_cast %273 : vector<1x16x96xf32> to vector<16x96xf32>
      %275 = vector.broadcast %272 : vector<1x96xf32> to vector<16x96xf32>
      %276 = arith.mulf %275, %274 : vector<16x96xf32>
      %277 = arith.addf %269, %276 : vector<16x96xf32>
      %c8_i32_156 = arith.constant 8 : i32
      %278 = arith.addi %215, %c8_i32_156 : i32
      %279 = arith.index_cast %278 : i32 to index
      %c0_157 = arith.constant 0 : index
      %280 = vector.load %arg15[%279, %c0_157] : memref<512x96xf32, #tpu.memory_space<vmem>>, vector<1x96xf32>
      %c56 = arith.constant 56 : index
      %c0_158 = arith.constant 0 : index
      %c0_159 = arith.constant 0 : index
      %281 = vector.load %arg17[%c56, %c0_158, %c0_159] : memref<64x16x96xf32, #tpu.memory_space<vmem>>, vector<1x16x96xf32>
      %282 = vector.shape_cast %281 : vector<1x16x96xf32> to vector<16x96xf32>
      %283 = vector.broadcast %280 : vector<1x96xf32> to vector<16x96xf32>
      %284 = arith.mulf %283, %282 : vector<16x96xf32>
      %285 = arith.addf %277, %284 : vector<16x96xf32>
      %c9_i32 = arith.constant 9 : i32
      %286 = arith.addi %215, %c9_i32 : i32
      %287 = arith.index_cast %286 : i32 to index
      %c0_160 = arith.constant 0 : index
      %288 = vector.load %arg15[%287, %c0_160] : memref<512x96xf32, #tpu.memory_space<vmem>>, vector<1x96xf32>
      %c57 = arith.constant 57 : index
      %c0_161 = arith.constant 0 : index
      %c0_162 = arith.constant 0 : index
      %289 = vector.load %arg17[%c57, %c0_161, %c0_162] : memref<64x16x96xf32, #tpu.memory_space<vmem>>, vector<1x16x96xf32>
      %290 = vector.shape_cast %289 : vector<1x16x96xf32> to vector<16x96xf32>
      %291 = vector.broadcast %288 : vector<1x96xf32> to vector<16x96xf32>
      %292 = arith.mulf %291, %290 : vector<16x96xf32>
      %293 = arith.addf %285, %292 : vector<16x96xf32>
      %c10_i32 = arith.constant 10 : i32
      %294 = arith.addi %215, %c10_i32 : i32
      %295 = arith.index_cast %294 : i32 to index
      %c0_163 = arith.constant 0 : index
      %296 = vector.load %arg15[%295, %c0_163] : memref<512x96xf32, #tpu.memory_space<vmem>>, vector<1x96xf32>
      %c58 = arith.constant 58 : index
      %c0_164 = arith.constant 0 : index
      %c0_165 = arith.constant 0 : index
      %297 = vector.load %arg17[%c58, %c0_164, %c0_165] : memref<64x16x96xf32, #tpu.memory_space<vmem>>, vector<1x16x96xf32>
      %298 = vector.shape_cast %297 : vector<1x16x96xf32> to vector<16x96xf32>
      %299 = vector.broadcast %296 : vector<1x96xf32> to vector<16x96xf32>
      %300 = arith.mulf %299, %298 : vector<16x96xf32>
      %301 = arith.addf %293, %300 : vector<16x96xf32>
      %c11_i32 = arith.constant 11 : i32
      %302 = arith.addi %215, %c11_i32 : i32
      %303 = arith.index_cast %302 : i32 to index
      %c0_166 = arith.constant 0 : index
      %304 = vector.load %arg15[%303, %c0_166] : memref<512x96xf32, #tpu.memory_space<vmem>>, vector<1x96xf32>
      %c59 = arith.constant 59 : index
      %c0_167 = arith.constant 0 : index
      %c0_168 = arith.constant 0 : index
      %305 = vector.load %arg17[%c59, %c0_167, %c0_168] : memref<64x16x96xf32, #tpu.memory_space<vmem>>, vector<1x16x96xf32>
      %306 = vector.shape_cast %305 : vector<1x16x96xf32> to vector<16x96xf32>
      %307 = vector.broadcast %304 : vector<1x96xf32> to vector<16x96xf32>
      %308 = arith.mulf %307, %306 : vector<16x96xf32>
      %309 = arith.addf %301, %308 : vector<16x96xf32>
      %c12_i32 = arith.constant 12 : i32
      %310 = arith.addi %215, %c12_i32 : i32
      %311 = arith.index_cast %310 : i32 to index
      %c0_169 = arith.constant 0 : index
      %312 = vector.load %arg15[%311, %c0_169] : memref<512x96xf32, #tpu.memory_space<vmem>>, vector<1x96xf32>
      %c60 = arith.constant 60 : index
      %c0_170 = arith.constant 0 : index
      %c0_171 = arith.constant 0 : index
      %313 = vector.load %arg17[%c60, %c0_170, %c0_171] : memref<64x16x96xf32, #tpu.memory_space<vmem>>, vector<1x16x96xf32>
      %314 = vector.shape_cast %313 : vector<1x16x96xf32> to vector<16x96xf32>
      %315 = vector.broadcast %312 : vector<1x96xf32> to vector<16x96xf32>
      %316 = arith.mulf %315, %314 : vector<16x96xf32>
      %317 = arith.addf %309, %316 : vector<16x96xf32>
      %c13_i32 = arith.constant 13 : i32
      %318 = arith.addi %215, %c13_i32 : i32
      %319 = arith.index_cast %318 : i32 to index
      %c0_172 = arith.constant 0 : index
      %320 = vector.load %arg15[%319, %c0_172] : memref<512x96xf32, #tpu.memory_space<vmem>>, vector<1x96xf32>
      %c61 = arith.constant 61 : index
      %c0_173 = arith.constant 0 : index
      %c0_174 = arith.constant 0 : index
      %321 = vector.load %arg17[%c61, %c0_173, %c0_174] : memref<64x16x96xf32, #tpu.memory_space<vmem>>, vector<1x16x96xf32>
      %322 = vector.shape_cast %321 : vector<1x16x96xf32> to vector<16x96xf32>
      %323 = vector.broadcast %320 : vector<1x96xf32> to vector<16x96xf32>
      %324 = arith.mulf %323, %322 : vector<16x96xf32>
      %325 = arith.addf %317, %324 : vector<16x96xf32>
      %c14_i32 = arith.constant 14 : i32
      %326 = arith.addi %215, %c14_i32 : i32
      %327 = arith.index_cast %326 : i32 to index
      %c0_175 = arith.constant 0 : index
      %328 = vector.load %arg15[%327, %c0_175] : memref<512x96xf32, #tpu.memory_space<vmem>>, vector<1x96xf32>
      %c62 = arith.constant 62 : index
      %c0_176 = arith.constant 0 : index
      %c0_177 = arith.constant 0 : index
      %329 = vector.load %arg17[%c62, %c0_176, %c0_177] : memref<64x16x96xf32, #tpu.memory_space<vmem>>, vector<1x16x96xf32>
      %330 = vector.shape_cast %329 : vector<1x16x96xf32> to vector<16x96xf32>
      %331 = vector.broadcast %328 : vector<1x96xf32> to vector<16x96xf32>
      %332 = arith.mulf %331, %330 : vector<16x96xf32>
      %333 = arith.addf %325, %332 : vector<16x96xf32>
      %c15_i32 = arith.constant 15 : i32
      %334 = arith.addi %215, %c15_i32 : i32
      %335 = arith.index_cast %334 : i32 to index
      %c0_178 = arith.constant 0 : index
      %336 = vector.load %arg15[%335, %c0_178] : memref<512x96xf32, #tpu.memory_space<vmem>>, vector<1x96xf32>
      %c63 = arith.constant 63 : index
      %c0_179 = arith.constant 0 : index
      %c0_180 = arith.constant 0 : index
      %337 = vector.load %arg17[%c63, %c0_179, %c0_180] : memref<64x16x96xf32, #tpu.memory_space<vmem>>, vector<1x16x96xf32>
      %338 = vector.shape_cast %337 : vector<1x16x96xf32> to vector<16x96xf32>
      %339 = vector.broadcast %336 : vector<1x96xf32> to vector<16x96xf32>
      %340 = arith.mulf %339, %338 : vector<16x96xf32>
      %341 = arith.addf %333, %340 : vector<16x96xf32>
      %342 = vector.extract_strided_slice %341 {offsets = [0, 0], sizes = [16, 32], strides = [1, 1]} : vector<16x96xf32> to vector<16x32xf32>
      %343 = vector.extract_strided_slice %341 {offsets = [0, 32], sizes = [16, 32], strides = [1, 1]} : vector<16x96xf32> to vector<16x32xf32>
      %344 = arith.addf %342, %343 : vector<16x32xf32>
      %345 = vector.extract_strided_slice %341 {offsets = [0, 64], sizes = [16, 32], strides = [1, 1]} : vector<16x96xf32> to vector<16x32xf32>
      %346 = arith.addf %344, %345 : vector<16x32xf32>
      %347 = arith.index_cast %215 : i32 to index
      %c0_181 = arith.constant 0 : index
      %348 = vector.load %arg18[%347, %c0_181] : memref<512x32xf32, #tpu.memory_space<vmem>>, vector<16x32xf32>
      tpu.vector_store %arg18[%347, %c0_181], %346 {strides = array<i32>} : memref<512x32xf32, #tpu.memory_space<vmem>>, vector<16x32xf32>,
    }
    %c8_i32_91 = arith.constant 8 : i32
    %c0_92 = arith.constant 0 : index
    %c0_93 = arith.constant 0 : index
    %157 = vector.load %arg11[%c0_92, %c0_93] : memref<1x32xf32, #tpu.memory_space<vmem>>, vector<1x32xf32>
    %c0_94 = arith.constant 0 : index
    %c0_95 = arith.constant 0 : index
    %158 = vector.load %arg12[%c0_94, %c0_95] : memref<1x32xf32, #tpu.memory_space<vmem>>, vector<1x32xf32>
    %c0_96 = arith.constant 0 : index
    %c0_97 = arith.constant 0 : index
    %159 = vector.load %arg18[%c0_96, %c0_97] : memref<512x32xf32, #tpu.memory_space<vmem>>, vector<128x32xf32>
    %160 = vector.broadcast %157 : vector<1x32xf32> to vector<128x32xf32>
    %161 = arith.mulf %159, %160 : vector<128x32xf32>
    %162 = vector.broadcast %158 : vector<1x32xf32> to vector<128x32xf32>
    %163 = arith.addf %161, %162 : vector<128x32xf32>
    %c0_98 = arith.constant 0 : index
    %c0_99 = arith.constant 0 : index
    %164 = vector.load %arg16[%c0_98, %c0_99] : memref<512x32xf32, #tpu.memory_space<vmem>>, vector<128x32xf32>
    %165 = arith.addf %163, %164 : vector<128x32xf32>
    %cst_100 = arith.constant 0.000000e+00 : f32
    %166 = vector.broadcast %cst_100 : f32 to vector<128x32xf32>
    %167 = arith.maximumf %165, %166 : vector<128x32xf32>
    %168 = tpu.transpose %167, [1, 0] : vector<128x32xf32> -> vector<32x128xf32>
    %c0_101 = arith.constant 0 : index
    %c0_102 = arith.constant 0 : index
    %c0_103 = arith.constant 0 : index
    %169 = vector.load %arg14[%c0_101, %c0_102, %c0_103] : memref<4x32x128xf32, #tpu.memory_space<vmem>>, vector<1x32x128xf32>
    %170 = vector.shape_cast %169 : vector<1x32x128xf32> to vector<32x128xf32>
    %171 = vector.shape_cast %168 : vector<32x128xf32> to vector<1x32x128xf32>
    tpu.vector_store %arg14[%c0_101, %c0_102, %c0_103], %171 {strides = array<i32>} : memref<4x32x128xf32, #tpu.memory_space<vmem>>, vector<1x32x128xf32>,
    %c128_104 = arith.constant 128 : index
    %c0_105 = arith.constant 0 : index
    %172 = vector.load %arg18[%c128_104, %c0_105] : memref<512x32xf32, #tpu.memory_space<vmem>>, vector<128x32xf32>
    %173 = vector.broadcast %157 : vector<1x32xf32> to vector<128x32xf32>
    %174 = arith.mulf %172, %173 : vector<128x32xf32>
    %175 = vector.broadcast %158 : vector<1x32xf32> to vector<128x32xf32>
    %176 = arith.addf %174, %175 : vector<128x32xf32>
    %c128_106 = arith.constant 128 : index
    %c0_107 = arith.constant 0 : index
    %177 = vector.load %arg16[%c128_106, %c0_107] : memref<512x32xf32, #tpu.memory_space<vmem>>, vector<128x32xf32>
    %178 = arith.addf %176, %177 : vector<128x32xf32>
    %cst_108 = arith.constant 0.000000e+00 : f32
    %179 = vector.broadcast %cst_108 : f32 to vector<128x32xf32>
    %180 = arith.maximumf %178, %179 : vector<128x32xf32>
    %181 = tpu.transpose %180, [1, 0] : vector<128x32xf32> -> vector<32x128xf32>
    %c1_109 = arith.constant 1 : index
    %c0_110 = arith.constant 0 : index
    %c0_111 = arith.constant 0 : index
    %182 = vector.load %arg14[%c1_109, %c0_110, %c0_111] : memref<4x32x128xf32, #tpu.memory_space<vmem>>, vector<1x32x128xf32>
    %183 = vector.shape_cast %182 : vector<1x32x128xf32> to vector<32x128xf32>
    %184 = vector.shape_cast %181 : vector<32x128xf32> to vector<1x32x128xf32>
    tpu.vector_store %arg14[%c1_109, %c0_110, %c0_111], %184 {strides = array<i32>} : memref<4x32x128xf32, #tpu.memory_space<vmem>>, vector<1x32x128xf32>,
    %c256_112 = arith.constant 256 : index
    %c0_113 = arith.constant 0 : index
    %185 = vector.load %arg18[%c256_112, %c0_113] : memref<512x32xf32, #tpu.memory_space<vmem>>, vector<128x32xf32>
    %186 = vector.broadcast %157 : vector<1x32xf32> to vector<128x32xf32>
    %187 = arith.mulf %185, %186 : vector<128x32xf32>
    %188 = vector.broadcast %158 : vector<1x32xf32> to vector<128x32xf32>
    %189 = arith.addf %187, %188 : vector<128x32xf32>
    %c256_114 = arith.constant 256 : index
    %c0_115 = arith.constant 0 : index
    %190 = vector.load %arg16[%c256_114, %c0_115] : memref<512x32xf32, #tpu.memory_space<vmem>>, vector<128x32xf32>
    %191 = arith.addf %189, %190 : vector<128x32xf32>
    %cst_116 = arith.constant 0.000000e+00 : f32
    %192 = vector.broadcast %cst_116 : f32 to vector<128x32xf32>
    %193 = arith.maximumf %191, %192 : vector<128x32xf32>
    %194 = tpu.transpose %193, [1, 0] : vector<128x32xf32> -> vector<32x128xf32>
    %c2_117 = arith.constant 2 : index
    %c0_118 = arith.constant 0 : index
    %c0_119 = arith.constant 0 : index
    %195 = vector.load %arg14[%c2_117, %c0_118, %c0_119] : memref<4x32x128xf32, #tpu.memory_space<vmem>>, vector<1x32x128xf32>
    %196 = vector.shape_cast %195 : vector<1x32x128xf32> to vector<32x128xf32>
    %197 = vector.shape_cast %194 : vector<32x128xf32> to vector<1x32x128xf32>
    tpu.vector_store %arg14[%c2_117, %c0_118, %c0_119], %197 {strides = array<i32>} : memref<4x32x128xf32, #tpu.memory_space<vmem>>, vector<1x32x128xf32>,
    %c384_120 = arith.constant 384 : index
    %c0_121 = arith.constant 0 : index
    %198 = vector.load %arg18[%c384_120, %c0_121] : memref<512x32xf32, #tpu.memory_space<vmem>>, vector<128x32xf32>
    %199 = vector.broadcast %157 : vector<1x32xf32> to vector<128x32xf32>
    %200 = arith.mulf %198, %199 : vector<128x32xf32>
    %201 = vector.broadcast %158 : vector<1x32xf32> to vector<128x32xf32>
    %202 = arith.addf %200, %201 : vector<128x32xf32>
    %c384_122 = arith.constant 384 : index
    %c0_123 = arith.constant 0 : index
    %203 = vector.load %arg16[%c384_122, %c0_123] : memref<512x32xf32, #tpu.memory_space<vmem>>, vector<128x32xf32>
    %204 = arith.addf %202, %203 : vector<128x32xf32>
    %cst_124 = arith.constant 0.000000e+00 : f32
    %205 = vector.broadcast %cst_124 : f32 to vector<128x32xf32>
    %206 = arith.maximumf %204, %205 : vector<128x32xf32>
    %207 = tpu.transpose %206, [1, 0] : vector<128x32xf32> -> vector<32x128xf32>
    %c3_125 = arith.constant 3 : index
    %c0_126 = arith.constant 0 : index
    %c0_127 = arith.constant 0 : index
    %208 = vector.load %arg14[%c3_125, %c0_126, %c0_127] : memref<4x32x128xf32, #tpu.memory_space<vmem>>, vector<1x32x128xf32>
    %209 = vector.shape_cast %208 : vector<1x32x128xf32> to vector<32x128xf32>
    %210 = vector.shape_cast %207 : vector<32x128xf32> to vector<1x32x128xf32>
    tpu.vector_store %arg14[%c3_125, %c0_126, %c0_127], %210 {strides = array<i32>} : memref<4x32x128xf32, #tpu.memory_space<vmem>>, vector<1x32x128xf32>,
    return
  }
  func.func @transform_0(%arg0: i32) -> (i32, i32, i32) {
    %c0_i32 = arith.constant 0 : i32
    %c0_i32_0 = arith.constant 0 : i32
    %c0_i32_1 = arith.constant 0 : i32
    return %arg0, %c0_i32, %c0_i32_0 : i32, i32, i32
  }
  func.func @transform_1(%arg0: i32) -> (i32, i32) {
    %c0_i32 = arith.constant 0 : i32
    %c0_i32_0 = arith.constant 0 : i32
    %c0_i32_1 = arith.constant 0 : i32
    return %c0_i32, %c0_i32_0 : i32, i32
  }
  func.func @transform_2(%arg0: i32) -> (i32, i32) {
    %c0_i32 = arith.constant 0 : i32
    %c0_i32_0 = arith.constant 0 : i32
    %c0_i32_1 = arith.constant 0 : i32
    return %c0_i32, %c0_i32_0 : i32, i32
  }
  func.func @transform_3(%arg0: i32) -> (i32, i32) {
    %c0_i32 = arith.constant 0 : i32
    %c0_i32_0 = arith.constant 0 : i32
    %c0_i32_1 = arith.constant 0 : i32
    return %c0_i32, %c0_i32_0 : i32, i32
  }
  func.func @transform_4(%arg0: i32) -> (i32, i32) {
    %c0_i32 = arith.constant 0 : i32
    %c0_i32_0 = arith.constant 0 : i32
    %c0_i32_1 = arith.constant 0 : i32
    return %c0_i32, %c0_i32_0 : i32, i32
  }
  func.func @transform_5(%arg0: i32) -> (i32, i32) {
    %c0_i32 = arith.constant 0 : i32
    %c0_i32_0 = arith.constant 0 : i32
    %c0_i32_1 = arith.constant 0 : i32
    return %c0_i32, %c0_i32_0 : i32, i32
  }
  func.func @transform_6(%arg0: i32) -> (i32, i32) {
    %c0_i32 = arith.constant 0 : i32
    %c0_i32_0 = arith.constant 0 : i32
    %c0_i32_1 = arith.constant 0 : i32
    return %c0_i32, %c0_i32_0 : i32, i32
  }
  func.func @transform_7(%arg0: i32) -> (i32, i32) {
    %c0_i32 = arith.constant 0 : i32
    %c0_i32_0 = arith.constant 0 : i32
    %c0_i32_1 = arith.constant 0 : i32
    return %c0_i32, %c0_i32_0 : i32, i32
  }
  func.func @transform_8(%arg0: i32) -> (i32, i32) {
    %c0_i32 = arith.constant 0 : i32
    %c0_i32_0 = arith.constant 0 : i32
    %c0_i32_1 = arith.constant 0 : i32
    return %c0_i32, %c0_i32_0 : i32, i32
  }
  func.func @transform_9(%arg0: i32) -> (i32, i32) {
    %c0_i32 = arith.constant 0 : i32
    %c0_i32_0 = arith.constant 0 : i32
    %c0_i32_1 = arith.constant 0 : i32
    return %c0_i32, %c0_i32_0 : i32, i32
  }
  func.func @transform_10(%arg0: i32) -> (i32, i32) {
    %c0_i32 = arith.constant 0 : i32
    %c0_i32_0 = arith.constant 0 : i32
    %c0_i32_1 = arith.constant 0 : i32
    return %c0_i32, %c0_i32_0 : i32, i32
  }
  func.func @transform_11(%arg0: i32) -> (i32, i32) {
    %c0_i32 = arith.constant 0 : i32
    %c0_i32_0 = arith.constant 0 : i32
    %c0_i32_1 = arith.constant 0 : i32
    return %c0_i32, %c0_i32_0 : i32, i32
  }
  func.func @transform_12(%arg0: i32) -> (i32, i32) {
    %c0_i32 = arith.constant 0 : i32
    %c0_i32_0 = arith.constant 0 : i32
    %c0_i32_1 = arith.constant 0 : i32
    return %c0_i32, %c0_i32_0 : i32, i32
  }
  func.func @transform_13(%arg0: i32) -> (i32, i32, i32) {
    %c0_i32 = arith.constant 0 : i32
    %c0_i32_0 = arith.constant 0 : i32
    %c0_i32_1 = arith.constant 0 : i32
    return %arg0, %c0_i32, %c0_i32_0 : i32, i32, i32
  }
}

</mosaic_0001>

<bundles_post_ra>
// kernel: tpu_custom_call.1
= control target key start
LH: loop header
LB: loop body
LE: loop exit
PB: predicated region body
PF: predicated region fallthrough
CT: control target
= control target key end

     0   :  { %s11638_s0 = inlined_call_operand.vmem [shape: f32[8,16,128], index: 0, kind: input, shape index: {}]   ;;  %s11639_s1 = inlined_call_operand.vmem [shape: f32[16,96], index: 1, kind: input, shape index: {}]   ;;  %s11640_s2 = inlined_call_operand.vmem [shape: f32[1,96], index: 2, kind: input, shape index: {}]   ;;  %s11641_s3 = inlined_call_operand.vmem [shape: f32[16,32], index: 3, kind: input, shape index: {}]   ;;  %s11642_s4 = inlined_call_operand.vmem [shape: f32[1,32], index: 4, kind: input, shape index: {}]   ;;  %s11643_s5 = inlined_call_operand.vmem [shape: f32[16,48], index: 5, kind: input, shape index: {}]   ;;  %s11644_s6 = inlined_call_operand.vmem [shape: f32[1,48], index: 6, kind: input, shape index: {}]   ;;  %s11645_s7 = inlined_call_operand.vmem [shape: f32[24,96], index: 7, kind: input, shape index: {}]   ;;  %s11646_s8 = inlined_call_operand.vmem [shape: f32[1,96], index: 8, kind: input, shape index: {}]   ;;  %s11647_s9 = inlined_call_operand.vmem [shape: f32[256,96], index: 9, kind: input, shape index: {}]   ;;  %s11648_s10 = inlined_call_operand.vmem [shape: f32[1,32], index: 10, kind: input, shape index: {}]   ;;  %s11649_s11 = inlined_call_operand.vmem [shape: f32[1,32], index: 11, kind: input, shape index: {}]   ;;  %s11650_s12 = inlined_call_operand.<no memory space> [shape: f32[1,1], index: 12, kind: input, shape index: {}]   ;;  %s11651_s13 = inlined_call_operand.hbm [shape: f32[8,32,128], index: 13, kind: output, shape index: {}]  }
   0x1   :  { %11667 = sst [smem:[#allocation21_spill]] %s11638_s0 }
   0x2   :  { %18 = sst [smem:[#allocation6]] %s11650_s12 }
   0x3   :  { %19 = vsyncpa [#allocation8], 0 }
   0x4   :  { %21 = vsyncpa [#allocation8 + $0x1], 0  ;;  %s9069_s27 = smov 0   ;;  %s9071_s28 = smov 0  }
   0x5   :  { %s9073_s29 = smov 0   ;;  %s9075_s30 = smov 0  }
   0x6 LB: > { %s9090_s12 = sadd.s32 4294967295, %s8965_s30   ;;  %s7199_s14 = sadd.s32 4294967294, %s8965_s30   ;;  %s8965_s30 = sphi %s9075_s30, %s11697_s30   ;;  %s8961_s29 = sphi %s9073_s29, %s11696_s29   ;;  %s8957_s28 = sphi %s9071_s28, %s11695_s28   ;;  %s8953_s27 = sphi %s9069_s27, %s11694_s27  }
   0x7   : > { %s9094_s15 = sadd.s32 1, %s8965_s30   ;;  %s312_s16 = sadd.s32 1, %s8961_s29 }
   0x8   : > { %s309_s17 = ssub.s32 %s8965_s30, %s9094_s15  ;;  %p322_p0 = scmp.ne.s32.totalorder %s8961_s29, %s8957_s28 }
   0x9   : > { %p310_p1 = scmp.eq.s32.totalorder %s309_s17, 0  ;;  %p323_p2 = scmp.eq.s32.totalorder %s9090_s12, 1 }
   0xa   : > { %p328_p3 = scmp.ne.s32.totalorder %s8957_s28, %s8953_s27  ;;  %p329_p4 = scmp.eq.s32.totalorder %s7199_s14, 1 }
   0xb   : > { %s9105_s18 = scalar_select %p310_p1, %s8961_s29, %s312_s16  }
   0xc   : > { %p9107_p5 = por %p323_p2, %p322_p0  ;;  %p9111_p6 = por %p329_p4, %p328_p3 }
   0xd   : > { %p7202_p7 = scmp.ge.s32.totalorder %s8965_s30, 1  ;;  %p393_p8 = scmp.lt.s32.totalorder %s8965_s30, 3 }
   0xf   : > { %p394_p9 = pnand %p7202_p7, %p393_p8 }
  0x11   : > { %397 = sbr.rel (%p394_p9) target bundleno = 3040 (0xbe0), region = 72 }
  0x18   : > { %s7204_s21 = sshll.u32 %s9090_s12, 2  ;;  %s11670_s0 = sld [smem:[#allocation21_spill]]  ;;  %v447_v0 = vld [vmem:[%s11639_s1] sm:$0xff]  ;;  %v448_v1 = vld [vmem:[%s11639_s1 + $0x8] sm:$0xff]  ;;  %vm500_vm0 = vcmask 130048   ;;  %vm694_vm1 = vcmask 785408  }
  0x19   : > { %p439_p10 = scmp.lt.s32.totalorder %s7204_s21, 7  ;;  %v9130_v3 = vpack.c.bf16 %v448_v1, %v447_v0  ;;  %v450_v5 = vld [vmem:[%s11641_s3] sm:$0xff]  ;;  %v451_v6 = vld [vmem:[%s11641_s3 + $0x8] sm:$0xff]  ;;  %vm862_vm2 = vcmask 261120   ;;  %s8983_s26 = smov 104   ;;  %vm1255_vm3 = vcmask 195584  }
  0x1a   : > { %v9146_v7 = vpack.c.bf16 %v451_v6, %v450_v5  ;;  %v453_v8 = vld [vmem:[%s11643_s5] sm:$0xff]  ;;  %v454_v9 = vld [vmem:[%s11643_s5 + $0x8] sm:$0xff]  ;;  %s446_s14 = sld [smem:[#allocation6]] }
  0x1b   : > { %s11699_s21 = smov (!%p439_p10, %s7204_s21), 7  ;;  %8473 = vmatprep.subr.bf16.mxu1 %v9130_v3  ;;  %v9154_v10 = vpack.c.bf16 %v454_v9, %v453_v8  ;;  %v456_v61 = vld [vmem:[%s11645_s7] sm:$0xff]  ;;  %v457_v62 = vld [vmem:[%s11645_s7 + $0x8] sm:$0xff] }
  0x1c   : > { %s7701_s22 = sshll.u32 %s11699_s21, 4  ;;  %s11652_s21 = sand.u32 1, %s8957_s28   ;;  %8475 = vmatpush3.bf16.msra.mxu1 %v9130_v3  ;;  %v9251_v63 = vpack.c.bf16 %v457_v62, %v456_v61  ;;  %v9258_v0 = vld [vmem:[%s11640_s2] ss:$0 sm:$0xff] }
  0x1d   : > { %8477 = vmatprep.subr.bf16.mxu1 %v9146_v7  ;;  %8481 = vmatprep.subr.bf16.mxu0 %v9154_v10 }
  0x1e   : > { %s9121_s25 = scalar_lea.vmem %s11670_s0, %s7701_s22  ;;  %s9137_s22 = sshll.u32 %s11652_s21, 7  ;;  %8483 = vmatpush3.bf16.msra.mxu0 %v9154_v10 }
  0x1f   : > { %v460_v2 = vld [vmem:[%s9121_s25] sm:$0xff]  ;;  %v461_v4 = vld [vmem:[%s9121_s25 + $0x8] sm:$0xff]  ;;  %8489 = vmatprep.subr.bf16.mxu0 %v9130_v3  ;;  %v7277_v59 = vld [vmem:[%s9121_s25 + $0x10] sm:$0xff]  ;;  %s11178_s17 = scalar_lea.vmem [#allocation7], %s9137_s22  ;;  %s11180_s0 = smov 0  }
  0x20   : > { %462 = vxpose.xlu0.b32.start [1/2] (short) %v460_v2, 128  ;;  %v7278_v60 = vld [vmem:[%s9121_s25 + $0x18] sm:$0xff] }
  0x24   : > { %463 = vxpose.xlu0.b32.end [2/2] (short) %v461_v4, 128 }
  0x5d   : > { %1709 = vxpose.xlu0.b32.start [1/2] (short) %v7277_v59, 128 }
  0x61   : > { %1710 = vxpose.xlu0.b32.end [2/2] (short) %v7278_v60, 128 }
  0xa0   : > { %v9160_v11 = vpop.trf.xlu0 }
  0xa1   : > { %8008 = vmatprep.mubr.msk.f32.mxu1 %vm500_vm0, %v9160_v11  ;;  %v879_v24 = vsel %vm500_vm0, %v9160_v11, 0.0 }
  0xa4   : > { %v9164_v12 = vpop.trf.xlu0 }
  0xa5   : > { %8009 = vmatmul.mubr.msk.f32.vlgmr.msra.gmra.mrb[0].mxu1 %vm500_vm0, %v9164_v12  ;;  %v894_v31 = vsel %vm500_vm0, %v9164_v12, 0.0 }
  0xa6   : > { %8479 = vmatpush3.bf16.msra.mxu1 %v9146_v7 }
  0xa7   : > { %8485 = vmatprep.subr.bf16.mxu1 %v9251_v63 }
  0xa8   : > { %v9169_v13 = vpop.trf.xlu0 }
  0xa9   : > { %8011 = vmatprep.mubr.msk.f32.mxu1 %vm500_vm0, %v9169_v13  ;;  %v880_v22 = vsel %vm500_vm0, %v9169_v13, 0.0 }
  0xaa   : > { %v881_v26 = vadd.f32 %v880_v22, %v879_v24 }
  0xac   : > { %v9173_v14 = vpop.trf.xlu0 }
  0xad   : > { %8012 = vmatmul.mubr.msk.f32.gmra.mrb[2].mxu1 %vm500_vm0, %v9173_v14  ;;  %v895_v27 = vsel %vm500_vm0, %v9173_v14, 0.0 }
  0xae   : > { %v896_v34 = vadd.f32 %v895_v27, %v894_v31 }
  0xb0   : > { %v9177_v15 = vpop.trf.xlu0 }
  0xb1   : > { %8014 = vmatprep.mubr.msk.f32.mxu1 %vm500_vm0, %v9177_v15  ;;  %v882_v25 = vsel %vm500_vm0, %v9177_v15, 0.0 }
  0xb2   : > { %v883_v29 = vadd.f32 %v882_v25, %v881_v26 }
  0xb4   : > { %v9181_v16 = vpop.trf.xlu0 }
  0xb5   : > { %8015 = vmatmul.mubr.msk.f32.gmra.mrb[4].mxu1 %vm500_vm0, %v9181_v16  ;;  %v897_v32 = vsel %vm500_vm0, %v9181_v16, 0.0 }
  0xb6   : > { %v898_v38 = vadd.f32 %v897_v32, %v896_v34 }
  0xb8   : > { %v484_v17 = vpop.trf.xlu0 }
  0xb9   : > { %8017 = vmatprep.mubr.msk.f32.mxu1 %vm500_vm0, %v484_v17  ;;  %v884_v28 = vsel %vm500_vm0, %v484_v17, 0.0 }
  0xba   : > { %v885_v35 = vadd.f32 %v884_v28, %v883_v29 }
  0xbc   : > { %v485_v18 = vpop.trf.xlu0 }
  0xbd   : > { %8018 = vmatmul.mubr.msk.f32.gmra.mrb[6].mxu1 %vm500_vm0, %v485_v18  ;;  %v899_v36 = vsel %vm500_vm0, %v485_v18, 0.0 }
  0xbe   : > { %v900_v43 = vadd.f32 %v899_v36, %v898_v38 }
  0xc0   : > { %v486_v19 = vpop.trf.xlu0 }
  0xc1   : > { %8020 = vmatprep.mubr.msk.f32.mxu1 %vm500_vm0, %v486_v19  ;;  %v886_v33 = vsel %vm500_vm0, %v486_v19, 0.0 }
  0xc2   : > { %v887_v39 = vadd.f32 %v886_v33, %v885_v35 }
  0xc4   : > { %v487_v20 = vpop.trf.xlu0 }
  0xc5   : > { %8021 = vmatmul.mubr.msk.f32.gmra.mrb[8].mxu1 %vm500_vm0, %v487_v20  ;;  %v901_v41 = vsel %vm500_vm0, %v487_v20, 0.0 }
  0xc6   : > { %v902_v46 = vadd.f32 %v901_v41, %v900_v43 }
  0xc8   : > { %v488_v21 = vpop.trf.xlu0 }
  0xc9   : > { %8023 = vmatprep.mubr.msk.f32.mxu1 %vm500_vm0, %v488_v21  ;;  %v888_v37 = vsel %vm500_vm0, %v488_v21, 0.0 }
  0xca   : > { %v889_v44 = vadd.f32 %v888_v37, %v887_v39 }
  0xcc   : > { %v489_v23 = vpop.trf.xlu0 }
  0xcd   : > { %8024 = vmatmul.mubr.msk.f32.gmra.mrb[10].mxu1 %vm500_vm0, %v489_v23  ;;  %v903_v45 = vsel %vm500_vm0, %v489_v23, 0.0 }
  0xce   : > { %v904_v51 = vadd.f32 %v903_v45, %v902_v46 }
  0xd0   : > { %v490_v30 = vpop.trf.xlu0 }
  0xd1   : > { %8026 = vmatprep.mubr.msk.f32.mxu1 %vm500_vm0, %v490_v30  ;;  %v890_v42 = vsel %vm500_vm0, %v490_v30, 0.0 }
  0xd2   : > { %v891_v48 = vadd.f32 %v890_v42, %v889_v44 }
  0xd4   : > { %v491_v40 = vpop.trf.xlu0 }
  0xd5   : > { %8027 = vmatmul.mubr.msk.f32.gmra.mrb[12].mxu1 %vm500_vm0, %v491_v40  ;;  %v905_v49 = vsel %vm500_vm0, %v491_v40, 0.0 }
  0xd6   : > { %v906_v53 = vadd.f32 %v905_v49, %v904_v51 }
  0xd8   : > { %v492_v47 = vpop.trf.xlu0 }
  0xd9   : > { %8029 = vmatprep.mubr.msk.f32.mxu1 %vm500_vm0, %v492_v47  ;;  %v892_v50 = vsel %vm500_vm0, %v492_v47, 0.0 }
  0xda   : > { %v893_v52 = vadd.f32 %v892_v50, %v891_v48 }
  0xdc   : > { %v493_v54 = vpop.trf.xlu0  ;;  %v910_v55 = vmul.f32 0.125, %v893_v52 }
  0xdd   : > { %v907_v56 = vsel %vm500_vm0, %v493_v54, 0.0  ;;  %8030 = vmatmul.mubr.msk.f32.gmra.mrb[14].mxu1 %vm500_vm0, %v493_v54 }
  0xde   : > { %v908_v57 = vadd.f32 %v907_v56, %v906_v53  ;;  %8036 = vmatprep.mubr.msk.f32.mxu1 %vm500_vm0, %v9160_v11  ;;  %8064 = vmatprep.mubr.msk.f32.mxu0 %vm500_vm0, %v910_v55 }
  0xe0   : > { %v911_v58 = vmul.f32 0.125, %v908_v57  ;;  %v9264_v6 = vpop.trf.xlu0 }
  0xe1   : > { %8037 = vmatmul.mubr.msk.f32.vlgmr.msra.gmra.mrb[16].mxu1 %vm500_vm0, %v9164_v12 }
  0xe2   : > { %8039 = vmatprep.mubr.msk.f32.mxu1 %vm500_vm0, %v9169_v13  ;;  %8065 = vmatmul.mubr.msk.f32.vlgmr.msra.gmra.mrb[0].mxu0 %vm500_vm0, %v911_v58 }
  0xe3   : > { %8491 = vmatpush3.bf16.msra.mxu0 %v9130_v3  ;;  %8487 = vmatpush3.bf16.msra.mxu1 %v9251_v63 }
  0xe4   : > { %8493 = vmatprep.subr.bf16.mxu0 %v9146_v7  ;;  %8125 = vmatprep.mubr.msk.f32.mxu0 %vm500_vm0, %v9264_v6  ;;  %v9270_v13 = vpop.trf.xlu0 }
  0xe5   : > { %8040 = vmatmul.mubr.msk.f32.gmra.mrb[18].mxu1 %vm500_vm0, %v9173_v14  ;;  %v2111_v14 = vsel %vm500_vm0, %v9264_v6, 0.0 }
  0xe6   : > { %8042 = vmatprep.mubr.msk.f32.mxu1 %vm500_vm0, %v9177_v15  ;;  %8126 = vmatmul.mubr.msk.f32.vlgmr.msra.gmra.mrb[2].mxu0 %vm500_vm0, %v9270_v13 }
  0xe7   : > { %8495 = vmatpush3.bf16.msra.mxu0 %v9146_v7 }
  0xe8   : > { %8501 = vmatprep.subr.bf16.mxu0 %v9251_v63  ;;  %v9280_v15 = vpop.trf.xlu0 }
  0xe9   : > { %8043 = vmatmul.mubr.msk.f32.gmra.mrb[20].mxu1 %vm500_vm0, %v9181_v16  ;;  %v2112_v16 = vsel %vm500_vm0, %v9280_v15, 0.0  ;;  %8128 = vmatprep.mubr.msk.f32.mxu0 %vm500_vm0, %v9280_v15 }
  0xea   : > { %8045 = vmatprep.mubr.msk.f32.mxu1 %vm500_vm0, %v484_v17 }
  0xed   : > { %8046 = vmatmul.mubr.msk.f32.gmra.mrb[22].mxu1 %vm500_vm0, %v485_v18  ;;  %v2113_v18 = vadd.f32 %v2112_v16, %v2111_v14 }
  0xee   : > { %8048 = vmatprep.mubr.msk.f32.mxu1 %vm500_vm0, %v486_v19 }
  0xf1   : > { %8049 = vmatmul.mubr.msk.f32.gmra.mrb[24].mxu1 %vm500_vm0, %v487_v20 }
  0xf2   : > { %8051 = vmatprep.mubr.msk.f32.mxu1 %vm500_vm0, %v488_v21  ;;  %v2126_v21 = vsel %vm500_vm0, %v9270_v13, 0.0 }
  0xf5   : > { %8052 = vmatmul.mubr.msk.f32.gmra.mrb[26].mxu1 %vm500_vm0, %v489_v23  ;;  %v9290_v23 = vpop.trf.xlu0 }
  0xf6   : > { %8054 = vmatprep.mubr.msk.f32.mxu1 %vm500_vm0, %v490_v30  ;;  %v2127_v24 = vsel %vm500_vm0, %v9290_v23, 0.0  ;;  %8129 = vmatmul.mubr.msk.f32.gmra.mrb[4].mxu0 %vm500_vm0, %v9290_v23 }
  0xf7   : > { %v2128_v25 = vadd.f32 %v2127_v24, %v2126_v21 }
  0xf9   : > { %8055 = vmatmul.mubr.msk.f32.gmra.mrb[28].mxu1 %vm500_vm0, %v491_v40  ;;  %v9298_v26 = vpop.trf.xlu0 }
  0xfa   : > { %8057 = vmatprep.mubr.msk.f32.mxu1 %vm500_vm0, %v492_v47  ;;  %v2114_v27 = vsel %vm500_vm0, %v9298_v26, 0.0  ;;  %8131 = vmatprep.mubr.msk.f32.mxu0 %vm500_vm0, %v9298_v26 }
  0xfb   : > { %v2115_v29 = vadd.f32 %v2114_v27, %v2113_v18  ;;  %v9381_v18 = vld [vmem:[%s11642_s4] ss:$0 sm:$0xff] }
  0xfd   : > { %8058 = vmatmul.mubr.msk.f32.gmra.mrb[30].mxu1 %vm500_vm0, %v493_v54  ;;  %v9306_v33 = vpop.trf.xlu0 }
  0xfe   : > { %v2129_v34 = vsel %vm500_vm0, %v9306_v33, 0.0  ;;  %8132 = vmatmul.mubr.msk.f32.gmra.mrb[6].mxu0 %vm500_vm0, %v9306_v33 }
  0xff   : > { %v2130_v35 = vadd.f32 %v2129_v34, %v2128_v25 }
 0x101   : > { %v9314_v36 = vpop.trf.xlu0 }
 0x102   : > { %v2116_v37 = vsel %vm500_vm0, %v9314_v36, 0.0  ;;  %8134 = vmatprep.mubr.msk.f32.mxu0 %vm500_vm0, %v9314_v36 }
 0x103   : > { %v2117_v39 = vadd.f32 %v2116_v37, %v2115_v29 }
 0x105   : > { %v9322_v43 = vpop.trf.xlu0 }
 0x106   : > { %v2131_v44 = vsel %vm500_vm0, %v9322_v43, 0.0  ;;  %8135 = vmatmul.mubr.msk.f32.gmra.mrb[8].mxu0 %vm500_vm0, %v9322_v43 }
 0x107   : > { %v2132_v45 = vadd.f32 %v2131_v44, %v2130_v35 }
 0x109   : > { %v9330_v46 = vpop.trf.xlu0 }
 0x10a   : > { %v2118_v47 = vsel %vm500_vm0, %v9330_v46, 0.0  ;;  %8137 = vmatprep.mubr.msk.f32.mxu0 %vm500_vm0, %v9330_v46 }
 0x10b   : > { %v2119_v49 = vadd.f32 %v2118_v47, %v2117_v39 }
 0x10d   : > { %v9338_v53 = vpop.trf.xlu0 }
 0x10e   : > { %v2133_v54 = vsel %vm500_vm0, %v9338_v53, 0.0  ;;  %8138 = vmatmul.mubr.msk.f32.gmra.mrb[10].mxu0 %vm500_vm0, %v9338_v53 }
 0x10f   : > { %v2134_v55 = vadd.f32 %v2133_v54, %v2132_v45 }
 0x111   : > { %v9346_v56 = vpop.trf.xlu0 }
 0x112   : > { %v2120_v57 = vsel %vm500_vm0, %v9346_v56, 0.0  ;;  %8140 = vmatprep.mubr.msk.f32.mxu0 %vm500_vm0, %v9346_v56 }
 0x113   : > { %v2121_v59 = vadd.f32 %v2120_v57, %v2119_v49 }
 0x178   : > { %v8010_v1 = vpop.f32.mrb[0].mxu1 }
 0x179   : > { %v621_v2 = vadd.f32 %v8010_v1, %v9258_v0  ;;  %v615_v4 = vpop.f32.mrb[1].mxu1  ;;  %v9354_v1 = vpop.trf.xlu0 }
 0x17a   : > { %v616_v5 = vadd.f32 %v9258_v0, %v615_v4  ;;  %v9362_v4 = vld [vmem:[%s11645_s7 + $0x10] sm:$0xff]  ;;  %8141 = vmatmul.mubr.msk.f32.gmra.mrb[12].mxu0 %vm500_vm0, %v9354_v1 }
 0x17b   : > { %696 = vst.msk [vmem:[#allocation2 + $0x8] sm:$0xff] %vm694_vm1, %v621_v2  ;;  %v2135_v2 = vsel %vm500_vm0, %v9354_v1, 0.0  ;;  %8071 = vmatprep.subr.mxu1 %v9362_v4 }
 0x17c   : > { %695 = vst.msk [vmem:[#allocation2] sm:$0xff] %vm694_vm1, %v616_v5  ;;  %v2136_v5 = vadd.f32 %v2135_v2, %v2134_v55  ;;  %8072 = vmatpush3.msra.mxu1 %v9362_v4 }
 0x17d   : > { %8497 = vmatprep.subr.bf16.mxu1 %v9154_v10 }
 0x180   : > { %v8013_v8 = vpop.f32.mrb[2].mxu1 }
 0x181   : > { %v631_v9 = vadd.f32 %v8013_v8, %v9258_v0  ;;  %v625_v11 = vpop.f32.mrb[3].mxu1  ;;  %v9369_v8 = vpop.trf.xlu0 }
 0x182   : > { %v626_v12 = vadd.f32 %v9258_v0, %v625_v11  ;;  %8143 = vmatprep.mubr.msk.f32.mxu0 %vm500_vm0, %v9369_v8 }
 0x183   : > { %698 = vst.msk [vmem:[#allocation2 + $0x18] sm:$0xff] %vm694_vm1, %v631_v9  ;;  %v2122_v9 = vsel %vm500_vm0, %v9369_v8, 0.0 }
 0x184   : > { %697 = vst.msk [vmem:[#allocation2 + $0x10] sm:$0xff] %vm694_vm1, %v626_v12  ;;  %v2123_v12 = vadd.f32 %v2122_v9, %v2121_v59 }
 0x188   : > { %v8016_v17 = vpop.f32.mrb[4].mxu1 }
 0x189   : > { %v641_v19 = vadd.f32 %v8016_v17, %v9258_v0  ;;  %v635_v20 = vpop.f32.mrb[5].mxu1 }
 0x18a   : > { %v636_v22 = vadd.f32 %v9258_v0, %v635_v20 }
 0x18b   : > { %700 = vst.msk [vmem:[#allocation2 + $0x28] sm:$0xff] %vm694_vm1, %v641_v19  ;;  %v9383_v19 = vpop.trf.xlu0 }
 0x18c   : > { %699 = vst.msk [vmem:[#allocation2 + $0x20] sm:$0xff] %vm694_vm1, %v636_v22  ;;  %v2137_v20 = vsel %vm500_vm0, %v9383_v19, 0.0  ;;  %8144 = vmatmul.mubr.msk.f32.gmra.mrb[14].mxu0 %vm500_vm0, %v9383_v19  ;;  %v7241_v22 = vld [vmem:[%s11644_s6] ss:$0 sm:$0xff] }
 0x18d   : > { %v9394_v24 = vadd.f32 %v2137_v20, %v2136_v5 }
 0x190   : > { %v8019_v28 = vpop.f32.mrb[6].mxu1 }
 0x191   : > { %v651_v30 = vadd.f32 %v8019_v28, %v9258_v0  ;;  %v645_v31 = vpop.f32.mrb[7].mxu1 }
 0x192   : > { %v646_v32 = vadd.f32 %v9258_v0, %v645_v31  ;;  %v9398_v31 = vpop.trf.xlu0 }
 0x193   : > { %702 = vst.msk [vmem:[#allocation2 + $0x38] sm:$0xff] %vm694_vm1, %v651_v30  ;;  %v2124_v34 = vsel %vm500_vm0, %v9398_v31, 0.0  ;;  %8146 = vmatprep.mubr.msk.f32.mxu0 %vm500_vm0, %v9398_v31 }
 0x194   : > { %701 = vst.msk [vmem:[#allocation2 + $0x30] sm:$0xff] %vm694_vm1, %v646_v32  ;;  %v9408_v37 = vadd.f32 %v2124_v34, %v2123_v12 }
 0x198   : > { %v8022_v38 = vpop.f32.mrb[8].mxu1 }
 0x199   : > { %v661_v40 = vadd.f32 %v8022_v38, %v9258_v0  ;;  %v655_v41 = vpop.f32.mrb[9].mxu1 }
 0x19a   : > { %v656_v42 = vadd.f32 %v9258_v0, %v655_v41  ;;  %v9414_v41 = vpop.trf.xlu0 }
 0x19b   : > { %704 = vst.msk [vmem:[#allocation2 + $0x48] sm:$0xff] %vm694_vm1, %v661_v40  ;;  %8147 = vmatmul.mubr.msk.f32.gmra.mrb[16].mxu0 %vm500_vm0, %v9414_v41 }
 0x19c   : > { %703 = vst.msk [vmem:[#allocation2 + $0x40] sm:$0xff] %vm694_vm1, %v656_v42  ;;  %8153 = vmatprep.mubr.msk.f32.mxu0 %vm500_vm0, %v9264_v6 }
 0x19f   : > { %8154 = vmatmul.mubr.msk.f32.vlgmr.msra.gmra.mrb[18].mxu0 %vm500_vm0, %v9270_v13 }
 0x1a0   : > { %v8025_v48 = vpop.f32.mrb[10].mxu1  ;;  %8156 = vmatprep.mubr.msk.f32.mxu0 %vm500_vm0, %v9280_v15  ;;  %8503 = vmatpush3.bf16.msra.mxu0 %v9251_v63 }
 0x1a1   : > { %v671_v50 = vadd.f32 %v8025_v48, %v9258_v0  ;;  %v665_v51 = vpop.f32.mrb[11].mxu1  ;;  %8188 = vmatprep.subr.mxu0 %v9362_v4 }
 0x1a2   : > { %v666_v52 = vadd.f32 %v9258_v0, %v665_v51 }
 0x1a3   : > { %706 = vst.msk [vmem:[#allocation2 + $0x58] sm:$0xff] %vm694_vm1, %v671_v50  ;;  %8157 = vmatmul.mubr.msk.f32.gmra.mrb[20].mxu0 %vm500_vm0, %v9290_v23 }
 0x1a4   : > { %705 = vst.msk [vmem:[#allocation2 + $0x50] sm:$0xff] %vm694_vm1, %v666_v52  ;;  %8159 = vmatprep.mubr.msk.f32.mxu0 %vm500_vm0, %v9298_v26  ;;  %8189 = vmatpush3.msra.mxu0 %v9362_v4 }
 0x1a5   : > { %8513 = vmatprep.subr.bf16.mxu0 %v9154_v10 }
 0x1a7   : > { %8160 = vmatmul.mubr.msk.f32.gmra.mrb[22].mxu0 %vm500_vm0, %v9306_v33 }
 0x1a8   : > { %v8028_v58 = vpop.f32.mrb[12].mxu1  ;;  %8162 = vmatprep.mubr.msk.f32.mxu0 %vm500_vm0, %v9314_v36 }
 0x1a9   : > { %v681_v60 = vadd.f32 %v8028_v58, %v9258_v0  ;;  %v675_v61 = vpop.f32.mrb[13].mxu1 }
 0x1aa   : > { %v676_v62 = vadd.f32 %v9258_v0, %v675_v61 }
 0x1ab   : > { %708 = vst.msk [vmem:[#allocation2 + $0x68] sm:$0xff] %vm694_vm1, %v681_v60  ;;  %8163 = vmatmul.mubr.msk.f32.gmra.mrb[24].mxu0 %vm500_vm0, %v9322_v43 }
 0x1ac   : > { %707 = vst.msk [vmem:[#allocation2 + $0x60] sm:$0xff] %vm694_vm1, %v676_v62  ;;  %8165 = vmatprep.mubr.msk.f32.mxu0 %vm500_vm0, %v9330_v46  ;;  %v1005_v62 = vlaneseq }
 0x1ae   : > { %v1006_v4 = vshrl.u32 %v1005_v62, 7 }
 0x1af   : > { %8166 = vmatmul.mubr.msk.f32.gmra.mrb[26].mxu0 %vm500_vm0, %v9338_v53  ;;  %v8984_v53 = vmov 1966171168  }
 0x1b0   : > { %v8031_v11 = vpop.f32.mrb[14].mxu1  ;;  %8168 = vmatprep.mubr.msk.f32.mxu0 %vm500_vm0, %v9346_v56  ;;  %v1003_v56 = vunpack.c.l.s4 %v8984_v53  ;;  %v9488_v9 = vsub.s32 0, %v1006_v4 }
 0x1b1   : > { %v691_v14 = vadd.f32 %v8031_v11, %v9258_v0  ;;  %v685_v16 = vpop.f32.mrb[15].mxu1 }
 0x1b2   : > { %v686_v17 = vadd.f32 %v9258_v0, %v685_v16  ;;  %v1004_v2 = vunpack.c.0.s8 %v1003_v56  ;;  %11672 = vst [vmem:[#allocation11_spill] sm:$0xff] %v9488_v9 }
 0x1b3   : > { %710 = vst.msk [vmem:[#allocation2 + $0x78] sm:$0xff] %vm694_vm1, %v691_v14  ;;  %8169 = vmatmul.mubr.msk.f32.gmra.mrb[28].mxu0 %vm500_vm0, %v9354_v1 }
 0x1b4   : > { %709 = vst.msk [vmem:[#allocation2 + $0x70] sm:$0xff] %vm694_vm1, %v686_v17  ;;  %v8038_v21 = vpop.f32.mrb[16].mxu1  ;;  %8171 = vmatprep.mubr.msk.f32.mxu0 %vm500_vm0, %v9369_v8  ;;  %v9484_v1 = vsub.s32 %v1004_v2, %v1006_v4 }
 0x1b5   : > { %v789_v25 = vadd.f32 %v8038_v21, %v9381_v18  ;;  %v783_v27 = vpop.f32.mrb[17].mxu1  ;;  %v8066_v28 = vpop.f32.mrb[0].mxu0 }
 0x1b6   : > { %v784_v29 = vadd.f32 %v9381_v18, %v783_v27  ;;  %v990_v30 = vpop.f32.mrb[1].mxu0  ;;  %v9416_v42 = vadd.f32 %v8066_v28, %v7241_v22  ;;  %11671 = vst [vmem:[#allocation10_spill] sm:$0xff] %v9484_v1 }
 0x1b7   : > { %864 = vst.msk [vmem:[#allocation3 + $0x8] sm:$0xff] %vm862_vm2, %v789_v25  ;;  %v9401_v32 = vadd.f32 %v7241_v22, %v990_v30  ;;  %8172 = vmatmul.mubr.msk.f32.gmra.mrb[30].mxu0 %vm500_vm0, %v9383_v19 }
 0x1b8   : > { %863 = vst.msk [vmem:[#allocation3] sm:$0xff] %vm862_vm2, %v784_v29  ;;  %v8041_v35 = vpop.f32.mrb[18].mxu1  ;;  %8174 = vmatprep.mubr.msk.f32.mxu0 %vm500_vm0, %v9398_v31 }
 0x1b9   : > { %v799_v38 = vadd.f32 %v8041_v35, %v9381_v18  ;;  %v793_v39 = vpop.f32.mrb[19].mxu1  ;;  %1179 = vrot.lane.b32.xlu1 %v9401_v32, %s8983_s26  ;;  %v1008_v5 = vrot.slane %v9401_v32, %v9484_v1  ;;  %v1001_v19 = vcombine.high %v9401_v32, %v9401_v32 }
 0x1ba   : > { %v794_v40 = vadd.f32 %v9381_v18, %v793_v39 }
 0x1bb   : > { %866 = vst.msk [vmem:[#allocation3 + $0x18] sm:$0xff] %vm862_vm2, %v799_v38  ;;  %8175 = vmatmul.mubr.msk.f32.gmra.mrb[32].mxu0 %vm500_vm0, %v9414_v41  ;;  %v1016_v8 = vcombine.high %v1008_v5, %v1008_v5  ;;  %v1024_v11 = vrot.slane %v1008_v5, %v9484_v1  ;;  %v1015_v28 = vrot.slane %v1001_v19, %v9484_v1 }
 0x1bc   : > { %865 = vst.msk [vmem:[#allocation3 + $0x10] sm:$0xff] %vm862_vm2, %v794_v40  ;;  %v8044_v44 = vpop.f32.mrb[20].mxu1 }
 0x1bd   : > { %v803_v45 = vpop.f32.mrb[21].mxu1  ;;  %1181 = vrot.lane.b32.xlu1 %v9416_v42, %s8983_s26  ;;  %v809_v6 = vadd.f32 %v8044_v44, %v9381_v18  ;;  %v1038_v12 = vrot.slane %v1016_v8, %v9484_v1  ;;  %v1102_v14 = vrot.slane %v1024_v11, %v9488_v9  ;;  %v1046_v20 = vcombine.high %v1024_v11, %v1024_v11 }
 0x1be   : > { %v804_v49 = vadd.f32 %v9381_v18, %v803_v45  ;;  %v1017_v34 = vcombine.high %v1015_v28, %v1015_v28  ;;  %v1031_v35 = vrot.slane %v1015_v28, %v9484_v1 }
 0x1bf   : > { %868 = vst.msk [vmem:[#allocation3 + $0x28] sm:$0xff] %vm862_vm2, %v809_v6  ;;  %v1106_v21 = vrot.slane %v1038_v12, %v9488_v9  ;;  %v1048_v29 = vcombine.high %v1038_v12, %v1038_v12  ;;  %v1110_v30 = vrot.slane %v1046_v20, %v9488_v9 }
 0x1c0   : > { %v8047_v47 = vpop.f32.mrb[22].mxu1  ;;  %867 = vst.msk [vmem:[#allocation3 + $0x20] sm:$0xff] %vm862_vm2, %v804_v49  ;;  %v1045_v45 = vrot.slane %v1017_v34, %v9484_v1 }
 0x1c1   : > { %v813_v48 = vpop.f32.mrb[23].mxu1  ;;  %v819_v50 = vadd.f32 %v8047_v47, %v9381_v18  ;;  %v1114_v38 = vrot.slane %v1048_v29, %v9488_v9  ;;  %v1118_v47 = vrot.slane %v1031_v35, %v9488_v9 }
 0x1c2   : > { %v814_v13 = vadd.f32 %v9381_v18, %v813_v48 }
 0x1c3   : > { %870 = vst.msk [vmem:[#allocation3 + $0x38] sm:$0xff] %vm862_vm2, %v819_v50 }
 0x1c4   : > { %v8050_v51 = vpop.f32.mrb[24].mxu1  ;;  %869 = vst.msk [vmem:[#allocation3 + $0x30] sm:$0xff] %vm862_vm2, %v814_v13  ;;  %v1047_v13 = vcombine.high %v1031_v35, %v1031_v35 }
 0x1c5   : > { %v829_v15 = vadd.f32 %v8050_v51, %v9381_v18  ;;  %v823_v52 = vpop.f32.mrb[25].mxu1  ;;  %v1122_v51 = vrot.slane %v1045_v45, %v9488_v9 }
 0x1c6   : > { %v824_v23 = vadd.f32 %v9381_v18, %v823_v52 }
 0x1c7   : > { %872 = vst.msk [vmem:[#allocation3 + $0x48] sm:$0xff] %vm862_vm2, %v829_v15 }
 0x1c8   : > { %871 = vst.msk [vmem:[#allocation3 + $0x40] sm:$0xff] %vm862_vm2, %v824_v23  ;;  %v8053_v26 = vpop.f32.mrb[26].mxu1 }
 0x1c9   : > { %v839_v54 = vadd.f32 %v8053_v26, %v9381_v18  ;;  %v833_v55 = vpop.f32.mrb[27].mxu1 }
 0x1ca   : > { %v834_v57 = vadd.f32 %v9381_v18, %v833_v55  ;;  %v1049_v55 = vcombine.high %v1045_v45, %v1045_v45 }
 0x1cb   : > { %874 = vst.msk [vmem:[#allocation3 + $0x58] sm:$0xff] %vm862_vm2, %v839_v54  ;;  %v1057_v54 = vrot.slane %v9416_v42, %v9484_v1 }
 0x1cc   : > { %873 = vst.msk [vmem:[#allocation3 + $0x50] sm:$0xff] %vm862_vm2, %v834_v57  ;;  %v8056_v58 = vpop.f32.mrb[28].mxu1  ;;  %v1126_v57 = vrot.slane %v1047_v13, %v9488_v9 }
 0x1cd   : > { %v849_v33 = vadd.f32 %v8056_v58, %v9381_v18  ;;  %v843_v59 = vpop.f32.mrb[29].mxu1 }
 0x1ce   : > { %v844_v36 = vadd.f32 %v9381_v18, %v843_v59 }
 0x1cf   : > { %876 = vst.msk [vmem:[#allocation3 + $0x68] sm:$0xff] %vm862_vm2, %v849_v33 }
 0x1d0   : > { %875 = vst.msk [vmem:[#allocation3 + $0x60] sm:$0xff] %vm862_vm2, %v844_v36  ;;  %v8059_v60 = vpop.f32.mrb[30].mxu1 }
 0x1d1   : > { %v859_v43 = vadd.f32 %v8059_v60, %v9381_v18  ;;  %v853_v61 = vpop.f32.mrb[31].mxu1  ;;  %v1065_v60 = vcombine.high %v1057_v54, %v1057_v54 }
 0x1d2   : > { %v854_v46 = vadd.f32 %v9381_v18, %v853_v61  ;;  %v1130_v61 = vrot.slane %v1049_v55, %v9488_v9 }
 0x1d3   : > { %878 = vst.msk [vmem:[#allocation3 + $0x78] sm:$0xff] %vm862_vm2, %v859_v43  ;;  %v1073_v43 = vrot.slane %v1057_v54, %v9484_v1  ;;  %v1087_v2 = vrot.slane %v1065_v60, %v9484_v1 }
 0x1d4   : > { %877 = vst.msk [vmem:[#allocation3 + $0x70] sm:$0xff] %vm862_vm2, %v854_v46 }
 0x1d5   : > { %v1134_v4 = vrot.slane %v1073_v43, %v9488_v9  ;;  %v1138_v19 = vrot.slane %v1087_v2, %v9488_v9  ;;  %v1097_v29 = vcombine.high %v1087_v2, %v1087_v2 }
 0x22b   : > { %v9493_v16 = vpop.permute.xlu1 %1179 }
 0x22c   : > { %v1185_v17 = vsub.f32 %v1102_v14, %v9493_v16  ;;  %v1187_v25 = vsub.f32 %v1106_v21, %v9493_v16  ;;  %v1189_v32 = vsub.f32 %v1110_v30, %v9493_v16  ;;  %v1191_v40 = vsub.f32 %v1114_v38, %v9493_v16 }
 0x22d   : > { %v1193_v6 = vsub.f32 %v1118_v47, %v9493_v16  ;;  %v1195_v52 = vsub.f32 %v1122_v51, %v9493_v16  ;;  %v1197_v33 = vsub.f32 %v1126_v57, %v9493_v16  ;;  %v1199_v53 = vsub.f32 %v1130_v61, %v9493_v16 }
 0x22e   : > { %8620 = vtanh.f32 %v1185_v17  ;;  %v1201_v8 = vsub.f32 %v1134_v4, %v9493_v16  ;;  %v1095_v17 = vcombine.high %v1073_v43, %v1073_v43 }
 0x22f   : > { %v9499_v22 = vpop.permute.xlu1 %1181 }
 0x230   : > { %v1186_v27 = vsub.f32 %v1102_v14, %v9499_v22  ;;  %v1188_v31 = vsub.f32 %v1106_v21, %v9499_v22  ;;  %v1190_v39 = vsub.f32 %v1110_v30, %v9499_v22  ;;  %v1192_v48 = vsub.f32 %v1114_v38, %v9499_v22 }
 0x231   : > { %v1194_v15 = vsub.f32 %v1118_v47, %v9499_v22  ;;  %v1196_v58 = vsub.f32 %v1122_v51, %v9499_v22  ;;  %v1198_v46 = vsub.f32 %v1126_v57, %v9499_v22  ;;  %v1200_v5 = vsub.f32 %v1130_v61, %v9499_v22 }
 0x232   : > { %8622 = vtanh.f32 %v1186_v27  ;;  %v1050_v14 = vcombine.high %v9416_v42, %v9416_v42  ;;  %v1202_v20 = vsub.f32 %v1134_v4, %v9499_v22  ;;  %v1203_v21 = vsub.f32 %v1138_v19, %v9493_v16 }
 0x233   : > { %8624 = vtanh.f32 %v1187_v25  ;;  %v1142_v42 = vrot.slane %v1095_v17, %v9488_v9  ;;  %v1204_v30 = vsub.f32 %v1138_v19, %v9499_v22 }
 0x234   : > { %8626 = vtanh.f32 %v1188_v31  ;;  %v1064_v28 = vrot.slane %v1050_v14, %v9484_v1 }
 0x235   : > { %8628 = vtanh.f32 %v1189_v32  ;;  %v1205_v31 = vsub.f32 %v1142_v42, %v9493_v16 }
 0x236   : > { %8630 = vtanh.f32 %v1190_v39  ;;  %v1066_v35 = vcombine.high %v1064_v28, %v1064_v28  ;;  %v1080_v38 = vrot.slane %v1064_v28, %v9484_v1  ;;  %v1146_v39 = vrot.slane %v1097_v29, %v9488_v9 }
 0x237   : > { %8632 = vtanh.f32 %v1191_v40  ;;  %v1206_v40 = vsub.f32 %v1142_v42, %v9499_v22 }
 0x238   : > { %v8621_v44 = vpop.eup %8620  ;;  %8634 = vtanh.f32 %v1192_v48  ;;  %v1207_v45 = vsub.f32 %v1146_v39, %v9493_v16  ;;  %v1094_v13 = vrot.slane %v1066_v35, %v9484_v1  ;;  %v1150_v51 = vrot.slane %v1080_v38, %v9488_v9 }
 0x239   : > { %8073 = vmatprep.mubr.msk.f32.mxu1 %vm1255_vm3, %v8621_v44  ;;  %8636 = vtanh.f32 %v1193_v6  ;;  %v8127_v44 = vpop.f32.mrb[2].mxu0  ;;  %v1096_v54 = vcombine.high %v1080_v38, %v1080_v38 }
 0x23a   : > { %8638 = vtanh.f32 %v1194_v15  ;;  %v1861_v47 = vadd.f32 %v8127_v44, %v9258_v0  ;;  %v1855_v48 = vpop.f32.mrb[3].mxu0  ;;  %v1208_v15 = vsub.f32 %v1146_v39, %v9499_v22  ;;  %v1154_v55 = vrot.slane %v1094_v13, %v9488_v9 }
 0x23b   : > { %8640 = vtanh.f32 %v1195_v52  ;;  %v1209_v52 = vsub.f32 %v1150_v51, %v9493_v16  ;;  %v1210_v57 = vsub.f32 %v1150_v51, %v9499_v22 }
 0x23c   : > { %v8623_v49 = vpop.eup %8622  ;;  %8642 = vtanh.f32 %v1196_v58  ;;  %1935 = vst.msk [vmem:[#allocation2 + $0x88] sm:$0xff] %vm694_vm1, %v1861_v47  ;;  %v8130_v58 = vpop.f32.mrb[4].mxu0  ;;  %v2141_v47 = vmul.f32 0.125, %v9408_v37 }
 0x23d   : > { %v8625_v50 = vpop.eup %8624  ;;  %8074 = vmatmul.mubr.msk.f32.vlgmr.msra.gmra.mrb[32].mxu1 %vm1255_vm3, %v8623_v49  ;;  %8644 = vtanh.f32 %v1197_v33  ;;  %v1856_v49 = vadd.f32 %v9258_v0, %v1855_v48  ;;  %v1211_v33 = vsub.f32 %v1154_v55, %v9493_v16 }
 0x23e   : > { %8499 = vmatpush3.bf16.msra.mxu1 %v9154_v10  ;;  %8076 = vmatprep.mubr.msk.f32.mxu1 %vm1255_vm3, %v8625_v50  ;;  %v8627_v23 = vpop.eup %8626  ;;  %8646 = vtanh.f32 %v1198_v46  ;;  %v1098_v46 = vcombine.high %v1094_v13, %v1094_v13 }
 0x23f   : > { %8505 = vmatprep.subr.bf16.mxu1 %v9130_v3  ;;  %v8629_v26 = vpop.eup %8628  ;;  %8648 = vtanh.f32 %v1199_v53  ;;  %1934 = vst.msk [vmem:[#allocation2 + $0x80] sm:$0xff] %vm694_vm1, %v1856_v49  ;;  %v1158_v53 = vrot.slane %v1096_v54, %v9488_v9 }
 0x240   : > { %v8631_v59 = vpop.eup %8630  ;;  %8650 = vtanh.f32 %v1200_v5  ;;  %v1162_v5 = vrot.slane %v1098_v46, %v9488_v9 }
 0x241   : > { %8077 = vmatmul.mubr.msk.f32.gmra.mrb[34].mxu1 %vm1255_vm3, %v8627_v23  ;;  %v8633_v36 = vpop.eup %8632  ;;  %8652 = vtanh.f32 %v1201_v8  ;;  %v1214_v8 = vsub.f32 %v1158_v53, %v9499_v22 }
 0x242   : > { %8079 = vmatprep.mubr.msk.f32.mxu1 %vm1255_vm3, %v8629_v26  ;;  %v8635_v56 = vpop.eup %8634  ;;  %8654 = vtanh.f32 %v1202_v20 }
 0x243   : > { %v8637_v62 = vpop.eup %8636  ;;  %8656 = vtanh.f32 %v1203_v21 }
 0x244   : > { %v8639_v11 = vpop.eup %8638  ;;  %8658 = vtanh.f32 %v1204_v30 }
 0x245   : > { %8080 = vmatmul.mubr.msk.f32.gmra.mrb[36].mxu1 %vm1255_vm3, %v8631_v59  ;;  %v8641_v12 = vpop.eup %8640  ;;  %8660 = vtanh.f32 %v1205_v31  ;;  %v1871_v59 = vadd.f32 %v8130_v58, %v9258_v0 }
 0x246   : > { %8082 = vmatprep.mubr.msk.f32.mxu1 %vm1255_vm3, %v8633_v36  ;;  %v8643_v25 = vpop.eup %8642  ;;  %8662 = vtanh.f32 %v1206_v40  ;;  %v1865_v36 = vpop.f32.mrb[5].mxu0 }
 0x247   : > { %v8645_v27 = vpop.eup %8644  ;;  %8664 = vtanh.f32 %v1207_v45  ;;  %v1866_v43 = vadd.f32 %v9258_v0, %v1865_v36  ;;  %1937 = vst.msk [vmem:[#allocation2 + $0x98] sm:$0xff] %vm694_vm1, %v1871_v59 }
 0x248   : > { %v8647_v32 = vpop.eup %8646  ;;  %8666 = vtanh.f32 %v1208_v15 }
 0x249   : > { %8083 = vmatmul.mubr.msk.f32.gmra.mrb[38].mxu1 %vm1255_vm3, %v8635_v56  ;;  %v8649_v34 = vpop.eup %8648  ;;  %8668 = vtanh.f32 %v1209_v52  ;;  %v1212_v56 = vsub.f32 %v1154_v55, %v9499_v22  ;;  %1936 = vst.msk [vmem:[#allocation2 + $0x90] sm:$0xff] %vm694_vm1, %v1866_v43 }
 0x24a   : > { %8085 = vmatprep.mubr.msk.f32.mxu1 %vm1255_vm3, %v8637_v62  ;;  %v8651_v6 = vpop.eup %8650  ;;  %8670 = vtanh.f32 %v1210_v57  ;;  %v1213_v62 = vsub.f32 %v1158_v53, %v9493_v16 }
 0x24b   : > { %v8653_v50 = vpop.eup %8652  ;;  %8672 = vtanh.f32 %v1211_v33 }
 0x24c   : > { %v8655_v23 = vpop.eup %8654  ;;  %8674 = vtanh.f32 %v1212_v56 }
 0x24d   : > { %8086 = vmatmul.mubr.msk.f32.gmra.mrb[40].mxu1 %vm1255_vm3, %v8639_v11  ;;  %v8657_v26 = vpop.eup %8656  ;;  %v8133_v11 = vpop.f32.mrb[6].mxu0  ;;  %8676 = vtanh.f32 %v1213_v62 }
 0x24e   : > { %8088 = vmatprep.mubr.msk.f32.mxu1 %vm1255_vm3, %v8641_v12  ;;  %v8659_v60 = vpop.eup %8658  ;;  %v1215_v12 = vsub.f32 %v1162_v5, %v9493_v16  ;;  %v1881_v14 = vadd.f32 %v8133_v11, %v9258_v0  ;;  %v1875_v17 = vpop.f32.mrb[7].mxu0  ;;  %8678 = vtanh.f32 %v1214_v8 }
 0x24f   : > { %v8661_v61 = vpop.eup %8660  ;;  %v1876_v20 = vadd.f32 %v9258_v0, %v1875_v17  ;;  %v8136_v28 = vpop.f32.mrb[8].mxu0 }
 0x250   : > { %v8663_v2 = vpop.eup %8662  ;;  %1939 = vst.msk [vmem:[#allocation2 + $0xa8] sm:$0xff] %vm694_vm1, %v1881_v14  ;;  %8680 = vtanh.f32 %v1215_v12  ;;  %v1891_v29 = vadd.f32 %v8136_v28, %v9258_v0  ;;  %v1885_v42 = vpop.f32.mrb[9].mxu0 }
 0x251   : > { %8089 = vmatmul.mubr.msk.f32.gmra.mrb[42].mxu1 %vm1255_vm3, %v8643_v25  ;;  %v8665_v4 = vpop.eup %8664  ;;  %v1216_v25 = vsub.f32 %v1162_v5, %v9499_v22  ;;  %1938 = vst.msk [vmem:[#allocation2 + $0xa0] sm:$0xff] %vm694_vm1, %v1876_v20  ;;  %v1886_v31 = vadd.f32 %v9258_v0, %v1885_v42  ;;  %v8139_v38 = vpop.f32.mrb[10].mxu0 }
 0x252   : > { %8091 = vmatprep.mubr.msk.f32.mxu1 %vm1255_vm3, %v8645_v27  ;;  %v8667_v19 = vpop.eup %8666  ;;  %1941 = vst.msk [vmem:[#allocation2 + $0xb8] sm:$0xff] %vm694_vm1, %v1891_v29  ;;  %v1901_v40 = vadd.f32 %v8139_v38, %v9258_v0  ;;  %v1895_v44 = vpop.f32.mrb[11].mxu0 }
 0x253   : > { %v8669_v21 = vpop.eup %8668  ;;  %8682 = vtanh.f32 %v1216_v25  ;;  %1940 = vst.msk [vmem:[#allocation2 + $0xb0] sm:$0xff] %vm694_vm1, %v1886_v31  ;;  %v1896_v48 = vadd.f32 %v9258_v0, %v1895_v44  ;;  %v9667_v31 = vld [vmem:[%s11646_s8] ss:$0 sm:$0xff] }
 0x254   : > { %v8671_v16 = vpop.eup %8670  ;;  %1943 = vst.msk [vmem:[#allocation2 + $0xc8] sm:$0xff] %vm694_vm1, %v1901_v40  ;;  %v9682_v40 = vld [vmem:[%s11647_s9] sm:$0xff] }
 0x255   : > { %8092 = vmatmul.mubr.msk.f32.gmra.mrb[44].mxu1 %vm1255_vm3, %v8647_v32  ;;  %v8673_v27 = vpop.eup %8672  ;;  %1942 = vst.msk [vmem:[#allocation2 + $0xc0] sm:$0xff] %vm694_vm1, %v1896_v48 }
 0x256   : > { %8094 = vmatprep.mubr.msk.f32.mxu1 %vm1255_vm3, %v8649_v34  ;;  %v8675_v30 = vpop.eup %8674  ;;  %v2139_v34 = vsel %vm500_vm0, %v9414_v41, 0.0 }
 0x257   : > { %v8677_v32 = vpop.eup %8676  ;;  %v2140_v39 = vadd.f32 %v2139_v34, %v9394_v24  ;;  %v8142_v24 = vpop.f32.mrb[12].mxu0 }
 0x258   : > { %v8679_v22 = vpop.eup %8678  ;;  %v1905_v49 = vpop.f32.mrb[13].mxu0 }
 0x259   : > { %8095 = vmatmul.mubr.msk.f32.gmra.mrb[46].mxu1 %vm1255_vm3, %v8651_v6  ;;  %v2142_v41 = vmul.f32 0.125, %v2140_v39  ;;  %v1911_v6 = vadd.f32 %v8142_v24, %v9258_v0  ;;  %v1906_v37 = vadd.f32 %v9258_v0, %v1905_v49 }
 0x25a   : > { %8097 = vmatprep.mubr.msk.f32.mxu1 %vm1255_vm3, %v8653_v50  ;;  %v8681_v35 = vpop.eup %8680 }
 0x25b   : > { %1945 = vst.msk [vmem:[#allocation2 + $0xd8] sm:$0xff] %vm694_vm1, %v1911_v6  ;;  %1944 = vst.msk [vmem:[#allocation2 + $0xd0] sm:$0xff] %vm694_vm1, %v1906_v37  ;;  %v9691_v6 = vld [vmem:[%s11647_s9 + $0x18] sm:$0xff] }
 0x25d   : > { %8098 = vmatmul.mubr.msk.f32.gmra.mrb[48].mxu1 %vm1255_vm3, %v8655_v23  ;;  %v8683_v45 = vpop.eup %8682 }
 0x25e   : > { %8100 = vmatprep.mubr.msk.f32.mxu1 %vm1255_vm3, %v8657_v26 }
 0x25f   : > { %v8145_v50 = vpop.f32.mrb[14].mxu0 }
 0x260   : > { %v1921_v13 = vadd.f32 %v8145_v50, %v9258_v0  ;;  %v1915_v51 = vpop.f32.mrb[15].mxu0  ;;  %v9699_v50 = vld [vmem:[%s11647_s9 + $0x10] sm:$0xff] }
 0x261   : > { %8101 = vmatmul.mubr.msk.f32.gmra.mrb[50].mxu1 %vm1255_vm3, %v8659_v60  ;;  %v1916_v15 = vadd.f32 %v9258_v0, %v1915_v51 }
 0x262   : > { %8103 = vmatprep.mubr.msk.f32.mxu1 %vm1255_vm3, %v8661_v61  ;;  %1947 = vst.msk [vmem:[#allocation2 + $0xe8] sm:$0xff] %vm694_vm1, %v1921_v13 }
 0x263   : > { %1946 = vst.msk [vmem:[#allocation2 + $0xe0] sm:$0xff] %vm694_vm1, %v1916_v15 }
 0x265   : > { %8104 = vmatmul.mubr.msk.f32.gmra.mrb[52].mxu1 %vm1255_vm3, %v8663_v2 }
 0x266   : > { %8106 = vmatprep.mubr.msk.f32.mxu1 %vm1255_vm3, %v8665_v4 }
 0x269   : > { %8107 = vmatmul.mubr.msk.f32.gmra.mrb[54].mxu1 %vm1255_vm3, %v8667_v19 }
 0x26a   : > { %8109 = vmatprep.mubr.msk.f32.mxu1 %vm1255_vm3, %v8669_v21 }
 0x26d   : > { %8110 = vmatmul.mubr.msk.f32.gmra.mrb[56].mxu1 %vm1255_vm3, %v8671_v16 }
 0x26e   : > { %8112 = vmatprep.mubr.msk.f32.mxu1 %vm1255_vm3, %v8673_v27  ;;  %v8148_v52 = vpop.f32.mrb[16].mxu0 }
 0x26f   : > { %v1931_v23 = vadd.f32 %v8148_v52, %v9258_v0  ;;  %v1925_v26 = vpop.f32.mrb[17].mxu0 }
 0x270   : > { %v1926_v54 = vadd.f32 %v9258_v0, %v1925_v26 }
 0x271   : > { %8113 = vmatmul.mubr.msk.f32.gmra.mrb[58].mxu1 %vm1255_vm3, %v8675_v30  ;;  %1949 = vst.msk [vmem:[#allocation2 + $0xf8] sm:$0xff] %vm694_vm1, %v1931_v23 }
 0x272   : > { %8115 = vmatprep.mubr.msk.f32.mxu1 %vm1255_vm3, %v8677_v32  ;;  %v8155_v55 = vpop.f32.mrb[18].mxu0  ;;  %1948 = vst.msk [vmem:[#allocation2 + $0xf0] sm:$0xff] %vm694_vm1, %v1926_v54  ;;  %v9709_v54 = vld [vmem:[%s11647_s9 + $0x28] sm:$0xff] }
 0x273   : > { %v2022_v57 = vadd.f32 %v8155_v55, %v9381_v18  ;;  %v2016_v58 = vpop.f32.mrb[19].mxu0 }
 0x274   : > { %v2017_v33 = vadd.f32 %v9381_v18, %v2016_v58  ;;  %v9717_v58 = vld [vmem:[%s11647_s9 + $0x20] sm:$0xff] }
 0x275   : > { %8116 = vmatmul.mubr.msk.f32.gmra.mrb[60].mxu1 %vm1255_vm3, %v8679_v22  ;;  %2096 = vst.msk [vmem:[#allocation3 + $0x88] sm:$0xff] %vm862_vm2, %v2022_v57  ;;  %v9669_v22 = vstv %s446_s14 }
 0x276   : > { %8118 = vmatprep.mubr.msk.f32.mxu1 %vm1255_vm3, %v8681_v35  ;;  %2095 = vst.msk [vmem:[#allocation3 + $0x80] sm:$0xff] %vm862_vm2, %v2017_v33  ;;  %v8158_v59 = vpop.f32.mrb[20].mxu0 }
 0x277   : > { %v2032_v36 = vadd.f32 %v8158_v59, %v9381_v18  ;;  %v2026_v60 = vpop.f32.mrb[21].mxu0 }
 0x278   : > { %v2027_v0 = vadd.f32 %v9381_v18, %v2026_v60 }
 0x279   : > { %8119 = vmatmul.mubr.msk.f32.gmra.mrb[62].mxu1 %vm1255_vm3, %v8683_v45  ;;  %2098 = vst.msk [vmem:[#allocation3 + $0x98] sm:$0xff] %vm862_vm2, %v2032_v36 }
 0x27a   : > { %8181 = vmatprep.mubr.msk.f32.mxu1 %vm500_vm0, %v2141_v47  ;;  %2097 = vst.msk [vmem:[#allocation3 + $0x90] sm:$0xff] %vm862_vm2, %v2027_v0  ;;  %v8161_v43 = vpop.f32.mrb[22].mxu0 }
 0x27b   : > { %v2042_v61 = vadd.f32 %v8161_v43, %v9381_v18  ;;  %v2036_v46 = vpop.f32.mrb[23].mxu0 }
 0x27c   : > { %v2037_v53 = vadd.f32 %v9381_v18, %v2036_v46 }
 0x27d   : > { %8182 = vmatmul.mubr.msk.f32.vlgmr.msra.gmra.mrb[64].mxu1 %vm500_vm0, %v2142_v41  ;;  %2100 = vst.msk [vmem:[#allocation3 + $0xa8] sm:$0xff] %vm862_vm2, %v2042_v61  ;;  %v9727_v61 = vld [vmem:[%s11647_s9 + $0x38] sm:$0xff] }
 0x27e   : > { %8507 = vmatpush3.bf16.msra.mxu1 %v9130_v3  ;;  %2099 = vst.msk [vmem:[#allocation3 + $0xa0] sm:$0xff] %vm862_vm2, %v2037_v53  ;;  %v8164_v56 = vpop.f32.mrb[24].mxu0 }
 0x27f   : > { %8509 = vmatprep.subr.bf16.mxu1 %v9146_v7  ;;  %v2052_v62 = vadd.f32 %v8164_v56, %v9381_v18  ;;  %v2046_v2 = vpop.f32.mrb[25].mxu0  ;;  %v9735_v56 = vld [vmem:[%s11647_s9 + $0x30] sm:$0xff] }
 0x280   : > { %v2047_v4 = vadd.f32 %v9381_v18, %v2046_v2 }
 0x281   : > { %2102 = vst.msk [vmem:[#allocation3 + $0xb8] sm:$0xff] %vm862_vm2, %v2052_v62 }
 0x282   : > { %2101 = vst.msk [vmem:[#allocation3 + $0xb0] sm:$0xff] %vm862_vm2, %v2047_v4  ;;  %v8167_v5 = vpop.f32.mrb[26].mxu0 }
 0x283   : > { %v2062_v8 = vadd.f32 %v8167_v5, %v9381_v18  ;;  %v2056_v11 = vpop.f32.mrb[27].mxu0 }
 0x284   : > { %v2057_v12 = vadd.f32 %v9381_v18, %v2056_v11 }
 0x285   : > { %2104 = vst.msk [vmem:[#allocation3 + $0xc8] sm:$0xff] %vm862_vm2, %v2062_v8 }
 0x286   : > { %2103 = vst.msk [vmem:[#allocation3 + $0xc0] sm:$0xff] %vm862_vm2, %v2057_v12  ;;  %v8170_v14 = vpop.f32.mrb[28].mxu0  ;;  %v9745_v12 = vld [vmem:[%s11647_s9 + $0x48] sm:$0xff] }
 0x287   : > { %v2072_v17 = vadd.f32 %v8170_v14, %v9381_v18  ;;  %v2066_v19 = vpop.f32.mrb[29].mxu0 }
 0x288   : > { %v2067_v20 = vadd.f32 %v9381_v18, %v2066_v19  ;;  %v9753_v19 = vld [vmem:[%s11647_s9 + $0x40] sm:$0xff] }
 0x289   : > { %2106 = vst.msk [vmem:[#allocation3 + $0xd8] sm:$0xff] %vm862_vm2, %v2072_v17 }
 0x28a   : > { %2105 = vst.msk [vmem:[#allocation3 + $0xd0] sm:$0xff] %vm862_vm2, %v2067_v20  ;;  %v8173_v21 = vpop.f32.mrb[30].mxu0 }
 0x28b   : > { %v2082_v25 = vadd.f32 %v8173_v21, %v9381_v18  ;;  %v2076_v16 = vpop.f32.mrb[31].mxu0 }
 0x28c   : > { %v2077_v27 = vadd.f32 %v9381_v18, %v2076_v16 }
 0x28d   : > { %2108 = vst.msk [vmem:[#allocation3 + $0xe8] sm:$0xff] %vm862_vm2, %v2082_v25 }
 0x28e   : > { %2107 = vst.msk [vmem:[#allocation3 + $0xe0] sm:$0xff] %vm862_vm2, %v2077_v27  ;;  %v8176_v28 = vpop.f32.mrb[32].mxu0 }
 0x28f   : > { %v2092_v29 = vadd.f32 %v8176_v28, %v9381_v18  ;;  %v2086_v42 = vpop.f32.mrb[33].mxu0 }
 0x290   : > { %v2087_v30 = vadd.f32 %v9381_v18, %v2086_v42  ;;  %v9675_v18 = vld [vmem:[%s11647_s9 + $0x8] sm:$0xff] }
 0x291   : > { %2110 = vst.msk [vmem:[#allocation3 + $0xf8] sm:$0xff] %vm862_vm2, %v2092_v29  ;;  %v9763_v29 = vld [vmem:[%s11647_s9 + $0x58] sm:$0xff] }
 0x292   : > { %2109 = vst.msk [vmem:[#allocation3 + $0xf0] sm:$0xff] %vm862_vm2, %v2087_v30 }
 0x310   : > { %v8075_v32 = vpop.f32.mrb[32].mxu1 }
 0x311   : > { %v1424_v34 = vadd.f32 %v8075_v32, %v9667_v31  ;;  %v1418_v35 = vpop.f32.mrb[33].mxu1  ;;  %v9771_v32 = vld [vmem:[%s11647_s9 + $0x50] sm:$0xff] }
 0x312   : > { %v1419_v38 = vadd.f32 %v9667_v31, %v1418_v35 }
 0x313   : > { %v1579_v39 = vmul.f32 %v9669_v22, %v1424_v34 }
 0x314   : > { %v1578_v44 = vmul.f32 %v9669_v22, %v1419_v38  ;;  %v8078_v45 = vpop.f32.mrb[34].mxu1 }
 0x315   : > { %v1643_v47 = vadd.f32 %v9675_v18, %v1579_v39  ;;  %v1434_v48 = vadd.f32 %v8078_v45, %v9667_v31  ;;  %v1428_v41 = vpop.f32.mrb[35].mxu1 }
 0x316   : > { %v1642_v24 = vadd.f32 %v9682_v40, %v1578_v44  ;;  %v1429_v49 = vadd.f32 %v9667_v31, %v1428_v41 }
 0x317   : > { %1675 = vst.msk [vmem:[#allocation4 + $0x8] sm:$0xff] %vm694_vm1, %v1643_v47  ;;  %v1581_v37 = vmul.f32 %v9669_v22, %v1434_v48  ;;  %v9781_v47 = vld [vmem:[%s11647_s9 + $0x68] sm:$0xff] }
 0x318   : > { %1674 = vst.msk [vmem:[#allocation4] sm:$0xff] %vm694_vm1, %v1642_v24  ;;  %v1580_v13 = vmul.f32 %v9669_v22, %v1429_v49  ;;  %v8081_v51 = vpop.f32.mrb[36].mxu1  ;;  %v9789_v24 = vld [vmem:[%s11647_s9 + $0x60] sm:$0xff] }
 0x319   : > { %v1645_v15 = vadd.f32 %v9691_v6, %v1581_v37  ;;  %v1444_v52 = vadd.f32 %v8081_v51, %v9667_v31  ;;  %v1438_v23 = vpop.f32.mrb[37].mxu1 }
 0x31a   : > { %v1644_v26 = vadd.f32 %v9699_v50, %v1580_v13  ;;  %v1439_v55 = vadd.f32 %v9667_v31, %v1438_v23  ;;  %v9799_v23 = vld [vmem:[%s11647_s9 + $0x78] sm:$0xff] }
 0x31b   : > { %1677 = vst.msk [vmem:[#allocation4 + $0x18] sm:$0xff] %vm694_vm1, %v1645_v15  ;;  %v1583_v57 = vmul.f32 %v9669_v22, %v1444_v52 }
 0x31c   : > { %1676 = vst.msk [vmem:[#allocation4 + $0x10] sm:$0xff] %vm694_vm1, %v1644_v26  ;;  %v1582_v33 = vmul.f32 %v9669_v22, %v1439_v55  ;;  %v8084_v59 = vpop.f32.mrb[38].mxu1 }
 0x31d   : > { %v1647_v36 = vadd.f32 %v9709_v54, %v1583_v57  ;;  %v1454_v60 = vadd.f32 %v8084_v59, %v9667_v31  ;;  %v1448_v0 = vpop.f32.mrb[39].mxu1  ;;  %v9807_v57 = vld [vmem:[%s11647_s9 + $0x70] sm:$0xff] }
 0x31e   : > { %v1646_v43 = vadd.f32 %v9717_v58, %v1582_v33  ;;  %v1449_v46 = vadd.f32 %v9667_v31, %v1448_v0 }
 0x31f   : > { %1679 = vst.msk [vmem:[#allocation4 + $0x28] sm:$0xff] %vm694_vm1, %v1647_v36  ;;  %v1585_v53 = vmul.f32 %v9669_v22, %v1454_v60 }
 0x320   : > { %1678 = vst.msk [vmem:[#allocation4 + $0x20] sm:$0xff] %vm694_vm1, %v1646_v43  ;;  %v1584_v62 = vmul.f32 %v9669_v22, %v1449_v46  ;;  %v8087_v2 = vpop.f32.mrb[40].mxu1  ;;  %v9817_v46 = vld [vmem:[%s11647_s9 + $0x88] sm:$0xff] }
 0x321   : > { %v1649_v4 = vadd.f32 %v9727_v61, %v1585_v53  ;;  %v1464_v5 = vadd.f32 %v8087_v2, %v9667_v31  ;;  %v1458_v8 = vpop.f32.mrb[41].mxu1  ;;  %v9825_v2 = vld [vmem:[%s11647_s9 + $0x80] sm:$0xff] }
 0x322   : > { %v1648_v11 = vadd.f32 %v9735_v56, %v1584_v62  ;;  %v1459_v14 = vadd.f32 %v9667_v31, %v1458_v8 }
 0x323   : > { %1681 = vst.msk [vmem:[#allocation4 + $0x38] sm:$0xff] %vm694_vm1, %v1649_v4  ;;  %v1587_v17 = vmul.f32 %v9669_v22, %v1464_v5 }
 0x324   : > { %1680 = vst.msk [vmem:[#allocation4 + $0x30] sm:$0xff] %vm694_vm1, %v1648_v11  ;;  %v1586_v20 = vmul.f32 %v9669_v22, %v1459_v14  ;;  %v8090_v21 = vpop.f32.mrb[42].mxu1 }
 0x325   : > { %v1651_v25 = vadd.f32 %v9745_v12, %v1587_v17  ;;  %v1474_v16 = vadd.f32 %v8090_v21, %v9667_v31  ;;  %v1468_v27 = vpop.f32.mrb[43].mxu1 }
 0x326   : > { %v1650_v28 = vadd.f32 %v9753_v19, %v1586_v20  ;;  %v1469_v42 = vadd.f32 %v9667_v31, %v1468_v27  ;;  %v9835_v20 = vld [vmem:[%s11647_s9 + $0x98] sm:$0xff] }
 0x327   : > { %1683 = vst.msk [vmem:[#allocation4 + $0x48] sm:$0xff] %vm694_vm1, %v1651_v25  ;;  %v1589_v30 = vmul.f32 %v9669_v22, %v1474_v16  ;;  %v9843_v16 = vld [vmem:[%s11647_s9 + $0x90] sm:$0xff] }
 0x328   : > { %1682 = vst.msk [vmem:[#allocation4 + $0x40] sm:$0xff] %vm694_vm1, %v1650_v28  ;;  %v1588_v34 = vmul.f32 %v9669_v22, %v1469_v42  ;;  %v8093_v35 = vpop.f32.mrb[44].mxu1 }
 0x329   : > { %v1653_v38 = vadd.f32 %v9763_v29, %v1589_v30  ;;  %v1484_v39 = vadd.f32 %v8093_v35, %v9667_v31  ;;  %v1478_v44 = vpop.f32.mrb[45].mxu1 }
 0x32a   : > { %v1652_v45 = vadd.f32 %v9771_v32, %v1588_v34  ;;  %v1479_v48 = vadd.f32 %v9667_v31, %v1478_v44 }
 0x32b   : > { %1685 = vst.msk [vmem:[#allocation4 + $0x58] sm:$0xff] %vm694_vm1, %v1653_v38  ;;  %v1591_v41 = vmul.f32 %v9669_v22, %v1484_v39  ;;  %v9853_v38 = vld [vmem:[%s11647_s9 + $0xa8] sm:$0xff] }
 0x32c   : > { %1684 = vst.msk [vmem:[#allocation4 + $0x50] sm:$0xff] %vm694_vm1, %v1652_v45  ;;  %v1590_v49 = vmul.f32 %v9669_v22, %v1479_v48  ;;  %v8096_v37 = vpop.f32.mrb[46].mxu1  ;;  %v9861_v45 = vld [vmem:[%s11647_s9 + $0xa0] sm:$0xff] }
 0x32d   : > { %v1655_v13 = vadd.f32 %v9781_v47, %v1591_v41  ;;  %v1494_v51 = vadd.f32 %v8096_v37, %v9667_v31  ;;  %v1488_v15 = vpop.f32.mrb[47].mxu1 }
 0x32e   : > { %v1654_v52 = vadd.f32 %v9789_v24, %v1590_v49  ;;  %v1489_v26 = vadd.f32 %v9667_v31, %v1488_v15  ;;  %v9871_v15 = vld [vmem:[%s11647_s9 + $0xb8] sm:$0xff] }
 0x32f   : > { %1687 = vst.msk [vmem:[#allocation4 + $0x68] sm:$0xff] %vm694_vm1, %v1655_v13  ;;  %v1593_v55 = vmul.f32 %v9669_v22, %v1494_v51 }
 0x330   : > { %1686 = vst.msk [vmem:[#allocation4 + $0x60] sm:$0xff] %vm694_vm1, %v1654_v52  ;;  %v1592_v33 = vmul.f32 %v9669_v22, %v1489_v26  ;;  %v8099_v59 = vpop.f32.mrb[48].mxu1 }
 0x331   : > { %v1657_v36 = vadd.f32 %v9799_v23, %v1593_v55  ;;  %v1504_v60 = vadd.f32 %v8099_v59, %v9667_v31  ;;  %v1498_v0 = vpop.f32.mrb[49].mxu1  ;;  %v9879_v55 = vld [vmem:[%s11647_s9 + $0xb0] sm:$0xff] }
 0x332   : > { %v1656_v43 = vadd.f32 %v9807_v57, %v1592_v33  ;;  %v1499_v53 = vadd.f32 %v9667_v31, %v1498_v0 }
 0x333   : > { %1689 = vst.msk [vmem:[#allocation4 + $0x78] sm:$0xff] %vm694_vm1, %v1657_v36  ;;  %v1595_v62 = vmul.f32 %v9669_v22, %v1504_v60 }
 0x334   : > { %1688 = vst.msk [vmem:[#allocation4 + $0x70] sm:$0xff] %vm694_vm1, %v1656_v43  ;;  %v1594_v4 = vmul.f32 %v9669_v22, %v1499_v53  ;;  %v8102_v5 = vpop.f32.mrb[50].mxu1  ;;  %v9889_v53 = vld [vmem:[%s11647_s9 + $0xc8] sm:$0xff] }
 0x335   : > { %v1659_v8 = vadd.f32 %v9817_v46, %v1595_v62  ;;  %v1514_v11 = vadd.f32 %v8102_v5, %v9667_v31  ;;  %v1508_v14 = vpop.f32.mrb[51].mxu1  ;;  %11673 = vst [vmem:[#allocation12_spill] sm:$0xff] %v9889_v53  ;;  %v9897_v5 = vld [vmem:[%s11647_s9 + $0xc0] sm:$0xff] }
 0x336   : > { %v1658_v17 = vadd.f32 %v9825_v2, %v1594_v4  ;;  %v1509_v21 = vadd.f32 %v9667_v31, %v1508_v14  ;;  %11674 = vst [vmem:[#allocation13_spill] sm:$0xff] %v9897_v5 }
 0x337   : > { %1691 = vst.msk [vmem:[#allocation4 + $0x88] sm:$0xff] %vm694_vm1, %v1659_v8  ;;  %v1597_v25 = vmul.f32 %v9669_v22, %v1514_v11 }
 0x338   : > { %1690 = vst.msk [vmem:[#allocation4 + $0x80] sm:$0xff] %vm694_vm1, %v1658_v17  ;;  %v1596_v27 = vmul.f32 %v9669_v22, %v1509_v21  ;;  %v8105_v28 = vpop.f32.mrb[52].mxu1 }
 0x339   : > { %v1661_v42 = vadd.f32 %v9835_v20, %v1597_v25  ;;  %v1524_v30 = vadd.f32 %v8105_v28, %v9667_v31  ;;  %v1518_v34 = vpop.f32.mrb[53].mxu1 }
 0x33a   : > { %v1660_v35 = vadd.f32 %v9843_v16, %v1596_v27  ;;  %v1519_v39 = vadd.f32 %v9667_v31, %v1518_v34  ;;  %v9907_v27 = vld [vmem:[%s11647_s9 + $0xd8] sm:$0xff] }
 0x33b   : > { %1693 = vst.msk [vmem:[#allocation4 + $0x98] sm:$0xff] %vm694_vm1, %v1661_v42  ;;  %v1599_v44 = vmul.f32 %v9669_v22, %v1524_v30  ;;  %11675 = vst [vmem:[#allocation14_spill] sm:$0xff] %v9907_v27  ;;  %v9915_v30 = vld [vmem:[%s11647_s9 + $0xd0] sm:$0xff] }
 0x33c   : > { %1692 = vst.msk [vmem:[#allocation4 + $0x90] sm:$0xff] %vm694_vm1, %v1660_v35  ;;  %v1598_v48 = vmul.f32 %v9669_v22, %v1519_v39  ;;  %v8108_v41 = vpop.f32.mrb[54].mxu1  ;;  %11676 = vst [vmem:[#allocation15_spill] sm:$0xff] %v9915_v30 }
 0x33d   : > { %v1663_v49 = vadd.f32 %v9853_v38, %v1599_v44  ;;  %v1534_v37 = vadd.f32 %v8108_v41, %v9667_v31  ;;  %v1528_v13 = vpop.f32.mrb[55].mxu1 }
 0x33e   : > { %v1662_v51 = vadd.f32 %v9861_v45, %v1598_v48  ;;  %v1529_v52 = vadd.f32 %v9667_v31, %v1528_v13 }
 0x33f   : > { %1695 = vst.msk [vmem:[#allocation4 + $0xa8] sm:$0xff] %vm694_vm1, %v1663_v49  ;;  %v1601_v26 = vmul.f32 %v9669_v22, %v1534_v37  ;;  %v9925_v49 = vld [vmem:[%s11647_s9 + $0xe8] sm:$0xff] }
 0x340   : > { %1694 = vst.msk [vmem:[#allocation4 + $0xa0] sm:$0xff] %vm694_vm1, %v1662_v51  ;;  %v1600_v33 = vmul.f32 %v9669_v22, %v1529_v52  ;;  %v8111_v59 = vpop.f32.mrb[56].mxu1  ;;  %11677 = vst [vmem:[#allocation16_spill] sm:$0xff] %v9925_v49  ;;  %v9933_v51 = vld [vmem:[%s11647_s9 + $0xe0] sm:$0xff] }
 0x341   : > { %v1665_v36 = vadd.f32 %v9871_v15, %v1601_v26  ;;  %v1544_v60 = vadd.f32 %v8111_v59, %v9667_v31  ;;  %v1538_v0 = vpop.f32.mrb[57].mxu1  ;;  %11678 = vst [vmem:[#allocation17_spill] sm:$0xff] %v9933_v51 }
 0x342   : > { %v1664_v43 = vadd.f32 %v9879_v55, %v1600_v33  ;;  %v1539_v62 = vadd.f32 %v9667_v31, %v1538_v0  ;;  %v9943_v0 = vld [vmem:[%s11647_s9 + $0xf8] sm:$0xff] }
 0x343   : > { %1697 = vst.msk [vmem:[#allocation4 + $0xb8] sm:$0xff] %vm694_vm1, %v1665_v36  ;;  %v1603_v4 = vmul.f32 %v9669_v22, %v1544_v60  ;;  %11679 = vst [vmem:[#allocation18_spill] sm:$0xff] %v9943_v0 }
 0x344   : > { %1696 = vst.msk [vmem:[#allocation4 + $0xb0] sm:$0xff] %vm694_vm1, %v1664_v43  ;;  %v1602_v8 = vmul.f32 %v9669_v22, %v1539_v62  ;;  %v8114_v11 = vpop.f32.mrb[58].mxu1 }
 0x345   : > { %v1667_v14 = vadd.f32 %v9889_v53, %v1603_v4  ;;  %v1554_v17 = vadd.f32 %v8114_v11, %v9667_v31  ;;  %v1548_v21 = vpop.f32.mrb[59].mxu1  ;;  %v9951_v4 = vld [vmem:[%s11647_s9 + $0xf0] sm:$0xff] }
 0x346   : > { %v1666_v25 = vadd.f32 %v9897_v5, %v1602_v8  ;;  %v1549_v28 = vadd.f32 %v9667_v31, %v1548_v21  ;;  %11680 = vst [vmem:[#allocation19_spill] sm:$0xff] %v9951_v4 }
 0x347   : > { %1699 = vst.msk [vmem:[#allocation4 + $0xc8] sm:$0xff] %vm694_vm1, %v1667_v14  ;;  %v1605_v42 = vmul.f32 %v9669_v22, %v1554_v17 }
 0x348   : > { %1698 = vst.msk [vmem:[#allocation4 + $0xc0] sm:$0xff] %vm694_vm1, %v1666_v25  ;;  %v1604_v34 = vmul.f32 %v9669_v22, %v1549_v28  ;;  %v8117_v35 = vpop.f32.mrb[60].mxu1  ;;  %v9960_v25 = vld [vmem:[%s11644_s6] ss:$0 sm:$0xff] }
 0x349   : > { %v1669_v39 = vadd.f32 %v9907_v27, %v1605_v42  ;;  %v1564_v44 = vadd.f32 %v8117_v35, %v9667_v31  ;;  %v1558_v48 = vpop.f32.mrb[61].mxu1  ;;  %11681 = vst [vmem:[#allocation20_spill] sm:$0xff] %v9960_v25  ;;  %v7346_v35 = vld [vmem:[%s9121_s25 + $0x28] sm:$0xff] }
 0x34a   : > { %v1668_v41 = vadd.f32 %v9915_v30, %v1604_v34  ;;  %v1559_v37 = vadd.f32 %v9667_v31, %v1558_v48  ;;  %v7345_v34 = vld [vmem:[%s9121_s25 + $0x20] sm:$0xff] }
 0x34b   : > { %1701 = vst.msk [vmem:[#allocation4 + $0xd8] sm:$0xff] %vm694_vm1, %v1669_v39  ;;  %v1607_v13 = vmul.f32 %v9669_v22, %v1564_v44 }
 0x34c   : > { %1700 = vst.msk [vmem:[#allocation4 + $0xd0] sm:$0xff] %vm694_vm1, %v1668_v41  ;;  %v1606_v52 = vmul.f32 %v9669_v22, %v1559_v37  ;;  %v8120_v26 = vpop.f32.mrb[62].mxu1 }
 0x34d   : > { %v1671_v33 = vadd.f32 %v9925_v49, %v1607_v13  ;;  %v1574_v59 = vadd.f32 %v8120_v26, %v9667_v31  ;;  %v1568_v36 = vpop.f32.mrb[63].mxu1 }
 0x34e   : > { %v1670_v60 = vadd.f32 %v9933_v51, %v1606_v52  ;;  %v1569_v43 = vadd.f32 %v9667_v31, %v1568_v36 }
 0x34f   : > { %1703 = vst.msk [vmem:[#allocation4 + $0xe8] sm:$0xff] %vm694_vm1, %v1671_v33  ;;  %v1609_v62 = vmul.f32 %v9669_v22, %v1574_v59 }
 0x350   : > { %1702 = vst.msk [vmem:[#allocation4 + $0xe0] sm:$0xff] %vm694_vm1, %v1670_v60  ;;  %v1608_v8 = vmul.f32 %v9669_v22, %v1569_v43  ;;  %v8183_v11 = vpop.f32.mrb[64].mxu1 }
 0x351   : > { %v1673_v14 = vadd.f32 %v9943_v0, %v1609_v62  ;;  %v2215_v17 = vpop.f32.mrb[65].mxu1  ;;  %v9967_v42 = vadd.f32 %v9960_v25, %v8183_v11 }
 0x352   : > { %v1672_v21 = vadd.f32 %v9951_v4, %v1608_v8  ;;  %v2216_v28 = vadd.f32 %v9960_v25, %v2215_v17 }
 0x353   : > { %1705 = vst.msk [vmem:[#allocation4 + $0xf8] sm:$0xff] %vm694_vm1, %v1673_v14 }
 0x354   : > { %1704 = vst.msk [vmem:[#allocation4 + $0xf0] sm:$0xff] %vm694_vm1, %v1672_v21  ;;  %2404 = vrot.lane.b32.xlu1 %v2216_v28, %s8983_s26  ;;  %v2233_v39 = vrot.slane %v2216_v28, %v9484_v1  ;;  %v2226_v26 = vcombine.high %v2216_v28, %v2216_v28 }
 0x356   : > { %v2241_v44 = vcombine.high %v2233_v39, %v2233_v39  ;;  %v2249_v48 = vrot.slane %v2233_v39, %v9484_v1  ;;  %v2240_v62 = vrot.slane %v2226_v26, %v9484_v1 }
 0x358   : > { %2406 = vrot.lane.b32.xlu1 %v9967_v42, %s8983_s26  ;;  %v2263_v41 = vrot.slane %v2241_v44, %v9484_v1  ;;  %v2327_v37 = vrot.slane %v2249_v48, %v9488_v9  ;;  %v2271_v33 = vcombine.high %v2249_v48, %v2249_v48  ;;  %v2242_v21 = vcombine.high %v2240_v62, %v2240_v62 }
 0x359   : > { %v2256_v28 = vrot.slane %v2240_v62, %v9484_v1 }
 0x35a   : > { %v2331_v59 = vrot.slane %v2263_v41, %v9488_v9  ;;  %v2273_v8 = vcombine.high %v2263_v41, %v2263_v41  ;;  %v2335_v11 = vrot.slane %v2271_v33, %v9488_v9  ;;  %v2270_v48 = vrot.slane %v2242_v21, %v9484_v1 }
 0x35b   : > { %v2343_v41 = vrot.slane %v2256_v28, %v9488_v9 }
 0x381   : > { %2927 = vxpose.xlu1.b32.start [1/2] (short) %v7345_v34, 128  ;;  %v2339_v34 = vrot.slane %v2273_v8, %v9488_v9 }
 0x385   : > { %2928 = vxpose.xlu1.b32.end [2/2] (short) %v7346_v35, 128 }
 0x3c6   : > { %v9977_v13 = vpop.permute.xlu1 %2404 }
 0x3c7   : > { %v2410_v52 = vsub.f32 %v2327_v37, %v9977_v13  ;;  %v2412_v60 = vsub.f32 %v2331_v59, %v9977_v13  ;;  %v2414_v17 = vsub.f32 %v2335_v11, %v9977_v13  ;;  %v2416_v39 = vsub.f32 %v2339_v34, %v9977_v13 }
 0x3c9   : > { %8684 = vtanh.f32 %v2410_v52  ;;  %v2418_v52 = vsub.f32 %v2343_v41, %v9977_v13 }
 0x3ca   : > { %v9981_v36 = vpop.permute.xlu1 %2406 }
 0x3cb   : > { %v2411_v43 = vsub.f32 %v2327_v37, %v9981_v36  ;;  %v2413_v14 = vsub.f32 %v2331_v59, %v9981_v36  ;;  %v2415_v35 = vsub.f32 %v2335_v11, %v9981_v36  ;;  %v2417_v37 = vsub.f32 %v2339_v34, %v9981_v36 }
 0x3cc   : > { %v2272_v59 = vcombine.high %v2256_v28, %v2256_v28 }
 0x3cd   : > { %8686 = vtanh.f32 %v2411_v43  ;;  %v2419_v43 = vsub.f32 %v2343_v41, %v9981_v36 }
 0x3ce   : > { %8688 = vtanh.f32 %v2412_v60  ;;  %v2347_v60 = vrot.slane %v2270_v48, %v9488_v9  ;;  %v2351_v21 = vrot.slane %v2272_v59, %v9488_v9 }
 0x3cf   : > { %8690 = vtanh.f32 %v2413_v14  ;;  %v2282_v14 = vrot.slane %v9967_v42, %v9484_v1 }
 0x3d0   : > { %8692 = vtanh.f32 %v2414_v17  ;;  %v2420_v62 = vsub.f32 %v2347_v60, %v9977_v13  ;;  %v2274_v17 = vcombine.high %v2270_v48, %v2270_v48  ;;  %v2421_v28 = vsub.f32 %v2347_v60, %v9981_v36 }
 0x3d1   : > { %8694 = vtanh.f32 %v2415_v35  ;;  %v2422_v34 = vsub.f32 %v2351_v21, %v9977_v13  ;;  %v2298_v41 = vrot.slane %v2282_v14, %v9484_v1  ;;  %v2423_v48 = vsub.f32 %v2351_v21, %v9981_v36 }
 0x3d2   : > { %8696 = vtanh.f32 %v2416_v39 }
 0x3d3   : > { %v8685_v44 = vpop.eup %8684  ;;  %8698 = vtanh.f32 %v2417_v37  ;;  %v2355_v37 = vrot.slane %v2274_v17, %v9488_v9  ;;  %v2359_v60 = vrot.slane %v2298_v41, %v9488_v9  ;;  %v2320_v17 = vcombine.high %v2298_v41, %v2298_v41 }
 0x3d4   : > { %8190 = vmatprep.mubr.msk.f32.mxu0 %vm1255_vm3, %v8685_v44  ;;  %8700 = vtanh.f32 %v2418_v52  ;;  %v2290_v44 = vcombine.high %v2282_v14, %v2282_v14  ;;  %v2275_v14 = vcombine.high %v9967_v42, %v9967_v42 }
 0x3d5   : > { %8702 = vtanh.f32 %v2419_v43  ;;  %v2424_v52 = vsub.f32 %v2355_v37, %v9977_v13  ;;  %v2425_v43 = vsub.f32 %v2355_v37, %v9981_v36  ;;  %v2367_v42 = vrot.slane %v2320_v17, %v9488_v9 }
 0x3d6   : > { %8704 = vtanh.f32 %v2420_v62  ;;  %v2312_v59 = vrot.slane %v2290_v44, %v9484_v1  ;;  %v2426_v62 = vsub.f32 %v2359_v60, %v9977_v13  ;;  %v2289_v44 = vrot.slane %v2275_v14, %v9484_v1 }
 0x3d7   : > { %v8687_v26 = vpop.eup %8686  ;;  %8706 = vtanh.f32 %v2421_v28  ;;  %v2427_v28 = vsub.f32 %v2359_v60, %v9981_v36 }
 0x3d8   : > { %v8689_v33 = vpop.eup %8688  ;;  %8191 = vmatmul.mubr.msk.f32.vlgmr.msra.gmra.mrb[34].mxu0 %vm1255_vm3, %v8687_v26  ;;  %8708 = vtanh.f32 %v2422_v34  ;;  %v2363_v21 = vrot.slane %v2312_v59, %v9488_v9  ;;  %v2322_v37 = vcombine.high %v2312_v59, %v2312_v59  ;;  %v2305_v60 = vrot.slane %v2289_v44, %v9484_v1 }
 0x3d9   : > { %8193 = vmatprep.mubr.msk.f32.mxu0 %vm1255_vm3, %v8689_v33  ;;  %8515 = vmatpush3.bf16.msra.mxu0 %v9154_v10  ;;  %v8691_v8 = vpop.eup %8690  ;;  %8710 = vtanh.f32 %v2423_v48  ;;  %v2430_v48 = vsub.f32 %v2367_v42, %v9977_v13  ;;  %v2431_v59 = vsub.f32 %v2367_v42, %v9981_v36 }
 0x3da   : > { %8521 = vmatprep.subr.bf16.mxu0 %v9130_v3  ;;  %v8693_v11 = vpop.eup %8692  ;;  %8712 = vtanh.f32 %v2424_v52  ;;  %v2428_v34 = vsub.f32 %v2363_v21, %v9977_v13  ;;  %v2429_v41 = vsub.f32 %v2363_v21, %v9981_v36  ;;  %v2375_v17 = vrot.slane %v2305_v60, %v9488_v9 }
 0x3db   : > { %v8695_v35 = vpop.eup %8694  ;;  %8714 = vtanh.f32 %v2425_v43  ;;  %v2371_v43 = vrot.slane %v2322_v37, %v9488_v9 }
 0x3dc   : > { %8194 = vmatmul.mubr.msk.f32.gmra.mrb[36].mxu0 %vm1255_vm3, %v8691_v8  ;;  %v8697_v39 = vpop.eup %8696  ;;  %8716 = vtanh.f32 %v2426_v62  ;;  %v2435_v37 = vsub.f32 %v2375_v17, %v9981_v36 }
 0x3dd   : > { %8196 = vmatprep.mubr.msk.f32.mxu0 %vm1255_vm3, %v8693_v11  ;;  %v8699_v26 = vpop.eup %8698  ;;  %8718 = vtanh.f32 %v2427_v28  ;;  %v2432_v62 = vsub.f32 %v2371_v43, %v9977_v13  ;;  %v2433_v21 = vsub.f32 %v2371_v43, %v9981_v36  ;;  %v2434_v28 = vsub.f32 %v2375_v17, %v9977_v13 }
 0x3de   : > { %v8701_v33 = vpop.eup %8700  ;;  %8720 = vtanh.f32 %v2428_v34 }
 0x3df   : > { %v8703_v8 = vpop.eup %8702  ;;  %8722 = vtanh.f32 %v2429_v41 }
 0x3e0   : > { %8197 = vmatmul.mubr.msk.f32.gmra.mrb[38].mxu0 %vm1255_vm3, %v8695_v35  ;;  %v8705_v11 = vpop.eup %8704  ;;  %8724 = vtanh.f32 %v2430_v48 }
 0x3e1   : > { %8199 = vmatprep.mubr.msk.f32.mxu0 %vm1255_vm3, %v8697_v39  ;;  %v8707_v35 = vpop.eup %8706  ;;  %8726 = vtanh.f32 %v2431_v59 }
 0x3e2   : > { %v8709_v39 = vpop.eup %8708  ;;  %8728 = vtanh.f32 %v2432_v62 }
 0x3e3   : > { %v8711_v52 = vpop.eup %8710  ;;  %8730 = vtanh.f32 %v2433_v21 }
 0x3e4   : > { %8200 = vmatmul.mubr.msk.f32.gmra.mrb[40].mxu0 %vm1255_vm3, %v8699_v26  ;;  %v8713_v26 = vpop.eup %8712  ;;  %8732 = vtanh.f32 %v2434_v28 }
 0x3e5   : > { %8202 = vmatprep.mubr.msk.f32.mxu0 %vm1255_vm3, %v8701_v33  ;;  %v2291_v33 = vcombine.high %v2289_v44, %v2289_v44  ;;  %8734 = vtanh.f32 %v2435_v37 }
 0x3e7   : > { %v2319_v14 = vrot.slane %v2291_v33, %v9484_v1 }
 0x3e8   : > { %8203 = vmatmul.mubr.msk.f32.gmra.mrb[42].mxu0 %vm1255_vm3, %v8703_v8  ;;  %v8715_v8 = vpop.eup %8714 }
 0x3e9   : > { %8205 = vmatprep.mubr.msk.f32.mxu0 %vm1255_vm3, %v8705_v11  ;;  %v8717_v11 = vpop.eup %8716  ;;  %v2379_v44 = vrot.slane %v2319_v14, %v9488_v9 }
 0x3ea   : > { %v8719_v34 = vpop.eup %8718 }
 0x3eb   : > { %v2436_v42 = vsub.f32 %v2379_v44, %v9977_v13  ;;  %v2437_v33 = vsub.f32 %v2379_v44, %v9981_v36 }
 0x3ec   : > { %8206 = vmatmul.mubr.msk.f32.gmra.mrb[44].mxu0 %vm1255_vm3, %v8707_v35  ;;  %v8721_v35 = vpop.eup %8720 }
 0x3ed   : > { %8208 = vmatprep.mubr.msk.f32.mxu0 %vm1255_vm3, %v8709_v39  ;;  %v2321_v39 = vcombine.high %v2305_v60, %v2305_v60  ;;  %v8723_v41 = vpop.eup %8722  ;;  %8736 = vtanh.f32 %v2436_v42 }
 0x3ee   : > { %v8725_v48 = vpop.eup %8724  ;;  %8738 = vtanh.f32 %v2437_v33 }
 0x3ef   : > { %v8727_v43 = vpop.eup %8726 }
 0x3f0   : > { %8209 = vmatmul.mubr.msk.f32.gmra.mrb[46].mxu0 %vm1255_vm3, %v8711_v52  ;;  %v2323_v52 = vcombine.high %v2319_v14, %v2319_v14  ;;  %v8729_v59 = vpop.eup %8728 }
 0x3f1   : > { %8211 = vmatprep.mubr.msk.f32.mxu0 %vm1255_vm3, %v8713_v26  ;;  %v2383_v26 = vrot.slane %v2321_v39, %v9488_v9  ;;  %v8731_v17 = vpop.eup %8730 }
 0x3f2   : > { %v2387_v62 = vrot.slane %v2323_v52, %v9488_v9  ;;  %v8733_v21 = vpop.eup %8732 }
 0x3f3   : > { %v2438_v60 = vsub.f32 %v2383_v26, %v9977_v13 }
 0x3f4   : > { %8212 = vmatmul.mubr.msk.f32.gmra.mrb[48].mxu0 %vm1255_vm3, %v8715_v8  ;;  %v2440_v14 = vsub.f32 %v2387_v62, %v9977_v13 }
 0x3f5   : > { %8214 = vmatprep.mubr.msk.f32.mxu0 %vm1255_vm3, %v8717_v11  ;;  %v2439_v11 = vsub.f32 %v2383_v26, %v9981_v36  ;;  %8740 = vtanh.f32 %v2438_v60 }
 0x3f7   : > { %8742 = vtanh.f32 %v2439_v11 }
 0x3f8   : > { %8215 = vmatmul.mubr.msk.f32.gmra.mrb[50].mxu0 %vm1255_vm3, %v8719_v34  ;;  %v2441_v34 = vsub.f32 %v2387_v62, %v9981_v36  ;;  %8744 = vtanh.f32 %v2440_v14 }
 0x3f9   : > { %8217 = vmatprep.mubr.msk.f32.mxu0 %vm1255_vm3, %v8721_v35  ;;  %v8735_v35 = vpop.eup %8734 }
 0x3fa   : > { %v8737_v39 = vpop.eup %8736  ;;  %8746 = vtanh.f32 %v2441_v34 }
 0x3fb   : > { %v8739_v36 = vpop.eup %8738 }
 0x3fc   : > { %8218 = vmatmul.mubr.msk.f32.gmra.mrb[52].mxu0 %vm1255_vm3, %v8723_v41 }
 0x3fd   : > { %8220 = vmatprep.mubr.msk.f32.mxu0 %vm1255_vm3, %v8725_v48 }
 0x3ff   : > { %v8741_v44 = vpop.eup %8740 }
 0x400   : > { %8221 = vmatmul.mubr.msk.f32.gmra.mrb[54].mxu0 %vm1255_vm3, %v8727_v43 }
 0x401   : > { %v10061_v8 = vpop.trf.xlu1  ;;  %8223 = vmatprep.mubr.msk.f32.mxu0 %vm1255_vm3, %v8729_v59  ;;  %v8743_v42 = vpop.eup %8742 }
 0x402   : > { %8242 = vmatprep.mubr.msk.f32.mxu1 %vm500_vm0, %v10061_v8  ;;  %v8745_v41 = vpop.eup %8744 }
 0x404   : > { %8224 = vmatmul.mubr.msk.f32.gmra.mrb[56].mxu0 %vm1255_vm3, %v8731_v17  ;;  %v8747_v52 = vpop.eup %8746  ;;  %v3329_v17 = vsel %vm500_vm0, %v10061_v8, 0.0 }
 0x405   : > { %v10069_v28 = vpop.trf.xlu1  ;;  %8226 = vmatprep.mubr.msk.f32.mxu0 %vm1255_vm3, %v8733_v21 }
 0x406   : > { %8243 = vmatmul.mubr.msk.f32.vlgmr.msra.gmra.mrb[66].mxu1 %vm500_vm0, %v10069_v28 }
 0x407   : > { %8511 = vmatpush3.bf16.msra.mxu1 %v9146_v7 }
 0x408   : > { %8227 = vmatmul.mubr.msk.f32.gmra.mrb[58].mxu0 %vm1255_vm3, %v8735_v35  ;;  %8517 = vmatprep.subr.bf16.mxu1 %v9251_v63 }
 0x409   : > { %v10078_v13 = vpop.trf.xlu1  ;;  %8229 = vmatprep.mubr.msk.f32.mxu0 %vm1255_vm3, %v8737_v39 }
 0x40a   : > { %8245 = vmatprep.mubr.msk.f32.mxu1 %vm500_vm0, %v10078_v13  ;;  %v3330_v11 = vsel %vm500_vm0, %v10078_v13, 0.0 }
 0x40b   : > { %v3331_v34 = vadd.f32 %v3330_v11, %v3329_v17 }
 0x40c   : > { %8230 = vmatmul.mubr.msk.f32.gmra.mrb[60].mxu0 %vm1255_vm3, %v8739_v36 }
 0x40d   : > { %v10084_v37 = vpop.trf.xlu1  ;;  %8232 = vmatprep.mubr.msk.f32.mxu0 %vm1255_vm3, %v8741_v44 }
 0x40e   : > { %8246 = vmatmul.mubr.msk.f32.gmra.mrb[68].mxu1 %vm500_vm0, %v10084_v37  ;;  %v3345_v35 = vsel %vm500_vm0, %v10084_v37, 0.0 }
 0x410   : > { %8233 = vmatmul.mubr.msk.f32.gmra.mrb[62].mxu0 %vm1255_vm3, %v8743_v42  ;;  %v3344_v42 = vsel %vm500_vm0, %v10069_v28, 0.0 }
 0x411   : > { %v10090_v48 = vpop.trf.xlu1  ;;  %8235 = vmatprep.mubr.msk.f32.mxu0 %vm1255_vm3, %v8745_v41  ;;  %v3346_v11 = vadd.f32 %v3345_v35, %v3344_v42 }
 0x412   : > { %8248 = vmatprep.mubr.msk.f32.mxu1 %vm500_vm0, %v10090_v48  ;;  %v3332_v21 = vsel %vm500_vm0, %v10090_v48, 0.0 }
 0x413   : > { %v3333_v36 = vadd.f32 %v3332_v21, %v3331_v34 }
 0x414   : > { %8236 = vmatmul.mubr.msk.f32.gmra.mrb[64].mxu0 %vm1255_vm3, %v8747_v52 }
 0x415   : > { %v10096_v26 = vpop.trf.xlu1 }
 0x416   : > { %8249 = vmatmul.mubr.msk.f32.gmra.mrb[70].mxu1 %vm500_vm0, %v10096_v26  ;;  %v3347_v41 = vsel %vm500_vm0, %v10096_v26, 0.0 }
 0x417   : > { %v3348_v34 = vadd.f32 %v3347_v41, %v3346_v11 }
 0x419   : > { %v10100_v33 = vpop.trf.xlu1 }
 0x41a   : > { %8251 = vmatprep.mubr.msk.f32.mxu1 %vm500_vm0, %v10100_v33  ;;  %v3334_v39 = vsel %vm500_vm0, %v10100_v33, 0.0 }
 0x41b   : > { %v3335_v17 = vadd.f32 %v3334_v39, %v3333_v36 }
 0x41d   : > { %v10104_v60 = vpop.trf.xlu1 }
 0x41e   : > { %8252 = vmatmul.mubr.msk.f32.gmra.mrb[72].mxu1 %vm500_vm0, %v10104_v60  ;;  %v3349_v9 = vsel %vm500_vm0, %v10104_v60, 0.0 }
 0x41f   : > { %v3350_v51 = vadd.f32 %v3349_v9, %v3348_v34 }
 0x421   : > { %v10108_v43 = vpop.trf.xlu1 }
 0x422   : > { %8254 = vmatprep.mubr.msk.f32.mxu1 %vm500_vm0, %v10108_v43  ;;  %v3336_v52 = vsel %vm500_vm0, %v10108_v43, 0.0 }
 0x423   : > { %v3337_v1 = vadd.f32 %v3336_v52, %v3335_v17 }
 0x425   : > { %v10112_v59 = vpop.trf.xlu1 }
 0x426   : > { %8255 = vmatmul.mubr.msk.f32.gmra.mrb[74].mxu1 %vm500_vm0, %v10112_v59  ;;  %v3351_v4 = vsel %vm500_vm0, %v10112_v59, 0.0 }
 0x427   : > { %v3352_v39 = vadd.f32 %v3351_v4, %v3350_v51 }
 0x429   : > { %v10116_v62 = vpop.trf.xlu1 }
 0x42a   : > { %8257 = vmatprep.mubr.msk.f32.mxu1 %vm500_vm0, %v10116_v62  ;;  %v3338_v21 = vsel %vm500_vm0, %v10116_v62, 0.0 }
 0x42b   : > { %v3339_v49 = vadd.f32 %v3338_v21, %v3337_v1 }
 0x42d   : > { %v2954_v14 = vpop.trf.xlu1 }
 0x42e   : > { %8258 = vmatmul.mubr.msk.f32.gmra.mrb[76].mxu1 %vm500_vm0, %v2954_v14  ;;  %v3353_v35 = vsel %vm500_vm0, %v2954_v14, 0.0 }
 0x42f   : > { %v3354_v52 = vadd.f32 %v3353_v35, %v3352_v39 }
 0x431   : > { %v2955_v44 = vpop.trf.xlu1 }
 0x432   : > { %8260 = vmatprep.mubr.msk.f32.mxu1 %vm500_vm0, %v2955_v44  ;;  %v3340_v0 = vsel %vm500_vm0, %v2955_v44, 0.0 }
 0x433   : > { %v3341_v36 = vadd.f32 %v3340_v0, %v3339_v49 }
 0x435   : > { %v2956_v25 = vpop.trf.xlu1 }
 0x436   : > { %8261 = vmatmul.mubr.msk.f32.gmra.mrb[78].mxu1 %vm500_vm0, %v2956_v25  ;;  %v3355_v30 = vsel %vm500_vm0, %v2956_v25, 0.0 }
 0x437   : > { %v3356_v17 = vadd.f32 %v3355_v30, %v3354_v52 }
 0x439   : > { %v2957_v42 = vpop.trf.xlu1 }
 0x43a   : > { %v3342_v41 = vsel %vm500_vm0, %v2957_v42, 0.0  ;;  %8263 = vmatprep.mubr.msk.f32.mxu1 %vm500_vm0, %v2957_v42 }
 0x43b   : > { %v3343_v11 = vadd.f32 %v3342_v41, %v3341_v36 }
 0x43d   : > { %v3359_v27 = vmul.f32 0.125, %v3343_v11  ;;  %v2958_v5 = vpop.trf.xlu1 }
 0x43e   : > { %v3357_v53 = vsel %vm500_vm0, %v2958_v5, 0.0  ;;  %8264 = vmatmul.mubr.msk.f32.gmra.mrb[80].mxu1 %vm500_vm0, %v2958_v5 }
 0x43f   : > { %v3358_v1 = vadd.f32 %v3357_v53, %v3356_v17  ;;  %8270 = vmatprep.mubr.msk.f32.mxu1 %vm500_vm0, %v10061_v8  ;;  %8298 = vmatprep.mubr.msk.f32.mxu0 %vm500_vm0, %v3359_v27  ;;  %v8877_v53 = vld [vmem:[%s11645_s7 + $0x10] sm:$0xff] }
 0x441   : > { %v3360_v9 = vmul.f32 0.125, %v3358_v1 }
 0x442   : > { %8271 = vmatmul.mubr.msk.f32.vlgmr.msra.gmra.mrb[82].mxu1 %vm500_vm0, %v10069_v28 }
 0x443   : > { %8273 = vmatprep.mubr.msk.f32.mxu1 %vm500_vm0, %v10078_v13  ;;  %8299 = vmatmul.mubr.msk.f32.vlgmr.msra.gmra.mrb[66].mxu0 %vm500_vm0, %v3360_v9 }
 0x444   : > { %8519 = vmatpush3.bf16.msra.mxu1 %v9251_v63  ;;  %8523 = vmatpush3.bf16.msra.mxu0 %v9130_v3 }
 0x445   : > { %8305 = vmatprep.subr.mxu1 %v8877_v53  ;;  %8525 = vmatprep.subr.bf16.mxu0 %v9146_v7 }
 0x446   : > { %8274 = vmatmul.mubr.msk.f32.gmra.mrb[84].mxu1 %vm500_vm0, %v10084_v37 }
 0x447   : > { %8276 = vmatprep.mubr.msk.f32.mxu1 %vm500_vm0, %v10090_v48 }
 0x448   : > { %8306 = vmatpush3.msra.mxu1 %v8877_v53 }
 0x449   : > { %8529 = vmatprep.subr.bf16.mxu1 %v9154_v10 }
 0x44a   : > { %8277 = vmatmul.mubr.msk.f32.gmra.mrb[86].mxu1 %vm500_vm0, %v10096_v26 }
 0x44b   : > { %8279 = vmatprep.mubr.msk.f32.mxu1 %vm500_vm0, %v10100_v33 }
 0x44e   : > { %8280 = vmatmul.mubr.msk.f32.gmra.mrb[88].mxu1 %vm500_vm0, %v10104_v60 }
 0x44f   : > { %8282 = vmatprep.mubr.msk.f32.mxu1 %vm500_vm0, %v10108_v43 }
 0x452   : > { %8283 = vmatmul.mubr.msk.f32.gmra.mrb[90].mxu1 %vm500_vm0, %v10112_v59 }
 0x453   : > { %8285 = vmatprep.mubr.msk.f32.mxu1 %vm500_vm0, %v10116_v62 }
 0x456   : > { %8286 = vmatmul.mubr.msk.f32.gmra.mrb[92].mxu1 %vm500_vm0, %v2954_v14 }
 0x457   : > { %8288 = vmatprep.mubr.msk.f32.mxu1 %vm500_vm0, %v2955_v44 }
 0x45a   : > { %8289 = vmatmul.mubr.msk.f32.gmra.mrb[94].mxu1 %vm500_vm0, %v2956_v25 }
 0x45b   : > { %8291 = vmatprep.mubr.msk.f32.mxu1 %vm500_vm0, %v2957_v42 }
 0x45e   : > { %8292 = vmatmul.mubr.msk.f32.gmra.mrb[96].mxu1 %vm500_vm0, %v2958_v5 }
 0x4ab   : > { %v8192_v3 = vpop.f32.mrb[34].mxu0 }
 0x4ac   : > { %v2642_v27 = vadd.f32 %v8192_v3, %v9667_v31  ;;  %v2636_v30 = vpop.f32.mrb[35].mxu0 }
 0x4ad   : > { %v2637_v49 = vadd.f32 %v9667_v31, %v2636_v30 }
 0x4ae   : > { %v2796_v51 = vmul.f32 %v2642_v27, %v9669_v22 }
 0x4af   : > { %v2795_v0 = vmul.f32 %v2637_v49, %v9669_v22  ;;  %v8195_v4 = vpop.f32.mrb[36].mxu0 }
 0x4b0   : > { %v2860_v8 = vadd.f32 %v2796_v51, %v9675_v18  ;;  %v2652_v28 = vadd.f32 %v8195_v4, %v9667_v31  ;;  %v2646_v25 = vpop.f32.mrb[37].mxu0 }
 0x4b1   : > { %v2859_v13 = vadd.f32 %v2795_v0, %v9682_v40  ;;  %v2647_v5 = vadd.f32 %v9667_v31, %v2646_v25 }
 0x4b2   : > { %2893 = vst.msk [vmem:[#allocation4 + $0x108] sm:$0xff] %vm694_vm1, %v2860_v8  ;;  %v2798_v37 = vmul.f32 %v2652_v28, %v9669_v22 }
 0x4b3   : > { %2892 = vst.msk [vmem:[#allocation4 + $0x100] sm:$0xff] %vm694_vm1, %v2859_v13  ;;  %v2797_v48 = vmul.f32 %v2647_v5, %v9669_v22  ;;  %v8198_v26 = vpop.f32.mrb[38].mxu0 }
 0x4b4   : > { %v2862_v33 = vadd.f32 %v2798_v37, %v9691_v6  ;;  %v2662_v18 = vadd.f32 %v8198_v26, %v9667_v31  ;;  %v2656_v60 = vpop.f32.mrb[39].mxu0 }
 0x4b5   : > { %v2861_v43 = vadd.f32 %v2797_v48, %v9699_v50  ;;  %v2657_v40 = vadd.f32 %v9667_v31, %v2656_v60 }
 0x4b6   : > { %2895 = vst.msk [vmem:[#allocation4 + $0x118] sm:$0xff] %vm694_vm1, %v2862_v33  ;;  %v2800_v59 = vmul.f32 %v2662_v18, %v9669_v22 }
 0x4b7   : > { %2894 = vst.msk [vmem:[#allocation4 + $0x110] sm:$0xff] %vm694_vm1, %v2861_v43  ;;  %v2799_v62 = vmul.f32 %v2657_v40, %v9669_v22  ;;  %v8201_v14 = vpop.f32.mrb[40].mxu0 }
 0x4b8   : > { %v2864_v44 = vadd.f32 %v2800_v59, %v9709_v54  ;;  %v2672_v6 = vadd.f32 %v8201_v14, %v9667_v31  ;;  %v2666_v21 = vpop.f32.mrb[41].mxu0 }
 0x4b9   : > { %v2863_v34 = vadd.f32 %v2799_v62, %v9717_v58  ;;  %v2667_v50 = vadd.f32 %v9667_v31, %v2666_v21 }
 0x4ba   : > { %2897 = vst.msk [vmem:[#allocation4 + $0x128] sm:$0xff] %vm694_vm1, %v2864_v44  ;;  %v2802_v35 = vmul.f32 %v2672_v6, %v9669_v22 }
 0x4bb   : > { %2896 = vst.msk [vmem:[#allocation4 + $0x120] sm:$0xff] %vm694_vm1, %v2863_v34  ;;  %v2801_v39 = vmul.f32 %v2667_v50, %v9669_v22  ;;  %v8204_v36 = vpop.f32.mrb[42].mxu0 }
 0x4bc   : > { %v2866_v42 = vadd.f32 %v2802_v35, %v9727_v61  ;;  %v2682_v54 = vadd.f32 %v8204_v36, %v9667_v31  ;;  %v2676_v41 = vpop.f32.mrb[43].mxu0  ;;  %v10228_v61 = vld [vmem:[%s11646_s8] ss:$0 sm:$0xff] }
 0x4bd   : > { %v2865_v52 = vadd.f32 %v2801_v39, %v9735_v56  ;;  %v2677_v58 = vadd.f32 %v9667_v31, %v2676_v41 }
 0x4be   : > { %2899 = vst.msk [vmem:[#allocation4 + $0x138] sm:$0xff] %vm694_vm1, %v2866_v42  ;;  %v2804_v11 = vmul.f32 %v2682_v54, %v9669_v22 }
 0x4bf   : > { %2898 = vst.msk [vmem:[#allocation4 + $0x130] sm:$0xff] %vm694_vm1, %v2865_v52  ;;  %v2803_v17 = vmul.f32 %v2677_v58, %v9669_v22  ;;  %v8207_v1 = vpop.f32.mrb[44].mxu0 }
 0x4c0   : > { %v2868_v9 = vadd.f32 %v2804_v11, %v9745_v12  ;;  %v2692_v56 = vadd.f32 %v10228_v61, %v8207_v1  ;;  %v2686_v53 = vpop.f32.mrb[45].mxu0 }
 0x4c1   : > { %v2867_v31 = vadd.f32 %v2803_v17, %v9753_v19  ;;  %v2687_v3 = vadd.f32 %v10228_v61, %v2686_v53 }
 0x4c2   : > { %2901 = vst.msk [vmem:[#allocation4 + $0x148] sm:$0xff] %vm694_vm1, %v2868_v9  ;;  %v2806_v27 = vmul.f32 %v2692_v56, %v9669_v22  ;;  %v10286_v9 = vld [vmem:[%s11640_s2] ss:$0 sm:$0xff] }
 0x4c3   : > { %2900 = vst.msk [vmem:[#allocation4 + $0x140] sm:$0xff] %vm694_vm1, %v2867_v31  ;;  %v2805_v12 = vmul.f32 %v2687_v3, %v9669_v22  ;;  %v8210_v30 = vpop.f32.mrb[46].mxu0 }
 0x4c4   : > { %v2870_v49 = vadd.f32 %v2806_v27, %v9763_v29  ;;  %v2702_v51 = vadd.f32 %v10228_v61, %v8210_v30  ;;  %v2696_v0 = vpop.f32.mrb[47].mxu0 }
 0x4c5   : > { %v2869_v4 = vadd.f32 %v2805_v12, %v9771_v32  ;;  %v2697_v19 = vadd.f32 %v10228_v61, %v2696_v0 }
 0x4c6   : > { %2903 = vst.msk [vmem:[#allocation4 + $0x158] sm:$0xff] %vm694_vm1, %v2870_v49  ;;  %v2808_v8 = vmul.f32 %v2702_v51, %v9669_v22 }
 0x4c7   : > { %2902 = vst.msk [vmem:[#allocation4 + $0x150] sm:$0xff] %vm694_vm1, %v2869_v4  ;;  %v2807_v28 = vmul.f32 %v2697_v19, %v9669_v22  ;;  %v8213_v25 = vpop.f32.mrb[48].mxu0  ;;  %v11682_v4 = vld [vmem:[#allocation12_spill] sm:$0xff] }
 0x4c8   : > { %v2872_v13 = vadd.f32 %v2808_v8, %v9781_v47  ;;  %v2712_v29 = vadd.f32 %v10228_v61, %v8213_v25  ;;  %v2706_v5 = vpop.f32.mrb[49].mxu0  ;;  %v11683_v25 = vld [vmem:[#allocation13_spill] sm:$0xff] }
 0x4c9   : > { %v2871_v37 = vadd.f32 %v2807_v28, %v9789_v24  ;;  %v2707_v32 = vadd.f32 %v10228_v61, %v2706_v5 }
 0x4ca   : > { %2905 = vst.msk [vmem:[#allocation4 + $0x168] sm:$0xff] %vm694_vm1, %v2872_v13  ;;  %v2810_v48 = vmul.f32 %v2712_v29, %v9669_v22 }
 0x4cb   : > { %2904 = vst.msk [vmem:[#allocation4 + $0x160] sm:$0xff] %vm694_vm1, %v2871_v37  ;;  %v2809_v26 = vmul.f32 %v2707_v32, %v9669_v22  ;;  %v8216_v33 = vpop.f32.mrb[50].mxu0 }
 0x4cc   : > { %v2874_v18 = vadd.f32 %v2810_v48, %v9799_v23  ;;  %v2722_v47 = vadd.f32 %v10228_v61, %v8216_v33  ;;  %v2716_v60 = vpop.f32.mrb[51].mxu0 }
 0x4cd   : > { %v2873_v43 = vadd.f32 %v2809_v26, %v9807_v57  ;;  %v2717_v24 = vadd.f32 %v10228_v61, %v2716_v60 }
 0x4ce   : > { %2907 = vst.msk [vmem:[#allocation4 + $0x178] sm:$0xff] %vm694_vm1, %v2874_v18  ;;  %v2812_v40 = vmul.f32 %v2722_v47, %v9669_v22  ;;  %v11684_v18 = vld [vmem:[#allocation14_spill] sm:$0xff] }
 0x4cf   : > { %2906 = vst.msk [vmem:[#allocation4 + $0x170] sm:$0xff] %vm694_vm1, %v2873_v43  ;;  %v2811_v59 = vmul.f32 %v2717_v24, %v9669_v22  ;;  %v8219_v62 = vpop.f32.mrb[52].mxu0  ;;  %v11685_v24 = vld [vmem:[#allocation15_spill] sm:$0xff] }
 0x4d0   : > { %v2876_v14 = vadd.f32 %v2812_v40, %v9817_v46  ;;  %v2732_v23 = vadd.f32 %v10228_v61, %v8219_v62  ;;  %v2726_v44 = vpop.f32.mrb[53].mxu0 }
 0x4d1   : > { %v2875_v6 = vadd.f32 %v2811_v59, %v9825_v2  ;;  %v2727_v57 = vadd.f32 %v10228_v61, %v2726_v44  ;;  %v11686_v44 = vld [vmem:[#allocation16_spill] sm:$0xff] }
 0x4d2   : > { %2909 = vst.msk [vmem:[#allocation4 + $0x188] sm:$0xff] %vm694_vm1, %v2876_v14  ;;  %v2814_v21 = vmul.f32 %v2732_v23, %v9669_v22 }
 0x4d3   : > { %2908 = vst.msk [vmem:[#allocation4 + $0x180] sm:$0xff] %vm694_vm1, %v2875_v6  ;;  %v2813_v34 = vmul.f32 %v2727_v57, %v9669_v22  ;;  %v8222_v50 = vpop.f32.mrb[54].mxu0 }
 0x4d4   : > { %v2878_v35 = vadd.f32 %v2814_v21, %v9835_v20  ;;  %v2742_v46 = vadd.f32 %v10228_v61, %v8222_v50  ;;  %v2736_v39 = vpop.f32.mrb[55].mxu0 }
 0x4d5   : > { %v2877_v36 = vadd.f32 %v2813_v34, %v9843_v16  ;;  %v2737_v2 = vadd.f32 %v10228_v61, %v2736_v39  ;;  %v11687_v34 = vld [vmem:[#allocation17_spill] sm:$0xff] }
 0x4d6   : > { %2911 = vst.msk [vmem:[#allocation4 + $0x198] sm:$0xff] %vm694_vm1, %v2878_v35  ;;  %v2816_v42 = vmul.f32 %v2742_v46, %v9669_v22 }
 0x4d7   : > { %2910 = vst.msk [vmem:[#allocation4 + $0x190] sm:$0xff] %vm694_vm1, %v2877_v36  ;;  %v2815_v54 = vmul.f32 %v2737_v2, %v9669_v22  ;;  %v8225_v41 = vpop.f32.mrb[56].mxu0 }
 0x4d8   : > { %v2880_v52 = vadd.f32 %v2816_v42, %v9853_v38  ;;  %v2752_v20 = vadd.f32 %v10228_v61, %v8225_v41  ;;  %v2746_v58 = vpop.f32.mrb[57].mxu0  ;;  %v11688_v41 = vld [vmem:[#allocation18_spill] sm:$0xff] }
 0x4d9   : > { %v2879_v11 = vadd.f32 %v2815_v54, %v9861_v45  ;;  %v2747_v16 = vadd.f32 %v10228_v61, %v2746_v58  ;;  %v8244_v17 = vpop.f32.mrb[66].mxu1 }
 0x4da   : > { %2913 = vst.msk [vmem:[#allocation4 + $0x1a8] sm:$0xff] %vm694_vm1, %v2880_v52  ;;  %v2818_v1 = vmul.f32 %v2752_v20, %v9669_v22  ;;  %v3079_v56 = vadd.f32 %v10286_v9, %v8244_v17  ;;  %v3073_v38 = vpop.f32.mrb[67].mxu1  ;;  %v11689_v20 = vld [vmem:[#allocation19_spill] sm:$0xff] }
 0x4db   : > { %2912 = vst.msk [vmem:[#allocation4 + $0x1a0] sm:$0xff] %vm694_vm1, %v2879_v11  ;;  %v2817_v53 = vmul.f32 %v2747_v16, %v9669_v22  ;;  %v3074_v45 = vadd.f32 %v10286_v9, %v3073_v38  ;;  %v8228_v31 = vpop.f32.mrb[58].mxu0 }
 0x4dc   : > { %v2882_v3 = vadd.f32 %v2818_v1, %v9871_v15  ;;  %3153 = vst.msk [vmem:[#allocation2 + $0x108] sm:$0xff] %vm694_vm1, %v3079_v56  ;;  %v2762_v27 = vadd.f32 %v10228_v61, %v8228_v31  ;;  %v2756_v12 = vpop.f32.mrb[59].mxu0 }
 0x4dd   : > { %v2881_v30 = vadd.f32 %v2817_v53, %v9879_v55  ;;  %3152 = vst.msk [vmem:[#allocation2 + $0x100] sm:$0xff] %vm694_vm1, %v3074_v45  ;;  %v2757_v49 = vadd.f32 %v10228_v61, %v2756_v12 }
 0x4de   : > { %2915 = vst.msk [vmem:[#allocation4 + $0x1b8] sm:$0xff] %vm694_vm1, %v2882_v3  ;;  %v2820_v51 = vmul.f32 %v2762_v27, %v9669_v22 }
 0x4df   : > { %2914 = vst.msk [vmem:[#allocation4 + $0x1b0] sm:$0xff] %vm694_vm1, %v2881_v30  ;;  %v2819_v0 = vmul.f32 %v2757_v49, %v9669_v22  ;;  %v8231_v15 = vpop.f32.mrb[60].mxu0 }
 0x4e0   : > { %v2884_v19 = vadd.f32 %v2820_v51, %v11682_v4  ;;  %v2772_v8 = vadd.f32 %v10228_v61, %v8231_v15  ;;  %v2766_v28 = vpop.f32.mrb[61].mxu0 }
 0x4e1   : > { %v2883_v55 = vadd.f32 %v2819_v0, %v11683_v25  ;;  %v2767_v13 = vadd.f32 %v10228_v61, %v2766_v28  ;;  %v8247_v29 = vpop.f32.mrb[68].mxu1  ;;  %v8880_v25 = vld [vmem:[%s11642_s4] ss:$0 sm:$0xff] }
 0x4e2   : > { %2917 = vst.msk [vmem:[#allocation4 + $0x1c8] sm:$0xff] %vm694_vm1, %v2884_v19  ;;  %v2822_v5 = vmul.f32 %v2772_v8, %v9669_v22  ;;  %v3089_v37 = vadd.f32 %v10286_v9, %v8247_v29  ;;  %v3083_v32 = vpop.f32.mrb[69].mxu1 }
 0x4e3   : > { %2916 = vst.msk [vmem:[#allocation4 + $0x1c0] sm:$0xff] %vm694_vm1, %v2883_v55  ;;  %v2821_v48 = vmul.f32 %v2767_v13, %v9669_v22  ;;  %v3084_v26 = vadd.f32 %v10286_v9, %v3083_v32  ;;  %v8234_v33 = vpop.f32.mrb[62].mxu0 }
 0x4e4   : > { %v2886_v47 = vadd.f32 %v2822_v5, %v11684_v18  ;;  %3155 = vst.msk [vmem:[#allocation2 + $0x118] sm:$0xff] %vm694_vm1, %v3089_v37  ;;  %v2782_v60 = vadd.f32 %v10228_v61, %v8234_v33  ;;  %v2776_v43 = vpop.f32.mrb[63].mxu0  ;;  %v11690_v37 = vld [vmem:[#allocation20_spill] sm:$0xff] }
 0x4e5   : > { %v2885_v40 = vadd.f32 %v2821_v48, %v11685_v24  ;;  %3154 = vst.msk [vmem:[#allocation2 + $0x110] sm:$0xff] %vm694_vm1, %v3084_v26  ;;  %v2777_v59 = vadd.f32 %v10228_v61, %v2776_v43 }
 0x4e6   : > { %2919 = vst.msk [vmem:[#allocation4 + $0x1d8] sm:$0xff] %vm694_vm1, %v2886_v47  ;;  %v2824_v62 = vmul.f32 %v2782_v60, %v9669_v22 }
 0x4e7   : > { %2918 = vst.msk [vmem:[#allocation4 + $0x1d0] sm:$0xff] %vm694_vm1, %v2885_v40  ;;  %v2823_v14 = vmul.f32 %v2777_v59, %v9669_v22  ;;  %v8237_v23 = vpop.f32.mrb[64].mxu0 }
 0x4e8   : > { %v2888_v6 = vadd.f32 %v2824_v62, %v11686_v44  ;;  %v2792_v57 = vadd.f32 %v10228_v61, %v8237_v23  ;;  %v2786_v21 = vpop.f32.mrb[65].mxu0 }
 0x4e9   : > { %v2887_v50 = vadd.f32 %v2823_v14, %v11687_v34  ;;  %v2787_v35 = vadd.f32 %v10228_v61, %v2786_v21  ;;  %v8250_v46 = vpop.f32.mrb[70].mxu1 }
 0x4ea   : > { %2921 = vst.msk [vmem:[#allocation4 + $0x1e8] sm:$0xff] %vm694_vm1, %v2888_v6  ;;  %v2826_v39 = vmul.f32 %v2792_v57, %v9669_v22  ;;  %v3099_v36 = vadd.f32 %v10286_v9, %v8250_v46  ;;  %v3093_v2 = vpop.f32.mrb[71].mxu1 }
 0x4eb   : > { %2920 = vst.msk [vmem:[#allocation4 + $0x1e0] sm:$0xff] %vm694_vm1, %v2887_v50  ;;  %v2825_v42 = vmul.f32 %v2787_v35, %v9669_v22  ;;  %v3094_v54 = vadd.f32 %v10286_v9, %v3093_v2 }
 0x4ec   : > { %v2890_v52 = vadd.f32 %v2826_v39, %v11688_v41  ;;  %3157 = vst.msk [vmem:[#allocation2 + $0x128] sm:$0xff] %vm694_vm1, %v3099_v36 }
 0x4ed   : > { %v2889_v58 = vadd.f32 %v2825_v42, %v11689_v20  ;;  %3156 = vst.msk [vmem:[#allocation2 + $0x120] sm:$0xff] %vm694_vm1, %v3094_v54 }
 0x4ee   : > { %2923 = vst.msk [vmem:[#allocation4 + $0x1f8] sm:$0xff] %vm694_vm1, %v2890_v52 }
 0x4ef   : > { %2922 = vst.msk [vmem:[#allocation4 + $0x1f0] sm:$0xff] %vm694_vm1, %v2889_v58  ;;  %v7413_v58 = vld [vmem:[%s9121_s25 + $0x30] sm:$0xff] }
 0x4f1   : > { %v8253_v11 = vpop.f32.mrb[72].mxu1 }
 0x4f2   : > { %v3109_v16 = vadd.f32 %v10286_v9, %v8253_v11  ;;  %v3103_v17 = vpop.f32.mrb[73].mxu1  ;;  %v7414_v11 = vld [vmem:[%s9121_s25 + $0x38] sm:$0xff] }
 0x4f3   : > { %v3104_v1 = vadd.f32 %v10286_v9, %v3103_v17 }
 0x4f4   : > { %3159 = vst.msk [vmem:[#allocation2 + $0x138] sm:$0xff] %vm694_vm1, %v3109_v16  ;;  %v11691_v16 = vld [vmem:[#allocation10_spill] sm:$0xff] }
 0x4f5   : > { %3158 = vst.msk [vmem:[#allocation2 + $0x130] sm:$0xff] %vm694_vm1, %v3104_v1 }
 0x4f9   : > { %v8256_v56 = vpop.f32.mrb[74].mxu1 }
 0x4fa   : > { %v3119_v38 = vadd.f32 %v10286_v9, %v8256_v56  ;;  %v3113_v53 = vpop.f32.mrb[75].mxu1 }
 0x4fb   : > { %v3114_v45 = vadd.f32 %v10286_v9, %v3113_v53  ;;  %v11692_v53 = vld [vmem:[#allocation11_spill] sm:$0xff] }
 0x4fc   : > { %3161 = vst.msk [vmem:[#allocation2 + $0x148] sm:$0xff] %vm694_vm1, %v3119_v38 }
 0x4fd   : > { %3160 = vst.msk [vmem:[#allocation2 + $0x140] sm:$0xff] %vm694_vm1, %v3114_v45 }
 0x501   : > { %v8259_v31 = vpop.f32.mrb[76].mxu1 }
 0x502   : > { %v3129_v3 = vadd.f32 %v10286_v9, %v8259_v31  ;;  %v3123_v27 = vpop.f32.mrb[77].mxu1 }
 0x503   : > { %v3124_v12 = vadd.f32 %v10286_v9, %v3123_v27 }
 0x504   : > { %3163 = vst.msk [vmem:[#allocation2 + $0x158] sm:$0xff] %vm694_vm1, %v3129_v3 }
 0x505   : > { %3162 = vst.msk [vmem:[#allocation2 + $0x150] sm:$0xff] %vm694_vm1, %v3124_v12 }
 0x509   : > { %v8262_v30 = vpop.f32.mrb[78].mxu1 }
 0x50a   : > { %v3139_v49 = vadd.f32 %v10286_v9, %v8262_v30  ;;  %v3133_v51 = vpop.f32.mrb[79].mxu1 }
 0x50b   : > { %v3134_v0 = vadd.f32 %v10286_v9, %v3133_v51 }
 0x50c   : > { %3165 = vst.msk [vmem:[#allocation2 + $0x168] sm:$0xff] %vm694_vm1, %v3139_v49 }
 0x50d   : > { %3164 = vst.msk [vmem:[#allocation2 + $0x160] sm:$0xff] %vm694_vm1, %v3134_v0 }
 0x511   : > { %v8265_v15 = vpop.f32.mrb[80].mxu1 }
 0x512   : > { %v3149_v4 = vadd.f32 %v10286_v9, %v8265_v15  ;;  %v3143_v19 = vpop.f32.mrb[81].mxu1 }
 0x513   : > { %v3144_v8 = vadd.f32 %v10286_v9, %v3143_v19 }
 0x514   : > { %3167 = vst.msk [vmem:[#allocation2 + $0x178] sm:$0xff] %vm694_vm1, %v3149_v4 }
 0x515   : > { %3166 = vst.msk [vmem:[#allocation2 + $0x170] sm:$0xff] %vm694_vm1, %v3144_v8  ;;  %v8272_v28 = vpop.f32.mrb[82].mxu1 }
 0x516   : > { %v3240_v55 = vadd.f32 %v8880_v25, %v8272_v28  ;;  %v3234_v13 = vpop.f32.mrb[83].mxu1  ;;  %v8300_v29 = vpop.f32.mrb[66].mxu0 }
 0x517   : > { %v3235_v5 = vadd.f32 %v8880_v25, %v3234_v13  ;;  %v10362_v32 = vadd.f32 %v11690_v37, %v8300_v29  ;;  %v3433_v48 = vpop.f32.mrb[67].mxu0 }
 0x518   : > { %3314 = vst.msk [vmem:[#allocation3 + $0x108] sm:$0xff] %vm862_vm2, %v3240_v55  ;;  %v10366_v9 = vadd.f32 %v11690_v37, %v3433_v48 }
 0x519   : > { %3313 = vst.msk [vmem:[#allocation3 + $0x100] sm:$0xff] %vm862_vm2, %v3235_v5  ;;  %v8275_v26 = vpop.f32.mrb[84].mxu1  ;;  %3624 = vrot.lane.b32.xlu0 %v10362_v32, %s8983_s26 }
 0x51a   : > { %v3250_v33 = vadd.f32 %v8880_v25, %v8275_v26  ;;  %v3244_v18 = vpop.f32.mrb[85].mxu1  ;;  %3622 = vrot.lane.b32.xlu1 %v10366_v9, %s8983_s26  ;;  %v3451_v17 = vrot.slane %v10366_v9, %v11691_v16  ;;  %v3444_v31 = vcombine.high %v10366_v9, %v10366_v9 }
 0x51b   : > { %v3245_v47 = vadd.f32 %v8880_v25, %v3244_v18 }
 0x51c   : > { %3316 = vst.msk [vmem:[#allocation3 + $0x118] sm:$0xff] %vm862_vm2, %v3250_v33  ;;  %v3459_v1 = vcombine.high %v3451_v17, %v3451_v17  ;;  %v3467_v56 = vrot.slane %v3451_v17, %v11691_v16  ;;  %v3458_v15 = vrot.slane %v3444_v31, %v11691_v16 }
 0x51d   : > { %3315 = vst.msk [vmem:[#allocation3 + $0x110] sm:$0xff] %vm862_vm2, %v3245_v47  ;;  %v8278_v60 = vpop.f32.mrb[86].mxu1 }
 0x51e   : > { %v3254_v43 = vpop.f32.mrb[87].mxu1  ;;  %v3260_v59 = vadd.f32 %v8880_v25, %v8278_v60  ;;  %v3481_v38 = vrot.slane %v3459_v1, %v11691_v16  ;;  %v3545_v45 = vrot.slane %v3467_v56, %v11692_v53  ;;  %v3489_v3 = vcombine.high %v3467_v56, %v3467_v56 }
 0x51f   : > { %v3255_v62 = vadd.f32 %v8880_v25, %v3254_v43  ;;  %v3474_v55 = vrot.slane %v3458_v15, %v11691_v16 }
 0x520   : > { %3318 = vst.msk [vmem:[#allocation3 + $0x128] sm:$0xff] %vm862_vm2, %v3260_v59  ;;  %v3549_v27 = vrot.slane %v3481_v38, %v11692_v53  ;;  %v3491_v4 = vcombine.high %v3481_v38, %v3481_v38  ;;  %v3553_v19 = vrot.slane %v3489_v3, %v11692_v53 }
 0x521   : > { %v8281_v24 = vpop.f32.mrb[88].mxu1  ;;  %3317 = vst.msk [vmem:[#allocation3 + $0x120] sm:$0xff] %vm862_vm2, %v3255_v62  ;;  %v3561_v48 = vrot.slane %v3474_v55, %v11692_v53  ;;  %v3490_v60 = vcombine.high %v3474_v55, %v3474_v55 }
 0x522   : > { %v3264_v40 = vpop.f32.mrb[89].mxu1  ;;  %v3270_v14 = vadd.f32 %v8880_v25, %v8281_v24  ;;  %v3557_v13 = vrot.slane %v3491_v4, %v11692_v53 }
 0x523   : > { %v3265_v23 = vadd.f32 %v8880_v25, %v3264_v40 }
 0x524   : > { %3320 = vst.msk [vmem:[#allocation3 + $0x138] sm:$0xff] %vm862_vm2, %v3270_v14  ;;  %v3500_v14 = vrot.slane %v10362_v32, %v11691_v16 }
 0x525   : > { %v8284_v44 = vpop.f32.mrb[90].mxu1  ;;  %3319 = vst.msk [vmem:[#allocation3 + $0x130] sm:$0xff] %vm862_vm2, %v3265_v23 }
 0x526   : > { %v3280_v6 = vadd.f32 %v8880_v25, %v8284_v44  ;;  %v3274_v57 = vpop.f32.mrb[91].mxu1  ;;  %v3569_v44 = vrot.slane %v3490_v60, %v11692_v53 }
 0x527   : > { %v3275_v21 = vadd.f32 %v8880_v25, %v3274_v57 }
 0x528   : > { %3322 = vst.msk [vmem:[#allocation3 + $0x148] sm:$0xff] %vm862_vm2, %v3280_v6 }
 0x529   : > { %3321 = vst.msk [vmem:[#allocation3 + $0x140] sm:$0xff] %vm862_vm2, %v3275_v21  ;;  %v8287_v34 = vpop.f32.mrb[92].mxu1 }
 0x52a   : > { %v3290_v50 = vadd.f32 %v8880_v25, %v8287_v34  ;;  %v3284_v35 = vpop.f32.mrb[93].mxu1  ;;  %v3508_v34 = vcombine.high %v3500_v14, %v3500_v14 }
 0x52b   : > { %v3285_v46 = vadd.f32 %v8880_v25, %v3284_v35 }
 0x52c   : > { %3324 = vst.msk [vmem:[#allocation3 + $0x158] sm:$0xff] %vm862_vm2, %v3290_v50  ;;  %v3516_v50 = vrot.slane %v3500_v14, %v11691_v16 }
 0x52d   : > { %3323 = vst.msk [vmem:[#allocation3 + $0x150] sm:$0xff] %vm862_vm2, %v3285_v46  ;;  %v8290_v39 = vpop.f32.mrb[94].mxu1 }
 0x52e   : > { %v3300_v36 = vadd.f32 %v8880_v25, %v8290_v39  ;;  %v3294_v2 = vpop.f32.mrb[95].mxu1  ;;  %v3538_v17 = vcombine.high %v3516_v50, %v3516_v50 }
 0x52f   : > { %v3295_v42 = vadd.f32 %v8880_v25, %v3294_v2 }
 0x530   : > { %3326 = vst.msk [vmem:[#allocation3 + $0x168] sm:$0xff] %vm862_vm2, %v3300_v36 }
 0x531   : > { %3325 = vst.msk [vmem:[#allocation3 + $0x160] sm:$0xff] %vm862_vm2, %v3295_v42  ;;  %v8293_v54 = vpop.f32.mrb[96].mxu1  ;;  %v3530_v42 = vrot.slane %v3508_v34, %v11691_v16 }
 0x532   : > { %v3310_v41 = vadd.f32 %v8880_v25, %v8293_v54  ;;  %v3304_v52 = vpop.f32.mrb[97].mxu1  ;;  %v3577_v54 = vrot.slane %v3516_v50, %v11692_v53 }
 0x533   : > { %v3305_v20 = vadd.f32 %v8880_v25, %v3304_v52  ;;  %v3460_v25 = vcombine.high %v3458_v15, %v3458_v15  ;;  %v3581_v1 = vrot.slane %v3530_v42, %v11692_v53 }
 0x534   : > { %3328 = vst.msk [vmem:[#allocation3 + $0x178] sm:$0xff] %vm862_vm2, %v3310_v41 }
 0x535   : > { %3327 = vst.msk [vmem:[#allocation3 + $0x170] sm:$0xff] %vm862_vm2, %v3305_v20  ;;  %v3488_v37 = vrot.slane %v3460_v25, %v11691_v16 }
 0x537   : > { %v3565_v43 = vrot.slane %v3488_v37, %v11692_v53  ;;  %v3492_v23 = vcombine.high %v3488_v37, %v3488_v37 }
 0x539   : > { %v3573_v35 = vrot.slane %v3492_v23, %v11692_v53 }
 0x543   : > { %4145 = vxpose.xlu1.b32.start [1/2] (short) %v7413_v58, 128 }
 0x547   : > { %4146 = vxpose.xlu1.b32.end [2/2] (short) %v7414_v11, 128  ;;  %v3493_v11 = vcombine.high %v10362_v32, %v10362_v32  ;;  %v3585_v32 = vrot.slane %v3538_v17, %v11692_v53 }
 0x549   : > { %v3507_v3 = vrot.slane %v3493_v11, %v11691_v16 }
 0x54b   : > { %v3509_v4 = vcombine.high %v3507_v3, %v3507_v3 }
 0x58b   : > { %v10397_v12 = vpop.permute.xlu0 %3624 }
 0x58c   : > { %v3629_v30 = vsub.f32 %v3545_v45, %v10397_v12  ;;  %v10400_v49 = vpop.permute.xlu1 %3622  ;;  %v3631_v8 = vsub.f32 %v3549_v27, %v10397_v12  ;;  %v3633_v29 = vsub.f32 %v3553_v19, %v10397_v12  ;;  %v3635_v9 = vsub.f32 %v3557_v13, %v10397_v12 }
 0x58d   : > { %v3628_v51 = vsub.f32 %v3545_v45, %v10400_v49  ;;  %v3630_v0 = vsub.f32 %v3549_v27, %v10400_v49  ;;  %v3632_v28 = vsub.f32 %v3553_v19, %v10400_v49  ;;  %v3634_v5 = vsub.f32 %v3557_v13, %v10400_v49 }
 0x58e   : > { %v3636_v33 = vsub.f32 %v3561_v48, %v10400_v49  ;;  %v3637_v24 = vsub.f32 %v3561_v48, %v10397_v12  ;;  %v3638_v40 = vsub.f32 %v3565_v43, %v10400_v49  ;;  %v3639_v6 = vsub.f32 %v3565_v43, %v10397_v12 }
 0x58f   : > { %8748 = vtanh.f32 %v3628_v51  ;;  %v3641_v46 = vsub.f32 %v3569_v44, %v10397_v12  ;;  %v3642_v39 = vsub.f32 %v3573_v35, %v10400_v49  ;;  %v3643_v41 = vsub.f32 %v3573_v35, %v10397_v12 }
 0x590   : > { %8750 = vtanh.f32 %v3629_v30  ;;  %v3644_v52 = vsub.f32 %v3577_v54, %v10400_v49  ;;  %v3645_v56 = vsub.f32 %v3577_v54, %v10397_v12  ;;  %v3646_v38 = vsub.f32 %v3581_v1, %v10400_v49 }
 0x591   : > { %8752 = vtanh.f32 %v3630_v0  ;;  %v3540_v27 = vcombine.high %v3530_v42, %v3530_v42  ;;  %v3647_v30 = vsub.f32 %v3581_v1, %v10397_v12  ;;  %v3648_v51 = vsub.f32 %v3585_v32, %v10400_v49 }
 0x592   : > { %8754 = vtanh.f32 %v3631_v8  ;;  %v3523_v19 = vrot.slane %v3507_v3, %v11691_v16 }
 0x593   : > { %8756 = vtanh.f32 %v3632_v28  ;;  %v3589_v8 = vrot.slane %v3540_v27, %v11692_v53  ;;  %v3649_v28 = vsub.f32 %v3585_v32, %v10397_v12 }
 0x594   : > { %8758 = vtanh.f32 %v3633_v29  ;;  %v3537_v29 = vrot.slane %v3509_v4, %v11691_v16 }
 0x595   : > { %8760 = vtanh.f32 %v3634_v5  ;;  %v3650_v25 = vsub.f32 %v3589_v8, %v10400_v49  ;;  %v3593_v5 = vrot.slane %v3523_v19, %v11692_v53  ;;  %v3651_v37 = vsub.f32 %v3589_v8, %v10397_v12 }
 0x596   : > { %8762 = vtanh.f32 %v3635_v9 }
 0x597   : > { %8764 = vtanh.f32 %v3636_v33  ;;  %v3652_v48 = vsub.f32 %v3593_v5, %v10400_v49  ;;  %v3539_v33 = vcombine.high %v3523_v19, %v3523_v19 }
 0x598   : > { %8766 = vtanh.f32 %v3637_v24 }
 0x599   : > { %v8749_v26 = vpop.eup %8748  ;;  %8768 = vtanh.f32 %v3638_v40  ;;  %v3541_v40 = vcombine.high %v3537_v29, %v3537_v29 }
 0x59a   : > { %v8751_v18 = vpop.eup %8750  ;;  %8307 = vmatprep.mubr.msk.f32.mxu1 %vm1255_vm3, %v8749_v26  ;;  %8770 = vtanh.f32 %v3639_v6 }
 0x59b   : > { %v8753_v47 = vpop.eup %8752  ;;  %8308 = vmatmul.mubr.msk.f32.vlgmr.msra.gmra.mrb[98].mxu1 %vm1255_vm3, %v8751_v18  ;;  %v3597_v18 = vrot.slane %v3537_v29, %v11692_v53  ;;  %v3605_v6 = vrot.slane %v3541_v40, %v11692_v53 }
 0x59c   : > { %8310 = vmatprep.mubr.msk.f32.mxu1 %vm1255_vm3, %v8753_v47  ;;  %8531 = vmatpush3.bf16.msra.mxu1 %v9154_v10  ;;  %v8755_v59 = vpop.eup %8754  ;;  %v3640_v10 = vsub.f32 %v3569_v44, %v10400_v49  ;;  %v3653_v47 = vsub.f32 %v3593_v5, %v10397_v12 }
 0x59d   : > { %v8757_v62 = vpop.eup %8756  ;;  %v3654_v60 = vsub.f32 %v3597_v18, %v10400_v49 }
 0x59e   : > { %v8759_v57 = vpop.eup %8758  ;;  %8772 = vtanh.f32 %v3640_v10 }
 0x59f   : > { %8311 = vmatmul.mubr.msk.f32.gmra.mrb[100].mxu1 %vm1255_vm3, %v8755_v59  ;;  %v8761_v21 = vpop.eup %8760  ;;  %8774 = vtanh.f32 %v3641_v46  ;;  %v3601_v59 = vrot.slane %v3539_v33, %v11692_v53  ;;  %v3659_v46 = vsub.f32 %v3605_v6, %v10397_v12 }
 0x5a0   : > { %8313 = vmatprep.mubr.msk.f32.mxu1 %vm1255_vm3, %v8757_v62  ;;  %v8763_v36 = vpop.eup %8762  ;;  %8776 = vtanh.f32 %v3642_v39  ;;  %v3655_v62 = vsub.f32 %v3597_v18, %v10397_v12 }
 0x5a1   : > { %v8765_v2 = vpop.eup %8764  ;;  %8778 = vtanh.f32 %v3643_v41  ;;  %v3656_v14 = vsub.f32 %v3601_v59, %v10400_v49 }
 0x5a2   : > { %v8767_v20 = vpop.eup %8766  ;;  %8780 = vtanh.f32 %v3644_v52 }
 0x5a3   : > { %8314 = vmatmul.mubr.msk.f32.gmra.mrb[102].mxu1 %vm1255_vm3, %v8759_v57  ;;  %v8769_v58 = vpop.eup %8768  ;;  %8782 = vtanh.f32 %v3645_v56  ;;  %v3657_v57 = vsub.f32 %v3601_v59, %v10397_v12 }
 0x5a4   : > { %8316 = vmatprep.mubr.msk.f32.mxu1 %vm1255_vm3, %v8761_v21  ;;  %v8771_v45 = vpop.eup %8770  ;;  %8784 = vtanh.f32 %v3646_v38  ;;  %v3658_v21 = vsub.f32 %v3605_v6, %v10400_v49 }
 0x5a5   : > { %8786 = vtanh.f32 %v3647_v30 }
 0x5a6   : > { %8788 = vtanh.f32 %v3648_v51 }
 0x5a7   : > { %8317 = vmatmul.mubr.msk.f32.gmra.mrb[104].mxu1 %vm1255_vm3, %v8763_v36  ;;  %8790 = vtanh.f32 %v3649_v28 }
 0x5a8   : > { %8319 = vmatprep.mubr.msk.f32.mxu1 %vm1255_vm3, %v8765_v2  ;;  %v8773_v31 = vpop.eup %8772  ;;  %8792 = vtanh.f32 %v3650_v25 }
 0x5a9   : > { %v8775_v0 = vpop.eup %8774  ;;  %8794 = vtanh.f32 %v3651_v37 }
 0x5aa   : > { %v8777_v15 = vpop.eup %8776  ;;  %8796 = vtanh.f32 %v3652_v48 }
 0x5ab   : > { %8320 = vmatmul.mubr.msk.f32.gmra.mrb[106].mxu1 %vm1255_vm3, %v8767_v20  ;;  %v8779_v55 = vpop.eup %8778  ;;  %8798 = vtanh.f32 %v3653_v47 }
 0x5ac   : > { %8322 = vmatprep.mubr.msk.f32.mxu1 %vm1255_vm3, %v8769_v58  ;;  %v8781_v13 = vpop.eup %8780  ;;  %8800 = vtanh.f32 %v3654_v60 }
 0x5ad   : > { %v8783_v9 = vpop.eup %8782  ;;  %8802 = vtanh.f32 %v3655_v62 }
 0x5ae   : > { %v8785_v26 = vpop.eup %8784  ;;  %8804 = vtanh.f32 %v3656_v14 }
 0x5af   : > { %8323 = vmatmul.mubr.msk.f32.gmra.mrb[108].mxu1 %vm1255_vm3, %v8771_v45  ;;  %v8787_v43 = vpop.eup %8786  ;;  %8806 = vtanh.f32 %v3657_v57 }
 0x5b0   : > { %8325 = vmatprep.mubr.msk.f32.mxu1 %vm1255_vm3, %v8773_v31  ;;  %v8789_v24 = vpop.eup %8788  ;;  %8808 = vtanh.f32 %v3658_v21  ;;  %v8881_v21 = vld [vmem:[%s11645_s7 + $0x10] sm:$0xff] }
 0x5b1   : > { %v8791_v23 = vpop.eup %8790  ;;  %8810 = vtanh.f32 %v3659_v46 }
 0x5b2   : > { %v8793_v44 = vpop.eup %8792 }
 0x5b3   : > { %8326 = vmatmul.mubr.msk.f32.gmra.mrb[110].mxu1 %vm1255_vm3, %v8775_v0  ;;  %v8795_v34 = vpop.eup %8794 }
 0x5b4   : > { %8328 = vmatprep.mubr.msk.f32.mxu1 %vm1255_vm3, %v8777_v15  ;;  %v8797_v50 = vpop.eup %8796 }
 0x5b5   : > { %v8799_v39 = vpop.eup %8798 }
 0x5b6   : > { %v8801_v49 = vpop.eup %8800 }
 0x5b7   : > { %8329 = vmatmul.mubr.msk.f32.gmra.mrb[112].mxu1 %vm1255_vm3, %v8779_v55  ;;  %v8803_v2 = vpop.eup %8802 }
 0x5b8   : > { %8331 = vmatprep.mubr.msk.f32.mxu1 %vm1255_vm3, %v8781_v13  ;;  %v8805_v42 = vpop.eup %8804 }
 0x5bb   : > { %8332 = vmatmul.mubr.msk.f32.gmra.mrb[114].mxu1 %vm1255_vm3, %v8783_v9 }
 0x5bc   : > { %8334 = vmatprep.mubr.msk.f32.mxu1 %vm1255_vm3, %v8785_v26 }
 0x5bf   : > { %8335 = vmatmul.mubr.msk.f32.gmra.mrb[116].mxu1 %vm1255_vm3, %v8787_v43 }
 0x5c0   : > { %8337 = vmatprep.mubr.msk.f32.mxu1 %vm1255_vm3, %v8789_v24 }
 0x5c3   : > { %v10478_v10 = vpop.trf.xlu1  ;;  %8338 = vmatmul.mubr.msk.f32.gmra.mrb[118].mxu1 %vm1255_vm3, %v8791_v23 }
 0x5c4   : > { %8340 = vmatprep.mubr.msk.f32.mxu1 %vm1255_vm3, %v8793_v44  ;;  %8359 = vmatprep.mubr.msk.f32.mxu0 %vm500_vm0, %v10478_v10  ;;  %v4547_v31 = vsel %vm500_vm0, %v10478_v10, 0.0 }
 0x5c7   : > { %v10486_v35 = vpop.trf.xlu1  ;;  %8341 = vmatmul.mubr.msk.f32.gmra.mrb[120].mxu1 %vm1255_vm3, %v8795_v34 }
 0x5c8   : > { %8343 = vmatprep.mubr.msk.f32.mxu1 %vm1255_vm3, %v8797_v50  ;;  %8360 = vmatmul.mubr.msk.f32.vlgmr.msra.gmra.mrb[68].mxu0 %vm500_vm0, %v10486_v35  ;;  %v4562_v15 = vsel %vm500_vm0, %v10486_v35, 0.0  ;;  %v10592_v50 = vld [vmem:[%s11647_s9 + $0x8] sm:$0xff] }
 0x5c9   : > { %8527 = vmatpush3.bf16.msra.mxu0 %v9146_v7  ;;  %v8807_v7 = vpop.eup %8806 }
 0x5ca   : > { %8533 = vmatprep.subr.bf16.mxu0 %v9251_v63  ;;  %v8809_v54 = vpop.eup %8808 }
 0x5cb   : > { %v10495_v36 = vpop.trf.xlu1  ;;  %8344 = vmatmul.mubr.msk.f32.gmra.mrb[122].mxu1 %vm1255_vm3, %v8799_v39  ;;  %v8811_v52 = vpop.eup %8810  ;;  %v10599_v39 = vld [vmem:[%s11647_s9] sm:$0xff] }
 0x5cc   : > { %8346 = vmatprep.mubr.msk.f32.mxu1 %vm1255_vm3, %v8801_v49  ;;  %8362 = vmatprep.mubr.msk.f32.mxu0 %vm500_vm0, %v10495_v36  ;;  %v4548_v38 = vsel %vm500_vm0, %v10495_v36, 0.0 }
 0x5cd   : > { %v4549_v27 = vadd.f32 %v4548_v38, %v4547_v31 }
 0x5cf   : > { %v10501_v12 = vpop.trf.xlu1  ;;  %8347 = vmatmul.mubr.msk.f32.gmra.mrb[124].mxu1 %vm1255_vm3, %v8803_v2 }
 0x5d0   : > { %8349 = vmatprep.mubr.msk.f32.mxu1 %vm1255_vm3, %v8805_v42  ;;  %8363 = vmatmul.mubr.msk.f32.gmra.mrb[70].mxu0 %vm500_vm0, %v10501_v12  ;;  %v4563_v32 = vsel %vm500_vm0, %v10501_v12, 0.0 }
 0x5d1   : > { %v4564_v8 = vadd.f32 %v4563_v32, %v4562_v15 }
 0x5d3   : > { %v10507_v41 = vpop.trf.xlu1  ;;  %8350 = vmatmul.mubr.msk.f32.gmra.mrb[126].mxu1 %vm1255_vm3, %v8807_v7 }
 0x5d4   : > { %8352 = vmatprep.mubr.msk.f32.mxu1 %vm1255_vm3, %v8809_v54  ;;  %8365 = vmatprep.mubr.msk.f32.mxu0 %vm500_vm0, %v10507_v41  ;;  %v4550_v3 = vsel %vm500_vm0, %v10507_v41, 0.0  ;;  %v10608_v54 = vld [vmem:[%s11647_s9 + $0x18] sm:$0xff] }
 0x5d5   : > { %v4551_v51 = vadd.f32 %v4550_v3, %v4549_v27  ;;  %v10634_v27 = vld [vmem:[%s11647_s9 + $0x20] sm:$0xff] }
 0x5d7   : > { %v10513_v20 = vpop.trf.xlu1  ;;  %8353 = vmatmul.mubr.msk.f32.gmra.mrb[128].mxu1 %vm1255_vm3, %v8811_v52 }
 0x5d8   : > { %8366 = vmatmul.mubr.msk.f32.gmra.mrb[72].mxu0 %vm500_vm0, %v10513_v20  ;;  %v4565_v4 = vsel %vm500_vm0, %v10513_v20, 0.0 }
 0x5d9   : > { %v4566_v13 = vadd.f32 %v4565_v4, %v4564_v8 }
 0x5db   : > { %v10518_v58 = vpop.trf.xlu1 }
 0x5dc   : > { %8368 = vmatprep.mubr.msk.f32.mxu0 %vm500_vm0, %v10518_v58  ;;  %v4552_v30 = vsel %vm500_vm0, %v10518_v58, 0.0 }
 0x5dd   : > { %v4553_v28 = vadd.f32 %v4552_v30, %v4551_v51 }
 0x5df   : > { %v10522_v11 = vpop.trf.xlu1 }
 0x5e0   : > { %8369 = vmatmul.mubr.msk.f32.gmra.mrb[74].mxu0 %vm500_vm0, %v10522_v11  ;;  %v4567_v25 = vsel %vm500_vm0, %v10522_v11, 0.0 }
 0x5e1   : > { %v4568_v9 = vadd.f32 %v4567_v25, %v4566_v13  ;;  %v10657_v25 = vld [vmem:[%s11647_s9 + $0x30] sm:$0xff] }
 0x5e3   : > { %v4169_v17 = vpop.trf.xlu1 }
 0x5e4   : > { %8371 = vmatprep.mubr.msk.f32.mxu0 %vm500_vm0, %v4169_v17  ;;  %v4554_v19 = vsel %vm500_vm0, %v4169_v17, 0.0 }
 0x5e5   : > { %v4555_v29 = vadd.f32 %v4554_v19, %v4553_v28  ;;  %v10649_v19 = vld [vmem:[%s11647_s9 + $0x38] sm:$0xff] }
 0x5e7   : > { %v4170_v1 = vpop.trf.xlu1 }
 0x5e8   : > { %8372 = vmatmul.mubr.msk.f32.gmra.mrb[76].mxu0 %vm500_vm0, %v4170_v1  ;;  %v4569_v37 = vsel %vm500_vm0, %v4170_v1, 0.0 }
 0x5e9   : > { %v4570_v18 = vadd.f32 %v4569_v37, %v4568_v9  ;;  %v10667_v9 = vld [vmem:[%s11647_s9 + $0x48] sm:$0xff] }
 0x5eb   : > { %v4171_v56 = vpop.trf.xlu1 }
 0x5ec   : > { %8374 = vmatprep.mubr.msk.f32.mxu0 %vm500_vm0, %v4171_v56  ;;  %v4556_v55 = vsel %vm500_vm0, %v4171_v56, 0.0 }
 0x5ed   : > { %v4557_v26 = vadd.f32 %v4556_v55, %v4555_v29 }
 0x5ef   : > { %v4172_v45 = vpop.trf.xlu1 }
 0x5f0   : > { %8375 = vmatmul.mubr.msk.f32.gmra.mrb[78].mxu0 %vm500_vm0, %v4172_v45  ;;  %v4571_v33 = vsel %vm500_vm0, %v4172_v45, 0.0 }
 0x5f1   : > { %v4572_v40 = vadd.f32 %v4571_v33, %v4570_v18  ;;  %v10675_v18 = vld [vmem:[%s11647_s9 + $0x40] sm:$0xff] }
 0x5f3   : > { %v4173_v0 = vpop.trf.xlu1 }
 0x5f4   : > { %8377 = vmatprep.mubr.msk.f32.mxu0 %vm500_vm0, %v4173_v0  ;;  %v4558_v48 = vsel %vm500_vm0, %v4173_v0, 0.0 }
 0x5f5   : > { %v4559_v47 = vadd.f32 %v4558_v48, %v4557_v26 }
 0x5f7   : > { %v4174_v5 = vpop.trf.xlu1 }
 0x5f8   : > { %8378 = vmatmul.mubr.msk.f32.gmra.mrb[80].mxu0 %vm500_vm0, %v4174_v5  ;;  %v4573_v43 = vsel %vm500_vm0, %v4174_v5, 0.0 }
 0x5f9   : > { %v4574_v62 = vadd.f32 %v4573_v43, %v4572_v40 }
 0x5fb   : > { %v4175_v60 = vpop.trf.xlu1 }
 0x5fc   : > { %v4560_v24 = vsel %vm500_vm0, %v4175_v60, 0.0  ;;  %8380 = vmatprep.mubr.msk.f32.mxu0 %vm500_vm0, %v4175_v60 }
 0x5fd   : > { %v4561_v59 = vadd.f32 %v4560_v24, %v4559_v47 }
 0x5ff   : > { %v4577_v14 = vmul.f32 0.125, %v4561_v59  ;;  %v4176_v23 = vpop.trf.xlu1 }
 0x600   : > { %v4575_v44 = vsel %vm500_vm0, %v4176_v23, 0.0  ;;  %8381 = vmatmul.mubr.msk.f32.gmra.mrb[82].mxu0 %vm500_vm0, %v4176_v23 }
 0x601   : > { %v4576_v6 = vadd.f32 %v4575_v44, %v4574_v62  ;;  %8387 = vmatprep.mubr.msk.f32.mxu0 %vm500_vm0, %v10478_v10  ;;  %8415 = vmatprep.mubr.msk.f32.mxu1 %vm500_vm0, %v4577_v14  ;;  %v10685_v62 = vld [vmem:[%s11647_s9 + $0x58] sm:$0xff]  ;;  %v10693_v44 = vld [vmem:[%s11647_s9 + $0x50] sm:$0xff] }
 0x603   : > { %v4578_v57 = vmul.f32 0.125, %v4576_v6 }
 0x604   : > { %8388 = vmatmul.mubr.msk.f32.vlgmr.msra.gmra.mrb[84].mxu0 %vm500_vm0, %v10486_v35 }
 0x605   : > { %8390 = vmatprep.mubr.msk.f32.mxu0 %vm500_vm0, %v10495_v36  ;;  %8416 = vmatmul.mubr.msk.f32.vlgmr.msra.gmra.mrb[130].mxu1 %vm500_vm0, %v4578_v57 }
 0x606   : > { %8535 = vmatpush3.bf16.msra.mxu0 %v9251_v63 }
 0x607   : > { %8422 = vmatprep.subr.mxu0 %v8881_v21 }
 0x608   : > { %8391 = vmatmul.mubr.msk.f32.gmra.mrb[86].mxu0 %vm500_vm0, %v10501_v12 }
 0x609   : > { %8393 = vmatprep.mubr.msk.f32.mxu0 %vm500_vm0, %v10507_v41 }
 0x60a   : > { %8423 = vmatpush3.msra.mxu0 %v8881_v21 }
 0x60c   : > { %8394 = vmatmul.mubr.msk.f32.gmra.mrb[88].mxu0 %vm500_vm0, %v10513_v20  ;;  %v10616_v20 = vld [vmem:[%s11647_s9 + $0x10] sm:$0xff] }
 0x60d   : > { %8396 = vmatprep.mubr.msk.f32.mxu0 %vm500_vm0, %v10518_v58 }
 0x610   : > { %8397 = vmatmul.mubr.msk.f32.gmra.mrb[90].mxu0 %vm500_vm0, %v10522_v11 }
 0x611   : > { %8399 = vmatprep.mubr.msk.f32.mxu0 %vm500_vm0, %v4169_v17 }
 0x614   : > { %8400 = vmatmul.mubr.msk.f32.gmra.mrb[92].mxu0 %vm500_vm0, %v4170_v1 }
 0x615   : > { %8402 = vmatprep.mubr.msk.f32.mxu0 %vm500_vm0, %v4171_v56 }
 0x618   : > { %8403 = vmatmul.mubr.msk.f32.gmra.mrb[94].mxu0 %vm500_vm0, %v4172_v45  ;;  %v10626_v45 = vld [vmem:[%s11647_s9 + $0x28] sm:$0xff] }
 0x619   : > { %8405 = vmatprep.mubr.msk.f32.mxu0 %vm500_vm0, %v4173_v0 }
 0x61c   : > { %8406 = vmatmul.mubr.msk.f32.gmra.mrb[96].mxu0 %vm500_vm0, %v4174_v5 }
 0x61d   : > { %8408 = vmatprep.mubr.msk.f32.mxu0 %vm500_vm0, %v4175_v60 }
 0x620   : > { %8409 = vmatmul.mubr.msk.f32.gmra.mrb[98].mxu0 %vm500_vm0, %v4176_v23 }
 0x66e   : > { %v8309_v63 = vpop.f32.mrb[98].mxu1 }
 0x66f   : > { %v3860_v10 = vadd.f32 %v10228_v61, %v8309_v63  ;;  %v3854_v34 = vpop.f32.mrb[99].mxu1 }
 0x670   : > { %v3855_v35 = vadd.f32 %v10228_v61, %v3854_v34 }
 0x671   : > { %v4014_v46 = vmul.f32 %v3860_v10, %v9669_v22 }
 0x672   : > { %v4013_v49 = vmul.f32 %v3855_v35, %v9669_v22  ;;  %v8312_v36 = vpop.f32.mrb[100].mxu1  ;;  %v10703_v35 = vld [vmem:[%s11647_s9 + $0x68] sm:$0xff] }
 0x673   : > { %v4078_v2 = vadd.f32 %v10592_v50, %v4014_v46  ;;  %v3870_v42 = vadd.f32 %v10228_v61, %v8312_v36  ;;  %v3864_v12 = vpop.f32.mrb[101].mxu1  ;;  %v10711_v36 = vld [vmem:[%s11647_s9 + $0x60] sm:$0xff] }
 0x674   : > { %v4077_v7 = vadd.f32 %v10599_v39, %v4013_v49  ;;  %v3865_v41 = vadd.f32 %v10228_v61, %v3864_v12 }
 0x675   : > { %4111 = vst.msk [vmem:[#allocation4 + $0x208] sm:$0xff] %vm694_vm1, %v4078_v2  ;;  %v4016_v52 = vmul.f32 %v3870_v42, %v9669_v22 }
 0x676   : > { %4110 = vst.msk [vmem:[#allocation4 + $0x200] sm:$0xff] %vm694_vm1, %v4077_v7  ;;  %v4015_v58 = vmul.f32 %v3865_v41, %v9669_v22  ;;  %v8315_v11 = vpop.f32.mrb[102].mxu1 }
 0x677   : > { %v4080_v17 = vadd.f32 %v10608_v54, %v4016_v52  ;;  %v3880_v1 = vadd.f32 %v10228_v61, %v8315_v11  ;;  %v3874_v56 = vpop.f32.mrb[103].mxu1 }
 0x678   : > { %v4079_v38 = vadd.f32 %v10616_v20, %v4015_v58  ;;  %v3875_v31 = vadd.f32 %v10228_v61, %v3874_v56  ;;  %v10642_v61 = vld [vmem:[%s11646_s8] ss:$0 sm:$0xff]  ;;  %v10721_v58 = vld [vmem:[%s11647_s9 + $0x78] sm:$0xff] }
 0x679   : > { %4113 = vst.msk [vmem:[#allocation4 + $0x218] sm:$0xff] %vm694_vm1, %v4080_v17  ;;  %v4018_v3 = vmul.f32 %v3880_v1, %v9669_v22  ;;  %v10729_v1 = vld [vmem:[%s11647_s9 + $0x70] sm:$0xff] }
 0x67a   : > { %4112 = vst.msk [vmem:[#allocation4 + $0x210] sm:$0xff] %vm694_vm1, %v4079_v38  ;;  %v4017_v32 = vmul.f32 %v3875_v31, %v9669_v22  ;;  %v8318_v30 = vpop.f32.mrb[104].mxu1 }
 0x67b   : > { %v4082_v51 = vadd.f32 %v10626_v45, %v4018_v3  ;;  %v3890_v0 = vadd.f32 %v10642_v61, %v8318_v30  ;;  %v3884_v15 = vpop.f32.mrb[105].mxu1 }
 0x67c   : > { %v4081_v4 = vadd.f32 %v10634_v27, %v4017_v32  ;;  %v3885_v8 = vadd.f32 %v10642_v61, %v3884_v15 }
 0x67d   : > { %4115 = vst.msk [vmem:[#allocation4 + $0x228] sm:$0xff] %vm694_vm1, %v4082_v51  ;;  %v4020_v28 = vmul.f32 %v3890_v0, %v9669_v22  ;;  %v10739_v51 = vld [vmem:[%s11647_s9 + $0x88] sm:$0xff] }
 0x67e   : > { %4114 = vst.msk [vmem:[#allocation4 + $0x220] sm:$0xff] %vm694_vm1, %v4081_v4  ;;  %v4019_v55 = vmul.f32 %v3885_v8, %v9669_v22  ;;  %v8321_v13 = vpop.f32.mrb[106].mxu1  ;;  %v10747_v4 = vld [vmem:[%s11647_s9 + $0x80] sm:$0xff] }
 0x67f   : > { %v4084_v29 = vadd.f32 %v10649_v19, %v4020_v28  ;;  %v3900_v5 = vadd.f32 %v10642_v61, %v8321_v13  ;;  %v3894_v37 = vpop.f32.mrb[107].mxu1 }
 0x680   : > { %v4083_v48 = vadd.f32 %v10657_v25, %v4019_v55  ;;  %v3895_v26 = vadd.f32 %v10642_v61, %v3894_v37  ;;  %v10757_v37 = vld [vmem:[%s11647_s9 + $0x98] sm:$0xff] }
 0x681   : > { %4117 = vst.msk [vmem:[#allocation4 + $0x238] sm:$0xff] %vm694_vm1, %v4084_v29  ;;  %v4022_v33 = vmul.f32 %v3900_v5, %v9669_v22 }
 0x682   : > { %4116 = vst.msk [vmem:[#allocation4 + $0x230] sm:$0xff] %vm694_vm1, %v4083_v48  ;;  %v4021_v47 = vmul.f32 %v3895_v26, %v9669_v22  ;;  %v8324_v60 = vpop.f32.mrb[108].mxu1 }
 0x683   : > { %v4086_v43 = vadd.f32 %v10667_v9, %v4022_v33  ;;  %v3910_v24 = vadd.f32 %v10642_v61, %v8324_v60  ;;  %v3904_v40 = vpop.f32.mrb[109].mxu1  ;;  %v10765_v33 = vld [vmem:[%s11647_s9 + $0x90] sm:$0xff] }
 0x684   : > { %v4085_v59 = vadd.f32 %v10675_v18, %v4021_v47  ;;  %v3905_v14 = vadd.f32 %v10642_v61, %v3904_v40 }
 0x685   : > { %4119 = vst.msk [vmem:[#allocation4 + $0x248] sm:$0xff] %vm694_vm1, %v4086_v43  ;;  %v4024_v23 = vmul.f32 %v3910_v24, %v9669_v22 }
 0x686   : > { %4118 = vst.msk [vmem:[#allocation4 + $0x240] sm:$0xff] %vm694_vm1, %v4085_v59  ;;  %v4023_v6 = vmul.f32 %v3905_v14, %v9669_v22  ;;  %v8327_v57 = vpop.f32.mrb[110].mxu1  ;;  %v10775_v14 = vld [vmem:[%s11647_s9 + $0xa8] sm:$0xff] }
 0x687   : > { %v4088_v21 = vadd.f32 %v10685_v62, %v4024_v23  ;;  %v3920_v63 = vadd.f32 %v10642_v61, %v8327_v57  ;;  %v3914_v10 = vpop.f32.mrb[111].mxu1  ;;  %v10783_v57 = vld [vmem:[%s11647_s9 + $0xa0] sm:$0xff] }
 0x688   : > { %v4087_v34 = vadd.f32 %v10693_v44, %v4023_v6  ;;  %v3915_v46 = vadd.f32 %v10642_v61, %v3914_v10 }
 0x689   : > { %4121 = vst.msk [vmem:[#allocation4 + $0x258] sm:$0xff] %vm694_vm1, %v4088_v21  ;;  %v4026_v49 = vmul.f32 %v3920_v63, %v9669_v22 }
 0x68a   : > { %4120 = vst.msk [vmem:[#allocation4 + $0x250] sm:$0xff] %vm694_vm1, %v4087_v34  ;;  %v4025_v2 = vmul.f32 %v3915_v46, %v9669_v22  ;;  %v8330_v42 = vpop.f32.mrb[112].mxu1 }
 0x68b   : > { %v4090_v12 = vadd.f32 %v10703_v35, %v4026_v49  ;;  %v3930_v7 = vadd.f32 %v10642_v61, %v8330_v42  ;;  %v3924_v41 = vpop.f32.mrb[113].mxu1  ;;  %v10793_v42 = vld [vmem:[%s11647_s9 + $0xb8] sm:$0xff] }
 0x68c   : > { %v4089_v52 = vadd.f32 %v10711_v36, %v4025_v2  ;;  %v3925_v11 = vadd.f32 %v10642_v61, %v3924_v41 }
 0x68d   : > { %4123 = vst.msk [vmem:[#allocation4 + $0x268] sm:$0xff] %vm694_vm1, %v4090_v12  ;;  %v4028_v17 = vmul.f32 %v3930_v7, %v9669_v22  ;;  %v10799_v7 = vld [vmem:[%s11640_s2] ss:$0 sm:$0xff] }
 0x68e   : > { %4122 = vst.msk [vmem:[#allocation4 + $0x260] sm:$0xff] %vm694_vm1, %v4089_v52  ;;  %v4027_v56 = vmul.f32 %v3925_v11, %v9669_v22  ;;  %v8333_v38 = vpop.f32.mrb[114].mxu1 }
 0x68f   : > { %v4092_v31 = vadd.f32 %v10721_v58, %v4028_v17  ;;  %v3940_v3 = vadd.f32 %v10642_v61, %v8333_v38  ;;  %v3934_v32 = vpop.f32.mrb[115].mxu1  ;;  %v10807_v17 = vld [vmem:[%s11647_s9 + $0xb0] sm:$0xff] }
 0x690   : > { %v4091_v30 = vadd.f32 %v10729_v1, %v4027_v56  ;;  %v3935_v0 = vadd.f32 %v10642_v61, %v3934_v32 }
 0x691   : > { %4125 = vst.msk [vmem:[#allocation4 + $0x278] sm:$0xff] %vm694_vm1, %v4092_v31  ;;  %v4030_v15 = vmul.f32 %v3940_v3, %v9669_v22 }
 0x692   : > { %4124 = vst.msk [vmem:[#allocation4 + $0x270] sm:$0xff] %vm694_vm1, %v4091_v30  ;;  %v4029_v8 = vmul.f32 %v3935_v0, %v9669_v22  ;;  %v8336_v28 = vpop.f32.mrb[116].mxu1 }
 0x693   : > { %v4094_v55 = vadd.f32 %v10739_v51, %v4030_v15  ;;  %v3950_v13 = vadd.f32 %v10642_v61, %v8336_v28  ;;  %v3944_v29 = vpop.f32.mrb[117].mxu1  ;;  %v10820_v15 = vld [vmem:[%s11647_s9 + $0xc8] sm:$0xff] }
 0x694   : > { %v4093_v5 = vadd.f32 %v10747_v4, %v4029_v8  ;;  %v3945_v48 = vadd.f32 %v10642_v61, %v3944_v29 }
 0x695   : > { %4127 = vst.msk [vmem:[#allocation4 + $0x288] sm:$0xff] %vm694_vm1, %v4094_v55  ;;  %v4032_v26 = vmul.f32 %v3950_v13, %v9669_v22  ;;  %v10828_v55 = vld [vmem:[%s11647_s9 + $0xc0] sm:$0xff] }
 0x696   : > { %4126 = vst.msk [vmem:[#allocation4 + $0x280] sm:$0xff] %vm694_vm1, %v4093_v5  ;;  %v4031_v47 = vmul.f32 %v3945_v48, %v9669_v22  ;;  %v8339_v60 = vpop.f32.mrb[118].mxu1 }
 0x697   : > { %v4096_v43 = vadd.f32 %v10757_v37, %v4032_v26  ;;  %v3960_v24 = vadd.f32 %v10642_v61, %v8339_v60  ;;  %v3954_v40 = vpop.f32.mrb[119].mxu1 }
 0x698   : > { %v4095_v59 = vadd.f32 %v10765_v33, %v4031_v47  ;;  %v3955_v23 = vadd.f32 %v10642_v61, %v3954_v40 }
 0x699   : > { %4129 = vst.msk [vmem:[#allocation4 + $0x298] sm:$0xff] %vm694_vm1, %v4096_v43  ;;  %v4034_v6 = vmul.f32 %v3960_v24, %v9669_v22  ;;  %v10838_v43 = vld [vmem:[%s11647_s9 + $0xd8] sm:$0xff] }
 0x69a   : > { %4128 = vst.msk [vmem:[#allocation4 + $0x290] sm:$0xff] %vm694_vm1, %v4095_v59  ;;  %v4033_v21 = vmul.f32 %v3955_v23, %v9669_v22  ;;  %v8342_v63 = vpop.f32.mrb[120].mxu1 }
 0x69b   : > { %v4098_v10 = vadd.f32 %v10775_v14, %v4034_v6  ;;  %v3970_v34 = vadd.f32 %v10642_v61, %v8342_v63  ;;  %v3964_v46 = vpop.f32.mrb[121].mxu1  ;;  %v8361_v49 = vpop.f32.mrb[68].mxu0  ;;  %v10847_v6 = vld [vmem:[%s11647_s9 + $0xd0] sm:$0xff] }
 0x69c   : > { %v4097_v2 = vadd.f32 %v10783_v57, %v4033_v21  ;;  %v3965_v12 = vadd.f32 %v10642_v61, %v3964_v46  ;;  %v4297_v41 = vadd.f32 %v10799_v7, %v8361_v49  ;;  %v4291_v52 = vpop.f32.mrb[69].mxu0 }
 0x69d   : > { %4131 = vst.msk [vmem:[#allocation4 + $0x2a8] sm:$0xff] %vm694_vm1, %v4098_v10  ;;  %v4036_v11 = vmul.f32 %v3970_v34, %v9669_v22  ;;  %v4292_v56 = vadd.f32 %v10799_v7, %v4291_v52 }
 0x69e   : > { %4130 = vst.msk [vmem:[#allocation4 + $0x2a0] sm:$0xff] %vm694_vm1, %v4097_v2  ;;  %v4035_v38 = vmul.f32 %v3965_v12, %v9669_v22  ;;  %4371 = vst.msk [vmem:[#allocation2 + $0x188] sm:$0xff] %vm694_vm1, %v4297_v41  ;;  %v8345_v31 = vpop.f32.mrb[122].mxu1  ;;  %v10860_v12 = vld [vmem:[%s11647_s9 + $0xe8] sm:$0xff] }
 0x69f   : > { %v4100_v3 = vadd.f32 %v10793_v42, %v4036_v11  ;;  %4370 = vst.msk [vmem:[#allocation2 + $0x180] sm:$0xff] %vm694_vm1, %v4292_v56  ;;  %v3980_v32 = vadd.f32 %v10642_v61, %v8345_v31  ;;  %v3974_v30 = vpop.f32.mrb[123].mxu1  ;;  %v10868_v11 = vld [vmem:[%s11647_s9 + $0xe0] sm:$0xff] }
 0x6a0   : > { %v4099_v0 = vadd.f32 %v10807_v17, %v4035_v38  ;;  %v3975_v8 = vadd.f32 %v10642_v61, %v3974_v30 }
 0x6a1   : > { %4133 = vst.msk [vmem:[#allocation4 + $0x2b8] sm:$0xff] %vm694_vm1, %v4100_v3  ;;  %v4038_v28 = vmul.f32 %v3980_v32, %v9669_v22 }
 0x6a2   : > { %4132 = vst.msk [vmem:[#allocation4 + $0x2b0] sm:$0xff] %vm694_vm1, %v4099_v0  ;;  %v4037_v13 = vmul.f32 %v3975_v8, %v9669_v22  ;;  %v8348_v29 = vpop.f32.mrb[124].mxu1  ;;  %v10878_v8 = vld [vmem:[%s11647_s9 + $0xf8] sm:$0xff] }
 0x6a3   : > { %v4102_v5 = vadd.f32 %v10820_v15, %v4038_v28  ;;  %v3990_v48 = vadd.f32 %v10642_v61, %v8348_v29  ;;  %v3984_v26 = vpop.f32.mrb[125].mxu1  ;;  %v8364_v47 = vpop.f32.mrb[70].mxu0 }
 0x6a4   : > { %v4101_v60 = vadd.f32 %v10828_v55, %v4037_v13  ;;  %v3985_v24 = vadd.f32 %v10642_v61, %v3984_v26  ;;  %v4307_v40 = vadd.f32 %v10799_v7, %v8364_v47  ;;  %v4301_v59 = vpop.f32.mrb[71].mxu0 }
 0x6a5   : > { %4135 = vst.msk [vmem:[#allocation4 + $0x2c8] sm:$0xff] %vm694_vm1, %v4102_v5  ;;  %v4040_v23 = vmul.f32 %v3990_v48, %v9669_v22  ;;  %v4302_v21 = vadd.f32 %v10799_v7, %v4301_v59  ;;  %v10887_v48 = vld [vmem:[%s11647_s9 + $0xf0] sm:$0xff] }
 0x6a6   : > { %4134 = vst.msk [vmem:[#allocation4 + $0x2c0] sm:$0xff] %vm694_vm1, %v4101_v60  ;;  %v4039_v63 = vmul.f32 %v3985_v24, %v9669_v22  ;;  %4373 = vst.msk [vmem:[#allocation2 + $0x198] sm:$0xff] %vm694_vm1, %v4307_v40  ;;  %v8351_v10 = vpop.f32.mrb[126].mxu1 }
 0x6a7   : > { %v4104_v34 = vadd.f32 %v10838_v43, %v4040_v23  ;;  %4372 = vst.msk [vmem:[#allocation2 + $0x190] sm:$0xff] %vm694_vm1, %v4302_v21  ;;  %v4000_v46 = vadd.f32 %v10642_v61, %v8351_v10  ;;  %v3994_v49 = vpop.f32.mrb[127].mxu1 }
 0x6a8   : > { %v4103_v2 = vadd.f32 %v10847_v6, %v4039_v63  ;;  %v3995_v41 = vadd.f32 %v10642_v61, %v3994_v49 }
 0x6a9   : > { %4137 = vst.msk [vmem:[#allocation4 + $0x2d8] sm:$0xff] %vm694_vm1, %v4104_v34  ;;  %v4042_v52 = vmul.f32 %v4000_v46, %v9669_v22 }
 0x6aa   : > { %4136 = vst.msk [vmem:[#allocation4 + $0x2d0] sm:$0xff] %vm694_vm1, %v4103_v2  ;;  %v4041_v56 = vmul.f32 %v3995_v41, %v9669_v22  ;;  %v8354_v38 = vpop.f32.mrb[128].mxu1 }
 0x6ab   : > { %v4106_v31 = vadd.f32 %v10860_v12, %v4042_v52  ;;  %v4010_v3 = vadd.f32 %v10642_v61, %v8354_v38  ;;  %v4004_v32 = vpop.f32.mrb[129].mxu1  ;;  %v8367_v30 = vpop.f32.mrb[72].mxu0 }
 0x6ac   : > { %v4105_v0 = vadd.f32 %v10868_v11, %v4041_v56  ;;  %v4005_v28 = vadd.f32 %v10642_v61, %v4004_v32  ;;  %v4317_v13 = vadd.f32 %v10799_v7, %v8367_v30  ;;  %v4311_v29 = vpop.f32.mrb[73].mxu0 }
 0x6ad   : > { %4139 = vst.msk [vmem:[#allocation4 + $0x2e8] sm:$0xff] %vm694_vm1, %v4106_v31  ;;  %v4044_v5 = vmul.f32 %v4010_v3, %v9669_v22  ;;  %v4312_v26 = vadd.f32 %v10799_v7, %v4311_v29  ;;  %v8884_v29 = vld [vmem:[%s11642_s4] ss:$0 sm:$0xff] }
 0x6ae   : > { %4138 = vst.msk [vmem:[#allocation4 + $0x2e0] sm:$0xff] %vm694_vm1, %v4105_v0  ;;  %v4043_v47 = vmul.f32 %v4005_v28, %v9669_v22  ;;  %4375 = vst.msk [vmem:[#allocation2 + $0x1a8] sm:$0xff] %vm694_vm1, %v4317_v13 }
 0x6af   : > { %v4108_v60 = vadd.f32 %v10878_v8, %v4044_v5  ;;  %4374 = vst.msk [vmem:[#allocation2 + $0x1a0] sm:$0xff] %vm694_vm1, %v4312_v26 }
 0x6b0   : > { %v4107_v24 = vadd.f32 %v10887_v48, %v4043_v47 }
 0x6b1   : > { %4141 = vst.msk [vmem:[#allocation4 + $0x2f8] sm:$0xff] %vm694_vm1, %v4108_v60 }
 0x6b2   : > { %4140 = vst.msk [vmem:[#allocation4 + $0x2f0] sm:$0xff] %vm694_vm1, %v4107_v24 }
 0x6b3   : > { %v8370_v40 = vpop.f32.mrb[74].mxu0 }
 0x6b4   : > { %v4327_v59 = vadd.f32 %v10799_v7, %v8370_v40  ;;  %v4321_v23 = vpop.f32.mrb[75].mxu0 }
 0x6b5   : > { %v4322_v21 = vadd.f32 %v10799_v7, %v4321_v23 }
 0x6b6   : > { %4377 = vst.msk [vmem:[#allocation2 + $0x1b8] sm:$0xff] %vm694_vm1, %v4327_v59 }
 0x6b7   : > { %4376 = vst.msk [vmem:[#allocation2 + $0x1b0] sm:$0xff] %vm694_vm1, %v4322_v21 }
 0x6bb   : > { %v8373_v63 = vpop.f32.mrb[76].mxu0 }
 0x6bc   : > { %v4337_v10 = vadd.f32 %v10799_v7, %v8373_v63  ;;  %v4331_v34 = vpop.f32.mrb[77].mxu0 }
 0x6bd   : > { %v4332_v46 = vadd.f32 %v10799_v7, %v4331_v34 }
 0x6be   : > { %4379 = vst.msk [vmem:[#allocation2 + $0x1c8] sm:$0xff] %vm694_vm1, %v4337_v10 }
 0x6bf   : > { %4378 = vst.msk [vmem:[#allocation2 + $0x1c0] sm:$0xff] %vm694_vm1, %v4332_v46 }
 0x6c3   : > { %v8376_v49 = vpop.f32.mrb[78].mxu0 }
 0x6c4   : > { %v4347_v2 = vadd.f32 %v10799_v7, %v8376_v49  ;;  %v4341_v41 = vpop.f32.mrb[79].mxu0 }
 0x6c5   : > { %v4342_v52 = vadd.f32 %v10799_v7, %v4341_v41 }
 0x6c6   : > { %4381 = vst.msk [vmem:[#allocation2 + $0x1d8] sm:$0xff] %vm694_vm1, %v4347_v2 }
 0x6c7   : > { %4380 = vst.msk [vmem:[#allocation2 + $0x1d0] sm:$0xff] %vm694_vm1, %v4342_v52 }
 0x6cb   : > { %v8379_v56 = vpop.f32.mrb[80].mxu0 }
 0x6cc   : > { %v4357_v38 = vadd.f32 %v10799_v7, %v8379_v56  ;;  %v4351_v31 = vpop.f32.mrb[81].mxu0 }
 0x6cd   : > { %v4352_v3 = vadd.f32 %v10799_v7, %v4351_v31 }
 0x6ce   : > { %4383 = vst.msk [vmem:[#allocation2 + $0x1e8] sm:$0xff] %vm694_vm1, %v4357_v38 }
 0x6cf   : > { %4382 = vst.msk [vmem:[#allocation2 + $0x1e0] sm:$0xff] %vm694_vm1, %v4352_v3 }
 0x6d3   : > { %v8382_v32 = vpop.f32.mrb[82].mxu0 }
 0x6d4   : > { %v4367_v30 = vadd.f32 %v10799_v7, %v8382_v32  ;;  %v4361_v0 = vpop.f32.mrb[83].mxu0 }
 0x6d5   : > { %v4362_v28 = vadd.f32 %v10799_v7, %v4361_v0  ;;  %v8885_v7 = vld [vmem:[%s11644_s6] ss:$0 sm:$0xff] }
 0x6d6   : > { %4385 = vst.msk [vmem:[#allocation2 + $0x1f8] sm:$0xff] %vm694_vm1, %v4367_v30 }
 0x6d7   : > { %4384 = vst.msk [vmem:[#allocation2 + $0x1f0] sm:$0xff] %vm694_vm1, %v4362_v28  ;;  %v8389_v13 = vpop.f32.mrb[84].mxu0 }
 0x6d8   : > { %v4458_v5 = vadd.f32 %v8884_v29, %v8389_v13  ;;  %v4452_v26 = vpop.f32.mrb[85].mxu0  ;;  %v8417_v47 = vpop.f32.mrb[130].mxu1 }
 0x6d9   : > { %v4453_v60 = vadd.f32 %v8884_v29, %v4452_v26  ;;  %v4651_v24 = vpop.f32.mrb[131].mxu1  ;;  %v10927_v10 = vadd.f32 %v8885_v7, %v8417_v47 }
 0x6da   : > { %4532 = vst.msk [vmem:[#allocation3 + $0x188] sm:$0xff] %vm862_vm2, %v4458_v5  ;;  %v4652_v40 = vadd.f32 %v8885_v7, %v4651_v24 }
 0x6db   : > { %4531 = vst.msk [vmem:[#allocation3 + $0x180] sm:$0xff] %vm862_vm2, %v4453_v60  ;;  %v8392_v59 = vpop.f32.mrb[86].mxu0 }
 0x6dc   : > { %v4468_v23 = vadd.f32 %v8884_v29, %v8392_v59  ;;  %v4462_v21 = vpop.f32.mrb[87].mxu0  ;;  %4840 = vrot.lane.b32.xlu0 %v4652_v40, %s8983_s26 }
 0x6dd   : > { %v4463_v63 = vadd.f32 %v8884_v29, %v4462_v21 }
 0x6de   : > { %4534 = vst.msk [vmem:[#allocation3 + $0x198] sm:$0xff] %vm862_vm2, %v4468_v23 }
 0x6df   : > { %4533 = vst.msk [vmem:[#allocation3 + $0x190] sm:$0xff] %vm862_vm2, %v4463_v63  ;;  %v8395_v34 = vpop.f32.mrb[88].mxu0  ;;  %v4669_v63 = vrot.slane %v4652_v40, %v11691_v16 }
 0x6e0   : > { %v4472_v46 = vpop.f32.mrb[89].mxu0  ;;  %4842 = vrot.lane.b32.xlu0 %v10927_v10, %s8983_s26  ;;  %v4478_v41 = vadd.f32 %v8884_v29, %v8395_v34 }
 0x6e1   : > { %v4473_v52 = vadd.f32 %v8884_v29, %v4472_v46  ;;  %v4677_v34 = vcombine.high %v4669_v63, %v4669_v63  ;;  %v4685_v46 = vrot.slane %v4669_v63, %v11691_v16 }
 0x6e2   : > { %4536 = vst.msk [vmem:[#allocation3 + $0x1a8] sm:$0xff] %vm862_vm2, %v4478_v41 }
 0x6e3   : > { %v8398_v49 = vpop.f32.mrb[90].mxu0  ;;  %4535 = vst.msk [vmem:[#allocation3 + $0x1a0] sm:$0xff] %vm862_vm2, %v4473_v52 }
 0x6e4   : > { %v4482_v2 = vpop.f32.mrb[91].mxu0  ;;  %v4488_v56 = vadd.f32 %v8884_v29, %v8398_v49  ;;  %v4699_v49 = vrot.slane %v4677_v34, %v11691_v16 }
 0x6e5   : > { %v4483_v38 = vadd.f32 %v8884_v29, %v4482_v2  ;;  %v4763_v2 = vrot.slane %v4685_v46, %v11692_v53 }
 0x6e6   : > { %4538 = vst.msk [vmem:[#allocation3 + $0x1b8] sm:$0xff] %vm862_vm2, %v4488_v56  ;;  %v4662_v56 = vcombine.high %v4652_v40, %v4652_v40 }
 0x6e7   : > { %v8401_v31 = vpop.f32.mrb[92].mxu0  ;;  %4537 = vst.msk [vmem:[#allocation3 + $0x1b0] sm:$0xff] %vm862_vm2, %v4483_v38  ;;  %v4707_v38 = vcombine.high %v4685_v46, %v4685_v46 }
 0x6e8   : > { %v4498_v3 = vadd.f32 %v8884_v29, %v8401_v31  ;;  %v4492_v32 = vpop.f32.mrb[93].mxu0 }
 0x6e9   : > { %v4493_v30 = vadd.f32 %v8884_v29, %v4492_v32 }
 0x6ea   : > { %4540 = vst.msk [vmem:[#allocation3 + $0x1c8] sm:$0xff] %vm862_vm2, %v4498_v3 }
 0x6eb   : > { %4539 = vst.msk [vmem:[#allocation3 + $0x1c0] sm:$0xff] %vm862_vm2, %v4493_v30  ;;  %v8404_v0 = vpop.f32.mrb[94].mxu0  ;;  %v4676_v30 = vrot.slane %v4662_v56, %v11691_v16 }
 0x6ec   : > { %v4508_v28 = vadd.f32 %v8884_v29, %v8404_v0  ;;  %v4502_v13 = vpop.f32.mrb[95].mxu0  ;;  %v4709_v0 = vcombine.high %v4699_v49, %v4699_v49 }
 0x6ed   : > { %v4503_v5 = vadd.f32 %v8884_v29, %v4502_v13 }
 0x6ee   : > { %4542 = vst.msk [vmem:[#allocation3 + $0x1d8] sm:$0xff] %vm862_vm2, %v4508_v28  ;;  %v4771_v28 = vrot.slane %v4707_v38, %v11692_v53 }
 0x6ef   : > { %4541 = vst.msk [vmem:[#allocation3 + $0x1d0] sm:$0xff] %vm862_vm2, %v4503_v5  ;;  %v8407_v26 = vpop.f32.mrb[96].mxu0  ;;  %v4678_v5 = vcombine.high %v4676_v30, %v4676_v30 }
 0x6f0   : > { %v4518_v47 = vadd.f32 %v8884_v29, %v8407_v26  ;;  %v4512_v60 = vpop.f32.mrb[97].mxu0  ;;  %v4692_v26 = vrot.slane %v4676_v30, %v11691_v16 }
 0x6f1   : > { %v4513_v24 = vadd.f32 %v8884_v29, %v4512_v60 }
 0x6f2   : > { %4544 = vst.msk [vmem:[#allocation3 + $0x1e8] sm:$0xff] %vm862_vm2, %v4518_v47  ;;  %v4775_v47 = vrot.slane %v4709_v0, %v11692_v53 }
 0x6f3   : > { %4543 = vst.msk [vmem:[#allocation3 + $0x1e0] sm:$0xff] %vm862_vm2, %v4513_v24  ;;  %v8410_v7 = vpop.f32.mrb[98].mxu0 }
 0x6f4   : > { %v4528_v59 = vadd.f32 %v8884_v29, %v8410_v7  ;;  %v4522_v23 = vpop.f32.mrb[99].mxu0 }
 0x6f5   : > { %v4523_v21 = vadd.f32 %v8884_v29, %v4522_v23  ;;  %v4767_v29 = vrot.slane %v4699_v49, %v11692_v53  ;;  %v4779_v23 = vrot.slane %v4692_v26, %v11692_v53  ;;  %v4708_v49 = vcombine.high %v4692_v26, %v4692_v26 }
 0x6f6   : > { %4546 = vst.msk [vmem:[#allocation3 + $0x1f8] sm:$0xff] %vm862_vm2, %v4528_v59  ;;  %v4706_v59 = vrot.slane %v4678_v5, %v11691_v16 }
 0x6f7   : > { %4545 = vst.msk [vmem:[#allocation3 + $0x1f0] sm:$0xff] %vm862_vm2, %v4523_v21  ;;  %v4787_v30 = vrot.slane %v4708_v49, %v11692_v53 }
 0x74e   : > { %v10949_v41 = vpop.permute.xlu0 %4840 }
 0x74f   : > { %v4846_v52 = vsub.f32 %v4763_v2, %v10949_v41  ;;  %v4848_v3 = vsub.f32 %v4767_v29, %v10949_v41  ;;  %v4850_v40 = vsub.f32 %v4771_v28, %v10949_v41  ;;  %v4852_v24 = vsub.f32 %v4775_v47, %v10949_v41 }
 0x750   : > { %v4854_v63 = vsub.f32 %v4779_v23, %v10949_v41 }
 0x751   : > { %8812 = vtanh.f32 %v4846_v52 }
 0x752   : > { %v10953_v31 = vpop.permute.xlu0 %4842 }
 0x753   : > { %v4847_v32 = vsub.f32 %v4763_v2, %v10953_v31  ;;  %v4849_v13 = vsub.f32 %v4767_v29, %v10953_v31  ;;  %v4851_v60 = vsub.f32 %v4771_v28, %v10953_v31  ;;  %v4853_v21 = vsub.f32 %v4775_v47, %v10953_v31 }
 0x754   : > { %v4783_v2 = vrot.slane %v4706_v59, %v11692_v53  ;;  %v4855_v52 = vsub.f32 %v4779_v23, %v10953_v31  ;;  %v4858_v28 = vsub.f32 %v4787_v30, %v10949_v41 }
 0x755   : > { %8814 = vtanh.f32 %v4847_v32  ;;  %v4710_v32 = vcombine.high %v4706_v59, %v4706_v59 }
 0x756   : > { %8816 = vtanh.f32 %v4848_v3  ;;  %v4856_v56 = vsub.f32 %v4783_v2, %v10949_v41  ;;  %v4718_v3 = vrot.slane %v10927_v10, %v11691_v16  ;;  %v4857_v0 = vsub.f32 %v4783_v2, %v10953_v31 }
 0x757   : > { %8818 = vtanh.f32 %v4849_v13  ;;  %v4791_v47 = vrot.slane %v4710_v32, %v11692_v53  ;;  %v4711_v2 = vcombine.high %v10927_v10, %v10927_v10 }
 0x758   : > { %8820 = vtanh.f32 %v4850_v40  ;;  %v4726_v5 = vcombine.high %v4718_v3, %v4718_v3  ;;  %v4734_v26 = vrot.slane %v4718_v3, %v11691_v16 }
 0x759   : > { %8822 = vtanh.f32 %v4851_v60  ;;  %v4859_v60 = vsub.f32 %v4787_v30, %v10953_v31  ;;  %v4725_v30 = vrot.slane %v4711_v2, %v11691_v16 }
 0x75a   : > { %8824 = vtanh.f32 %v4852_v24  ;;  %v4860_v24 = vsub.f32 %v4791_v47, %v10949_v41  ;;  %v4748_v23 = vrot.slane %v4726_v5, %v11691_v16 }
 0x75b   : > { %v8813_v7 = vpop.eup %8812  ;;  %8826 = vtanh.f32 %v4853_v21  ;;  %v4795_v21 = vrot.slane %v4734_v26, %v11692_v53 }
 0x75c   : > { %8424 = vmatprep.mubr.msk.f32.mxu0 %vm1255_vm3, %v8813_v7  ;;  %8828 = vtanh.f32 %v4854_v63  ;;  %v4861_v63 = vsub.f32 %v4791_v47, %v10953_v31  ;;  %v4741_v47 = vrot.slane %v4725_v30, %v11691_v16 }
 0x75d   : > { %8830 = vtanh.f32 %v4855_v52  ;;  %v4756_v52 = vcombine.high %v4734_v26, %v4734_v26  ;;  %v4727_v26 = vcombine.high %v4725_v30, %v4725_v30 }
 0x75e   : > { %8832 = vtanh.f32 %v4856_v56  ;;  %v4799_v56 = vrot.slane %v4748_v23, %v11692_v53 }
 0x75f   : > { %v8815_v34 = vpop.eup %8814  ;;  %8834 = vtanh.f32 %v4857_v0  ;;  %v4758_v0 = vcombine.high %v4748_v23, %v4748_v23  ;;  %v4803_v10 = vrot.slane %v4756_v52, %v11692_v53  ;;  %v4757_v52 = vcombine.high %v4741_v47, %v4741_v47 }
 0x760   : > { %v8817_v46 = vpop.eup %8816  ;;  %8425 = vmatmul.mubr.msk.f32.vlgmr.msra.gmra.mrb[100].mxu0 %vm1255_vm3, %v8815_v34  ;;  %8836 = vtanh.f32 %v4858_v28  ;;  %v4862_v34 = vsub.f32 %v4795_v21, %v10949_v41  ;;  %v4865_v28 = vsub.f32 %v4799_v56, %v10953_v31 }
 0x761   : > { %8427 = vmatprep.mubr.msk.f32.mxu0 %vm1255_vm3, %v8817_v46  ;;  %v8819_v38 = vpop.eup %8818  ;;  %8838 = vtanh.f32 %v4859_v60  ;;  %v4807_v60 = vrot.slane %v4758_v0, %v11692_v53  ;;  %v4819_v30 = vrot.slane %v4757_v52, %v11692_v53 }
 0x762   : > { %v8821_v29 = vpop.eup %8820  ;;  %8840 = vtanh.f32 %v4860_v24  ;;  %v4867_v24 = vsub.f32 %v4803_v10, %v10953_v31 }
 0x763   : > { %v8823_v13 = vpop.eup %8822  ;;  %8842 = vtanh.f32 %v4861_v63  ;;  %v4811_v63 = vrot.slane %v4741_v47, %v11692_v53 }
 0x764   : > { %8428 = vmatmul.mubr.msk.f32.gmra.mrb[102].mxu0 %vm1255_vm3, %v8819_v38  ;;  %v8825_v40 = vpop.eup %8824  ;;  %v4863_v38 = vsub.f32 %v4795_v21, %v10953_v31  ;;  %8844 = vtanh.f32 %v4862_v34  ;;  %v4755_v21 = vrot.slane %v4727_v26, %v11691_v16  ;;  %v4869_v34 = vsub.f32 %v4807_v60, %v10953_v31 }
 0x765   : > { %8430 = vmatprep.mubr.msk.f32.mxu0 %vm1255_vm3, %v8821_v29  ;;  %v8827_v7 = vpop.eup %8826  ;;  %v4864_v29 = vsub.f32 %v4799_v56, %v10949_v41  ;;  %v4871_v16 = vsub.f32 %v4811_v63, %v10953_v31 }
 0x766   : > { %v8829_v59 = vpop.eup %8828  ;;  %8846 = vtanh.f32 %v4863_v38  ;;  %v4815_v56 = vrot.slane %v4755_v21, %v11692_v53 }
 0x767   : > { %v8831_v46 = vpop.eup %8830  ;;  %8848 = vtanh.f32 %v4864_v29 }
 0x768   : > { %8431 = vmatmul.mubr.msk.f32.gmra.mrb[104].mxu0 %vm1255_vm3, %v8823_v13  ;;  %v8833_v49 = vpop.eup %8832  ;;  %v4866_v13 = vsub.f32 %v4803_v10, %v10949_v41  ;;  %8850 = vtanh.f32 %v4865_v28  ;;  %v4872_v38 = vsub.f32 %v4815_v56, %v10949_v41  ;;  %v4873_v0 = vsub.f32 %v4815_v56, %v10953_v31 }
 0x769   : > { %8433 = vmatprep.mubr.msk.f32.mxu0 %vm1255_vm3, %v8825_v40  ;;  %v8835_v3 = vpop.eup %8834  ;;  %v4874_v10 = vsub.f32 %v4819_v30, %v10949_v41 }
 0x76a   : > { %v8837_v32 = vpop.eup %8836  ;;  %8852 = vtanh.f32 %v4866_v13 }
 0x76b   : > { %v8839_v40 = vpop.eup %8838  ;;  %8854 = vtanh.f32 %v4867_v24 }
 0x76c   : > { %8434 = vmatmul.mubr.msk.f32.gmra.mrb[106].mxu0 %vm1255_vm3, %v8827_v7  ;;  %v8841_v5 = vpop.eup %8840  ;;  %v4868_v7 = vsub.f32 %v4807_v60, %v10949_v41 }
 0x76d   : > { %8436 = vmatprep.mubr.msk.f32.mxu0 %vm1255_vm3, %v8829_v59  ;;  %v8843_v59 = vpop.eup %8842 }
 0x76e   : > { %v8845_v23 = vpop.eup %8844  ;;  %8856 = vtanh.f32 %v4868_v7 }
 0x76f   : > { %8858 = vtanh.f32 %v4869_v34 }
 0x770   : > { %8437 = vmatmul.mubr.msk.f32.gmra.mrb[108].mxu0 %vm1255_vm3, %v8831_v46  ;;  %v4870_v46 = vsub.f32 %v4811_v63, %v10949_v41 }
 0x771   : > { %8439 = vmatprep.mubr.msk.f32.mxu0 %vm1255_vm3, %v8833_v49  ;;  %v8847_v49 = vpop.eup %8846 }
 0x772   : > { %v8849_v2 = vpop.eup %8848  ;;  %8860 = vtanh.f32 %v4870_v46 }
 0x773   : > { %v8851_v29 = vpop.eup %8850  ;;  %8862 = vtanh.f32 %v4871_v16 }
 0x774   : > { %8440 = vmatmul.mubr.msk.f32.gmra.mrb[110].mxu0 %vm1255_vm3, %v8835_v3  ;;  %v8853_v3 = vpop.eup %8852  ;;  %8864 = vtanh.f32 %v4872_v38 }
 0x775   : > { %8442 = vmatprep.mubr.msk.f32.mxu0 %vm1255_vm3, %v8837_v32  ;;  %v4759_v32 = vcombine.high %v4755_v21, %v4755_v21  ;;  %v8855_v28 = vpop.eup %8854  ;;  %8866 = vtanh.f32 %v4873_v0 }
 0x776   : > { %8868 = vtanh.f32 %v4874_v10 }
 0x778   : > { %8443 = vmatmul.mubr.msk.f32.gmra.mrb[112].mxu0 %vm1255_vm3, %v8839_v40  ;;  %v8857_v13 = vpop.eup %8856  ;;  %v4823_v40 = vrot.slane %v4759_v32, %v11692_v53 }
 0x779   : > { %8445 = vmatprep.mubr.msk.f32.mxu0 %vm1255_vm3, %v8841_v5  ;;  %v4875_v5 = vsub.f32 %v4819_v30, %v10953_v31  ;;  %v8859_v47 = vpop.eup %8858 }
 0x77a   : > { %v4876_v26 = vsub.f32 %v4823_v40, %v10949_v41  ;;  %v4877_v24 = vsub.f32 %v4823_v40, %v10953_v31 }
 0x77b   : > { %8870 = vtanh.f32 %v4875_v5 }
 0x77c   : > { %8446 = vmatmul.mubr.msk.f32.gmra.mrb[114].mxu0 %vm1255_vm3, %v8843_v59  ;;  %v8861_v60 = vpop.eup %8860  ;;  %8872 = vtanh.f32 %v4876_v26 }
 0x77d   : > { %8448 = vmatprep.mubr.msk.f32.mxu0 %vm1255_vm3, %v8845_v23  ;;  %v8863_v53 = vpop.eup %8862  ;;  %8874 = vtanh.f32 %v4877_v24 }
 0x77e   : > { %v8865_v7 = vpop.eup %8864 }
 0x77f   : > { %v8867_v59 = vpop.eup %8866 }
 0x780   : > { %8449 = vmatmul.mubr.msk.f32.gmra.mrb[116].mxu0 %vm1255_vm3, %v8847_v49  ;;  %v8869_v23 = vpop.eup %8868 }
 0x781   : > { %8451 = vmatprep.mubr.msk.f32.mxu0 %vm1255_vm3, %v8849_v2 }
 0x784   : > { %8452 = vmatmul.mubr.msk.f32.gmra.mrb[118].mxu0 %vm1255_vm3, %v8851_v29 }
 0x785   : > { %8454 = vmatprep.mubr.msk.f32.mxu0 %vm1255_vm3, %v8853_v3  ;;  %v8871_v41 = vpop.eup %8870 }
 0x786   : > { %v8873_v21 = vpop.eup %8872 }
 0x787   : > { %v8875_v31 = vpop.eup %8874 }
 0x788   : > { %8455 = vmatmul.mubr.msk.f32.gmra.mrb[120].mxu0 %vm1255_vm3, %v8855_v28 }
 0x789   : > { %8457 = vmatprep.mubr.msk.f32.mxu0 %vm1255_vm3, %v8857_v13 }
 0x78c   : > { %8458 = vmatmul.mubr.msk.f32.gmra.mrb[122].mxu0 %vm1255_vm3, %v8859_v47 }
 0x78d   : > { %8460 = vmatprep.mubr.msk.f32.mxu0 %vm1255_vm3, %v8861_v60 }
 0x790   : > { %8461 = vmatmul.mubr.msk.f32.gmra.mrb[124].mxu0 %vm1255_vm3, %v8863_v53 }
 0x791   : > { %8463 = vmatprep.mubr.msk.f32.mxu0 %vm1255_vm3, %v8865_v7 }
 0x794   : > { %8464 = vmatmul.mubr.msk.f32.gmra.mrb[126].mxu0 %vm1255_vm3, %v8867_v59 }
 0x795   : > { %8466 = vmatprep.mubr.msk.f32.mxu0 %vm1255_vm3, %v8869_v23 }
 0x798   : > { %8467 = vmatmul.mubr.msk.f32.gmra.mrb[128].mxu0 %vm1255_vm3, %v8871_v41 }
 0x799   : > { %8469 = vmatprep.mubr.msk.f32.mxu0 %vm1255_vm3, %v8873_v21 }
 0x79c   : > { %8470 = vmatmul.mubr.msk.f32.gmra.mrb[130].mxu0 %vm1255_vm3, %v8875_v31 }
 0x833   : > { %v8426_v63 = vpop.f32.mrb[100].mxu0 }
 0x834   : > { %v5078_v34 = vadd.f32 %v10642_v61, %v8426_v63  ;;  %v5072_v46 = vpop.f32.mrb[101].mxu0 }
 0x835   : > { %v5073_v49 = vadd.f32 %v10642_v61, %v5072_v46 }
 0x836   : > { %v5232_v2 = vmul.f32 %v5078_v34, %v9669_v22 }
 0x837   : > { %v5231_v52 = vmul.f32 %v5073_v49, %v9669_v22  ;;  %v8429_v56 = vpop.f32.mrb[102].mxu0 }
 0x838   : > { %v5296_v16 = vadd.f32 %v5232_v2, %v10592_v50  ;;  %v5088_v38 = vadd.f32 %v10642_v61, %v8429_v56  ;;  %v5082_v29 = vpop.f32.mrb[103].mxu0 }
 0x839   : > { %v5295_v3 = vadd.f32 %v5231_v52, %v10599_v39  ;;  %v5083_v32 = vadd.f32 %v10642_v61, %v5082_v29 }
 0x83a   : > { %5329 = vst.msk [vmem:[#allocation4 + $0x308] sm:$0xff] %vm694_vm1, %v5296_v16  ;;  %v5234_v30 = vmul.f32 %v5088_v38, %v9669_v22 }
 0x83b   : > { %5328 = vst.msk [vmem:[#allocation4 + $0x300] sm:$0xff] %vm694_vm1, %v5295_v3  ;;  %v5233_v0 = vmul.f32 %v5083_v32, %v9669_v22  ;;  %v8432_v10 = vpop.f32.mrb[104].mxu0 }
 0x83c   : > { %v5298_v28 = vadd.f32 %v5234_v30, %v10608_v54  ;;  %v5098_v50 = vadd.f32 %v10642_v61, %v8432_v10  ;;  %v5092_v13 = vpop.f32.mrb[105].mxu0 }
 0x83d   : > { %v5297_v40 = vadd.f32 %v5233_v0, %v10616_v20  ;;  %v5093_v39 = vadd.f32 %v10642_v61, %v5092_v13 }
 0x83e   : > { %5331 = vst.msk [vmem:[#allocation4 + $0x318] sm:$0xff] %vm694_vm1, %v5298_v28  ;;  %v5236_v5 = vmul.f32 %v5098_v50, %v9669_v22 }
 0x83f   : > { %5330 = vst.msk [vmem:[#allocation4 + $0x310] sm:$0xff] %vm694_vm1, %v5297_v40  ;;  %v5235_v26 = vmul.f32 %v5093_v39, %v9669_v22  ;;  %v8435_v47 = vpop.f32.mrb[106].mxu0 }
 0x840   : > { %v5300_v60 = vadd.f32 %v5236_v5, %v10626_v45  ;;  %v5108_v54 = vadd.f32 %v10642_v61, %v8435_v47  ;;  %v5102_v24 = vpop.f32.mrb[107].mxu0 }
 0x841   : > { %v5299_v53 = vadd.f32 %v5235_v26, %v10634_v27  ;;  %v5103_v20 = vadd.f32 %v10642_v61, %v5102_v24 }
 0x842   : > { %5333 = vst.msk [vmem:[#allocation4 + $0x328] sm:$0xff] %vm694_vm1, %v5300_v60  ;;  %v5238_v7 = vmul.f32 %v5108_v54, %v9669_v22 }
 0x843   : > { %5332 = vst.msk [vmem:[#allocation4 + $0x320] sm:$0xff] %vm694_vm1, %v5299_v53  ;;  %v5237_v59 = vmul.f32 %v5103_v20, %v9669_v22  ;;  %v8438_v23 = vpop.f32.mrb[108].mxu0 }
 0x844   : > { %v5302_v41 = vadd.f32 %v5238_v7, %v10649_v19  ;;  %v5118_v45 = vadd.f32 %v10642_v61, %v8438_v23  ;;  %v5112_v21 = vpop.f32.mrb[109].mxu0 }
 0x845   : > { %v5301_v31 = vadd.f32 %v5237_v59, %v10657_v25  ;;  %v5113_v27 = vadd.f32 %v10642_v61, %v5112_v21 }
 0x846   : > { %5335 = vst.msk [vmem:[#allocation4 + $0x338] sm:$0xff] %vm694_vm1, %v5302_v41  ;;  %v5240_v63 = vmul.f32 %v5118_v45, %v9669_v22 }
 0x847   : > { %5334 = vst.msk [vmem:[#allocation4 + $0x330] sm:$0xff] %vm694_vm1, %v5301_v31  ;;  %v5239_v34 = vmul.f32 %v5113_v27, %v9669_v22  ;;  %v8441_v46 = vpop.f32.mrb[110].mxu0 }
 0x848   : > { %v5304_v49 = vadd.f32 %v5240_v63, %v10667_v9  ;;  %v5128_v19 = vadd.f32 %v10642_v61, %v8441_v46  ;;  %v5122_v2 = vpop.f32.mrb[111].mxu0 }
 0x849   : > { %v5303_v52 = vadd.f32 %v5239_v34, %v10675_v18  ;;  %v5123_v25 = vadd.f32 %v10642_v61, %v5122_v2 }
 0x84a   : > { %5337 = vst.msk [vmem:[#allocation4 + $0x348] sm:$0xff] %vm694_vm1, %v5304_v49  ;;  %v5242_v56 = vmul.f32 %v5128_v19, %v9669_v22 }
 0x84b   : > { %5336 = vst.msk [vmem:[#allocation4 + $0x340] sm:$0xff] %vm694_vm1, %v5303_v52  ;;  %v5241_v16 = vmul.f32 %v5123_v25, %v9669_v22  ;;  %v8444_v38 = vpop.f32.mrb[112].mxu0 }
 0x84c   : > { %v5306_v29 = vadd.f32 %v5242_v56, %v10685_v62  ;;  %v5138_v9 = vadd.f32 %v10642_v61, %v8444_v38  ;;  %v5132_v3 = vpop.f32.mrb[113].mxu0 }
 0x84d   : > { %v5305_v32 = vadd.f32 %v5241_v16, %v10693_v44  ;;  %v5133_v18 = vadd.f32 %v10642_v61, %v5132_v3 }
 0x84e   : > { %5339 = vst.msk [vmem:[#allocation4 + $0x358] sm:$0xff] %vm694_vm1, %v5306_v29  ;;  %v5244_v30 = vmul.f32 %v5138_v9, %v9669_v22 }
 0x84f   : > { %5338 = vst.msk [vmem:[#allocation4 + $0x350] sm:$0xff] %vm694_vm1, %v5305_v32  ;;  %v5243_v0 = vmul.f32 %v5133_v18, %v9669_v22  ;;  %v8447_v10 = vpop.f32.mrb[114].mxu0 }
 0x850   : > { %v5308_v28 = vadd.f32 %v5244_v30, %v10703_v35  ;;  %v5148_v62 = vadd.f32 %v10642_v61, %v8447_v10  ;;  %v5142_v50 = vpop.f32.mrb[115].mxu0 }
 0x851   : > { %v5307_v13 = vadd.f32 %v5243_v0, %v10711_v36  ;;  %v5143_v44 = vadd.f32 %v10642_v61, %v5142_v50  ;;  %v11110_v36 = vld [vmem:[%s11646_s8] ss:$0 sm:$0xff] }
 0x852   : > { %5341 = vst.msk [vmem:[#allocation4 + $0x368] sm:$0xff] %vm694_vm1, %v5308_v28  ;;  %v5246_v40 = vmul.f32 %v5148_v62, %v9669_v22 }
 0x853   : > { %5340 = vst.msk [vmem:[#allocation4 + $0x360] sm:$0xff] %vm694_vm1, %v5307_v13  ;;  %v5245_v39 = vmul.f32 %v5143_v44, %v9669_v22  ;;  %v8450_v5 = vpop.f32.mrb[116].mxu0 }
 0x854   : > { %v5310_v26 = vadd.f32 %v5246_v40, %v10721_v58  ;;  %v5158_v35 = vadd.f32 %v10642_v61, %v8450_v5  ;;  %v5152_v47 = vpop.f32.mrb[117].mxu0 }
 0x855   : > { %v5309_v60 = vadd.f32 %v5245_v39, %v10729_v1  ;;  %v5153_v54 = vadd.f32 %v11110_v36, %v5152_v47 }
 0x856   : > { %5343 = vst.msk [vmem:[#allocation4 + $0x378] sm:$0xff] %vm694_vm1, %v5310_v26  ;;  %v5248_v24 = vmul.f32 %v5158_v35, %v9669_v22 }
 0x857   : > { %5342 = vst.msk [vmem:[#allocation4 + $0x370] sm:$0xff] %vm694_vm1, %v5309_v60  ;;  %v5247_v58 = vmul.f32 %v5153_v54, %v9669_v22  ;;  %v8453_v53 = vpop.f32.mrb[118].mxu0 }
 0x858   : > { %v5312_v61 = vadd.f32 %v5248_v24, %v10739_v51  ;;  %v5168_v1 = vadd.f32 %v11110_v36, %v8453_v53  ;;  %v5162_v20 = vpop.f32.mrb[119].mxu0 }
 0x859   : > { %v5311_v7 = vadd.f32 %v5247_v58, %v10747_v4  ;;  %v5163_v59 = vadd.f32 %v11110_v36, %v5162_v20 }
 0x85a   : > { %5345 = vst.msk [vmem:[#allocation4 + $0x388] sm:$0xff] %vm694_vm1, %v5312_v61  ;;  %v5250_v23 = vmul.f32 %v5168_v1, %v9669_v22 }
 0x85b   : > { %5344 = vst.msk [vmem:[#allocation4 + $0x380] sm:$0xff] %vm694_vm1, %v5311_v7  ;;  %v5249_v41 = vmul.f32 %v5163_v59, %v9669_v22  ;;  %v8456_v45 = vpop.f32.mrb[120].mxu0 }
 0x85c   : > { %v5314_v21 = vadd.f32 %v5250_v23, %v10757_v37  ;;  %v5178_v51 = vadd.f32 %v11110_v36, %v8456_v45  ;;  %v5172_v31 = vpop.f32.mrb[121].mxu0 }
 0x85d   : > { %v5313_v27 = vadd.f32 %v5249_v41, %v10765_v33  ;;  %v5173_v4 = vadd.f32 %v11110_v36, %v5172_v31 }
 0x85e   : > { %5347 = vst.msk [vmem:[#allocation4 + $0x398] sm:$0xff] %vm694_vm1, %v5314_v21  ;;  %v5252_v63 = vmul.f32 %v5178_v51, %v9669_v22 }
 0x85f   : > { %5346 = vst.msk [vmem:[#allocation4 + $0x390] sm:$0xff] %vm694_vm1, %v5313_v27  ;;  %v5251_v34 = vmul.f32 %v5173_v4, %v9669_v22  ;;  %v8459_v46 = vpop.f32.mrb[122].mxu0 }
 0x860   : > { %v5316_v49 = vadd.f32 %v5252_v63, %v10775_v14  ;;  %v5188_v37 = vadd.f32 %v11110_v36, %v8459_v46  ;;  %v5182_v19 = vpop.f32.mrb[123].mxu0 }
 0x861   : > { %v5315_v2 = vadd.f32 %v5251_v34, %v10783_v57  ;;  %v5183_v33 = vadd.f32 %v11110_v36, %v5182_v19 }
 0x862   : > { %5349 = vst.msk [vmem:[#allocation4 + $0x3a8] sm:$0xff] %vm694_vm1, %v5316_v49  ;;  %v5254_v52 = vmul.f32 %v5188_v37, %v9669_v22 }
 0x863   : > { %5348 = vst.msk [vmem:[#allocation4 + $0x3a0] sm:$0xff] %vm694_vm1, %v5315_v2  ;;  %v5253_v25 = vmul.f32 %v5183_v33, %v9669_v22  ;;  %v8462_v56 = vpop.f32.mrb[124].mxu0 }
 0x864   : > { %v5318_v16 = vadd.f32 %v5254_v52, %v10793_v42  ;;  %v5198_v14 = vadd.f32 %v11110_v36, %v8462_v56  ;;  %v5192_v38 = vpop.f32.mrb[125].mxu0 }
 0x865   : > { %v5317_v29 = vadd.f32 %v5253_v25, %v10807_v17  ;;  %v5193_v57 = vadd.f32 %v11110_v36, %v5192_v38 }
 0x866   : > { %5351 = vst.msk [vmem:[#allocation4 + $0x3b8] sm:$0xff] %vm694_vm1, %v5318_v16  ;;  %v5256_v9 = vmul.f32 %v5198_v14, %v9669_v22 }
 0x867   : > { %5350 = vst.msk [vmem:[#allocation4 + $0x3b0] sm:$0xff] %vm694_vm1, %v5317_v29  ;;  %v5255_v3 = vmul.f32 %v5193_v57, %v9669_v22  ;;  %v8465_v32 = vpop.f32.mrb[126].mxu0 }
 0x868   : > { %v5320_v18 = vadd.f32 %v5256_v9, %v10820_v15  ;;  %v5208_v42 = vadd.f32 %v11110_v36, %v8465_v32  ;;  %v5202_v30 = vpop.f32.mrb[127].mxu0 }
 0x869   : > { %v5319_v0 = vadd.f32 %v5255_v3, %v10828_v55  ;;  %v5203_v17 = vadd.f32 %v11110_v36, %v5202_v30 }
 0x86a   : > { %5353 = vst.msk [vmem:[#allocation4 + $0x3c8] sm:$0xff] %vm694_vm1, %v5320_v18  ;;  %v5258_v10 = vmul.f32 %v5208_v42, %v9669_v22 }
 0x86b   : > { %5352 = vst.msk [vmem:[#allocation4 + $0x3c0] sm:$0xff] %vm694_vm1, %v5319_v0  ;;  %v5257_v28 = vmul.f32 %v5203_v17, %v9669_v22  ;;  %v8468_v62 = vpop.f32.mrb[128].mxu0 }
 0x86c   : > { %v5322_v50 = vadd.f32 %v5258_v10, %v10838_v43  ;;  %v5218_v15 = vadd.f32 %v11110_v36, %v8468_v62  ;;  %v5212_v13 = vpop.f32.mrb[129].mxu0 }
 0x86d   : > { %v5321_v44 = vadd.f32 %v5257_v28, %v10847_v6  ;;  %v5213_v55 = vadd.f32 %v11110_v36, %v5212_v13 }
 0x86e   : > { %5355 = vst.msk [vmem:[#allocation4 + $0x3d8] sm:$0xff] %vm694_vm1, %v5322_v50  ;;  %v5260_v40 = vmul.f32 %v5218_v15, %v9669_v22 }
 0x86f   : > { %5354 = vst.msk [vmem:[#allocation4 + $0x3d0] sm:$0xff] %vm694_vm1, %v5321_v44  ;;  %v5259_v39 = vmul.f32 %v5213_v55, %v9669_v22  ;;  %v8471_v5 = vpop.f32.mrb[130].mxu0 }
 0x870   : > { %v5324_v26 = vadd.f32 %v5260_v40, %v10860_v12  ;;  %v5228_v43 = vadd.f32 %v11110_v36, %v8471_v5  ;;  %v5222_v35 = vpop.f32.mrb[131].mxu0 }
 0x871   : > { %v5323_v47 = vadd.f32 %v5259_v39, %v10868_v11  ;;  %v5223_v6 = vadd.f32 %v11110_v36, %v5222_v35 }
 0x872   : > { %5357 = vst.msk [vmem:[#allocation4 + $0x3e8] sm:$0xff] %vm694_vm1, %v5324_v26  ;;  %v5262_v60 = vmul.f32 %v5228_v43, %v9669_v22 }
 0x873   : > { %5356 = vst.msk [vmem:[#allocation4 + $0x3e0] sm:$0xff] %vm694_vm1, %v5323_v47  ;;  %v5261_v54 = vmul.f32 %v5223_v6, %v9669_v22 }
 0x874   : > { %v5326_v24 = vadd.f32 %v5262_v60, %v10878_v8 }
 0x875   : > { %v5325_v58 = vadd.f32 %v5261_v54, %v10887_v48 }
 0x876   : > { %5359 = vst.msk [vmem:[#allocation4 + $0x3f8] sm:$0xff] %vm694_vm1, %v5326_v24 }
 0x877   : > { %5358 = vst.msk [vmem:[#allocation4 + $0x3f0] sm:$0xff] %vm694_vm1, %v5325_v58 }
 0x878 LB: >> { %s7481_s21 = sshll.u32 %s8969_s0, 4  ;;  %v5369_v22 = vld [vmem:[#allocation4] sm:$0xff]  ;;  %v5381_v12 = vld [vmem:[#allocation4 + $0x10] sm:$0xff]  ;;  %v5370_v34 = vld [vmem:[#allocation4 + $0x8] sm:$0xff]  ;;  %s8985_s22 = smov 96   ;;  %s8969_s0 = sphi %s11180_s0, %s5365_s0  }
 0x879   : >> { %v5395_v11 = vld [vmem:[#allocation4 + $0x20] sm:$0xff]  ;;  %v5409_v8 = vld [vmem:[#allocation4 + $0x30] sm:$0xff]  ;;  %s11188_s23 = scalar_lea.vmem [#allocation2], %s7481_s21  ;;  %v5382_v19 = vld [vmem:[#allocation4 + $0x18] sm:$0xff]  ;;  %s8986_s24 = smov 64  }
 0x87a   : >> { %v7482_v48 = vld [vmem:[%s11188_s23] ss:$0 sm:$0xff]  ;;  %v7485_v36 = vld [vmem:[%s11188_s23 + $0x1] ss:$0 sm:$0xff]  ;;  %v7488_v53 = vld [vmem:[%s11188_s23 + $0x2] ss:$0 sm:$0xff] }
 0x87b   : >> { %v5375_v61 = vmul.f32 %v7482_v48, %v5369_v22  ;;  %v5387_v1 = vmul.f32 %v7485_v36, %v5381_v12  ;;  %v5401_v20 = vmul.f32 %v7488_v53, %v5395_v11  ;;  %v7491_v7 = vld [vmem:[%s11188_s23 + $0x3] ss:$0 sm:$0xff]  ;;  %v7494_v59 = vld [vmem:[%s11188_s23 + $0x4] ss:$0 sm:$0xff]  ;;  %v7497_v21 = vld [vmem:[%s11188_s23 + $0x5] ss:$0 sm:$0xff]  ;;  %v5376_v37 = vmul.f32 %v7482_v48, %v5370_v34 }
 0x87c   : >> { %v5423_v23 = vld [vmem:[#allocation4 + $0x40] sm:$0xff]  ;;  %v5415_v45 = vmul.f32 %v7491_v7, %v5409_v8  ;;  %v5437_v51 = vld [vmem:[#allocation4 + $0x50] sm:$0xff]  ;;  %v5396_v2 = vld [vmem:[#allocation4 + $0x28] sm:$0xff]  ;;  %v5388_v56 = vmul.f32 %v7485_v36, %v5382_v19  ;;  %s5605_s25 = scalar_lea.vmem [#allocation5], %s7481_s21  ;;  %s5365_s0 = sadd.s32 1, %s8969_s0  }
 0x87d   : >> { %v5389_v41 = vadd.f32 %v5387_v1, %v5375_v61  ;;  %v5429_v27 = vmul.f32 %v7494_v59, %v5423_v23  ;;  %v7500_v4 = vld [vmem:[%s11188_s23 + $0x6] ss:$0 sm:$0xff]  ;;  %v5443_v49 = vmul.f32 %v7497_v21, %v5437_v51  ;;  %v5410_v33 = vld [vmem:[#allocation4 + $0x38] sm:$0xff]  ;;  %v7503_v52 = vld [vmem:[%s11188_s23 + $0x7] ss:$0 sm:$0xff]  ;;  %v5402_v16 = vmul.f32 %v7488_v53, %v5396_v2  ;;  %p5362_p11 = scmp.ge.s32.totalorder %s5365_s0, 8  }
 0x87e   : >> { %v5451_v63 = vld [vmem:[#allocation4 + $0x60] sm:$0xff]  ;;  %v5465_v25 = vld [vmem:[#allocation4 + $0x70] sm:$0xff]  ;;  %v5424_v29 = vld [vmem:[#allocation4 + $0x48] sm:$0xff]  ;;  %v5390_v3 = vadd.f32 %v5388_v56, %v5376_v37  ;;  %v5416_v32 = vmul.f32 %v7491_v7, %v5410_v33  ;;  %s11213_s14 = smov (%p5362_p11), 0  }
 0x87f   : >> { %v5403_v31 = vadd.f32 %v5401_v20, %v5389_v41  ;;  %v5457_v38 = vmul.f32 %v7500_v4, %v5451_v63  ;;  %v7506_v57 = vld [vmem:[%s11188_s23 + $0x8] ss:$0 sm:$0xff]  ;;  %v5479_v9 = vld [vmem:[#allocation4 + $0x80] sm:$0xff]  ;;  %v5471_v42 = vmul.f32 %v7503_v52, %v5465_v25  ;;  %v5438_v30 = vld [vmem:[#allocation4 + $0x58] sm:$0xff]  ;;  %v5430_v28 = vmul.f32 %v7494_v59, %v5424_v29 }
 0x880   : >> { %v7509_v0 = vld [vmem:[%s11188_s23 + $0x9] ss:$0 sm:$0xff]  ;;  %v5493_v17 = vld [vmem:[#allocation4 + $0x90] sm:$0xff]  ;;  %v5404_v10 = vadd.f32 %v5402_v16, %v5390_v3  ;;  %v5485_v50 = vmul.f32 %v7506_v57, %v5479_v9  ;;  %v7512_v13 = vld [vmem:[%s11188_s23 + $0xa] ss:$0 sm:$0xff]  ;;  %v5444_v40 = vmul.f32 %v7497_v21, %v5438_v30 }
 0x881   : >> { %v5417_v46 = vadd.f32 %v5415_v45, %v5403_v31  ;;  %v5452_v15 = vld [vmem:[#allocation4 + $0x68] sm:$0xff]  ;;  %v5507_v44 = vld [vmem:[#allocation4 + $0xa0] sm:$0xff]  ;;  %v5499_v5 = vmul.f32 %v7509_v0, %v5493_v17  ;;  %v5466_v26 = vld [vmem:[#allocation4 + $0x78] sm:$0xff] }
 0x882   : >> { %v5418_v55 = vadd.f32 %v5416_v32, %v5404_v10  ;;  %v7515_v43 = vld [vmem:[%s11188_s23 + $0xb] ss:$0 sm:$0xff]  ;;  %v5521_v35 = vld [vmem:[#allocation4 + $0xb0] sm:$0xff]  ;;  %v5458_v6 = vmul.f32 %v7500_v4, %v5452_v15  ;;  %v5513_v54 = vmul.f32 %v7512_v13, %v5507_v44  ;;  %v7518_v58 = vld [vmem:[%s11188_s23 + $0xc] ss:$0 sm:$0xff]  ;;  %v5472_v11 = vmul.f32 %v7503_v52, %v5466_v26 }
 0x883   : >> { %v5431_v14 = vadd.f32 %v5429_v27, %v5417_v46  ;;  %v5480_v24 = vld [vmem:[#allocation4 + $0x88] sm:$0xff]  ;;  %v5535_v22 = vld [vmem:[#allocation4 + $0xc0] sm:$0xff]  ;;  %v5527_v48 = vmul.f32 %v7515_v43, %v5521_v35  ;;  %v5494_v36 = vld [vmem:[#allocation4 + $0x98] sm:$0xff] }
 0x884   : >> { %v5432_v47 = vadd.f32 %v5430_v28, %v5418_v55  ;;  %v7521_v53 = vld [vmem:[%s11188_s23 + $0xd] ss:$0 sm:$0xff]  ;;  %v5549_v61 = vld [vmem:[#allocation4 + $0xd0] sm:$0xff]  ;;  %v5486_v20 = vmul.f32 %v7506_v57, %v5480_v24  ;;  %v5541_v59 = vmul.f32 %v7518_v58, %v5535_v22  ;;  %v7524_v41 = vld [vmem:[%s11188_s23 + $0xe] ss:$0 sm:$0xff]  ;;  %v5500_v51 = vmul.f32 %v7509_v0, %v5494_v36 }
 0x885   : >> { %v5445_v18 = vadd.f32 %v5443_v49, %v5431_v14  ;;  %v5508_v23 = vld [vmem:[#allocation4 + $0xa8] sm:$0xff]  ;;  %v5563_v45 = vld [vmem:[#allocation4 + $0xe0] sm:$0xff]  ;;  %v5555_v27 = vmul.f32 %v7521_v53, %v5549_v61  ;;  %v5522_v4 = vld [vmem:[#allocation4 + $0xb8] sm:$0xff] }
 0x886   : >> { %v5446_v12 = vadd.f32 %v5444_v40, %v5432_v47  ;;  %v7527_v63 = vld [vmem:[%s11188_s23 + $0xf] ss:$0 sm:$0xff]  ;;  %v5577_v34 = vld [vmem:[#allocation4 + $0xf0] sm:$0xff]  ;;  %v5514_v49 = vmul.f32 %v7512_v13, %v5508_v23  ;;  %v5569_v19 = vmul.f32 %v7524_v41, %v5563_v45  ;;  %v5528_v52 = vmul.f32 %v7515_v43, %v5522_v4  ;;  %v5550_v16 = vld [vmem:[#allocation4 + $0xd8] sm:$0xff] }
 0x887   : >> { %v5459_v62 = vadd.f32 %v5457_v38, %v5445_v18  ;;  %v5536_v2 = vld [vmem:[#allocation4 + $0xc8] sm:$0xff]  ;;  %v5583_v56 = vmul.f32 %v7527_v63, %v5577_v34  ;;  %v5556_v3 = vmul.f32 %v7521_v53, %v5550_v16  ;;  %v5578_v18 = vld [vmem:[#allocation4 + $0xf8] sm:$0xff] }
 0x888   : >> { %v5460_v1 = vadd.f32 %v5458_v6, %v5446_v12  ;;  %v5542_v38 = vmul.f32 %v7518_v58, %v5536_v2  ;;  %v5564_v57 = vld [vmem:[#allocation4 + $0xe8] sm:$0xff]  ;;  %v5584_v17 = vmul.f32 %v7527_v63, %v5578_v18 }
 0x889   : >> { %v5473_v39 = vadd.f32 %v5471_v42, %v5459_v62  ;;  %v5570_v30 = vmul.f32 %v7524_v41, %v5564_v57 }
 0x88a   : >> { %v5474_v21 = vadd.f32 %v5472_v11, %v5460_v1 }
 0x88b   : >> { %v5487_v60 = vadd.f32 %v5485_v50, %v5473_v39 }
 0x88c   : >> { %v5488_v46 = vadd.f32 %v5486_v20, %v5474_v21 }
 0x88d   : >> { %v5501_v8 = vadd.f32 %v5499_v5, %v5487_v60 }
 0x88e   : >> { %v5502_v33 = vadd.f32 %v5500_v51, %v5488_v46 }
 0x88f   : >> { %v5515_v7 = vadd.f32 %v5513_v54, %v5501_v8 }
 0x890   : >> { %v5516_v14 = vadd.f32 %v5514_v49, %v5502_v33 }
 0x891   : >> { %v5529_v31 = vadd.f32 %v5527_v48, %v5515_v7 }
 0x892   : >> { %v5530_v9 = vadd.f32 %v5528_v52, %v5516_v14 }
 0x893   : >> { %v5543_v37 = vadd.f32 %v5541_v59, %v5529_v31 }
 0x894   : >> { %v5544_v42 = vadd.f32 %v5542_v38, %v5530_v9 }
 0x895   : >> { %v5557_v25 = vadd.f32 %v5555_v27, %v5543_v37 }
 0x896   : >> { %v5558_v0 = vadd.f32 %v5556_v3, %v5544_v42 }
 0x897   : >> { %v5571_v29 = vadd.f32 %v5569_v19, %v5557_v25 }
 0x898   : >> { %v5572_v10 = vadd.f32 %v5570_v30, %v5558_v0 }
 0x899   : >> { %v5585_v32 = vadd.f32 %v5583_v56, %v5571_v29 }
 0x89a   : >> { %v5586_v28 = vadd.f32 %v5584_v17, %v5572_v10 }
 0x89b   : >> { %5589 = vrot.lane.b32.xlu0 %v5585_v32, %s8985_s22  ;;  %5597 = vrot.lane.b32.xlu1 %v5585_v32, %s8986_s24 }
 0x89f   : >> { %5591 = vrot.lane.b32.xlu0 %v5586_v28, %s8985_s22  ;;  %5599 = vrot.lane.b32.xlu1 %v5586_v28, %s8986_s24 }
 0x90d   : >> { %v5590_v62 = vpop.permute.xlu0 %5589  ;;  %v5598_v50 = vpop.permute.xlu1 %5597 }
 0x90e   : >> { %v5595_v15 = vadd.f32 %v5590_v62, %v5585_v32 }
 0x910   : >> { %v5603_v13 = vadd.f32 %v5598_v50, %v5595_v15  ;;  %5364 = sbr.rel (!%p5362_p11) target bundleno = 2168 (0x878), region = 272 }
 0x911   : >> { %v5592_v44 = vpop.permute.xlu0 %5591  ;;  %v5600_v55 = vpop.permute.xlu1 %5599 }
 0x912   : >> { %5606 = vst.msk [vmem:[%s5605_s25] sm:$0xff] %vm862_vm2, %v5603_v13  ;;  %v5596_v40 = vadd.f32 %v5592_v44, %v5586_v28 }
 0x914   : >> { %v5604_v39 = vadd.f32 %v5600_v55, %v5596_v40 }
 0x916   : >> { %5607 = vst.msk [vmem:[%s5605_s25 + $0x8] sm:$0xff] %vm862_vm2, %v5604_v39 }
 0x917 LB: >> { %s7528_s26 = sshll.u32 %s8973_s14, 4  ;;  %v5618_v5 = vld [vmem:[#allocation4 + $0x100] sm:$0xff]  ;;  %v5630_v26 = vld [vmem:[#allocation4 + $0x110] sm:$0xff]  ;;  %v5619_v59 = vld [vmem:[#allocation4 + $0x108] sm:$0xff]  ;;  %s8987_s0 = smov 96   ;;  %s8973_s14 = sphi %s11213_s14, %s5613_s14  }
 0x918   : >> { %v5644_v43 = vld [vmem:[#allocation4 + $0x120] sm:$0xff]  ;;  %v5658_v35 = vld [vmem:[#allocation4 + $0x130] sm:$0xff]  ;;  %s11221_s16 = scalar_lea.vmem [#allocation2], %s7528_s26  ;;  %v5631_v21 = vld [vmem:[#allocation4 + $0x118] sm:$0xff]  ;;  %s8988_s21 = smov 64  }
 0x919   : >> { %v7530_v47 = vld [vmem:[%s11221_s16 + $0x80] ss:$0 sm:$0xff]  ;;  %v7533_v6 = vld [vmem:[%s11221_s16 + $0x81] ss:$0 sm:$0xff]  ;;  %v7536_v60 = vld [vmem:[%s11221_s16 + $0x82] ss:$0 sm:$0xff] }
 0x91a   : >> { %v5624_v54 = vmul.f32 %v7530_v47, %v5618_v5  ;;  %v5636_v24 = vmul.f32 %v7533_v6, %v5630_v26  ;;  %v5650_v58 = vmul.f32 %v7536_v60, %v5644_v43  ;;  %v7539_v22 = vld [vmem:[%s11221_s16 + $0x83] ss:$0 sm:$0xff]  ;;  %v7542_v12 = vld [vmem:[%s11221_s16 + $0x84] ss:$0 sm:$0xff]  ;;  %v7545_v36 = vld [vmem:[%s11221_s16 + $0x85] ss:$0 sm:$0xff]  ;;  %v5625_v45 = vmul.f32 %v7530_v47, %v5619_v59 }
 0x91b   : >> { %v5672_v11 = vld [vmem:[#allocation4 + $0x140] sm:$0xff]  ;;  %v5664_v48 = vmul.f32 %v7539_v22, %v5658_v35  ;;  %v5686_v53 = vld [vmem:[#allocation4 + $0x150] sm:$0xff]  ;;  %v5645_v51 = vld [vmem:[#allocation4 + $0x128] sm:$0xff]  ;;  %v5637_v63 = vmul.f32 %v7533_v6, %v5631_v21  ;;  %s7046_s23 = scalar_lea.vmem [#allocation5], %s7528_s26  ;;  %s5613_s14 = sadd.s32 1, %s8973_s14  }
 0x91c   : >> { %v5638_v8 = vadd.f32 %v5636_v24, %v5624_v54  ;;  %v5678_v1 = vmul.f32 %v7542_v12, %v5672_v11  ;;  %v7548_v20 = vld [vmem:[%s11221_s16 + $0x86] ss:$0 sm:$0xff]  ;;  %v5692_v41 = vmul.f32 %v7545_v36, %v5686_v53  ;;  %v5659_v31 = vld [vmem:[#allocation4 + $0x138] sm:$0xff]  ;;  %v7551_v27 = vld [vmem:[%s11221_s16 + $0x87] ss:$0 sm:$0xff]  ;;  %v5651_v34 = vmul.f32 %v7536_v60, %v5645_v51  ;;  %p5610_p12 = scmp.ge.s32.totalorder %s5613_s14, 8  }
 0x91d   : >> { %v5700_v7 = vld [vmem:[#allocation4 + $0x160] sm:$0xff]  ;;  %v5714_v4 = vld [vmem:[#allocation4 + $0x170] sm:$0xff]  ;;  %v5673_v37 = vld [vmem:[#allocation4 + $0x148] sm:$0xff]  ;;  %v5639_v33 = vadd.f32 %v5637_v63, %v5625_v45  ;;  %v5665_v52 = vmul.f32 %v7539_v22, %v5659_v31  ;;  %s11246_s22 = smov (%p5610_p12), 0  }
 0x91e   : >> { %v5652_v61 = vadd.f32 %v5650_v58, %v5638_v8  ;;  %v5706_v49 = vmul.f32 %v7548_v20, %v5700_v7  ;;  %v7554_v19 = vld [vmem:[%s11221_s16 + $0x88] ss:$0 sm:$0xff]  ;;  %v5728_v2 = vld [vmem:[#allocation4 + $0x180] sm:$0xff]  ;;  %v5720_v56 = vmul.f32 %v7551_v27, %v5714_v4  ;;  %v5687_v16 = vld [vmem:[#allocation4 + $0x158] sm:$0xff]  ;;  %v5679_v57 = vmul.f32 %v7542_v12, %v5673_v37 }
 0x91f   : >> { %v7557_v14 = vld [vmem:[%s11221_s16 + $0x89] ss:$0 sm:$0xff]  ;;  %v5742_v38 = vld [vmem:[#allocation4 + $0x190] sm:$0xff]  ;;  %v5653_v29 = vadd.f32 %v5651_v34, %v5639_v33  ;;  %v5734_v3 = vmul.f32 %v7554_v19, %v5728_v2  ;;  %v7560_v18 = vld [vmem:[%s11221_s16 + $0x8a] ss:$0 sm:$0xff]  ;;  %v5693_v0 = vmul.f32 %v7545_v36, %v5687_v16 }
 0x920   : >> { %v5666_v23 = vadd.f32 %v5664_v48, %v5652_v61  ;;  %v5701_v32 = vld [vmem:[#allocation4 + $0x168] sm:$0xff]  ;;  %v5756_v42 = vld [vmem:[#allocation4 + $0x1a0] sm:$0xff]  ;;  %v5748_v10 = vmul.f32 %v7557_v14, %v5742_v38  ;;  %v5715_v28 = vld [vmem:[#allocation4 + $0x178] sm:$0xff] }
 0x921   : >> { %v5667_v30 = vadd.f32 %v5665_v52, %v5653_v29  ;;  %v7563_v62 = vld [vmem:[%s11221_s16 + $0x8b] ss:$0 sm:$0xff]  ;;  %v5770_v50 = vld [vmem:[#allocation4 + $0x1b0] sm:$0xff]  ;;  %v5707_v13 = vmul.f32 %v7548_v20, %v5701_v32  ;;  %v5762_v55 = vmul.f32 %v7560_v18, %v5756_v42  ;;  %v7566_v39 = vld [vmem:[%s11221_s16 + $0x8c] ss:$0 sm:$0xff]  ;;  %v5721_v43 = vmul.f32 %v7551_v27, %v5715_v28 }
 0x922   : >> { %v5680_v46 = vadd.f32 %v5678_v1, %v5666_v23  ;;  %v5729_v40 = vld [vmem:[#allocation4 + $0x188] sm:$0xff]  ;;  %v5784_v5 = vld [vmem:[#allocation4 + $0x1c0] sm:$0xff]  ;;  %v5776_v47 = vmul.f32 %v7563_v62, %v5770_v50  ;;  %v5743_v6 = vld [vmem:[#allocation4 + $0x198] sm:$0xff] }
 0x923   : >> { %v5681_v15 = vadd.f32 %v5679_v57, %v5667_v30  ;;  %v7569_v60 = vld [vmem:[%s11221_s16 + $0x8d] ss:$0 sm:$0xff]  ;;  %v5798_v54 = vld [vmem:[#allocation4 + $0x1d0] sm:$0xff]  ;;  %v5735_v58 = vmul.f32 %v7554_v19, %v5729_v40  ;;  %v5790_v12 = vmul.f32 %v7566_v39, %v5784_v5  ;;  %v7572_v8 = vld [vmem:[%s11221_s16 + $0x8e] ss:$0 sm:$0xff]  ;;  %v5749_v53 = vmul.f32 %v7557_v14, %v5743_v6 }
 0x924   : >> { %v5694_v25 = vadd.f32 %v5692_v41, %v5680_v46  ;;  %v5757_v11 = vld [vmem:[#allocation4 + $0x1a8] sm:$0xff]  ;;  %v5812_v48 = vld [vmem:[#allocation4 + $0x1e0] sm:$0xff]  ;;  %v5804_v1 = vmul.f32 %v7569_v60, %v5798_v54  ;;  %v5771_v20 = vld [vmem:[#allocation4 + $0x1b8] sm:$0xff] }
 0x925   : >> { %v5695_v26 = vadd.f32 %v5693_v0, %v5681_v15  ;;  %v7575_v7 = vld [vmem:[%s11221_s16 + $0x8f] ss:$0 sm:$0xff]  ;;  %v5826_v59 = vld [vmem:[#allocation4 + $0x1f0] sm:$0xff]  ;;  %v5763_v41 = vmul.f32 %v7560_v18, %v5757_v11  ;;  %v5818_v21 = vmul.f32 %v7572_v8, %v5812_v48  ;;  %v5777_v27 = vmul.f32 %v7563_v62, %v5771_v20  ;;  %v5799_v34 = vld [vmem:[#allocation4 + $0x1d8] sm:$0xff] }
 0x926   : >> { %v5708_v9 = vadd.f32 %v5706_v49, %v5694_v25  ;;  %v5785_v51 = vld [vmem:[#allocation4 + $0x1c8] sm:$0xff]  ;;  %v5832_v63 = vmul.f32 %v7575_v7, %v5826_v59  ;;  %v5805_v33 = vmul.f32 %v7569_v60, %v5799_v34  ;;  %v5827_v25 = vld [vmem:[#allocation4 + $0x1f8] sm:$0xff] }
 0x927   : >> { %v5709_v24 = vadd.f32 %v5707_v13, %v5695_v26  ;;  %v5791_v49 = vmul.f32 %v7566_v39, %v5785_v51  ;;  %v5813_v19 = vld [vmem:[#allocation4 + $0x1e8] sm:$0xff]  ;;  %v5833_v38 = vmul.f32 %v7575_v7, %v5827_v25 }
 0x928   : >> { %v5722_v17 = vadd.f32 %v5720_v56, %v5708_v9  ;;  %v5819_v16 = vmul.f32 %v7572_v8, %v5813_v19 }
 0x929   : >> { %v5723_v36 = vadd.f32 %v5721_v43, %v5709_v24 }
 0x92a   : >> { %v5736_v44 = vadd.f32 %v5734_v3, %v5722_v17 }
 0x92b   : >> { %v5737_v23 = vadd.f32 %v5735_v58, %v5723_v36 }
 0x92c   : >> { %v5750_v35 = vadd.f32 %v5748_v10, %v5736_v44 }
 0x92d   : >> { %v5751_v31 = vadd.f32 %v5749_v53, %v5737_v23 }
 0x92e   : >> { %v5764_v22 = vadd.f32 %v5762_v55, %v5750_v35 }
 0x92f   : >> { %v5765_v46 = vadd.f32 %v5763_v41, %v5751_v31 }
 0x930   : >> { %v5778_v61 = vadd.f32 %v5776_v47, %v5764_v22 }
 0x931   : >> { %v5779_v2 = vadd.f32 %v5777_v27, %v5765_v46 }
 0x932   : >> { %v5792_v45 = vadd.f32 %v5790_v12, %v5778_v61 }
 0x933   : >> { %v5793_v56 = vadd.f32 %v5791_v49, %v5779_v2 }
 0x934   : >> { %v5806_v4 = vadd.f32 %v5804_v1, %v5792_v45 }
 0x935   : >> { %v5807_v14 = vadd.f32 %v5805_v33, %v5793_v56 }
 0x936   : >> { %v5820_v37 = vadd.f32 %v5818_v21, %v5806_v4 }
 0x937   : >> { %v5821_v29 = vadd.f32 %v5819_v16, %v5807_v14 }
 0x938   : >> { %v5834_v52 = vadd.f32 %v5832_v63, %v5820_v37 }
 0x939   : >> { %v5835_v57 = vadd.f32 %v5833_v38, %v5821_v29 }
 0x93a   : >> { %5838 = vrot.lane.b32.xlu0 %v5834_v52, %s8987_s0  ;;  %5846 = vrot.lane.b32.xlu1 %v5834_v52, %s8988_s21 }
 0x93e   : >> { %5840 = vrot.lane.b32.xlu0 %v5835_v57, %s8987_s0  ;;  %5848 = vrot.lane.b32.xlu1 %v5835_v57, %s8988_s21 }
 0x9ac   : >> { %v5839_v9 = vpop.permute.xlu0 %5838  ;;  %v5847_v3 = vpop.permute.xlu1 %5846 }
 0x9ad   : >> { %v5844_v32 = vadd.f32 %v5839_v9, %v5834_v52 }
 0x9af   : >> { %v5852_v18 = vadd.f32 %v5847_v3, %v5844_v32  ;;  %5612 = sbr.rel (!%p5610_p12) target bundleno = 2327 (0x917), region = 283 }
 0x9b0   : >> { %v5841_v42 = vpop.permute.xlu0 %5840  ;;  %v5849_v30 = vpop.permute.xlu1 %5848 }
 0x9b1   : >> { %7577 = vst.msk [vmem:[%s7046_s23 + $0x80] sm:$0xff] %vm862_vm2, %v5852_v18  ;;  %v5845_v0 = vadd.f32 %v5841_v42, %v5835_v57 }
 0x9b3   : >> { %v5853_v17 = vadd.f32 %v5849_v30, %v5845_v0 }
 0x9b5   : >> { %7578 = vst.msk [vmem:[%s7046_s23 + $0x88] sm:$0xff] %vm862_vm2, %v5853_v17 }
 0x9b6 LB: >> { %s7579_s24 = sshll.u32 %s8977_s22, 4  ;;  %v5867_v10 = vld [vmem:[#allocation4 + $0x200] sm:$0xff]  ;;  %v5879_v28 = vld [vmem:[#allocation4 + $0x210] sm:$0xff]  ;;  %v5868_v12 = vld [vmem:[#allocation4 + $0x208] sm:$0xff]  ;;  %s8989_s14 = smov 96   ;;  %s8977_s22 = sphi %s11246_s22, %s5862_s22  }
 0x9b7   : >> { %v5893_v62 = vld [vmem:[#allocation4 + $0x220] sm:$0xff]  ;;  %v5907_v50 = vld [vmem:[#allocation4 + $0x230] sm:$0xff]  ;;  %s11254_s25 = scalar_lea.vmem [#allocation2], %s7579_s24  ;;  %v5880_v36 = vld [vmem:[#allocation4 + $0x218] sm:$0xff]  ;;  %s8990_s26 = smov 64  }
 0x9b8   : >> { %v7581_v15 = vld [vmem:[%s11254_s25 + $0x100] ss:$0 sm:$0xff]  ;;  %v7584_v13 = vld [vmem:[%s11254_s25 + $0x101] ss:$0 sm:$0xff]  ;;  %v7587_v44 = vld [vmem:[%s11254_s25 + $0x102] ss:$0 sm:$0xff] }
 0x9b9   : >> { %v5873_v55 = vmul.f32 %v7581_v15, %v5867_v10  ;;  %v5885_v40 = vmul.f32 %v7584_v13, %v5879_v28  ;;  %v5899_v39 = vmul.f32 %v7587_v44, %v5893_v62  ;;  %v7590_v5 = vld [vmem:[%s11254_s25 + $0x103] ss:$0 sm:$0xff]  ;;  %v7593_v26 = vld [vmem:[%s11254_s25 + $0x104] ss:$0 sm:$0xff]  ;;  %v7596_v6 = vld [vmem:[%s11254_s25 + $0x105] ss:$0 sm:$0xff]  ;;  %v5874_v48 = vmul.f32 %v7581_v15, %v5868_v12 }
 0x9ba   : >> { %v5921_v43 = vld [vmem:[#allocation4 + $0x240] sm:$0xff]  ;;  %v5913_v47 = vmul.f32 %v7590_v5, %v5907_v50  ;;  %v5935_v60 = vld [vmem:[#allocation4 + $0x250] sm:$0xff]  ;;  %v5894_v53 = vld [vmem:[#allocation4 + $0x228] sm:$0xff]  ;;  %v5886_v7 = vmul.f32 %v7584_v13, %v5880_v36  ;;  %s7097_s16 = scalar_lea.vmem [#allocation5], %s7579_s24  ;;  %s5862_s22 = sadd.s32 1, %s8977_s22  }
 0x9bb   : >> { %v5887_v35 = vadd.f32 %v5885_v40, %v5873_v55  ;;  %v5927_v24 = vmul.f32 %v7593_v26, %v5921_v43  ;;  %v7599_v58 = vld [vmem:[%s11254_s25 + $0x106] ss:$0 sm:$0xff]  ;;  %v5941_v8 = vmul.f32 %v7596_v6, %v5935_v60  ;;  %v5908_v61 = vld [vmem:[#allocation4 + $0x238] sm:$0xff]  ;;  %v7602_v1 = vld [vmem:[%s11254_s25 + $0x107] ss:$0 sm:$0xff]  ;;  %v5900_v59 = vmul.f32 %v7587_v44, %v5894_v53  ;;  %p5859_p13 = scmp.ge.s32.totalorder %s5862_s22, 8  }
 0x9bc   : >> { %v5949_v22 = vld [vmem:[#allocation4 + $0x260] sm:$0xff]  ;;  %v5963_v20 = vld [vmem:[#allocation4 + $0x270] sm:$0xff]  ;;  %v5922_v45 = vld [vmem:[#allocation4 + $0x248] sm:$0xff]  ;;  %v5888_v31 = vadd.f32 %v5886_v7, %v5874_v48  ;;  %v5914_v27 = vmul.f32 %v7590_v5, %v5908_v61  ;;  %s11279_s0 = smov (%p5859_p13), 0  }
 0x9bd   : >> { %v5901_v54 = vadd.f32 %v5899_v39, %v5887_v35  ;;  %v5955_v41 = vmul.f32 %v7599_v58, %v5949_v22  ;;  %v7605_v21 = vld [vmem:[%s11254_s25 + $0x108] ss:$0 sm:$0xff]  ;;  %v5977_v51 = vld [vmem:[#allocation4 + $0x280] sm:$0xff]  ;;  %v5969_v63 = vmul.f32 %v7602_v1, %v5963_v20  ;;  %v5936_v34 = vld [vmem:[#allocation4 + $0x258] sm:$0xff]  ;;  %v5928_v19 = vmul.f32 %v7593_v26, %v5922_v45 }
 0x9be   : >> { %v7608_v46 = vld [vmem:[%s11254_s25 + $0x109] ss:$0 sm:$0xff]  ;;  %v5991_v49 = vld [vmem:[#allocation4 + $0x290] sm:$0xff]  ;;  %v5902_v37 = vadd.f32 %v5900_v59, %v5888_v31  ;;  %v5983_v33 = vmul.f32 %v7605_v21, %v5977_v51  ;;  %v7611_v25 = vld [vmem:[%s11254_s25 + $0x10a] ss:$0 sm:$0xff]  ;;  %v5942_v14 = vmul.f32 %v7596_v6, %v5936_v34 }
 0x9bf   : >> { %v5915_v11 = vadd.f32 %v5913_v47, %v5901_v54  ;;  %v5950_v52 = vld [vmem:[#allocation4 + $0x268] sm:$0xff]  ;;  %v6005_v56 = vld [vmem:[#allocation4 + $0x2a0] sm:$0xff]  ;;  %v5997_v29 = vmul.f32 %v7608_v46, %v5991_v49  ;;  %v5964_v57 = vld [vmem:[#allocation4 + $0x278] sm:$0xff] }
 0x9c0   : >> { %v5916_v16 = vadd.f32 %v5914_v27, %v5902_v37  ;;  %v7614_v9 = vld [vmem:[%s11254_s25 + $0x10b] ss:$0 sm:$0xff]  ;;  %v6019_v3 = vld [vmem:[#allocation4 + $0x2b0] sm:$0xff]  ;;  %v5956_v18 = vmul.f32 %v7599_v58, %v5950_v52  ;;  %v6011_v30 = vmul.f32 %v7611_v25, %v6005_v56  ;;  %v7617_v17 = vld [vmem:[%s11254_s25 + $0x10c] ss:$0 sm:$0xff]  ;;  %v5970_v62 = vmul.f32 %v7602_v1, %v5964_v57 }
 0x9c1   : >> { %v5929_v23 = vadd.f32 %v5927_v24, %v5915_v11  ;;  %v5978_v0 = vld [vmem:[#allocation4 + $0x288] sm:$0xff]  ;;  %v6033_v10 = vld [vmem:[#allocation4 + $0x2c0] sm:$0xff]  ;;  %v6025_v15 = vmul.f32 %v7614_v9, %v6019_v3  ;;  %v5992_v13 = vld [vmem:[#allocation4 + $0x298] sm:$0xff] }
 0x9c2   : >> { %v5930_v32 = vadd.f32 %v5928_v19, %v5916_v16  ;;  %v7620_v44 = vld [vmem:[%s11254_s25 + $0x10d] ss:$0 sm:$0xff]  ;;  %v6047_v55 = vld [vmem:[#allocation4 + $0x2d0] sm:$0xff]  ;;  %v5984_v39 = vmul.f32 %v7605_v21, %v5978_v0  ;;  %v6039_v26 = vmul.f32 %v7617_v17, %v6033_v10  ;;  %v7623_v35 = vld [vmem:[%s11254_s25 + $0x10e] ss:$0 sm:$0xff]  ;;  %v5998_v60 = vmul.f32 %v7608_v46, %v5992_v13 }
 0x9c3   : >> { %v5943_v4 = vadd.f32 %v5941_v8, %v5929_v23  ;;  %v6006_v43 = vld [vmem:[#allocation4 + $0x2a8] sm:$0xff]  ;;  %v6061_v47 = vld [vmem:[#allocation4 + $0x2e0] sm:$0xff]  ;;  %v6053_v24 = vmul.f32 %v7620_v44, %v6047_v55  ;;  %v6020_v58 = vld [vmem:[#allocation4 + $0x2b8] sm:$0xff] }
 0x9c4   : >> { %v5944_v28 = vadd.f32 %v5942_v14, %v5930_v32  ;;  %v7626_v22 = vld [vmem:[%s11254_s25 + $0x10f] ss:$0 sm:$0xff]  ;;  %v6075_v12 = vld [vmem:[#allocation4 + $0x2f0] sm:$0xff]  ;;  %v6012_v8 = vmul.f32 %v7611_v25, %v6006_v43  ;;  %v6067_v36 = vmul.f32 %v7623_v35, %v6061_v47  ;;  %v6026_v1 = vmul.f32 %v7614_v9, %v6020_v58  ;;  %v6048_v59 = vld [vmem:[#allocation4 + $0x2d8] sm:$0xff] }
 0x9c5   : >> { %v5957_v2 = vadd.f32 %v5955_v41, %v5943_v4  ;;  %v6034_v53 = vld [vmem:[#allocation4 + $0x2c8] sm:$0xff]  ;;  %v6081_v7 = vmul.f32 %v7626_v22, %v6075_v12  ;;  %v6054_v31 = vmul.f32 %v7620_v44, %v6048_v59  ;;  %v6076_v4 = vld [vmem:[#allocation4 + $0x2f8] sm:$0xff] }
 0x9c6   : >> { %v5958_v40 = vadd.f32 %v5956_v18, %v5944_v28  ;;  %v6040_v41 = vmul.f32 %v7617_v17, %v6034_v53  ;;  %v6062_v21 = vld [vmem:[#allocation4 + $0x2e8] sm:$0xff]  ;;  %v6082_v49 = vmul.f32 %v7626_v22, %v6076_v4 }
 0x9c7   : >> { %v5971_v38 = vadd.f32 %v5969_v63, %v5957_v2  ;;  %v6068_v34 = vmul.f32 %v7623_v35, %v6062_v21 }
 0x9c8   : >> { %v5972_v6 = vadd.f32 %v5970_v62, %v5958_v40 }
 0x9c9   : >> { %v5985_v42 = vadd.f32 %v5983_v33, %v5971_v38 }
 0x9ca   : >> { %v5986_v11 = vadd.f32 %v5984_v39, %v5972_v6 }
 0x9cb   : >> { %v5999_v50 = vadd.f32 %v5997_v29, %v5985_v42 }
 0x9cc   : >> { %v6000_v61 = vadd.f32 %v5998_v60, %v5986_v11 }
 0x9cd   : >> { %v6013_v5 = vadd.f32 %v6011_v30, %v5999_v50 }
 0x9ce   : >> { %v6014_v23 = vadd.f32 %v6012_v8, %v6000_v61 }
 0x9cf   : >> { %v6027_v54 = vadd.f32 %v6025_v15, %v6013_v5 }
 0x9d0   : >> { %v6028_v51 = vadd.f32 %v6026_v1, %v6014_v23 }
 0x9d1   : >> { %v6041_v48 = vadd.f32 %v6039_v26, %v6027_v54 }
 0x9d2   : >> { %v6042_v63 = vadd.f32 %v6040_v41, %v6028_v51 }
 0x9d3   : >> { %v6055_v20 = vadd.f32 %v6053_v24, %v6041_v48 }
 0x9d4   : >> { %v6056_v46 = vadd.f32 %v6054_v31, %v6042_v63 }
 0x9d5   : >> { %v6069_v45 = vadd.f32 %v6067_v36, %v6055_v20 }
 0x9d6   : >> { %v6070_v37 = vadd.f32 %v6068_v34, %v6056_v46 }
 0x9d7   : >> { %v6083_v27 = vadd.f32 %v6081_v7, %v6069_v45 }
 0x9d8   : >> { %v6084_v19 = vadd.f32 %v6082_v49, %v6070_v37 }
 0x9d9   : >> { %6087 = vrot.lane.b32.xlu0 %v6083_v27, %s8989_s14  ;;  %6095 = vrot.lane.b32.xlu1 %v6083_v27, %s8990_s26 }
 0x9dd   : >> { %6089 = vrot.lane.b32.xlu0 %v6084_v19, %s8989_s14  ;;  %6097 = vrot.lane.b32.xlu1 %v6084_v19, %s8990_s26 }
 0xa4b   : >> { %v6088_v2 = vpop.permute.xlu0 %6087  ;;  %v6096_v33 = vpop.permute.xlu1 %6095 }
 0xa4c   : >> { %v6093_v52 = vadd.f32 %v6088_v2, %v6083_v27 }
 0xa4e   : >> { %v6101_v25 = vadd.f32 %v6096_v33, %v6093_v52  ;;  %5861 = sbr.rel (!%p5859_p13) target bundleno = 2486 (0x9b6), region = 294 }
 0xa4f   : >> { %v6090_v56 = vpop.permute.xlu0 %6089  ;;  %v6098_v16 = vpop.permute.xlu1 %6097 }
 0xa50   : >> { %7628 = vst.msk [vmem:[%s7097_s16 + $0x100] sm:$0xff] %vm862_vm2, %v6101_v25  ;;  %v6094_v14 = vadd.f32 %v6090_v56, %v6084_v19 }
 0xa52   : >> { %v6102_v38 = vadd.f32 %v6098_v16, %v6094_v14 }
 0xa54   : >> { %7629 = vst.msk [vmem:[%s7097_s16 + $0x108] sm:$0xff] %vm862_vm2, %v6102_v38 }
 0xa55 LB: >> { %s7630_s21 = sshll.u32 %s8981_s0, 4  ;;  %v6116_v29 = vld [vmem:[#allocation4 + $0x300] sm:$0xff]  ;;  %v6128_v57 = vld [vmem:[#allocation4 + $0x310] sm:$0xff]  ;;  %v6117_v26 = vld [vmem:[#allocation4 + $0x308] sm:$0xff]  ;;  %s8991_s22 = smov 96   ;;  %s8981_s0 = sphi %s11279_s0, %s6111_s0  }
 0xa56   : >> { %v6142_v9 = vld [vmem:[#allocation4 + $0x320] sm:$0xff]  ;;  %v6156_v3 = vld [vmem:[#allocation4 + $0x330] sm:$0xff]  ;;  %s11287_s23 = scalar_lea.vmem [#allocation2], %s7630_s21  ;;  %v6129_v6 = vld [vmem:[#allocation4 + $0x318] sm:$0xff]  ;;  %s8992_s24 = smov 64  }
 0xa57   : >> { %v7632_v32 = vld [vmem:[%s11287_s23 + $0x180] ss:$0 sm:$0xff]  ;;  %v7635_v18 = vld [vmem:[%s11287_s23 + $0x181] ss:$0 sm:$0xff]  ;;  %v7638_v42 = vld [vmem:[%s11287_s23 + $0x182] ss:$0 sm:$0xff] }
 0xa58   : >> { %v6122_v30 = vmul.f32 %v7632_v32, %v6116_v29  ;;  %v6134_v0 = vmul.f32 %v7635_v18, %v6128_v57  ;;  %v6148_v17 = vmul.f32 %v7638_v42, %v6142_v9  ;;  %v7641_v10 = vld [vmem:[%s11287_s23 + $0x183] ss:$0 sm:$0xff]  ;;  %v7644_v28 = vld [vmem:[%s11287_s23 + $0x184] ss:$0 sm:$0xff]  ;;  %v7647_v13 = vld [vmem:[%s11287_s23 + $0x185] ss:$0 sm:$0xff]  ;;  %v6123_v47 = vmul.f32 %v7632_v32, %v6117_v26 }
 0xa59   : >> { %v6170_v62 = vld [vmem:[#allocation4 + $0x340] sm:$0xff]  ;;  %v6162_v15 = vmul.f32 %v7641_v10, %v6156_v3  ;;  %v6184_v44 = vld [vmem:[#allocation4 + $0x350] sm:$0xff]  ;;  %v6143_v60 = vld [vmem:[#allocation4 + $0x328] sm:$0xff]  ;;  %v6135_v22 = vmul.f32 %v7635_v18, %v6129_v6  ;;  %s7148_s25 = scalar_lea.vmem [#allocation5], %s7630_s21  ;;  %s6111_s0 = sadd.s32 1, %s8981_s0  }
 0xa5a   : >> { %v6136_v50 = vadd.f32 %v6134_v0, %v6122_v30  ;;  %v6176_v40 = vmul.f32 %v7644_v28, %v6170_v62  ;;  %v7650_v39 = vld [vmem:[%s11287_s23 + $0x186] ss:$0 sm:$0xff]  ;;  %v6190_v35 = vmul.f32 %v7647_v13, %v6184_v44  ;;  %v6157_v54 = vld [vmem:[#allocation4 + $0x338] sm:$0xff]  ;;  %v7653_v24 = vld [vmem:[%s11287_s23 + $0x187] ss:$0 sm:$0xff]  ;;  %v6149_v12 = vmul.f32 %v7638_v42, %v6143_v60  ;;  %p6108_p0 = scmp.ge.s32.totalorder %s6111_s0, 8  }
 0xa5b   : >> { %v6198_v5 = vld [vmem:[#allocation4 + $0x360] sm:$0xff]  ;;  %v6212_v58 = vld [vmem:[#allocation4 + $0x370] sm:$0xff]  ;;  %v6171_v48 = vld [vmem:[#allocation4 + $0x348] sm:$0xff]  ;;  %v6137_v61 = vadd.f32 %v6135_v22, %v6123_v47  ;;  %v6163_v1 = vmul.f32 %v7641_v10, %v6157_v54  ;;  %s7703_s0 = sshll.u32 (%p6108_p0), %s9090_s12, 11  ;;  %s11693_s14 = sand.u32 (%p6108_p0), 1, %s8957_s28  }
 0xa5c   : >> { %v6150_v55 = vadd.f32 %v6148_v17, %v6136_v50  ;;  %v6204_v8 = vmul.f32 %v7650_v39, %v6198_v5  ;;  %v7656_v36 = vld [vmem:[%s11287_s23 + $0x188] ss:$0 sm:$0xff]  ;;  %v6226_v53 = vld [vmem:[#allocation4 + $0x380] sm:$0xff]  ;;  %v6218_v7 = vmul.f32 %v7653_v24, %v6212_v58  ;;  %v6185_v59 = vld [vmem:[#allocation4 + $0x358] sm:$0xff]  ;;  %v6177_v21 = vmul.f32 %v7644_v28, %v6171_v48  ;;  %s11597_s12 = scalar_lea.sflag (%p6108_p0), [#allocation8], %s11693_s14  ;;  %s8993_s16 = smov (%p6108_p0), [#allocation7]  }
 0xa5d   : >> { %v7659_v23 = vld [vmem:[%s11287_s23 + $0x189] ss:$0 sm:$0xff]  ;;  %v6240_v41 = vld [vmem:[#allocation4 + $0x390] sm:$0xff]  ;;  %v6151_v45 = vadd.f32 %v6149_v12, %v6137_v61  ;;  %v6232_v31 = vmul.f32 %v7656_v36, %v6226_v53  ;;  %v7662_v4 = vld [vmem:[%s11287_s23 + $0x18a] ss:$0 sm:$0xff]  ;;  %v6191_v46 = vmul.f32 %v7647_v13, %v6185_v59  ;;  %s8891_s21 = sshll.u32 (%p6108_p0), %s8993_s16, 4  ;;  %s8892_s21 = int_to_ptr.vmem [resolvable:$false] %s8891_s21 }
 0xa5e   : >> { %v6164_v43 = vadd.f32 %v6162_v15, %v6150_v55  ;;  %v6199_v27 = vld [vmem:[#allocation4 + $0x368] sm:$0xff]  ;;  %v6254_v63 = vld [vmem:[#allocation4 + $0x3a0] sm:$0xff]  ;;  %v6246_v37 = vmul.f32 %v7659_v23, %v6240_v41  ;;  %v6213_v19 = vld [vmem:[#allocation4 + $0x378] sm:$0xff] }
 0xa5f   : >> { %v6165_v34 = vadd.f32 %v6163_v1, %v6151_v45  ;;  %v7665_v2 = vld [vmem:[%s11287_s23 + $0x18b] ss:$0 sm:$0xff]  ;;  %v6268_v33 = vld [vmem:[#allocation4 + $0x3b0] sm:$0xff]  ;;  %v6205_v25 = vmul.f32 %v7650_v39, %v6199_v27  ;;  %v6260_v16 = vmul.f32 %v7662_v4, %v6254_v63  ;;  %v7668_v38 = vld [vmem:[%s11287_s23 + $0x18c] ss:$0 sm:$0xff]  ;;  %v6219_v9 = vmul.f32 %v7653_v24, %v6213_v19 }
 0xa60   : >> { %v6178_v11 = vadd.f32 %v6176_v40, %v6164_v43  ;;  %v6227_v14 = vld [vmem:[#allocation4 + $0x388] sm:$0xff]  ;;  %v6282_v29 = vld [vmem:[#allocation4 + $0x3c0] sm:$0xff]  ;;  %v6274_v32 = vmul.f32 %v7665_v2, %v6268_v33  ;;  %v6241_v18 = vld [vmem:[#allocation4 + $0x398] sm:$0xff] }
 0xa61   : >> { %v6179_v52 = vadd.f32 %v6177_v21, %v6165_v34  ;;  %v7671_v42 = vld [vmem:[%s11287_s23 + $0x18d] ss:$0 sm:$0xff]  ;;  %v6296_v30 = vld [vmem:[#allocation4 + $0x3d0] sm:$0xff]  ;;  %v6233_v17 = vmul.f32 %v7656_v36, %v6227_v14  ;;  %v6288_v28 = vmul.f32 %v7668_v38, %v6282_v29  ;;  %v7674_v50 = vld [vmem:[%s11287_s23 + $0x18e] ss:$0 sm:$0xff]  ;;  %v6247_v44 = vmul.f32 %v7659_v23, %v6241_v18 }
 0xa62   : >> { %v6192_v20 = vadd.f32 %v6190_v35, %v6178_v11  ;;  %v6255_v62 = vld [vmem:[#allocation4 + $0x3a8] sm:$0xff]  ;;  %v6310_v15 = vld [vmem:[#allocation4 + $0x3e0] sm:$0xff]  ;;  %v6302_v40 = vmul.f32 %v7671_v42, %v6296_v30  ;;  %v6269_v39 = vld [vmem:[#allocation4 + $0x3b8] sm:$0xff] }
 0xa63   : >> { %v6193_v57 = vadd.f32 %v6191_v46, %v6179_v52  ;;  %v7677_v5 = vld [vmem:[%s11287_s23 + $0x18f] ss:$0 sm:$0xff]  ;;  %v6324_v26 = vld [vmem:[#allocation4 + $0x3f0] sm:$0xff]  ;;  %v6261_v35 = vmul.f32 %v7662_v4, %v6255_v62  ;;  %v6316_v6 = vmul.f32 %v7674_v50, %v6310_v15  ;;  %v6275_v24 = vmul.f32 %v7665_v2, %v6269_v39  ;;  %v6297_v12 = vld [vmem:[#allocation4 + $0x3d8] sm:$0xff]  ;;  %s6915_s23 = sshll.u32 (%p6108_p0), %s11178_s17, 4  ;;  %s11591_s23 = int_to_ptr.vmem [resolvable:$true] %s6915_s23 }
 0xa64   : >> { %v6206_v51 = vadd.f32 %v6204_v8, %v6192_v20  ;;  %v6283_v60 = vld [vmem:[#allocation4 + $0x3c8] sm:$0xff]  ;;  %v6330_v22 = vmul.f32 %v7677_v5, %v6324_v26  ;;  %v6303_v61 = vmul.f32 %v7671_v42, %v6297_v12  ;;  %v6325_v20 = vld [vmem:[#allocation4 + $0x3f8] sm:$0xff]  ;;  %v11320_v19 = vld [vmem:[%s11649_s11] ss:$0 sm:$0xff] (%p6108_p0)  ;;  %s8887_s26 = scalar_lea.vmem (%p6108_p0), %s11591_s23, 2048  ;;  %p8894_p4 = scmp.lt.s32.totalorder (%p6108_p0), %s11591_s23, %s8892_s21 }
 0xa65   : >> { %v6207_v0 = vadd.f32 %v6205_v25, %v6193_v57  ;;  %v6289_v8 = vmul.f32 %v7668_v38, %v6283_v60  ;;  %v6311_v36 = vld [vmem:[#allocation4 + $0x3e8] sm:$0xff]  ;;  %v6331_v41 = vmul.f32 %v7677_v5, %v6325_v20  ;;  %v6549_v25 = vld [vmem:[#allocation3 + $0x80] sm:$0xff] (%p6108_p0)  ;;  %p8888_p1 = scmp.ne.s32.totalorder (%p6108_p0), %s11591_s23, %s8887_s26 }
 0xa66   : >> { %v6220_v49 = vadd.f32 %v6218_v7, %v6206_v51  ;;  %v6317_v59 = vmul.f32 %v7674_v50, %v6311_v36  ;;  %v6417_v29 = vld [vmem:[#allocation3] sm:$0xff] (%p6108_p0)  ;;  %v6418_v42 = vld [vmem:[#allocation3 + $0x8] sm:$0xff] (%p6108_p0) }
 0xa67   : >> { %v6221_v13 = vadd.f32 %v6219_v9, %v6207_v0  ;;  %v6550_v9 = vld [vmem:[#allocation3 + $0x88] sm:$0xff] (%p6108_p0)  ;;  %p8889_p2 = pnand (%p6108_p0), %p8888_p1, %p9107_p5 }
 0xa68   : >> { %v6234_v56 = vadd.f32 %v6232_v31, %v6220_v49 }
 0xa69   : >> { %v6235_v43 = vadd.f32 %v6233_v17, %v6221_v13  ;;  %p8890_p3 = pneg (%p6108_p0), %p8889_p2 }
 0xa6a   : >> { %v6248_v3 = vadd.f32 %v6246_v37, %v6234_v56  ;;  %v11315_v37 = vld [vmem:[%s11648_s10] ss:$0 sm:$0xff] (%p6108_p0) }
 0xa6b   : >> { %v6249_v54 = vadd.f32 %v6247_v44, %v6235_v43 }
 0xa6c   : >> { %v6262_v10 = vadd.f32 %v6260_v16, %v6248_v3 }
 0xa6d   : >> { %v6263_v11 = vadd.f32 %v6261_v35, %v6249_v54 }
 0xa6e   : >> { %v6276_v55 = vadd.f32 %v6274_v32, %v6262_v10 }
 0xa6f   : >> { %v6277_v53 = vadd.f32 %v6275_v24, %v6263_v11 }
 0xa70   : >> { %v6290_v47 = vadd.f32 %v6288_v28, %v6276_v55  ;;  %v6551_v55 = vld [vmem:[#allocation3 + $0x90] sm:$0xff] (%p6108_p0) }
 0xa71   : >> { %v6291_v7 = vadd.f32 %v6289_v8, %v6277_v53 }
 0xa72   : >> { %v6304_v58 = vadd.f32 %v6302_v40, %v6290_v47 }
 0xa73   : >> { %v6305_v23 = vadd.f32 %v6303_v61, %v6291_v7 }
 0xa74   : >> { %v6318_v48 = vadd.f32 %v6316_v6, %v6304_v58  ;;  %v6419_v6 = vld [vmem:[#allocation3 + $0x10] sm:$0xff] (%p6108_p0) }
 0xa75   : >> { %v6319_v45 = vadd.f32 %v6317_v59, %v6305_v23 }
 0xa76   : >> { %v6332_v1 = vadd.f32 %v6330_v22, %v6318_v48  ;;  %v6552_v48 = vld [vmem:[#allocation3 + $0x98] sm:$0xff] (%p6108_p0) }
 0xa77   : >> { %v6333_v21 = vadd.f32 %v6331_v41, %v6319_v45 }
 0xa78   : >> { %6336 = vrot.lane.b32.xlu0 %v6332_v1, %s8991_s22  ;;  %6344 = vrot.lane.b32.xlu1 %v6332_v1, %s8992_s24 }
 0xa7c   : >> { %6338 = vrot.lane.b32.xlu0 %v6333_v21, %s8991_s22  ;;  %6346 = vrot.lane.b32.xlu1 %v6333_v21, %s8992_s24 }
 0xaea   : >> { %v6337_v51 = vpop.permute.xlu0 %6336  ;;  %v6345_v31 = vpop.permute.xlu1 %6344 }
 0xaeb   : >> { %v6342_v27 = vadd.f32 %v6337_v51, %v6332_v1  ;;  %v6420_v1 = vld [vmem:[#allocation3 + $0x18] sm:$0xff] (%p6108_p0) }
 0xaed   : >> { %v6350_v4 = vadd.f32 %v6345_v31, %v6342_v27  ;;  %6110 = sbr.rel (!%p6108_p0) target bundleno = 2645 (0xa55), region = 305  ;;  %v6553_v31 = vld [vmem:[#allocation3 + $0xa0] sm:$0xff] (%p6108_p0) }
 0xaee   : >> { %v6339_v63 = vpop.permute.xlu0 %6338  ;;  %v6347_v34 = vpop.permute.xlu1 %6346 }
 0xaef   : >> { %7679 = vst.msk [vmem:[%s7148_s25 + $0x180] sm:$0xff] %vm862_vm2, %v6350_v4  ;;  %v6343_v46 = vadd.f32 %v6339_v63, %v6333_v21  ;;  %v6421_v63 = vld [vmem:[#allocation3 + $0x20] sm:$0xff] (%p6108_p0) }
 0xaf1   : >> { %v6351_v49 = vadd.f32 %v6347_v34, %v6343_v46 }
 0xaf3   : >> { %7680 = vst.msk [vmem:[%s7148_s25 + $0x188] sm:$0xff] %vm862_vm2, %v6351_v49  ;;  %s11589_s25 = scalar_lea.hbm (%p6108_p0), %s11651_s13, %s7703_s0  ;;  %s8893_s0 = scalar_lea.vmem (%p6108_p0), %s8892_s21, 4096 }
 0xaf4   : > { %p8895_p7 = scmp.lt.s32.totalorder %s8893_s0, %s8887_s26 }
 0xaf6   : > { %p8896_p8 = por %p8895_p7, %p8894_p4 }
 0xaf8   : > { %p8897_p9 = pnand %p8896_p8, %p8890_p3 }
 0xafa   : > { %v6501_v2 = vld [vmem:[#allocation5 + $0x80] sm:$0xff]  ;;  %v6502_v16 = vld [vmem:[#allocation5 + $0x88] sm:$0xff]  ;;  %v6503_v32 = vld [vmem:[#allocation5 + $0x90] sm:$0xff] }
 0xafb   : > { %v6517_v33 = vmul.f32 %v11315_v37, %v6501_v2  ;;  %v6357_v52 = vld [vmem:[#allocation5] sm:$0xff]  ;;  %v6358_v14 = vld [vmem:[#allocation5 + $0x8] sm:$0xff]  ;;  %v6518_v57 = vmul.f32 %v11315_v37, %v6502_v16  ;;  %v6519_v30 = vmul.f32 %v11315_v37, %v6503_v32  ;;  %v6359_v0 = vld [vmem:[#allocation5 + $0x10] sm:$0xff] }
 0xafc   : > { %v6379_v56 = vmul.f32 %v11315_v37, %v6357_v52  ;;  %v6380_v3 = vmul.f32 %v11315_v37, %v6358_v14  ;;  %v6504_v17 = vld [vmem:[#allocation5 + $0x98] sm:$0xff]  ;;  %v6381_v50 = vmul.f32 %v11315_v37, %v6359_v0  ;;  %v6505_v5 = vld [vmem:[#allocation5 + $0xa0] sm:$0xff]  ;;  %v6506_v61 = vld [vmem:[#allocation5 + $0xa8] sm:$0xff] }
 0xafd   : > { %v6533_v38 = vadd.f32 %v11320_v19, %v6517_v33  ;;  %v6534_v28 = vadd.f32 %v11320_v19, %v6518_v57  ;;  %v6360_v15 = vld [vmem:[#allocation5 + $0x18] sm:$0xff]  ;;  %v6535_v44 = vadd.f32 %v11320_v19, %v6519_v30  ;;  %v6520_v40 = vmul.f32 %v11315_v37, %v6504_v17  ;;  %v6361_v60 = vld [vmem:[#allocation5 + $0x20] sm:$0xff]  ;;  %v6362_v20 = vld [vmem:[#allocation5 + $0x28] sm:$0xff] }
 0xafe   : > { %v6401_v18 = vadd.f32 %v11320_v19, %v6379_v56  ;;  %v6402_v62 = vadd.f32 %v11320_v19, %v6380_v3  ;;  %v6382_v39 = vmul.f32 %v11315_v37, %v6360_v15  ;;  %v6403_v47 = vadd.f32 %v11320_v19, %v6381_v50  ;;  %v6507_v45 = vld [vmem:[#allocation5 + $0xb0] sm:$0xff]  ;;  %v6508_v52 = vld [vmem:[#allocation5 + $0xb8] sm:$0xff]  ;;  %v6554_v16 = vld [vmem:[#allocation3 + $0xa8] sm:$0xff] }
 0xaff   : > { %v6565_v10 = vadd.f32 %v6549_v25, %v6533_v38  ;;  %v6566_v43 = vadd.f32 %v6550_v9, %v6534_v28  ;;  %v6567_v58 = vadd.f32 %v6551_v55, %v6535_v44  ;;  %v6536_v22 = vadd.f32 %v11320_v19, %v6520_v40  ;;  %v6363_v34 = vld [vmem:[#allocation5 + $0x30] sm:$0xff]  ;;  %v6509_v57 = vld [vmem:[#allocation5 + $0xc0] sm:$0xff]  ;;  %v6422_v9 = vld [vmem:[#allocation3 + $0x28] sm:$0xff] }
 0xb00   : > { %v6433_v13 = vadd.f32 %v6417_v29, %v6401_v18  ;;  %v6434_v35 = vadd.f32 %v6418_v42, %v6402_v62  ;;  %v6521_v12 = vmul.f32 %v11315_v37, %v6505_v5  ;;  %v6435_v8 = vadd.f32 %v6419_v6, %v6403_v47  ;;  %v6364_v29 = vld [vmem:[#allocation5 + $0x38] sm:$0xff]  ;;  %v6365_v18 = vld [vmem:[#allocation5 + $0x40] sm:$0xff]  ;;  %v6555_v62 = vld [vmem:[#allocation3 + $0xb0] sm:$0xff] }
 0xb01   : > { %v6581_v26 = vmax.f32 %v6565_v10, 0.0  ;;  %v6582_v24 = vmax.f32 %v6566_v43, 0.0  ;;  %v6404_v36 = vadd.f32 %v11320_v19, %v6382_v39  ;;  %v6383_v53 = vmul.f32 %v11315_v37, %v6361_v60  ;;  %v6423_v15 = vld [vmem:[#allocation3 + $0x30] sm:$0xff]  ;;  %v6510_v44 = vld [vmem:[#allocation5 + $0xc8] sm:$0xff] }
 0xb02   : > { %v6449_v54 = vmax.f32 %v6433_v13, 0.0  ;;  %v6450_v11 = vmax.f32 %v6434_v35, 0.0  ;;  %v6583_v7 = vmax.f32 %v6567_v58, 0.0  ;;  %v6568_v59 = vadd.f32 %v6552_v48, %v6536_v22  ;;  %v6366_v55 = vld [vmem:[#allocation5 + $0x48] sm:$0xff]  ;;  %v6511_v47 = vld [vmem:[#allocation5 + $0xd0] sm:$0xff]  ;;  %v6425_v48 = vld [vmem:[#allocation3 + $0x40] sm:$0xff] }
 0xb03   : > { %6597 = vxpose.xlu1.b32.start [1/16] (narrow) %v6581_v26, 32  ;;  %v6537_v23 = vadd.f32 %v11320_v19, %v6521_v12  ;;  %v6522_v41 = vmul.f32 %v11315_v37, %v6506_v61  ;;  %v6451_v21 = vmax.f32 %v6435_v8, 0.0  ;;  %v6436_v51 = vadd.f32 %v6420_v1, %v6404_v36  ;;  %v6556_v26 = vld [vmem:[#allocation3 + $0xb8] sm:$0xff] }
 0xb04   : > { %6465 = vxpose.xlu0.b32.start [1/16] (narrow) %v6449_v54, 32  ;;  %v6405_v27 = vadd.f32 %v11320_v19, %v6383_v53  ;;  %v6384_v4 = vmul.f32 %v11315_v37, %v6362_v20  ;;  %v6523_v46 = vmul.f32 %v11315_v37, %v6507_v45  ;;  %v6584_v49 = vmax.f32 %v6568_v59, 0.0  ;;  %v6424_v54 = vld [vmem:[#allocation3 + $0x38] sm:$0xff] }
 0xb05   : > { %v6569_v2 = vadd.f32 %v6553_v31, %v6537_v23  ;;  %v6538_v33 = vadd.f32 %v11320_v19, %v6522_v41  ;;  %v6452_v25 = vmax.f32 %v6436_v51, 0.0  ;;  %v6385_v38 = vmul.f32 %v11315_v37, %v6363_v34  ;;  %v6512_v20 = vld [vmem:[#allocation5 + $0xd8] sm:$0xff]  ;;  %v6558_v31 = vld [vmem:[#allocation3 + $0xc8] sm:$0xff] }
 0xb06   : > { %v6437_v56 = vadd.f32 %v6421_v63, %v6405_v27  ;;  %v6406_v14 = vadd.f32 %v11320_v19, %v6384_v4  ;;  %v6539_v3 = vadd.f32 %v11320_v19, %v6523_v46  ;;  %v6524_v32 = vmul.f32 %v11315_v37, %v6508_v52  ;;  %v6368_v45 = vld [vmem:[#allocation5 + $0x58] sm:$0xff]  ;;  %v6426_v27 = vld [vmem:[#allocation3 + $0x48] sm:$0xff]  ;;  %v6634_v4 = vld [vmem:[#allocation5 + $0x100] sm:$0xff] }
 0xb07   : > { %6598 = vxpose.xlu1.b32.cont [2/16] (narrow) %v6582_v24, 32  ;;  %v6585_v42 = vmax.f32 %v6569_v2, 0.0  ;;  %v6570_v30 = vadd.f32 %v6554_v16, %v6538_v33  ;;  %v6386_v0 = vmul.f32 %v11315_v37, %v6364_v29  ;;  %v6525_v17 = vmul.f32 %v11315_v37, %v6509_v57  ;;  %v6557_v24 = vld [vmem:[#allocation3 + $0xc0] sm:$0xff]  ;;  %v6635_v2 = vld [vmem:[#allocation5 + $0x108] sm:$0xff] }
 0xb08   : > { %6466 = vxpose.xlu0.b32.cont [2/16] (narrow) %v6450_v11, 32  ;;  %v6453_v10 = vmax.f32 %v6437_v56, 0.0  ;;  %v6438_v28 = vadd.f32 %v6422_v9, %v6406_v14  ;;  %v6407_v50 = vadd.f32 %v11320_v19, %v6385_v38  ;;  %v6387_v13 = vmul.f32 %v11315_v37, %v6365_v18  ;;  %v6367_v11 = vld [vmem:[#allocation5 + $0x50] sm:$0xff] }
 0xb09   : > { %v6540_v40 = vadd.f32 %v11320_v19, %v6524_v32  ;;  %v6586_v39 = vmax.f32 %v6570_v30, 0.0  ;;  %v6571_v5 = vadd.f32 %v6555_v62, %v6539_v3  ;;  %v6408_v43 = vadd.f32 %v11320_v19, %v6386_v0  ;;  %v6769_v14 = vld [vmem:[#allocation5 + $0x190] sm:$0xff] }
 0xb0a   : > { %v6541_v35 = vadd.f32 %v11320_v19, %v6525_v17  ;;  %v6454_v6 = vmax.f32 %v6438_v28, 0.0  ;;  %v6439_v60 = vadd.f32 %v6423_v15, %v6407_v50  ;;  %v6526_v58 = vmul.f32 %v11315_v37, %v6510_v44  ;;  %v6636_v3 = vld [vmem:[#allocation5 + $0x110] sm:$0xff]  ;;  %v6770_v17 = vld [vmem:[#allocation5 + $0x198] sm:$0xff]  ;;  %v6513_v50 = vld [vmem:[#allocation5 + $0xe0] sm:$0xff] }
 0xb0b   : > { %6599 = vxpose.xlu1.b32.cont [3/16] (narrow) %v6583_v7, 32  ;;  %v6388_v22 = vmul.f32 %v11315_v37, %v6366_v55  ;;  %v6409_v12 = vadd.f32 %v11320_v19, %v6387_v13  ;;  %v6572_v8 = vadd.f32 %v6556_v26, %v6540_v40  ;;  %v6527_v36 = vmul.f32 %v11315_v37, %v6511_v47  ;;  %v6427_v18 = vld [vmem:[#allocation3 + $0x50] sm:$0xff]  ;;  %v6369_v26 = vld [vmem:[#allocation5 + $0x60] sm:$0xff] }
 0xb0c   : > { %6467 = vxpose.xlu0.b32.cont [3/16] (narrow) %v6451_v21, 32  ;;  %v6587_v53 = vmax.f32 %v6571_v5, 0.0  ;;  %v6440_v61 = vadd.f32 %v6424_v54, %v6408_v43  ;;  %v11361_v1 = vadd.f32 %v6557_v24, %v6541_v35  ;;  %v6455_v7 = vmax.f32 %v6439_v60, 0.0  ;;  %v6767_v21 = vld [vmem:[#allocation5 + $0x180] sm:$0xff]  ;;  %v6560_v60 = vld [vmem:[#allocation3 + $0xd8] sm:$0xff] }
 0xb0d   : > { %v6542_v59 = vadd.f32 %v11320_v19, %v6526_v58  ;;  %v6410_v23 = vadd.f32 %v11320_v19, %v6388_v22  ;;  %v6389_v41 = vmul.f32 %v11315_v37, %v6367_v11  ;;  %v11366_v51 = vadd.f32 %v6425_v48, %v6409_v12  ;;  %v6428_v54 = vld [vmem:[#allocation3 + $0x58] sm:$0xff]  ;;  %v6638_v22 = vld [vmem:[#allocation5 + $0x120] sm:$0xff]  ;;  %v6772_v48 = vld [vmem:[#allocation5 + $0x1a8] sm:$0xff] }
 0xb0e   : > { %v6588_v63 = vmax.f32 %v6572_v8, 0.0  ;;  %v6543_v34 = vadd.f32 %v11320_v19, %v6527_v36  ;;  %v6528_v46 = vmul.f32 %v11315_v37, %v6512_v20  ;;  %v6456_v33 = vmax.f32 %v6440_v61, 0.0  ;;  %v6639_v36 = vld [vmem:[#allocation5 + $0x128] sm:$0xff] }
 0xb0f   : > { %6600 = vxpose.xlu1.b32.cont [4/16] (narrow) %v6584_v49, 32  ;;  %v6768_v49 = vld [vmem:[#allocation5 + $0x188] sm:$0xff]  ;;  %v6589_v52 = vmax.f32 %v11361_v1, 0.0  ;;  %v6390_v56 = vmul.f32 %v11315_v37, %v6368_v45  ;;  %v6783_v16 = vmul.f32 %v11315_v37, %v6767_v21  ;;  %v11373_v38 = vadd.f32 %v6558_v31, %v6542_v59  ;;  %v6640_v31 = vld [vmem:[#allocation5 + $0x130] sm:$0xff] }
 0xb10   : > { %6468 = vxpose.xlu0.b32.cont [4/16] (narrow) %v6452_v25, 32  ;;  %v6559_v25 = vld [vmem:[#allocation3 + $0xd0] sm:$0xff]  ;;  %v11375_v29 = vadd.f32 %v6426_v27, %v6410_v23  ;;  %v6411_v57 = vadd.f32 %v11320_v19, %v6389_v41  ;;  %v6650_v9 = vmul.f32 %v11315_v37, %v6634_v4  ;;  %v6457_v32 = vmax.f32 %v11366_v51, 0.0  ;;  %v6514_v20 = vld [vmem:[#allocation5 + $0xe8] sm:$0xff] }
 0xb11   : > { %v6784_v30 = vmul.f32 %v11315_v37, %v6768_v49  ;;  %v6651_v0 = vmul.f32 %v11315_v37, %v6635_v2  ;;  %v11385_v28 = vadd.f32 %v6559_v25, %v6543_v34  ;;  %v6544_v62 = vadd.f32 %v11320_v19, %v6528_v46  ;;  %v6773_v23 = vld [vmem:[#allocation5 + $0x1b0] sm:$0xff]  ;;  %v6774_v49 = vld [vmem:[#allocation5 + $0x1b8] sm:$0xff] }
 0xb12   : > { %v11389_v15 = vadd.f32 %v11320_v19, %v6650_v9  ;;  %v6785_v13 = vmul.f32 %v11315_v37, %v6769_v14  ;;  %v6412_v44 = vadd.f32 %v11320_v19, %v6390_v56  ;;  %v11400_v5 = vadd.f32 %v6427_v18, %v6411_v57  ;;  %v6515_v4 = vld [vmem:[#allocation5 + $0xf0] sm:$0xff]  ;;  %v6641_v2 = vld [vmem:[#allocation5 + $0x138] sm:$0xff]  ;;  %v6429_v9 = vld [vmem:[#allocation3 + $0x60] sm:$0xff] }
 0xb13   : > { %6601 = vxpose.xlu1.b32.cont [5/16] (narrow) %v6585_v42, 32  ;;  %v11381_v42 = vadd.f32 %v11320_v19, %v6783_v16  ;;  %v11394_v55 = vadd.f32 %v11320_v19, %v6784_v30  ;;  %v11397_v40 = vadd.f32 %v11320_v19, %v6651_v0  ;;  %v6786_v35 = vmul.f32 %v11315_v37, %v6770_v17  ;;  %v6775_v17 = vld [vmem:[#allocation5 + $0x1c0] sm:$0xff] }
 0xb14   : > { %6469 = vxpose.xlu0.b32.cont [5/16] (narrow) %v6453_v10, 32  ;;  %v6637_v10 = vld [vmem:[#allocation5 + $0x118] sm:$0xff]  ;;  %v11403_v43 = vadd.f32 %v11320_v19, %v6785_v13  ;;  %v6529_v24 = vmul.f32 %v11315_v37, %v6513_v50  ;;  %v6590_v12 = vmax.f32 %v11373_v38, 0.0  ;;  %v6591_v61 = vmax.f32 %v11385_v28, 0.0 }
 0xb15   : > { %v6653_v47 = vmul.f32 %v11315_v37, %v6637_v10  ;;  %v11413_v11 = vadd.f32 %v11320_v19, %v6786_v35  ;;  %v6391_v1 = vmul.f32 %v11315_v37, %v6369_v26  ;;  %v6459_v41 = vmax.f32 %v11400_v5, 0.0  ;;  %v6372_v50 = vld [vmem:[#allocation5 + $0x78] sm:$0xff] }
 0xb16   : > { %v11423_v45 = vadd.f32 %v6560_v60, %v6544_v62  ;;  %v11425_v21 = vadd.f32 %v6428_v54, %v6412_v44  ;;  %v6654_v51 = vmul.f32 %v11315_v37, %v6638_v22  ;;  %v6545_v27 = vadd.f32 %v11320_v19, %v6529_v24  ;;  %v6516_v62 = vld [vmem:[#allocation5 + $0xf8] sm:$0xff]  ;;  %v6642_v44 = vld [vmem:[#allocation5 + $0x140] sm:$0xff]  ;;  %v6562_v24 = vld [vmem:[#allocation3 + $0xe8] sm:$0xff] }
 0xb17   : > { %6602 = vxpose.xlu1.b32.cont [6/16] (narrow) %v6586_v39, 32  ;;  %v6652_v39 = vmul.f32 %v11315_v37, %v6636_v3  ;;  %v11416_v8 = vadd.f32 %v11320_v19, %v6653_v47  ;;  %v6788_v34 = vmul.f32 %v11315_v37, %v6772_v48  ;;  %v6655_v46 = vmul.f32 %v11315_v37, %v6639_v36  ;;  %v6776_v47 = vld [vmem:[#allocation5 + $0x1c8] sm:$0xff]  ;;  %v6777_v36 = vld [vmem:[#allocation5 + $0x1d0] sm:$0xff] }
 0xb18   : > { %6470 = vxpose.xlu0.b32.cont [6/16] (narrow) %v6454_v6, 32  ;;  %v6771_v6 = vld [vmem:[#allocation5 + $0x1a0] sm:$0xff]  ;;  %v11437_v56 = vadd.f32 %v11320_v19, %v6654_v51  ;;  %v6789_v16 = vmul.f32 %v11315_v37, %v6773_v23  ;;  %v6413_v14 = vadd.f32 %v11320_v19, %v6391_v1  ;;  %v6656_v57 = vmul.f32 %v11315_v37, %v6640_v31  ;;  %v6430_v22 = vld [vmem:[#allocation3 + $0x68] sm:$0xff]  ;;  %v6778_v51 = vld [vmem:[#allocation5 + $0x1d8] sm:$0xff] }
 0xb19   : > { %v11409_v58 = vadd.f32 %v11320_v19, %v6652_v39  ;;  %v6787_v59 = vmul.f32 %v11315_v37, %v6771_v6  ;;  %v11442_v38 = vadd.f32 %v11320_v19, %v6788_v34  ;;  %v6531_v3 = vmul.f32 %v11315_v37, %v6515_v4  ;;  %v6643_v6 = vld [vmem:[#allocation5 + $0x148] sm:$0xff]  ;;  %v6645_v31 = vld [vmem:[#allocation5 + $0x158] sm:$0xff] }
 0xb1a   : > { %v11450_v18 = vadd.f32 %v11320_v19, %v6789_v16  ;;  %v6790_v30 = vmul.f32 %v11315_v37, %v6774_v49  ;;  %v6657_v0 = vmul.f32 %v11315_v37, %v6641_v2  ;;  %v6592_v10 = vmax.f32 %v11423_v45, 0.0 }
 0xb1b   : > { %6603 = vxpose.xlu1.b32.cont [7/16] (narrow) %v6587_v53, 32  ;;  %v6458_v53 = vmax.f32 %v11375_v29, 0.0  ;;  %v11445_v29 = vadd.f32 %v11320_v19, %v6655_v46  ;;  %v11456_v13 = vadd.f32 %v11320_v19, %v6656_v57  ;;  %v6460_v60 = vmax.f32 %v11425_v21, 0.0  ;;  %v6563_v46 = vld [vmem:[#allocation3 + $0xf0] sm:$0xff] }
 0xb1c   : > { %6471 = vxpose.xlu0.b32.cont [7/16] (narrow) %v6455_v7, 32  ;;  %v6370_v7 = vld [vmem:[#allocation5 + $0x68] sm:$0xff]  ;;  %v11461_v26 = vadd.f32 %v11320_v19, %v6790_v30  ;;  %v11464_v35 = vadd.f32 %v11320_v19, %v6657_v0  ;;  %v6445_v54 = vadd.f32 %v6429_v9, %v6413_v14  ;;  %v6791_v48 = vmul.f32 %v11315_v37, %v6775_v17  ;;  %v6779_v9 = vld [vmem:[#allocation5 + $0x1e0] sm:$0xff] }
 0xb1d   : > { %v6392_v25 = vmul.f32 %v11315_v37, %v6370_v7  ;;  %v6532_v1 = vmul.f32 %v11315_v37, %v6516_v62  ;;  %v6658_v7 = vmul.f32 %v11315_v37, %v6642_v44  ;;  %v6792_v45 = vmul.f32 %v11315_v37, %v6776_v47  ;;  %v6646_v30 = vld [vmem:[#allocation5 + $0x160] sm:$0xff]  ;;  %v6780_v62 = vld [vmem:[#allocation5 + $0x1e8] sm:$0xff] }
 0xb1e   : > { %v11474_v23 = vadd.f32 %v11320_v19, %v6791_v48  ;;  %v6659_v21 = vmul.f32 %v11315_v37, %v6643_v6  ;;  %v6793_v34 = vmul.f32 %v11315_v37, %v6777_v36  ;;  %v6794_v14 = vmul.f32 %v11315_v37, %v6778_v51  ;;  %v6781_v6 = vld [vmem:[#allocation5 + $0x1f0] sm:$0xff] }
 0xb1f   : > { %6604 = vxpose.xlu1.b32.cont [8/16] (narrow) %v6588_v63, 32  ;;  %v11430_v63 = vadd.f32 %v11320_v19, %v6787_v59  ;;  %v6414_v5 = vadd.f32 %v11320_v19, %v6392_v25  ;;  %v11479_v4 = vadd.f32 %v11320_v19, %v6658_v7  ;;  %v11484_v2 = vadd.f32 %v11320_v19, %v6792_v45  ;;  %v6649_v7 = vld [vmem:[#allocation5 + $0x178] sm:$0xff] }
 0xb20   : > { %6472 = vxpose.xlu0.b32.cont [8/16] (narrow) %v6456_v33, 32  ;;  %v6561_v33 = vld [vmem:[#allocation3 + $0xe0] sm:$0xff]  ;;  %v6461_v25 = vmax.f32 %v6445_v54, 0.0  ;;  %v11491_v16 = vadd.f32 %v11320_v19, %v6793_v34  ;;  %v6661_v57 = vmul.f32 %v11315_v37, %v6645_v31  ;;  %v6548_v17 = vadd.f32 %v11320_v19, %v6532_v1  ;;  %v6782_v1 = vld [vmem:[#allocation5 + $0x1f8] sm:$0xff] }
 0xb21   : > { %v6577_v28 = vadd.f32 %v6561_v33, %v6545_v27  ;;  %v6446_v27 = vadd.f32 %v6430_v22, %v6414_v5  ;;  %v11487_v33 = vadd.f32 %v11320_v19, %v6659_v21  ;;  %v6795_v47 = vmul.f32 %v11315_v37, %v6779_v9  ;;  %v6815_v34 = vld [vmem:[#allocation3 + $0x180] sm:$0xff] }
 0xb22   : > { %v6662_v22 = vmul.f32 %v11315_v37, %v6646_v30  ;;  %v6796_v36 = vmul.f32 %v11315_v37, %v6780_v62  ;;  %v6797_v45 = vmul.f32 %v11315_v37, %v6781_v6  ;;  %v6831_v30 = vadd.f32 %v6815_v34, %v11381_v42  ;;  %v6816_v62 = vld [vmem:[#allocation3 + $0x188] sm:$0xff] }
 0xb23   : > { %6605 = vxpose.xlu1.b32.cont [9/16] (narrow) %v6589_v52, 32  ;;  %v6530_v52 = vmul.f32 %v11315_v37, %v6514_v20  ;;  %v6394_v20 = vmul.f32 %v11315_v37, %v6372_v50  ;;  %v6593_v59 = vmax.f32 %v6577_v28, 0.0  ;;  %v11503_v28 = vadd.f32 %v11320_v19, %v6661_v57  ;;  %v6647_v50 = vld [vmem:[#allocation5 + $0x168] sm:$0xff] }
 0xb24   : > { %6473 = vxpose.xlu0.b32.cont [9/16] (narrow) %v6457_v32, 32  ;;  %v6371_v32 = vld [vmem:[#allocation5 + $0x70] sm:$0xff]  ;;  %v11509_v48 = vadd.f32 %v11320_v19, %v6795_v47  ;;  %v11518_v51 = vadd.f32 %v11320_v19, %v6796_v36  ;;  %v6819_v36 = vld [vmem:[#allocation3 + $0x1a0] sm:$0xff] }
 0xb25   : > { %v6546_v39 = vadd.f32 %v11320_v19, %v6530_v52  ;;  %v6416_v5 = vadd.f32 %v11320_v19, %v6394_v20  ;;  %v6684_v47 = vld [vmem:[#allocation3 + $0x110] sm:$0xff] }
 0xb27   : > { %6606 = vxpose.xlu1.b32.cont [10/16] (narrow) %v6590_v12, 32  ;;  %v6393_v12 = vmul.f32 %v11315_v37, %v6371_v32 }
 0xb28   : > { %6474 = vxpose.xlu0.b32.cont [10/16] (narrow) %v6458_v53, 32  ;;  %v6547_v53 = vadd.f32 %v11320_v19, %v6531_v3  ;;  %v6431_v3 = vld [vmem:[#allocation3 + $0x70] sm:$0xff] }
 0xb29   : > { %v6415_v49 = vadd.f32 %v11320_v19, %v6393_v12  ;;  %v6648_v12 = vld [vmem:[#allocation5 + $0x170] sm:$0xff] }
 0xb2a   : > { %v6579_v0 = vadd.f32 %v6563_v46, %v6547_v53  ;;  %v6663_v53 = vmul.f32 %v11315_v37, %v6647_v50  ;;  %v11525_v46 = vadd.f32 %v11320_v19, %v6797_v45  ;;  %v6847_v50 = vmax.f32 %v6831_v30, 0.0 }
 0xb2b   : > { %6607 = vxpose.xlu1.b32.cont [11/16] (narrow) %v6591_v61, 32  ;;  %v6644_v61 = vld [vmem:[#allocation5 + $0x150] sm:$0xff]  ;;  %v6447_v54 = vadd.f32 %v6431_v3, %v6415_v49  ;;  %v6798_v49 = vmul.f32 %v11315_v37, %v6782_v1 }
 0xb2c   : > { %6475 = vxpose.xlu0.b32.cont [11/16] (narrow) %v6459_v41, 32  ;;  %v6578_v41 = vadd.f32 %v6562_v24, %v6546_v39  ;;  %v6660_v52 = vmul.f32 %v11315_v37, %v6644_v61  ;;  %v6564_v39 = vld [vmem:[#allocation3 + $0xf8] sm:$0xff]  ;;  %v6595_v20 = vmax.f32 %v6579_v0, 0.0  ;;  %v11521_v31 = vadd.f32 %v11320_v19, %v6663_v53  ;;  %v6686_v53 = vld [vmem:[#allocation3 + $0x120] sm:$0xff] }
 0xb2d   : > { %v6432_v24 = vld [vmem:[#allocation3 + $0x78] sm:$0xff]  ;;  %v6580_v61 = vadd.f32 %v6564_v39, %v6548_v17  ;;  %v11533_v57 = vadd.f32 %v11320_v19, %v6798_v49 }
 0xb2e   : > { %v11496_v32 = vadd.f32 %v11320_v19, %v6660_v52  ;;  %v6594_v44 = vmax.f32 %v6578_v41, 0.0  ;;  %v6448_v21 = vadd.f32 %v6432_v24, %v6416_v5  ;;  %v6664_v41 = vmul.f32 %v11315_v37, %v6648_v12  ;;  %v6685_v24 = vld [vmem:[#allocation3 + $0x118] sm:$0xff] }
 0xb2f   : > { %6608 = vxpose.xlu1.b32.cont [12/16] (narrow) %v6592_v10, 32  ;;  %v11500_v10 = vadd.f32 %v11320_v19, %v6794_v14  ;;  %v6665_v52 = vmul.f32 %v11315_v37, %v6649_v7  ;;  %v6596_v3 = vmax.f32 %v6580_v61, 0.0  ;;  %v6683_v37 = vld [vmem:[#allocation3 + $0x108] sm:$0xff] }
 0xb30   : > { %6476 = vxpose.xlu0.b32.cont [12/16] (narrow) %v6460_v60, 32  ;;  %v6462_v60 = vmax.f32 %v6446_v27, 0.0  ;;  %v6463_v27 = vmax.f32 %v6447_v54, 0.0  ;;  %v11530_v14 = vadd.f32 %v11320_v19, %v6664_v41  ;;  %v6464_v0 = vmax.f32 %v6448_v21, 0.0  ;;  %v6818_v54 = vld [vmem:[#allocation3 + $0x198] sm:$0xff]  ;;  %v6687_v61 = vld [vmem:[#allocation3 + $0x128] sm:$0xff] }
 0xb31   : > { %v11536_v9 = vadd.f32 %v11320_v19, %v6665_v52  ;;  %v6699_v5 = vadd.f32 %v6683_v37, %v11397_v40  ;;  %v6701_v40 = vadd.f32 %v6685_v24, %v11416_v8  ;;  %v6703_v8 = vadd.f32 %v6687_v61, %v11445_v29  ;;  %v6821_v41 = vld [vmem:[#allocation3 + $0x1b0] sm:$0xff]  ;;  %v6822_v52 = vld [vmem:[#allocation3 + $0x1b8] sm:$0xff] }
 0xb33   : > { %6609 = vxpose.xlu1.b32.cont [13/16] (narrow) %v6593_v59, 32  ;;  %v11514_v59 = vadd.f32 %v11320_v19, %v6662_v22  ;;  %v6817_v19 = vld [vmem:[#allocation3 + $0x190] sm:$0xff]  ;;  %v6717_v7 = vmax.f32 %v6701_v40, 0.0  ;;  %v6719_v49 = vmax.f32 %v6703_v8, 0.0 }
 0xb34   : > { %6477 = vxpose.xlu0.b32.cont [13/16] (narrow) %v6461_v25, 32  ;;  %v6682_v25 = vld [vmem:[#allocation3 + $0x100] sm:$0xff]  ;;  %v6833_v42 = vadd.f32 %v6817_v19, %v11403_v43  ;;  %v6835_v43 = vadd.f32 %v6819_v36, %v11430_v63  ;;  %v6837_v63 = vadd.f32 %v6821_v41, %v11450_v18  ;;  %v6825_v19 = vld [vmem:[#allocation3 + $0x1d0] sm:$0xff]  ;;  %v6828_v36 = vld [vmem:[#allocation3 + $0x1e8] sm:$0xff] }
 0xb35   : > { %v6698_v17 = vadd.f32 %v6682_v25, %v11389_v15  ;;  %v6700_v15 = vadd.f32 %v6684_v47, %v11409_v58  ;;  %v6702_v58 = vadd.f32 %v6686_v53, %v11437_v56  ;;  %v6689_v25 = vld [vmem:[#allocation3 + $0x138] sm:$0xff]  ;;  %v6692_v47 = vld [vmem:[#allocation3 + $0x150] sm:$0xff]  ;;  %v6695_v53 = vld [vmem:[#allocation3 + $0x168] sm:$0xff] }
 0xb36   : > { %v6849_v22 = vmax.f32 %v6833_v42, 0.0  ;;  %v6851_v45 = vmax.f32 %v6835_v43, 0.0  ;;  %v6705_v29 = vadd.f32 %v6689_v25, %v11464_v35 }
 0xb37   : > { %6610 = vxpose.xlu1.b32.cont [14/16] (narrow) %v6594_v44, 32  ;;  %v6832_v44 = vadd.f32 %v6816_v62, %v11394_v55  ;;  %v6714_v39 = vmax.f32 %v6698_v17, 0.0  ;;  %v6834_v55 = vadd.f32 %v6818_v54, %v11413_v11  ;;  %v6716_v12 = vmax.f32 %v6700_v15, 0.0  ;;  %v6690_v17 = vld [vmem:[#allocation3 + $0x140] sm:$0xff]  ;;  %v6693_v15 = vld [vmem:[#allocation3 + $0x158] sm:$0xff] }
 0xb38   : > { %6478 = vxpose.xlu0.b32.cont [14/16] (narrow) %v6462_v60, 32  ;;  %v6715_v60 = vmax.f32 %v6699_v5, 0.0  ;;  %v6718_v21 = vmax.f32 %v6702_v58, 0.0  ;;  %v6721_v37 = vmax.f32 %v6705_v29, 0.0  ;;  %v6696_v58 = vld [vmem:[#allocation3 + $0x170] sm:$0xff] }
 0xb39   : > { %v6848_v6 = vmax.f32 %v6832_v44, 0.0  ;;  %v6850_v1 = vmax.f32 %v6834_v55, 0.0  ;;  %v6691_v44 = vld [vmem:[#allocation3 + $0x148] sm:$0xff]  ;;  %v6694_v55 = vld [vmem:[#allocation3 + $0x160] sm:$0xff] }
 0xb3a   : > { %v6707_v35 = vadd.f32 %v6691_v44, %v11487_v33  ;;  %v6709_v33 = vadd.f32 %v6693_v15, %v11503_v28  ;;  %v6711_v28 = vadd.f32 %v6695_v53, %v11521_v31 }
 0xb3b   : > { %6611 = vxpose.xlu1.b32.cont [15/16] (narrow) %v6595_v20, 32  ;;  %v6820_v20 = vld [vmem:[#allocation3 + $0x1a8] sm:$0xff] }
 0xb3c   : > { %6479 = vxpose.xlu0.b32.cont [15/16] (narrow) %v6463_v27, 32  ;;  %v6836_v11 = vadd.f32 %v6820_v20, %v11442_v38  ;;  %v6688_v27 = vld [vmem:[#allocation3 + $0x130] sm:$0xff]  ;;  %v6838_v38 = vadd.f32 %v6822_v52, %v11461_v26  ;;  %v6723_v42 = vmax.f32 %v6707_v35, 0.0  ;;  %v6725_v40 = vmax.f32 %v6709_v33, 0.0 }
 0xb3d   : > { %v6704_v56 = vadd.f32 %v6688_v27, %v11456_v13  ;;  %v6706_v13 = vadd.f32 %v6690_v17, %v11479_v4  ;;  %v6708_v4 = vadd.f32 %v6692_v47, %v11496_v32  ;;  %v6710_v32 = vadd.f32 %v6694_v55, %v11514_v59 }
 0xb3e   : > { %v6852_v34 = vmax.f32 %v6836_v11, 0.0  ;;  %v6854_v62 = vmax.f32 %v6838_v38, 0.0  ;;  %v6727_v61 = vmax.f32 %v6711_v28, 0.0  ;;  %v6712_v59 = vadd.f32 %v6696_v58, %v11530_v14  ;;  %v6697_v11 = vld [vmem:[#allocation3 + $0x178] sm:$0xff] }
 0xb3f   : > { %6612 = vxpose.xlu1.b32.end [16/16] (narrow) %v6596_v3, 32  ;;  %v6853_v3 = vmax.f32 %v6837_v63, 0.0  ;;  %v6720_v30 = vmax.f32 %v6704_v56, 0.0  ;;  %v6722_v5 = vmax.f32 %v6706_v13, 0.0  ;;  %v6724_v24 = vmax.f32 %v6708_v4, 0.0 }
 0xb40   : > { %6480 = vxpose.xlu0.b32.end [16/16] (narrow) %v6464_v0, 32  ;;  %v6823_v0 = vld [vmem:[#allocation3 + $0x1c0] sm:$0xff]  ;;  %v6726_v43 = vmax.f32 %v6710_v32, 0.0  ;;  %v6728_v31 = vmax.f32 %v6712_v59, 0.0  ;;  %v6713_v8 = vadd.f32 %v6697_v11, %v11536_v9 }
 0xb41   : > { %v6839_v18 = vadd.f32 %v6823_v0, %v11474_v23  ;;  %v6841_v23 = vadd.f32 %v6825_v19, %v11491_v16 }
 0xb42   : > { %v6729_v14 = vmax.f32 %v6713_v8, 0.0 }
 0xb43   : > { %6863 = vxpose.xlu1.b32.start [1/16] (narrow) %v6847_v50, 32  ;;  %v6824_v50 = vld [vmem:[#allocation3 + $0x1c8] sm:$0xff]  ;;  %v6857_v54 = vmax.f32 %v6841_v23, 0.0 }
 0xb44   : > { %6730 = vxpose.xlu0.b32.start [1/16] (narrow) %v6714_v39, 32  ;;  %v6855_v39 = vmax.f32 %v6839_v18, 0.0  ;;  %v6840_v26 = vadd.f32 %v6824_v50, %v11484_v2 }
 0xb47   : > { %6864 = vxpose.xlu1.b32.cont [2/16] (narrow) %v6848_v6, 32  ;;  %v6856_v6 = vmax.f32 %v6840_v26, 0.0 }
 0xb48   : > { %6731 = vxpose.xlu0.b32.cont [2/16] (narrow) %v6715_v60, 32  ;;  %v6826_v60 = vld [vmem:[#allocation3 + $0x1d8] sm:$0xff] }
 0xb49   : > { %v6842_v2 = vadd.f32 %v6826_v60, %v11500_v10  ;;  %v6844_v10 = vadd.f32 %v6828_v36, %v11518_v51 }
 0xb4b   : > { %6865 = vxpose.xlu1.b32.cont [3/16] (narrow) %v6849_v22, 32  ;;  %v6827_v22 = vld [vmem:[#allocation3 + $0x1e0] sm:$0xff]  ;;  %v6860_v20 = vmax.f32 %v6844_v10, 0.0 }
 0xb4c   : > { %6732 = vxpose.xlu0.b32.cont [3/16] (narrow) %v6716_v12, 32  ;;  %v6858_v12 = vmax.f32 %v6842_v2, 0.0  ;;  %v6843_v16 = vadd.f32 %v6827_v22, %v11509_v48 }
 0xb4f   : > { %6866 = vxpose.xlu1.b32.cont [4/16] (narrow) %v6850_v1, 32  ;;  %v6859_v1 = vmax.f32 %v6843_v16, 0.0 }
 0xb50   : > { %6733 = vxpose.xlu0.b32.cont [4/16] (narrow) %v6717_v7, 32  ;;  %v6829_v7 = vld [vmem:[#allocation3 + $0x1f0] sm:$0xff] }
 0xb51   : > { %v6845_v48 = vadd.f32 %v6829_v7, %v11525_v46 }
 0xb53   : > { %6867 = vxpose.xlu1.b32.cont [5/16] (narrow) %v6851_v45, 32  ;;  %v6830_v45 = vld [vmem:[#allocation3 + $0x1f8] sm:$0xff]  ;;  %v6861_v51 = vmax.f32 %v6845_v48, 0.0 }
 0xb54   : > { %6734 = vxpose.xlu0.b32.cont [5/16] (narrow) %v6718_v21, 32  ;;  %v6846_v21 = vadd.f32 %v6830_v45, %v11533_v57 }
 0xb56   : > { %v6862_v46 = vmax.f32 %v6846_v21, 0.0 }
 0xb57   : > { %6868 = vxpose.xlu1.b32.cont [6/16] (narrow) %v6852_v34, 32 }
 0xb58   : > { %6735 = vxpose.xlu0.b32.cont [6/16] (narrow) %v6719_v49, 32 }
 0xb5b   : > { %6869 = vxpose.xlu1.b32.cont [7/16] (narrow) %v6853_v3, 32 }
 0xb5c   : > { %6736 = vxpose.xlu0.b32.cont [7/16] (narrow) %v6720_v30, 32 }
 0xb5f   : > { %6870 = vxpose.xlu1.b32.cont [8/16] (narrow) %v6854_v62, 32 }
 0xb60   : > { %6737 = vxpose.xlu0.b32.cont [8/16] (narrow) %v6721_v37, 32 }
 0xb63   : > { %6871 = vxpose.xlu1.b32.cont [9/16] (narrow) %v6855_v39, 32 }
 0xb64   : > { %6738 = vxpose.xlu0.b32.cont [9/16] (narrow) %v6722_v5, 32 }
 0xb67   : > { %6872 = vxpose.xlu1.b32.cont [10/16] (narrow) %v6856_v6, 32 }
 0xb68   : > { %6739 = vxpose.xlu0.b32.cont [10/16] (narrow) %v6723_v42, 32 }
 0xb6b   : > { %6873 = vxpose.xlu1.b32.cont [11/16] (narrow) %v6857_v54, 32 }
 0xb6c   : > { %6740 = vxpose.xlu0.b32.cont [11/16] (narrow) %v6724_v24, 32 }
 0xb6f   : > { %6874 = vxpose.xlu1.b32.cont [12/16] (narrow) %v6858_v12, 32 }
 0xb70   : > { %6741 = vxpose.xlu0.b32.cont [12/16] (narrow) %v6725_v40, 32 }
 0xb73   : > { %6875 = vxpose.xlu1.b32.cont [13/16] (narrow) %v6859_v1, 32 }
 0xb74   : > { %6742 = vxpose.xlu0.b32.cont [13/16] (narrow) %v6726_v43, 32 }
 0xb77   : > { %6876 = vxpose.xlu1.b32.cont [14/16] (narrow) %v6860_v20, 32 }
 0xb78   : > { %6743 = vxpose.xlu0.b32.cont [14/16] (narrow) %v6727_v61, 32 }
 0xb7b   : > { %6877 = vxpose.xlu1.b32.cont [15/16] (narrow) %v6861_v51, 32 }
 0xb7c   : > { %6744 = vxpose.xlu0.b32.cont [15/16] (narrow) %v6728_v31, 32 }
 0xb7f   : > { %6878 = vxpose.xlu1.b32.end [16/16] (narrow) %v6862_v46, 32 }
 0xb80   : > { %6745 = vxpose.xlu0.b32.end [16/16] (narrow) %v6729_v14, 32 }
 0xb83   : > { %v6613_v41 = vpop.trf.xlu1 }
 0xb84   : > { %7683 = vst [vmem:[%s11178_s17 + $0x20] sm:$0xff] %v6613_v41  ;;  %v6481_v27 = vpop.trf.xlu0 }
 0xb85   : > { %6497 = vst [vmem:[%s11178_s17] sm:$0xff] %v6481_v27 }
 0xb87   : > { %v6614_v57 = vpop.trf.xlu1 }
 0xb88   : > { %7684 = vst [vmem:[%s11178_s17 + $0x28] sm:$0xff] %v6614_v57  ;;  %v6482_v9 = vpop.trf.xlu0 }
 0xb89   : > { %6498 = vst [vmem:[%s11178_s17 + $0x8] sm:$0xff] %v6482_v9 }
 0xb8b   : > { %v6615_v34 = vpop.trf.xlu1 }
 0xb8c   : > { %7685 = vst [vmem:[%s11178_s17 + $0x30] sm:$0xff] %v6615_v34  ;;  %v6483_v63 = vpop.trf.xlu0 }
 0xb8d   : > { %6499 = vst [vmem:[%s11178_s17 + $0x10] sm:$0xff] %v6483_v63 }
 0xb8f   : > { %v6616_v49 = vpop.trf.xlu1 }
 0xb90   : > { %7686 = vst [vmem:[%s11178_s17 + $0x38] sm:$0xff] %v6616_v49  ;;  %v6484_v56 = vpop.trf.xlu0 }
 0xb91   : > { %6500 = vst [vmem:[%s11178_s17 + $0x18] sm:$0xff] %v6484_v56 }
 0xbc3   : > { %v6879_v52 = vpop.trf.xlu1 }
 0xbc4   : > { %7691 = vst [vmem:[%s11178_s17 + $0x60] sm:$0xff] %v6879_v52  ;;  %v6746_v25 = vpop.trf.xlu0 }
 0xbc5   : > { %7687 = vst [vmem:[%s11178_s17 + $0x40] sm:$0xff] %v6746_v25 }
 0xbc7   : > { %v6880_v3 = vpop.trf.xlu1 }
 0xbc8   : > { %7692 = vst [vmem:[%s11178_s17 + $0x68] sm:$0xff] %v6880_v3  ;;  %v6747_v38 = vpop.trf.xlu0 }
 0xbc9   : > { %7688 = vst [vmem:[%s11178_s17 + $0x48] sm:$0xff] %v6747_v38 }
 0xbcb   : > { %v6881_v30 = vpop.trf.xlu1 }
 0xbcc   : > { %7693 = vst [vmem:[%s11178_s17 + $0x70] sm:$0xff] %v6881_v30  ;;  %v6748_v29 = vpop.trf.xlu0 }
 0xbcd   : > { %7689 = vst [vmem:[%s11178_s17 + $0x50] sm:$0xff] %v6748_v29 }
 0xbcf   : > { %v6882_v0 = vpop.trf.xlu1 }
 0xbd0   : > { %7694 = vst [vmem:[%s11178_s17 + $0x78] sm:$0xff] %v6882_v0  ;;  %v6749_v17 = vpop.trf.xlu0 }
 0xbd1   : > { %7690 = vst [vmem:[%s11178_s17 + $0x58] sm:$0xff] %v6749_v17 }
 0xbd2   : > { %8900 = shalt.err (!%p8897_p9)
}
 0xbd3   : > { %s8901_s17 = scalar_lea.hbm %s11589_s25, 2048  ;;  %s8905_s14 = scalar_lea.hbm %s11651_s13, 4096 }
 0xbd4   : > { %p8902_p10 = scmp.ne.s32.totalorder %s11589_s25, %s8901_s17  ;;  %p8906_p13 = scmp.lt.u32.totalorder %s11589_s25, %s11651_s13 }
 0xbd5   : > { %p8907_p0 = scmp.lt.u32.totalorder %s8905_s14, %s8901_s17  ;;  %p8909_p2 = scmp.lt.u32.totalorder %s8901_s17, %s11589_s25 }
 0xbd6   : > { %p8903_p11 = pnand %p8902_p10, %p9107_p5 }
 0xbd7   : > { %p8908_p1 = por %p8907_p0, %p8906_p13 }
 0xbd8   : > { %p8904_p12 = pneg %p8903_p11 }
 0xbd9   : > { %p8910_p3 = por %p8909_p2, %p8908_p1 }
 0xbdb   : > { %p8911_p4 = pnand %p8910_p3, %p8904_p12 }
 0xbdd   : > { %8914 = shalt.err (!%p8911_p4)
}
 0xbde   : > { %s8994_s26 = smov 128   ;;  %s8995_s0 = smov 8  }
 0xbdf   : > { %8536 = dma.vmem_to_hbm [thread:$0]  (%p9107_p5), %s11591_s23, 2048, %s11589_s25, %s11597_s12, %s8994_s26, %s8994_s26, %s8995_s0  }
 0xbe0 PF: > { %p8542_p7 = scmp.ge.s32.totalorder %s8965_s30, 2  ;;  %s6930_s22 = sand.u32 1, %s8953_s27  }
 0xbe1   : > { %s6931_s17 = scalar_lea.sflag [#allocation8], %s6930_s22 }
 0xbe2   : > { %p8539_p8 = pnand %p8542_p7, %p9111_p6 }
 0xbe4   : > { %8948 = dma.done.wait (!%p8539_p8), %s6931_s17, 2048  }
 0xbe5   : > { %8950 = vsyncadd (!%p8539_p8), %s6931_s17, 4294965248  ;;  %p24_p9 = scmp.ge.s32.totalorder %s9094_s15, 4   ;;  %s11694_s27 = smov %s8957_s28 }
 0xbe6   : > { %s11695_s28 = smov %s8961_s29  ;;  %s11696_s29 = smov %s9105_s18 }
 0xbe7   : > { %s11697_s30 = smov %s9094_s15  ;;  %26 = sbr.rel (!%p24_p9) target bundleno = 6 (0x6), region = 316 }
 0xbee   :  { %6936 = vsyncpa [#allocation8], 1 }
 0xbef   :  { %6938 = vsyncpa [#allocation8 + $0x1], 1 }

</bundles_post_ra>
